<compile_context>
chip_gen: v6e
topology: v6e:2x2x1
jax: 0.10.0
libtpu: 0.0.40
codegen_flags: <defaults>
</compile_context>

<pallas_src>
import functools
import math

import jax
import jax.numpy as jnp
from jax.experimental import pallas as pl
from jax.experimental.pallas import tpu as pltpu


LANE = 128

# (expand_ratio, kernel, stride, in_c, out_c, se_ratio)  -- reduced b4-style stack
_BLOCKS = [
    (1, 3, 1, 8, 8, 0.25),
    (6, 3, 2, 8, 16, 0.25),
    (6, 5, 2, 16, 24, 0.25),
]
_STEM_C = 8
_HEAD_C = 32
_IN_C = 3
_STEM_K = 3
_STEM_KCOL = _STEM_K * _STEM_K * _IN_C     # 27 real im2col columns
_STEM_KPAD = 32                            # pad stem K only to a sublane multiple


# ----------------------------------------------------------------------------
# VMEM budget (explicit scoped limit per generation)
# ----------------------------------------------------------------------------
def _vmem_limit_bytes():
    """~100 MiB on 128-MiB parts (v5e/v6e), ~48 MiB on 64-MiB parts (v7x)."""
    try:
        cap = int(pltpu.get_tpu_info().vmem_capacity_bytes)
    except Exception:
        cap = 64 * 1024 * 1024             # conservative fallback
    return int(max(min(cap - 16 * 1024 * 1024, 100 * 1024 * 1024),
                   32 * 1024 * 1024))


_VMEM_LIMIT = _vmem_limit_bytes()


# ----------------------------------------------------------------------------
# helpers
# ----------------------------------------------------------------------------
def _cp(c):
    """pad a channel count up to a lane multiple (128)."""
    return ((c + LANE - 1) // LANE) * LANE


def _round_up(x, m):
    return ((x + m - 1) // m) * m


def _same_pad(h, k, s):
    """TensorFlow-style SAME padding (Conv2dStaticSamePadding in EfficientNet)."""
    out = -(-h // s)
    pad = max((out - 1) * s + k - h, 0)
    return pad // 2, pad - pad // 2, out


def _im2col(x, k, s):
    # only used for the 3-channel stem conv (27 columns): tiny blow-up, and the
    # following matmul is M-tiled so only one tile is resident in VMEM.
    B, H, W, C = x.shape
    pt, pb, Ho = _same_pad(H, k, s)
    pL, pR, Wo = _same_pad(W, k, s)
    xp = jnp.pad(x, ((0, 0), (pt, pb), (pL, pR), (0, 0)))
    cols = []
    for di in range(k):
        for dj in range(k):
            cols.append(xp[:, di:di + Ho * s:s, dj:dj + Wo * s:s, :])
    patches = jnp.stack(cols, axis=3)                        # (B,Ho,Wo,k*k,C)
    return patches.reshape(B * Ho * Wo, k * k * C), (B, Ho, Wo)


# in-kernel activation helpers: exp on the EUP + approx reciprocal keeps the
# full VPU divide off the critical path (biggest win on v5e, free elsewhere).
def _sigmoid(y):
    return pl.reciprocal(1.0 + jnp.exp(-jnp.maximum(y, -60.0)), approx=True)


def _swish(y):
    return y * _sigmoid(y)


# ----------------------------------------------------------------------------
# M-tiled matmul + folded-BN + activation kernel  (stem & head 1x1 convs)
# ----------------------------------------------------------------------------
def _mm_kernel(x_ref, w_ref, s_ref, b_ref, o_ref, *, act):
    y = jnp.dot(x_ref[...], w_ref[...], preferred_element_type=jnp.float32)
    y = y * s_ref[...] + b_ref[...]
    if act == "swish":
        y = _swish(y)
    o_ref[...] = y.astype(o_ref.dtype)


def matmul_bn_act(x, w, scale, bias, act="none", out_dtype=jnp.bfloat16):
    """x:(M,K) @ w:(K,N) with per-column scale/bias + activation.

    N must be lane-padded; K is either lane-padded or the full (small) K."""
    M, K = x.shape
    N = w.shape[1]
    # fixed 512-row M tile, M padded up to a tile multiple -> bounded,
    # double-buffered VMEM footprint at any M (no giant single-block fallback).
    tile_m = 512
    Mp = _round_up(M, 8)
    if Mp <= tile_m:
        tile_m = Mp
    else:
        Mp = _round_up(Mp, tile_m)
    xp = x.astype(jnp.bfloat16)
    if Mp != M:
        xp = jnp.pad(xp, ((0, Mp - M), (0, 0)))
    # TODO(synk): mark the constant w/scale/bias blocks pipeline_mode=
    # pl.Buffered(1) once real b4 widths make their double-buffering costly.
    out = pl.pallas_call(
        functools.partial(_mm_kernel, act=act),
        out_shape=jax.ShapeDtypeStruct((Mp, N), out_dtype),
        grid=(Mp // tile_m,),
        in_specs=[
            pl.BlockSpec((tile_m, K), lambda i: (i, 0)),
            pl.BlockSpec((K, N), lambda i: (0, 0)),
            pl.BlockSpec((1, N), lambda i: (0, 0)),
            pl.BlockSpec((1, N), lambda i: (0, 0)),
        ],
        out_specs=pl.BlockSpec((tile_m, N), lambda i: (i, 0)),
        compiler_params=pltpu.CompilerParams(
            dimension_semantics=("parallel",),
            vmem_limit_bytes=_VMEM_LIMIT),
    )(xp, w, scale, bias)
    return out[:M] if Mp != M else out


# ----------------------------------------------------------------------------
# fused MBConv block kernel
#   expand(1x1+BN+swish) -> depthwise(kxk, stride s, SAME)+BN+swish
#   -> squeeze-excite -> project(1x1+BN) -> residual
# The stride is handled by a stride-phase decomposition so every in-kernel
# depthwise tap is a static, unit-stride slice of a zero-halo'd VMEM scratch.
# ----------------------------------------------------------------------------
def _make_block_kernel(*, P, k, s, Ho, Wo, Hq, Wq, cexp_p, phase_geom,
                       has_expand, has_skip, need_flat):
    def kernel(*refs):
        it = iter(refs)
        xph = [next(it) for _ in range(P)]                 # (1, Ha*Wr, Cin_p) bf16
        if has_expand:
            ew, esc, ebi = next(it), next(it), next(it)
        dww, dwsc, dwbi = next(it), next(it), next(it)
        srw, srb, sew, seb = next(it), next(it), next(it), next(it)
        pw, psc, pbi = next(it), next(it), next(it)
        o_ref = next(it)                                   # (1, Ho*Wo, Cout_p) bf16
        dw_scr = next(it)                                  # (P, Hq, Wq, Cexp_p) f32
        flat_scr = next(it) if need_flat else None         # misaligned fallback only

        # --- stage 1: pointwise expand + BN + swish, one dense store per
        #     stride phase; only the SAME-padding halo is zeroed (the interior
        #     is fully overwritten every grid step).
        for p in range(P):
            hq0, Ha, wq0, Wr = phase_geom[p]
            if hq0 > 0:
                dw_scr[p, 0:hq0, :, :] = jnp.zeros((hq0, Wq, cexp_p), jnp.float32)
            if hq0 + Ha < Hq:
                dw_scr[p, hq0 + Ha:Hq, :, :] = jnp.zeros(
                    (Hq - hq0 - Ha, Wq, cexp_p), jnp.float32)
            if wq0 > 0:
                dw_scr[p, hq0:hq0 + Ha, 0:wq0, :] = jnp.zeros(
                    (Ha, wq0, cexp_p), jnp.float32)
            if wq0 + Wr < Wq:
                dw_scr[p, hq0:hq0 + Ha, wq0 + Wr:Wq, :] = jnp.zeros(
                    (Ha, Wq - wq0 - Wr, cexp_p), jnp.float32)

            xin = xph[p][0]                                # (Ha*Wr, Cin_p) bf16
            if has_expand:
                e = jnp.dot(xin, ew[...], preferred_element_type=jnp.float32)
                e = e * esc[...] + ebi[...]
                e = _swish(e)
            else:
                e = xin.astype(jnp.float32)
            if Wr % 8 == 0:
                # aligned: single lane/sublane-dense block store
                dw_scr[p, hq0:hq0 + Ha, wq0:wq0 + Wr, :] = e.reshape(Ha, Wr, cexp_p)
            else:
                # tiny misaligned tail: keep the proven per-row store path
                for i in range(Ha):
                    dw_scr[p, hq0 + i, wq0:wq0 + Wr, :] = e[i * Wr:(i + 1) * Wr, :]

        # --- stage 2: depthwise conv + BN + swish ----------------------------
        # each sublane-offset column slice (a re-tiled VMEM copy) is hoisted
        # out of the row-tap loop: k*s slices instead of k*k.
        acc = jnp.zeros((Ho, Wo, cexp_p), jnp.float32)
        for dj in range(k):
            jj = dj // s
            for a in range(s):
                p = a * s + (dj % s)
                col = dw_scr[p, :, jj:jj + Wo, :]          # (Hq, Wo, Cexp_p)
                for di in range(a, k, s):
                    ii = di // s
                    t = di * k + dj
                    acc = acc + col[ii:ii + Ho] * dww[t:t + 1, :]
        y = acc * dwsc[...] + dwbi[...]
        y = _swish(y)                                      # (Ho, Wo, Cexp_p) f32

        # flatten rows so SE + project consume the matmul layout directly
        if not need_flat:
            y = y.reshape(Ho * Wo, cexp_p)
        else:
            for ho in range(Ho):                           # sub-8-width fallback
                flat_scr[ho * Wo:(ho + 1) * Wo, :] = y[ho]
            y = flat_scr[...]

        # --- stage 3: squeeze-and-excite (fused, per-sample) -----------------
        se_in = jnp.sum(y, axis=0, keepdims=True) * (1.0 / (Ho * Wo))
        s1 = jnp.dot(se_in.astype(jnp.bfloat16), srw[...],
                     preferred_element_type=jnp.float32) + srb[...]
        s1 = _swish(s1)
        s2 = jnp.dot(s1.astype(jnp.bfloat16), sew[...],
                     preferred_element_type=jnp.float32) + seb[...]
        s2 = _sigmoid(s2)                                  # (1, Cexp_p)
        y = y * s2

        # --- stage 4: pointwise project + BN, fused residual, bf16 store -----
        out = jnp.dot(y.astype(jnp.bfloat16), pw[...],
                      preferred_element_type=jnp.float32)
        out = out * psc[...] + pbi[...]
        if has_skip:
            out = out + xph[0][0].astype(jnp.float32)      # identity skip
        o_ref[0] = out.astype(o_ref.dtype)

    return kernel


def _run_block(x, bp, spec):
    """x: (B, H, W, Cin_p) bf16 lane-padded NHWC -> (B, Ho, Wo, Cout_p) bf16."""
    exp, k, s, cin, cout, se = spec
    B, H, W, Cin_p = x.shape
    cexp = cin * exp
    cexp_p, cout_p = _cp(cexp), _cp(cout)
    has_expand = exp != 1
    has_skip = (s == 1 and cin == cout)

    pt, pb, Ho = _same_pad(H, k, s)
    pL, pR, Wo = _same_pad(W, k, s)
    Hq = Ho + (k - 1) // s
    Wq = Wo + (k - 1) // s
    P = s * s
    need_flat = (Wo % 8 != 0)

    # stride-phase decomposition (identity reshape for s == 1).
    # TODO(synk): for s > 1 move this split in-kernel (strided pl.ds / strided
    # DMA) to drop one extra HBM round trip of the activation.
    phase_geom, phase_inputs = [], []
    for a in range(s):
        for r in range(s):
            h0 = (a - pt) % s
            w0 = (r - pL) % s
            Ha = (H - h0 + s - 1) // s
            Wr = (W - w0 + s - 1) // s
            hq0 = (h0 + pt) // s
            wq0 = (w0 + pL) // s
            assert hq0 + Ha <= Hq and wq0 + Wr <= Wq
            phase_geom.append((hq0, Ha, wq0, Wr))
            if s == 1:
                xa = x.reshape(B, H * W, Cin_p)
            else:
                xa = x[:, h0::s, w0::s, :].reshape(B, Ha * Wr, Cin_p)
            phase_inputs.append(xa.astype(jnp.bfloat16))

    kernel = _make_block_kernel(P=P, k=k, s=s, Ho=Ho, Wo=Wo, Hq=Hq, Wq=Wq,
                                cexp_p=cexp_p, phase_geom=phase_geom,
                                has_expand=has_expand, has_skip=has_skip,
                                need_flat=need_flat)

    inputs, in_specs, blk_bytes = [], [], []

    def _add(arr, block_shape, index_map):
        inputs.append(arr)
        in_specs.append(pl.BlockSpec(block_shape, index_map))
        blk_bytes.append(math.prod(block_shape) * arr.dtype.itemsize)

    for xa, g in zip(phase_inputs, phase_geom):
        _add(xa, (1, g[1] * g[3], Cin_p), lambda b: (b, 0, 0))

    def add_full(arr):
        # TODO(synk): mark these constant-index weight blocks
        # pipeline_mode=pl.Buffered(1) at real b4 widths to halve their VMEM.
        _add(arr, arr.shape, lambda b: (0, 0))

    if has_expand:
        add_full(bp["expand_w"]); add_full(bp["expand_scale"]); add_full(bp["expand_bias"])
    add_full(bp["dw_w"]); add_full(bp["dw_scale"]); add_full(bp["dw_bias"])
    add_full(bp["se_r_w"]); add_full(bp["se_r_b"])
    add_full(bp["se_e_w"]); add_full(bp["se_e_b"])
    add_full(bp["proj_w"]); add_full(bp["proj_scale"]); add_full(bp["proj_bias"])

    scratch_shapes = [pltpu.VMEM((P, Hq, Wq, cexp_p), jnp.float32)]
    scr_bytes = P * Hq * Wq * cexp_p * 4
    if need_flat:
        scratch_shapes.append(pltpu.VMEM((Ho * Wo, cexp_p), jnp.float32))
        scr_bytes += Ho * Wo * cexp_p * 4

    # trace-time budget check: scratch + double-buffered in/out blocks
    est = scr_bytes + 2 * sum(blk_bytes) + 2 * Ho * Wo * cout_p * 2
    assert est <= _VMEM_LIMIT, (est, _VMEM_LIMIT)

    # TODO(synk): at real b4 resolutions add an output-row-strip grid axis here
    # (strip "arbitrary", batch "parallel") for v7x VMEM and pipeline depth.
    out = pl.pallas_call(
        kernel,
        out_shape=jax.ShapeDtypeStruct((B, Ho * Wo, cout_p), jnp.bfloat16),
        grid=(B,),
        in_specs=in_specs,
        out_specs=pl.BlockSpec((1, Ho * Wo, cout_p), lambda b: (b, 0, 0)),
        scratch_shapes=scratch_shapes,
        compiler_params=pltpu.CompilerParams(
            dimension_semantics=("parallel",),
            vmem_limit_bytes=_VMEM_LIMIT),
    )(*inputs)
    return out.reshape(B, Ho, Wo, cout_p)


# ----------------------------------------------------------------------------
# synthetic, pre-padded parameters (weights bf16, BN scale/bias f32)
# ----------------------------------------------------------------------------
def _pad_row(v, cp):
    v = jnp.asarray(v, jnp.float32)
    return jnp.pad(v, (0, cp - v.shape[0])).reshape(1, cp)


def _bn_fold(key, c, cp):
    k1, k2, k3, k4 = jax.random.split(key, 4)
    gamma = 1.0 + 0.1 * jax.random.normal(k1, (c,))
    beta = 0.1 * jax.random.normal(k2, (c,))
    mean = 0.1 * jax.random.normal(k3, (c,))
    var = 1.0 + 0.1 * jnp.abs(jax.random.normal(k4, (c,)))
    scale = gamma / jnp.sqrt(var + 1e-3)
    bias = beta - mean * scale
    return _pad_row(scale, cp), _pad_row(bias, cp)


def _conv_w(key, fan_in, fan_out, kp, np_):
    w = jax.random.normal(key, (fan_in, fan_out)) / jnp.sqrt(float(fan_in))
    return jnp.pad(w, ((0, kp - fan_in), (0, np_ - fan_out))).astype(jnp.bfloat16)


def init_encoder_params(key):
    params = {}
    key, ks = jax.random.split(key)
    k_w, k_bn = jax.random.split(ks)
    stem_scale, stem_bias = _bn_fold(k_bn, _STEM_C, _cp(_STEM_C))
    params["stem"] = {
        "w": _conv_w(k_w, _STEM_KCOL, _STEM_C, _STEM_KPAD, _cp(_STEM_C)),
        "scale": stem_scale,
        "bias": stem_bias,
    }
    blocks = []
    for (exp, k, s, cin, cout, se) in _BLOCKS:
        key, kb = jax.random.split(key)
        keys = jax.random.split(kb, 10)
        cexp = cin * exp
        cse = max(1, int(cin * se))
        cin_p, cexp_p, cse_p, cout_p = _cp(cin), _cp(cexp), _cp(cse), _cp(cout)
        bp = {}
        if exp != 1:
            bp["expand_w"] = _conv_w(keys[0], cin, cexp, cin_p, cexp_p)
            bp["expand_scale"], bp["expand_bias"] = _bn_fold(keys[1], cexp, cexp_p)
        dw = (jax.random.normal(keys[2], (k * k, cexp)) / k).astype(jnp.float32)
        bp["dw_w"] = jnp.pad(dw, ((0, 0), (0, cexp_p - cexp)))
        bp["dw_scale"], bp["dw_bias"] = _bn_fold(keys[3], cexp, cexp_p)
        bp["se_r_w"] = _conv_w(keys[4], cexp, cse, cexp_p, cse_p)
        bp["se_r_b"] = _pad_row(0.1 * jax.random.normal(keys[5], (cse,)), cse_p)
        bp["se_e_w"] = _conv_w(keys[6], cse, cexp, cse_p, cexp_p)
        bp["se_e_b"] = _pad_row(0.1 * jax.random.normal(keys[7], (cexp,)), cexp_p)
        bp["proj_w"] = _conv_w(keys[8], cexp, cout, cexp_p, cout_p)
        bp["proj_scale"], bp["proj_bias"] = _bn_fold(keys[9], cout, cout_p)
        blocks.append(bp)
    params["blocks"] = blocks
    key, kh = jax.random.split(key)
    k_w, k_bn = jax.random.split(kh)
    head_scale, head_bias = _bn_fold(k_bn, _HEAD_C, _cp(_HEAD_C))
    params["head"] = {
        "w": _conv_w(k_w, _BLOCKS[-1][4], _HEAD_C, _cp(_BLOCKS[-1][4]), _cp(_HEAD_C)),
        "scale": head_scale,
        "bias": head_bias,
    }
    return params


# ----------------------------------------------------------------------------
# forward pass (eval mode, no grad): NCHW in -> NCHW features out
# ----------------------------------------------------------------------------
@jax.jit
def encoder_forward(params, x_nchw):
    x = jnp.transpose(x_nchw.astype(jnp.float32), (0, 2, 3, 1))   # NCHW -> NHWC

    # ---- stem: 3x3 s2 conv + BN + swish (im2col on the 3-channel input) ----
    patches, (B, Ho, Wo) = _im2col(x, _STEM_K, 2)
    patches = patches.astype(jnp.bfloat16)                        # bf16 stem traffic
    patches = jnp.pad(patches, ((0, 0), (0, _STEM_KPAD - patches.shape[1])))
    y = matmul_bn_act(patches, params["stem"]["w"],
                      params["stem"]["scale"], params["stem"]["bias"], act="swish")
    x = y.reshape(B, Ho, Wo, _cp(_STEM_C))          # lane-padded bf16 activation

    # ---- MBConv blocks: one fused pallas_call each ----
    for bp, spec in zip(params["blocks"], _BLOCKS):
        x = _run_block(x, bp, spec)

    # ---- head: 1x1 conv + BN + swish ----
    B, H, W, Cp = x.shape
    y = matmul_bn_act(x.reshape(B * H * W, Cp), params["head"]["w"],
                      params["head"]["scale"], params["head"]["bias"], act="swish")
    feat = y.reshape(B, H, W, _cp(_HEAD_C))[..., :_HEAD_C].astype(jnp.float32)
    return jnp.transpose(feat, (0, 3, 1, 2))        # NHWC -> NCHW


# ----------------------------------------------------------------------------
if __name__ == "__main__":
    key = jax.random.PRNGKey(0)
    k_param, k_x = jax.random.split(key)
    params = init_encoder_params(k_param)
    x = jax.random.normal(k_x, (2, _IN_C, 32, 32), dtype=jnp.float32)  # NCHW input

    feat = encoder_forward(params, x)
    feat = jax.block_until_ready(feat)

    assert feat.shape == (2, _HEAD_C, 4, 4), feat.shape
    assert bool(jnp.all(jnp.isfinite(feat)))
    print("KERNEL_OK")
</pallas_src>

<mosaic_0001>
module attributes {stable_mosaic.version = 11 : i64} {
  func.func @_mm_kernel(%arg0: i32, %arg1: memref<512x32xbf16, #tpu.memory_space<vmem>>, %arg2: memref<32x128xbf16, #tpu.memory_space<vmem>>, %arg3: memref<1x128xf32, #tpu.memory_space<vmem>>, %arg4: memref<1x128xf32, #tpu.memory_space<vmem>>, %arg5: memref<512x128xbf16, #tpu.memory_space<vmem>>) attributes {dimension_semantics = [#tpu.dimension_semantics<parallel>], iteration_bounds = array<i64: 1>, scalar_prefetch = 0 : i64, scratch_operands = 0 : i64, tpu.core_type = #tpu.core_type<tc>, window_params = [{transform_indices = @transform_0, window_bounds = array<i64: 512, 32>}, {pipeline_mode = #tpu.pipeline_mode<synchronous>, transform_indices = @transform_1, window_bounds = array<i64: 32, 128>}, {pipeline_mode = #tpu.pipeline_mode<synchronous>, transform_indices = @transform_2, window_bounds = array<i64: 1, 128>}, {pipeline_mode = #tpu.pipeline_mode<synchronous>, transform_indices = @transform_3, window_bounds = array<i64: 1, 128>}, {transform_indices = @transform_4, window_bounds = array<i64: 512, 128>}]} {
    %c0 = arith.constant 0 : index
    %c0_0 = arith.constant 0 : index
    %0 = vector.load %arg1[%c0, %c0_0] : memref<512x32xbf16, #tpu.memory_space<vmem>>, vector<512x32xbf16>
    %c0_1 = arith.constant 0 : index
    %c0_2 = arith.constant 0 : index
    %1 = vector.load %arg2[%c0_1, %c0_2] : memref<32x128xbf16, #tpu.memory_space<vmem>>, vector<32x128xbf16>
    %cst = arith.constant dense<0.000000e+00> : vector<512x128xf32>
    %2 = tpu.matmul %0, %1, %cst {dimension_numbers = #tpu.dot_dimension_numbers<[1], [0], [0], [1], [0, 0, 1, 1], [], []>} : vector<512x32xbf16>, vector<32x128xbf16>, vector<512x128xf32> -> vector<512x128xf32>
    %c0_3 = arith.constant 0 : index
    %c0_4 = arith.constant 0 : index
    %3 = vector.load %arg3[%c0_3, %c0_4] : memref<1x128xf32, #tpu.memory_space<vmem>>, vector<1x128xf32>
    %4 = vector.broadcast %3 : vector<1x128xf32> to vector<512x128xf32>
    %5 = arith.mulf %2, %4 : vector<512x128xf32>
    %c0_5 = arith.constant 0 : index
    %c0_6 = arith.constant 0 : index
    %6 = vector.load %arg4[%c0_5, %c0_6] : memref<1x128xf32, #tpu.memory_space<vmem>>, vector<1x128xf32>
    %7 = vector.broadcast %6 : vector<1x128xf32> to vector<512x128xf32>
    %8 = arith.addf %5, %7 : vector<512x128xf32>
    %cst_7 = arith.constant -6.000000e+01 : f32
    %9 = vector.broadcast %cst_7 : f32 to vector<512x128xf32>
    %10 = arith.maximumf %8, %9 : vector<512x128xf32>
    %cst_8 = arith.constant 0.000000e+00 : f32
    %11 = vector.broadcast %cst_8 : f32 to vector<512x128xf32>
    %12 = arith.subf %11, %10 : vector<512x128xf32>
    %13 = math.exp %12 : vector<512x128xf32>
    %cst_9 = arith.constant 1.000000e+00 : f32
    %14 = vector.broadcast %cst_9 : f32 to vector<512x128xf32>
    %15 = arith.addf %14, %13 : vector<512x128xf32>
    %16 = tpu.reciprocal %15 {approx = true} : vector<512x128xf32> -> vector<512x128xf32>
    %17 = arith.mulf %8, %16 : vector<512x128xf32>
    %18 = arith.truncf %17 : vector<512x128xf32> to vector<512x128xbf16>
    %c0_10 = arith.constant 0 : index
    %c0_11 = arith.constant 0 : index
    %19 = vector.load %arg5[%c0_10, %c0_11] : memref<512x128xbf16, #tpu.memory_space<vmem>>, vector<512x128xbf16>
    tpu.vector_store %arg5[%c0_10, %c0_11], %18 {strides = array<i32>} : memref<512x128xbf16, #tpu.memory_space<vmem>>, vector<512x128xbf16>,
    return
  }
  func.func @transform_0(%arg0: i32) -> (i32, i32) {
    %c0_i32 = arith.constant 0 : i32
    %c0_i32_0 = arith.constant 0 : i32
    return %arg0, %c0_i32 : i32, i32
  }
  func.func @transform_1(%arg0: i32) -> (i32, i32) {
    %c0_i32 = arith.constant 0 : i32
    %c0_i32_0 = arith.constant 0 : i32
    %c0_i32_1 = arith.constant 0 : i32
    return %c0_i32, %c0_i32_0 : i32, i32
  }
  func.func @transform_2(%arg0: i32) -> (i32, i32) {
    %c0_i32 = arith.constant 0 : i32
    %c0_i32_0 = arith.constant 0 : i32
    %c0_i32_1 = arith.constant 0 : i32
    return %c0_i32, %c0_i32_0 : i32, i32
  }
  func.func @transform_3(%arg0: i32) -> (i32, i32) {
    %c0_i32 = arith.constant 0 : i32
    %c0_i32_0 = arith.constant 0 : i32
    %c0_i32_1 = arith.constant 0 : i32
    return %c0_i32, %c0_i32_0 : i32, i32
  }
  func.func @transform_4(%arg0: i32) -> (i32, i32) {
    %c0_i32 = arith.constant 0 : i32
    %c0_i32_0 = arith.constant 0 : i32
    return %arg0, %c0_i32 : i32, i32
  }
}

module attributes {stable_mosaic.version = 11 : i64} {
  func.func @kernel(%arg0: i32, %arg1: memref<1x256x128xbf16, #tpu.memory_space<vmem>>, %arg2: memref<9x128xf32, #tpu.memory_space<vmem>>, %arg3: memref<1x128xf32, #tpu.memory_space<vmem>>, %arg4: memref<1x128xf32, #tpu.memory_space<vmem>>, %arg5: memref<128x128xbf16, #tpu.memory_space<vmem>>, %arg6: memref<1x128xf32, #tpu.memory_space<vmem>>, %arg7: memref<128x128xbf16, #tpu.memory_space<vmem>>, %arg8: memref<1x128xf32, #tpu.memory_space<vmem>>, %arg9: memref<128x128xbf16, #tpu.memory_space<vmem>>, %arg10: memref<1x128xf32, #tpu.memory_space<vmem>>, %arg11: memref<1x128xf32, #tpu.memory_space<vmem>>, %arg12: memref<1x256x128xbf16, #tpu.memory_space<vmem>>, %arg13: memref<1x18x18x128xf32, #tpu.memory_space<vmem>>) attributes {dimension_semantics = [#tpu.dimension_semantics<parallel>], iteration_bounds = array<i64: 2>, scalar_prefetch = 0 : i64, scratch_operands = 1 : i64, tpu.core_type = #tpu.core_type<tc>, window_params = [{transform_indices = @transform_0, window_bounds = array<i64: 1, 256, 128>}, {pipeline_mode = #tpu.pipeline_mode<synchronous>, transform_indices = @transform_1, window_bounds = array<i64: 9, 128>}, {pipeline_mode = #tpu.pipeline_mode<synchronous>, transform_indices = @transform_2, window_bounds = array<i64: 1, 128>}, {pipeline_mode = #tpu.pipeline_mode<synchronous>, transform_indices = @transform_3, window_bounds = array<i64: 1, 128>}, {pipeline_mode = #tpu.pipeline_mode<synchronous>, transform_indices = @transform_4, window_bounds = array<i64: 128, 128>}, {pipeline_mode = #tpu.pipeline_mode<synchronous>, transform_indices = @transform_5, window_bounds = array<i64: 1, 128>}, {pipeline_mode = #tpu.pipeline_mode<synchronous>, transform_indices = @transform_6, window_bounds = array<i64: 128, 128>}, {pipeline_mode = #tpu.pipeline_mode<synchronous>, transform_indices = @transform_7, window_bounds = array<i64: 1, 128>}, {pipeline_mode = #tpu.pipeline_mode<synchronous>, transform_indices = @transform_8, window_bounds = array<i64: 128, 128>}, {pipeline_mode = #tpu.pipeline_mode<synchronous>, transform_indices = @transform_9, window_bounds = array<i64: 1, 128>}, {pipeline_mode = #tpu.pipeline_mode<synchronous>, transform_indices = @transform_10, window_bounds = array<i64: 1, 128>}, {transform_indices = @transform_11, window_bounds = array<i64: 1, 256, 128>}]} {
    %cst = arith.constant 0.000000e+00 : f32
    %0 = vector.broadcast %cst : f32 to vector<1x18x128xf32>
    %c0 = arith.constant 0 : index
    %c0_0 = arith.constant 0 : index
    %c0_1 = arith.constant 0 : index
    %c0_2 = arith.constant 0 : index
    %1 = vector.load %arg13[%c0, %c0_0, %c0_1, %c0_2] : memref<1x18x18x128xf32, #tpu.memory_space<vmem>>, vector<1x1x18x128xf32>
    %2 = vector.shape_cast %1 : vector<1x1x18x128xf32> to vector<1x18x128xf32>
    %3 = vector.shape_cast %0 : vector<1x18x128xf32> to vector<1x1x18x128xf32>
    tpu.vector_store %arg13[%c0, %c0_0, %c0_1, %c0_2], %3 {strides = array<i32>} : memref<1x18x18x128xf32, #tpu.memory_space<vmem>>, vector<1x1x18x128xf32>,
    %cst_3 = arith.constant 0.000000e+00 : f32
    %4 = vector.broadcast %cst_3 : f32 to vector<1x18x128xf32>
    %c0_4 = arith.constant 0 : index
    %c17 = arith.constant 17 : index
    %c0_5 = arith.constant 0 : index
    %c0_6 = arith.constant 0 : index
    %5 = vector.load %arg13[%c0_4, %c17, %c0_5, %c0_6] : memref<1x18x18x128xf32, #tpu.memory_space<vmem>>, vector<1x1x18x128xf32>
    %6 = vector.shape_cast %5 : vector<1x1x18x128xf32> to vector<1x18x128xf32>
    %7 = vector.shape_cast %4 : vector<1x18x128xf32> to vector<1x1x18x128xf32>
    tpu.vector_store %arg13[%c0_4, %c17, %c0_5, %c0_6], %7 {strides = array<i32>} : memref<1x18x18x128xf32, #tpu.memory_space<vmem>>, vector<1x1x18x128xf32>,
    %cst_7 = arith.constant 0.000000e+00 : f32
    %8 = vector.broadcast %cst_7 : f32 to vector<16x1x128xf32>
    %c0_8 = arith.constant 0 : index
    %c1 = arith.constant 1 : index
    %c0_9 = arith.constant 0 : index
    %c0_10 = arith.constant 0 : index
    %9 = vector.load %arg13[%c0_8, %c1, %c0_9, %c0_10] : memref<1x18x18x128xf32, #tpu.memory_space<vmem>>, vector<1x16x1x128xf32>
    %10 = vector.shape_cast %9 : vector<1x16x1x128xf32> to vector<16x1x128xf32>
    %11 = vector.shape_cast %8 : vector<16x1x128xf32> to vector<1x16x1x128xf32>
    tpu.vector_store %arg13[%c0_8, %c1, %c0_9, %c0_10], %11 {strides = array<i32>} : memref<1x18x18x128xf32, #tpu.memory_space<vmem>>, vector<1x16x1x128xf32>,
    %cst_11 = arith.constant 0.000000e+00 : f32
    %12 = vector.broadcast %cst_11 : f32 to vector<16x1x128xf32>
    %c0_12 = arith.constant 0 : index
    %c1_13 = arith.constant 1 : index
    %c17_14 = arith.constant 17 : index
    %c0_15 = arith.constant 0 : index
    %13 = vector.load %arg13[%c0_12, %c1_13, %c17_14, %c0_15] : memref<1x18x18x128xf32, #tpu.memory_space<vmem>>, vector<1x16x1x128xf32>
    %14 = vector.shape_cast %13 : vector<1x16x1x128xf32> to vector<16x1x128xf32>
    %15 = vector.shape_cast %12 : vector<16x1x128xf32> to vector<1x16x1x128xf32>
    tpu.vector_store %arg13[%c0_12, %c1_13, %c17_14, %c0_15], %15 {strides = array<i32>} : memref<1x18x18x128xf32, #tpu.memory_space<vmem>>, vector<1x16x1x128xf32>,
    %c0_16 = arith.constant 0 : index
    %c0_17 = arith.constant 0 : index
    %c0_18 = arith.constant 0 : index
    %16 = vector.load %arg1[%c0_16, %c0_17, %c0_18] : memref<1x256x128xbf16, #tpu.memory_space<vmem>>, vector<1x256x128xbf16>
    %17 = vector.shape_cast %16 : vector<1x256x128xbf16> to vector<256x128xbf16>
    %18 = arith.extf %17 : vector<256x128xbf16> to vector<256x128xf32>
    %19 = vector.shape_cast %18 : vector<256x128xf32> to vector<16x16x128xf32>
    %c0_19 = arith.constant 0 : index
    %c1_20 = arith.constant 1 : index
    %c1_21 = arith.constant 1 : index
    %c0_22 = arith.constant 0 : index
    %20 = vector.load %arg13[%c0_19, %c1_20, %c1_21, %c0_22] : memref<1x18x18x128xf32, #tpu.memory_space<vmem>>, vector<1x16x16x128xf32>
    %21 = vector.shape_cast %20 : vector<1x16x16x128xf32> to vector<16x16x128xf32>
    %22 = vector.shape_cast %19 : vector<16x16x128xf32> to vector<1x16x16x128xf32>
    tpu.vector_store %arg13[%c0_19, %c1_20, %c1_21, %c0_22], %22 {strides = array<i32>} : memref<1x18x18x128xf32, #tpu.memory_space<vmem>>, vector<1x16x16x128xf32>,
    %cst_23 = arith.constant 0.000000e+00 : f32
    %23 = vector.broadcast %cst_23 : f32 to vector<16x16x128xf32>
    %c0_24 = arith.constant 0 : index
    %c0_25 = arith.constant 0 : index
    %c0_26 = arith.constant 0 : index
    %c0_27 = arith.constant 0 : index
    %24 = vector.load %arg13[%c0_24, %c0_25, %c0_26, %c0_27] : memref<1x18x18x128xf32, #tpu.memory_space<vmem>>, vector<1x18x16x128xf32>
    %25 = vector.shape_cast %24 : vector<1x18x16x128xf32> to vector<18x16x128xf32>
    %26 = vector.extract_strided_slice %25 {offsets = [0, 0, 0], sizes = [16, 16, 128], strides = [1, 1, 1]} : vector<18x16x128xf32> to vector<16x16x128xf32>
    %c0_28 = arith.constant 0 : index
    %c0_29 = arith.constant 0 : index
    %27 = vector.load %arg2[%c0_28, %c0_29] : memref<9x128xf32, #tpu.memory_space<vmem>>, vector<1x128xf32>
    %28 = vector.shape_cast %27 : vector<1x128xf32> to vector<1x1x128xf32>
    %29 = vector.broadcast %28 : vector<1x1x128xf32> to vector<16x16x128xf32>
    %30 = arith.mulf %26, %29 : vector<16x16x128xf32>
    %31 = arith.addf %23, %30 : vector<16x16x128xf32>
    %32 = vector.extract_strided_slice %25 {offsets = [1, 0, 0], sizes = [16, 16, 128], strides = [1, 1, 1]} : vector<18x16x128xf32> to vector<16x16x128xf32>
    %c3 = arith.constant 3 : index
    %c0_30 = arith.constant 0 : index
    %33 = vector.load %arg2[%c3, %c0_30] : memref<9x128xf32, #tpu.memory_space<vmem>>, vector<1x128xf32>
    %34 = vector.shape_cast %33 : vector<1x128xf32> to vector<1x1x128xf32>
    %35 = vector.broadcast %34 : vector<1x1x128xf32> to vector<16x16x128xf32>
    %36 = arith.mulf %32, %35 : vector<16x16x128xf32>
    %37 = arith.addf %31, %36 : vector<16x16x128xf32>
    %38 = vector.extract_strided_slice %25 {offsets = [2, 0, 0], sizes = [16, 16, 128], strides = [1, 1, 1]} : vector<18x16x128xf32> to vector<16x16x128xf32>
    %c6 = arith.constant 6 : index
    %c0_31 = arith.constant 0 : index
    %39 = vector.load %arg2[%c6, %c0_31] : memref<9x128xf32, #tpu.memory_space<vmem>>, vector<1x128xf32>
    %40 = vector.shape_cast %39 : vector<1x128xf32> to vector<1x1x128xf32>
    %41 = vector.broadcast %40 : vector<1x1x128xf32> to vector<16x16x128xf32>
    %42 = arith.mulf %38, %41 : vector<16x16x128xf32>
    %43 = arith.addf %37, %42 : vector<16x16x128xf32>
    %c0_32 = arith.constant 0 : index
    %c0_33 = arith.constant 0 : index
    %c1_34 = arith.constant 1 : index
    %c0_35 = arith.constant 0 : index
    %44 = vector.load %arg13[%c0_32, %c0_33, %c1_34, %c0_35] : memref<1x18x18x128xf32, #tpu.memory_space<vmem>>, vector<1x18x16x128xf32>
    %45 = vector.shape_cast %44 : vector<1x18x16x128xf32> to vector<18x16x128xf32>
    %46 = vector.extract_strided_slice %45 {offsets = [0, 0, 0], sizes = [16, 16, 128], strides = [1, 1, 1]} : vector<18x16x128xf32> to vector<16x16x128xf32>
    %c1_36 = arith.constant 1 : index
    %c0_37 = arith.constant 0 : index
    %47 = vector.load %arg2[%c1_36, %c0_37] : memref<9x128xf32, #tpu.memory_space<vmem>>, vector<1x128xf32>
    %48 = vector.shape_cast %47 : vector<1x128xf32> to vector<1x1x128xf32>
    %49 = vector.broadcast %48 : vector<1x1x128xf32> to vector<16x16x128xf32>
    %50 = arith.mulf %46, %49 : vector<16x16x128xf32>
    %51 = arith.addf %43, %50 : vector<16x16x128xf32>
    %52 = vector.extract_strided_slice %45 {offsets = [1, 0, 0], sizes = [16, 16, 128], strides = [1, 1, 1]} : vector<18x16x128xf32> to vector<16x16x128xf32>
    %c4 = arith.constant 4 : index
    %c0_38 = arith.constant 0 : index
    %53 = vector.load %arg2[%c4, %c0_38] : memref<9x128xf32, #tpu.memory_space<vmem>>, vector<1x128xf32>
    %54 = vector.shape_cast %53 : vector<1x128xf32> to vector<1x1x128xf32>
    %55 = vector.broadcast %54 : vector<1x1x128xf32> to vector<16x16x128xf32>
    %56 = arith.mulf %52, %55 : vector<16x16x128xf32>
    %57 = arith.addf %51, %56 : vector<16x16x128xf32>
    %58 = vector.extract_strided_slice %45 {offsets = [2, 0, 0], sizes = [16, 16, 128], strides = [1, 1, 1]} : vector<18x16x128xf32> to vector<16x16x128xf32>
    %c7 = arith.constant 7 : index
    %c0_39 = arith.constant 0 : index
    %59 = vector.load %arg2[%c7, %c0_39] : memref<9x128xf32, #tpu.memory_space<vmem>>, vector<1x128xf32>
    %60 = vector.shape_cast %59 : vector<1x128xf32> to vector<1x1x128xf32>
    %61 = vector.broadcast %60 : vector<1x1x128xf32> to vector<16x16x128xf32>
    %62 = arith.mulf %58, %61 : vector<16x16x128xf32>
    %63 = arith.addf %57, %62 : vector<16x16x128xf32>
    %c0_40 = arith.constant 0 : index
    %c0_41 = arith.constant 0 : index
    %c2 = arith.constant 2 : index
    %c0_42 = arith.constant 0 : index
    %64 = vector.load %arg13[%c0_40, %c0_41, %c2, %c0_42] : memref<1x18x18x128xf32, #tpu.memory_space<vmem>>, vector<1x18x16x128xf32>
    %65 = vector.shape_cast %64 : vector<1x18x16x128xf32> to vector<18x16x128xf32>
    %66 = vector.extract_strided_slice %65 {offsets = [0, 0, 0], sizes = [16, 16, 128], strides = [1, 1, 1]} : vector<18x16x128xf32> to vector<16x16x128xf32>
    %c2_43 = arith.constant 2 : index
    %c0_44 = arith.constant 0 : index
    %67 = vector.load %arg2[%c2_43, %c0_44] : memref<9x128xf32, #tpu.memory_space<vmem>>, vector<1x128xf32>
    %68 = vector.shape_cast %67 : vector<1x128xf32> to vector<1x1x128xf32>
    %69 = vector.broadcast %68 : vector<1x1x128xf32> to vector<16x16x128xf32>
    %70 = arith.mulf %66, %69 : vector<16x16x128xf32>
    %71 = arith.addf %63, %70 : vector<16x16x128xf32>
    %72 = vector.extract_strided_slice %65 {offsets = [1, 0, 0], sizes = [16, 16, 128], strides = [1, 1, 1]} : vector<18x16x128xf32> to vector<16x16x128xf32>
    %c5 = arith.constant 5 : index
    %c0_45 = arith.constant 0 : index
    %73 = vector.load %arg2[%c5, %c0_45] : memref<9x128xf32, #tpu.memory_space<vmem>>, vector<1x128xf32>
    %74 = vector.shape_cast %73 : vector<1x128xf32> to vector<1x1x128xf32>
    %75 = vector.broadcast %74 : vector<1x1x128xf32> to vector<16x16x128xf32>
    %76 = arith.mulf %72, %75 : vector<16x16x128xf32>
    %77 = arith.addf %71, %76 : vector<16x16x128xf32>
    %78 = vector.extract_strided_slice %65 {offsets = [2, 0, 0], sizes = [16, 16, 128], strides = [1, 1, 1]} : vector<18x16x128xf32> to vector<16x16x128xf32>
    %c8 = arith.constant 8 : index
    %c0_46 = arith.constant 0 : index
    %79 = vector.load %arg2[%c8, %c0_46] : memref<9x128xf32, #tpu.memory_space<vmem>>, vector<1x128xf32>
    %80 = vector.shape_cast %79 : vector<1x128xf32> to vector<1x1x128xf32>
    %81 = vector.broadcast %80 : vector<1x1x128xf32> to vector<16x16x128xf32>
    %82 = arith.mulf %78, %81 : vector<16x16x128xf32>
    %83 = arith.addf %77, %82 : vector<16x16x128xf32>
    %c0_47 = arith.constant 0 : index
    %c0_48 = arith.constant 0 : index
    %84 = vector.load %arg3[%c0_47, %c0_48] : memref<1x128xf32, #tpu.memory_space<vmem>>, vector<1x128xf32>
    %85 = vector.shape_cast %84 : vector<1x128xf32> to vector<1x1x128xf32>
    %86 = vector.broadcast %85 : vector<1x1x128xf32> to vector<16x16x128xf32>
    %87 = arith.mulf %83, %86 : vector<16x16x128xf32>
    %c0_49 = arith.constant 0 : index
    %c0_50 = arith.constant 0 : index
    %88 = vector.load %arg4[%c0_49, %c0_50] : memref<1x128xf32, #tpu.memory_space<vmem>>, vector<1x128xf32>
    %89 = vector.shape_cast %88 : vector<1x128xf32> to vector<1x1x128xf32>
    %90 = vector.broadcast %89 : vector<1x1x128xf32> to vector<16x16x128xf32>
    %91 = arith.addf %87, %90 : vector<16x16x128xf32>
    %cst_51 = arith.constant -6.000000e+01 : f32
    %92 = vector.broadcast %cst_51 : f32 to vector<16x16x128xf32>
    %93 = arith.maximumf %91, %92 : vector<16x16x128xf32>
    %cst_52 = arith.constant 0.000000e+00 : f32
    %94 = vector.broadcast %cst_52 : f32 to vector<16x16x128xf32>
    %95 = arith.subf %94, %93 : vector<16x16x128xf32>
    %96 = math.exp %95 : vector<16x16x128xf32>
    %cst_53 = arith.constant 1.000000e+00 : f32
    %97 = vector.broadcast %cst_53 : f32 to vector<16x16x128xf32>
    %98 = arith.addf %97, %96 : vector<16x16x128xf32>
    %99 = tpu.reciprocal %98 {approx = true} : vector<16x16x128xf32> -> vector<16x16x128xf32>
    %100 = arith.mulf %91, %99 : vector<16x16x128xf32>
    %101 = vector.shape_cast %100 : vector<16x16x128xf32> to vector<256x128xf32>
    %cst_54 = arith.constant dense<0.000000e+00> : vector<128xf32>
    %102 = vector.multi_reduction <add>, %101, %cst_54 [0] : vector<256x128xf32> to vector<128xf32>
    %103 = vector.shape_cast %102 : vector<128xf32> to vector<1x128xf32>
    %cst_55 = arith.constant 3.906250e-03 : f32
    %104 = vector.broadcast %cst_55 : f32 to vector<1x128xf32>
    %105 = arith.mulf %103, %104 : vector<1x128xf32>
    %106 = arith.truncf %105 : vector<1x128xf32> to vector<1x128xbf16>
    %c0_56 = arith.constant 0 : index
    %c0_57 = arith.constant 0 : index
    %107 = vector.load %arg5[%c0_56, %c0_57] : memref<128x128xbf16, #tpu.memory_space<vmem>>, vector<128x128xbf16>
    %cst_58 = arith.constant dense<0.000000e+00> : vector<1x128xf32>
    %108 = tpu.matmul %106, %107, %cst_58 {dimension_numbers = #tpu.dot_dimension_numbers<[1], [0], [0], [1], [0, 0, 1, 1], [], []>} : vector<1x128xbf16>, vector<128x128xbf16>, vector<1x128xf32> -> vector<1x128xf32>
    %c0_59 = arith.constant 0 : index
    %c0_60 = arith.constant 0 : index
    %109 = vector.load %arg6[%c0_59, %c0_60] : memref<1x128xf32, #tpu.memory_space<vmem>>, vector<1x128xf32>
    %110 = arith.addf %108, %109 : vector<1x128xf32>
    %cst_61 = arith.constant -6.000000e+01 : f32
    %111 = vector.broadcast %cst_61 : f32 to vector<1x128xf32>
    %112 = arith.maximumf %110, %111 : vector<1x128xf32>
    %cst_62 = arith.constant 0.000000e+00 : f32
    %113 = vector.broadcast %cst_62 : f32 to vector<1x128xf32>
    %114 = arith.subf %113, %112 : vector<1x128xf32>
    %115 = math.exp %114 : vector<1x128xf32>
    %cst_63 = arith.constant 1.000000e+00 : f32
    %116 = vector.broadcast %cst_63 : f32 to vector<1x128xf32>
    %117 = arith.addf %116, %115 : vector<1x128xf32>
    %118 = tpu.reciprocal %117 {approx = true} : vector<1x128xf32> -> vector<1x128xf32>
    %119 = arith.mulf %110, %118 : vector<1x128xf32>
    %120 = arith.truncf %119 : vector<1x128xf32> to vector<1x128xbf16>
    %c0_64 = arith.constant 0 : index
    %c0_65 = arith.constant 0 : index
    %121 = vector.load %arg7[%c0_64, %c0_65] : memref<128x128xbf16, #tpu.memory_space<vmem>>, vector<128x128xbf16>
    %cst_66 = arith.constant dense<0.000000e+00> : vector<1x128xf32>
    %122 = tpu.matmul %120, %121, %cst_66 {dimension_numbers = #tpu.dot_dimension_numbers<[1], [0], [0], [1], [0, 0, 1, 1], [], []>} : vector<1x128xbf16>, vector<128x128xbf16>, vector<1x128xf32> -> vector<1x128xf32>
    %c0_67 = arith.constant 0 : index
    %c0_68 = arith.constant 0 : index
    %123 = vector.load %arg8[%c0_67, %c0_68] : memref<1x128xf32, #tpu.memory_space<vmem>>, vector<1x128xf32>
    %124 = arith.addf %122, %123 : vector<1x128xf32>
    %cst_69 = arith.constant -6.000000e+01 : f32
    %125 = vector.broadcast %cst_69 : f32 to vector<1x128xf32>
    %126 = arith.maximumf %124, %125 : vector<1x128xf32>
    %cst_70 = arith.constant 0.000000e+00 : f32
    %127 = vector.broadcast %cst_70 : f32 to vector<1x128xf32>
    %128 = arith.subf %127, %126 : vector<1x128xf32>
    %129 = math.exp %128 : vector<1x128xf32>
    %cst_71 = arith.constant 1.000000e+00 : f32
    %130 = vector.broadcast %cst_71 : f32 to vector<1x128xf32>
    %131 = arith.addf %130, %129 : vector<1x128xf32>
    %132 = tpu.reciprocal %131 {approx = true} : vector<1x128xf32> -> vector<1x128xf32>
    %133 = vector.broadcast %132 : vector<1x128xf32> to vector<256x128xf32>
    %134 = arith.mulf %101, %133 : vector<256x128xf32>
    %135 = arith.truncf %134 : vector<256x128xf32> to vector<256x128xbf16>
    %c0_72 = arith.constant 0 : index
    %c0_73 = arith.constant 0 : index
    %136 = vector.load %arg9[%c0_72, %c0_73] : memref<128x128xbf16, #tpu.memory_space<vmem>>, vector<128x128xbf16>
    %cst_74 = arith.constant dense<0.000000e+00> : vector<256x128xf32>
    %137 = tpu.matmul %135, %136, %cst_74 {dimension_numbers = #tpu.dot_dimension_numbers<[1], [0], [0], [1], [0, 0, 1, 1], [], []>} : vector<256x128xbf16>, vector<128x128xbf16>, vector<256x128xf32> -> vector<256x128xf32>
    %c0_75 = arith.constant 0 : index
    %c0_76 = arith.constant 0 : index
    %138 = vector.load %arg10[%c0_75, %c0_76] : memref<1x128xf32, #tpu.memory_space<vmem>>, vector<1x128xf32>
    %139 = vector.broadcast %138 : vector<1x128xf32> to vector<256x128xf32>
    %140 = arith.mulf %137, %139 : vector<256x128xf32>
    %c0_77 = arith.constant 0 : index
    %c0_78 = arith.constant 0 : index
    %141 = vector.load %arg11[%c0_77, %c0_78] : memref<1x128xf32, #tpu.memory_space<vmem>>, vector<1x128xf32>
    %142 = vector.broadcast %141 : vector<1x128xf32> to vector<256x128xf32>
    %143 = arith.addf %140, %142 : vector<256x128xf32>
    %c0_79 = arith.constant 0 : index
    %c0_80 = arith.constant 0 : index
    %c0_81 = arith.constant 0 : index
    %144 = vector.load %arg1[%c0_79, %c0_80, %c0_81] : memref<1x256x128xbf16, #tpu.memory_space<vmem>>, vector<1x256x128xbf16>
    %145 = vector.shape_cast %144 : vector<1x256x128xbf16> to vector<256x128xbf16>
    %146 = arith.extf %145 : vector<256x128xbf16> to vector<256x128xf32>
    %147 = arith.addf %143, %146 : vector<256x128xf32>
    %148 = arith.truncf %147 : vector<256x128xf32> to vector<256x128xbf16>
    %c0_82 = arith.constant 0 : index
    %c0_83 = arith.constant 0 : index
    %c0_84 = arith.constant 0 : index
    %149 = vector.load %arg12[%c0_82, %c0_83, %c0_84] : memref<1x256x128xbf16, #tpu.memory_space<vmem>>, vector<1x256x128xbf16>
    %150 = vector.shape_cast %149 : vector<1x256x128xbf16> to vector<256x128xbf16>
    %151 = vector.shape_cast %148 : vector<256x128xbf16> to vector<1x256x128xbf16>
    tpu.vector_store %arg12[%c0_82, %c0_83, %c0_84], %151 {strides = array<i32>} : memref<1x256x128xbf16, #tpu.memory_space<vmem>>, vector<1x256x128xbf16>,
    return
  }
  func.func @transform_0(%arg0: i32) -> (i32, i32, i32) {
    %c0_i32 = arith.constant 0 : i32
    %c0_i32_0 = arith.constant 0 : i32
    %c0_i32_1 = arith.constant 0 : i32
    return %arg0, %c0_i32, %c0_i32_0 : i32, i32, i32
  }
  func.func @transform_1(%arg0: i32) -> (i32, i32) {
    %c0_i32 = arith.constant 0 : i32
    %c0_i32_0 = arith.constant 0 : i32
    %c0_i32_1 = arith.constant 0 : i32
    return %c0_i32, %c0_i32_0 : i32, i32
  }
  func.func @transform_2(%arg0: i32) -> (i32, i32) {
    %c0_i32 = arith.constant 0 : i32
    %c0_i32_0 = arith.constant 0 : i32
    %c0_i32_1 = arith.constant 0 : i32
    return %c0_i32, %c0_i32_0 : i32, i32
  }
  func.func @transform_3(%arg0: i32) -> (i32, i32) {
    %c0_i32 = arith.constant 0 : i32
    %c0_i32_0 = arith.constant 0 : i32
    %c0_i32_1 = arith.constant 0 : i32
    return %c0_i32, %c0_i32_0 : i32, i32
  }
  func.func @transform_4(%arg0: i32) -> (i32, i32) {
    %c0_i32 = arith.constant 0 : i32
    %c0_i32_0 = arith.constant 0 : i32
    %c0_i32_1 = arith.constant 0 : i32
    return %c0_i32, %c0_i32_0 : i32, i32
  }
  func.func @transform_5(%arg0: i32) -> (i32, i32) {
    %c0_i32 = arith.constant 0 : i32
    %c0_i32_0 = arith.constant 0 : i32
    %c0_i32_1 = arith.constant 0 : i32
    return %c0_i32, %c0_i32_0 : i32, i32
  }
  func.func @transform_6(%arg0: i32) -> (i32, i32) {
    %c0_i32 = arith.constant 0 : i32
    %c0_i32_0 = arith.constant 0 : i32
    %c0_i32_1 = arith.constant 0 : i32
    return %c0_i32, %c0_i32_0 : i32, i32
  }
  func.func @transform_7(%arg0: i32) -> (i32, i32) {
    %c0_i32 = arith.constant 0 : i32
    %c0_i32_0 = arith.constant 0 : i32
    %c0_i32_1 = arith.constant 0 : i32
    return %c0_i32, %c0_i32_0 : i32, i32
  }
  func.func @transform_8(%arg0: i32) -> (i32, i32) {
    %c0_i32 = arith.constant 0 : i32
    %c0_i32_0 = arith.constant 0 : i32
    %c0_i32_1 = arith.constant 0 : i32
    return %c0_i32, %c0_i32_0 : i32, i32
  }
  func.func @transform_9(%arg0: i32) -> (i32, i32) {
    %c0_i32 = arith.constant 0 : i32
    %c0_i32_0 = arith.constant 0 : i32
    %c0_i32_1 = arith.constant 0 : i32
    return %c0_i32, %c0_i32_0 : i32, i32
  }
  func.func @transform_10(%arg0: i32) -> (i32, i32) {
    %c0_i32 = arith.constant 0 : i32
    %c0_i32_0 = arith.constant 0 : i32
    %c0_i32_1 = arith.constant 0 : i32
    return %c0_i32, %c0_i32_0 : i32, i32
  }
  func.func @transform_11(%arg0: i32) -> (i32, i32, i32) {
    %c0_i32 = arith.constant 0 : i32
    %c0_i32_0 = arith.constant 0 : i32
    %c0_i32_1 = arith.constant 0 : i32
    return %arg0, %c0_i32, %c0_i32_0 : i32, i32, i32
  }
}

module attributes {stable_mosaic.version = 11 : i64} {
  func.func @kernel(%arg0: i32, %arg1: memref<1x64x128xbf16, #tpu.memory_space<vmem>>, %arg2: memref<1x64x128xbf16, #tpu.memory_space<vmem>>, %arg3: memref<1x64x128xbf16, #tpu.memory_space<vmem>>, %arg4: memref<1x64x128xbf16, #tpu.memory_space<vmem>>, %arg5: memref<128x128xbf16, #tpu.memory_space<vmem>>, %arg6: memref<1x128xf32, #tpu.memory_space<vmem>>, %arg7: memref<1x128xf32, #tpu.memory_space<vmem>>, %arg8: memref<9x128xf32, #tpu.memory_space<vmem>>, %arg9: memref<1x128xf32, #tpu.memory_space<vmem>>, %arg10: memref<1x128xf32, #tpu.memory_space<vmem>>, %arg11: memref<128x128xbf16, #tpu.memory_space<vmem>>, %arg12: memref<1x128xf32, #tpu.memory_space<vmem>>, %arg13: memref<128x128xbf16, #tpu.memory_space<vmem>>, %arg14: memref<1x128xf32, #tpu.memory_space<vmem>>, %arg15: memref<128x128xbf16, #tpu.memory_space<vmem>>, %arg16: memref<1x128xf32, #tpu.memory_space<vmem>>, %arg17: memref<1x128xf32, #tpu.memory_space<vmem>>, %arg18: memref<1x64x128xbf16, #tpu.memory_space<vmem>>, %arg19: memref<4x9x9x128xf32, #tpu.memory_space<vmem>>) attributes {dimension_semantics = [#tpu.dimension_semantics<parallel>], iteration_bounds = array<i64: 2>, scalar_prefetch = 0 : i64, scratch_operands = 1 : i64, tpu.core_type = #tpu.core_type<tc>, window_params = [{transform_indices = @transform_0, window_bounds = array<i64: 1, 64, 128>}, {transform_indices = @transform_1, window_bounds = array<i64: 1, 64, 128>}, {transform_indices = @transform_2, window_bounds = array<i64: 1, 64, 128>}, {transform_indices = @transform_3, window_bounds = array<i64: 1, 64, 128>}, {pipeline_mode = #tpu.pipeline_mode<synchronous>, transform_indices = @transform_4, window_bounds = array<i64: 128, 128>}, {pipeline_mode = #tpu.pipeline_mode<synchronous>, transform_indices = @transform_5, window_bounds = array<i64: 1, 128>}, {pipeline_mode = #tpu.pipeline_mode<synchronous>, transform_indices = @transform_6, window_bounds = array<i64: 1, 128>}, {pipeline_mode = #tpu.pipeline_mode<synchronous>, transform_indices = @transform_7, window_bounds = array<i64: 9, 128>}, {pipeline_mode = #tpu.pipeline_mode<synchronous>, transform_indices = @transform_8, window_bounds = array<i64: 1, 128>}, {pipeline_mode = #tpu.pipeline_mode<synchronous>, transform_indices = @transform_9, window_bounds = array<i64: 1, 128>}, {pipeline_mode = #tpu.pipeline_mode<synchronous>, transform_indices = @transform_10, window_bounds = array<i64: 128, 128>}, {pipeline_mode = #tpu.pipeline_mode<synchronous>, transform_indices = @transform_11, window_bounds = array<i64: 1, 128>}, {pipeline_mode = #tpu.pipeline_mode<synchronous>, transform_indices = @transform_12, window_bounds = array<i64: 128, 128>}, {pipeline_mode = #tpu.pipeline_mode<synchronous>, transform_indices = @transform_13, window_bounds = array<i64: 1, 128>}, {pipeline_mode = #tpu.pipeline_mode<synchronous>, transform_indices = @transform_14, window_bounds = array<i64: 128, 128>}, {pipeline_mode = #tpu.pipeline_mode<synchronous>, transform_indices = @transform_15, window_bounds = array<i64: 1, 128>}, {pipeline_mode = #tpu.pipeline_mode<synchronous>, transform_indices = @transform_16, window_bounds = array<i64: 1, 128>}, {transform_indices = @transform_17, window_bounds = array<i64: 1, 64, 128>}]} {
    %cst = arith.constant 0.000000e+00 : f32
    %0 = vector.broadcast %cst : f32 to vector<1x9x128xf32>
    %c0 = arith.constant 0 : index
    %c8 = arith.constant 8 : index
    %c0_0 = arith.constant 0 : index
    %c0_1 = arith.constant 0 : index
    %1 = vector.load %arg19[%c0, %c8, %c0_0, %c0_1] : memref<4x9x9x128xf32, #tpu.memory_space<vmem>>, vector<1x1x9x128xf32>
    %2 = vector.shape_cast %1 : vector<1x1x9x128xf32> to vector<1x9x128xf32>
    %3 = vector.shape_cast %0 : vector<1x9x128xf32> to vector<1x1x9x128xf32>
    tpu.vector_store %arg19[%c0, %c8, %c0_0, %c0_1], %3 {strides = array<i32>} : memref<4x9x9x128xf32, #tpu.memory_space<vmem>>, vector<1x1x9x128xf32>,
    %cst_2 = arith.constant 0.000000e+00 : f32
    %4 = vector.broadcast %cst_2 : f32 to vector<8x1x128xf32>
    %c0_3 = arith.constant 0 : index
    %c0_4 = arith.constant 0 : index
    %c8_5 = arith.constant 8 : index
    %c0_6 = arith.constant 0 : index
    %5 = vector.load %arg19[%c0_3, %c0_4, %c8_5, %c0_6] : memref<4x9x9x128xf32, #tpu.memory_space<vmem>>, vector<1x8x1x128xf32>
    %6 = vector.shape_cast %5 : vector<1x8x1x128xf32> to vector<8x1x128xf32>
    %7 = vector.shape_cast %4 : vector<8x1x128xf32> to vector<1x8x1x128xf32>
    tpu.vector_store %arg19[%c0_3, %c0_4, %c8_5, %c0_6], %7 {strides = array<i32>} : memref<4x9x9x128xf32, #tpu.memory_space<vmem>>, vector<1x8x1x128xf32>,
    %c0_7 = arith.constant 0 : index
    %c0_8 = arith.constant 0 : index
    %c0_9 = arith.constant 0 : index
    %8 = vector.load %arg1[%c0_7, %c0_8, %c0_9] : memref<1x64x128xbf16, #tpu.memory_space<vmem>>, vector<1x64x128xbf16>
    %9 = vector.shape_cast %8 : vector<1x64x128xbf16> to vector<64x128xbf16>
    %c0_10 = arith.constant 0 : index
    %c0_11 = arith.constant 0 : index
    %10 = vector.load %arg5[%c0_10, %c0_11] : memref<128x128xbf16, #tpu.memory_space<vmem>>, vector<128x128xbf16>
    %cst_12 = arith.constant dense<0.000000e+00> : vector<64x128xf32>
    %11 = tpu.matmul %9, %10, %cst_12 {dimension_numbers = #tpu.dot_dimension_numbers<[1], [0], [0], [1], [0, 0, 1, 1], [], []>} : vector<64x128xbf16>, vector<128x128xbf16>, vector<64x128xf32> -> vector<64x128xf32>
    %c0_13 = arith.constant 0 : index
    %c0_14 = arith.constant 0 : index
    %12 = vector.load %arg6[%c0_13, %c0_14] : memref<1x128xf32, #tpu.memory_space<vmem>>, vector<1x128xf32>
    %13 = vector.broadcast %12 : vector<1x128xf32> to vector<64x128xf32>
    %14 = arith.mulf %11, %13 : vector<64x128xf32>
    %c0_15 = arith.constant 0 : index
    %c0_16 = arith.constant 0 : index
    %15 = vector.load %arg7[%c0_15, %c0_16] : memref<1x128xf32, #tpu.memory_space<vmem>>, vector<1x128xf32>
    %16 = vector.broadcast %15 : vector<1x128xf32> to vector<64x128xf32>
    %17 = arith.addf %14, %16 : vector<64x128xf32>
    %cst_17 = arith.constant -6.000000e+01 : f32
    %18 = vector.broadcast %cst_17 : f32 to vector<64x128xf32>
    %19 = arith.maximumf %17, %18 : vector<64x128xf32>
    %cst_18 = arith.constant 0.000000e+00 : f32
    %20 = vector.broadcast %cst_18 : f32 to vector<64x128xf32>
    %21 = arith.subf %20, %19 : vector<64x128xf32>
    %22 = math.exp %21 : vector<64x128xf32>
    %cst_19 = arith.constant 1.000000e+00 : f32
    %23 = vector.broadcast %cst_19 : f32 to vector<64x128xf32>
    %24 = arith.addf %23, %22 : vector<64x128xf32>
    %25 = tpu.reciprocal %24 {approx = true} : vector<64x128xf32> -> vector<64x128xf32>
    %26 = arith.mulf %17, %25 : vector<64x128xf32>
    %27 = vector.shape_cast %26 : vector<64x128xf32> to vector<8x8x128xf32>
    %c0_20 = arith.constant 0 : index
    %c0_21 = arith.constant 0 : index
    %c0_22 = arith.constant 0 : index
    %c0_23 = arith.constant 0 : index
    %28 = vector.load %arg19[%c0_20, %c0_21, %c0_22, %c0_23] : memref<4x9x9x128xf32, #tpu.memory_space<vmem>>, vector<1x8x8x128xf32>
    %29 = vector.shape_cast %28 : vector<1x8x8x128xf32> to vector<8x8x128xf32>
    %30 = vector.shape_cast %27 : vector<8x8x128xf32> to vector<1x8x8x128xf32>
    tpu.vector_store %arg19[%c0_20, %c0_21, %c0_22, %c0_23], %30 {strides = array<i32>} : memref<4x9x9x128xf32, #tpu.memory_space<vmem>>, vector<1x8x8x128xf32>,
    %cst_24 = arith.constant 0.000000e+00 : f32
    %31 = vector.broadcast %cst_24 : f32 to vector<1x9x128xf32>
    %c1 = arith.constant 1 : index
    %c8_25 = arith.constant 8 : index
    %c0_26 = arith.constant 0 : index
    %c0_27 = arith.constant 0 : index
    %32 = vector.load %arg19[%c1, %c8_25, %c0_26, %c0_27] : memref<4x9x9x128xf32, #tpu.memory_space<vmem>>, vector<1x1x9x128xf32>
    %33 = vector.shape_cast %32 : vector<1x1x9x128xf32> to vector<1x9x128xf32>
    %34 = vector.shape_cast %31 : vector<1x9x128xf32> to vector<1x1x9x128xf32>
    tpu.vector_store %arg19[%c1, %c8_25, %c0_26, %c0_27], %34 {strides = array<i32>} : memref<4x9x9x128xf32, #tpu.memory_space<vmem>>, vector<1x1x9x128xf32>,
    %cst_28 = arith.constant 0.000000e+00 : f32
    %35 = vector.broadcast %cst_28 : f32 to vector<8x1x128xf32>
    %c1_29 = arith.constant 1 : index
    %c0_30 = arith.constant 0 : index
    %c8_31 = arith.constant 8 : index
    %c0_32 = arith.constant 0 : index
    %36 = vector.load %arg19[%c1_29, %c0_30, %c8_31, %c0_32] : memref<4x9x9x128xf32, #tpu.memory_space<vmem>>, vector<1x8x1x128xf32>
    %37 = vector.shape_cast %36 : vector<1x8x1x128xf32> to vector<8x1x128xf32>
    %38 = vector.shape_cast %35 : vector<8x1x128xf32> to vector<1x8x1x128xf32>
    tpu.vector_store %arg19[%c1_29, %c0_30, %c8_31, %c0_32], %38 {strides = array<i32>} : memref<4x9x9x128xf32, #tpu.memory_space<vmem>>, vector<1x8x1x128xf32>,
    %c0_33 = arith.constant 0 : index
    %c0_34 = arith.constant 0 : index
    %c0_35 = arith.constant 0 : index
    %39 = vector.load %arg2[%c0_33, %c0_34, %c0_35] : memref<1x64x128xbf16, #tpu.memory_space<vmem>>, vector<1x64x128xbf16>
    %40 = vector.shape_cast %39 : vector<1x64x128xbf16> to vector<64x128xbf16>
    %c0_36 = arith.constant 0 : index
    %c0_37 = arith.constant 0 : index
    %41 = vector.load %arg5[%c0_36, %c0_37] : memref<128x128xbf16, #tpu.memory_space<vmem>>, vector<128x128xbf16>
    %cst_38 = arith.constant dense<0.000000e+00> : vector<64x128xf32>
    %42 = tpu.matmul %40, %41, %cst_38 {dimension_numbers = #tpu.dot_dimension_numbers<[1], [0], [0], [1], [0, 0, 1, 1], [], []>} : vector<64x128xbf16>, vector<128x128xbf16>, vector<64x128xf32> -> vector<64x128xf32>
    %c0_39 = arith.constant 0 : index
    %c0_40 = arith.constant 0 : index
    %43 = vector.load %arg6[%c0_39, %c0_40] : memref<1x128xf32, #tpu.memory_space<vmem>>, vector<1x128xf32>
    %44 = vector.broadcast %43 : vector<1x128xf32> to vector<64x128xf32>
    %45 = arith.mulf %42, %44 : vector<64x128xf32>
    %c0_41 = arith.constant 0 : index
    %c0_42 = arith.constant 0 : index
    %46 = vector.load %arg7[%c0_41, %c0_42] : memref<1x128xf32, #tpu.memory_space<vmem>>, vector<1x128xf32>
    %47 = vector.broadcast %46 : vector<1x128xf32> to vector<64x128xf32>
    %48 = arith.addf %45, %47 : vector<64x128xf32>
    %cst_43 = arith.constant -6.000000e+01 : f32
    %49 = vector.broadcast %cst_43 : f32 to vector<64x128xf32>
    %50 = arith.maximumf %48, %49 : vector<64x128xf32>
    %cst_44 = arith.constant 0.000000e+00 : f32
    %51 = vector.broadcast %cst_44 : f32 to vector<64x128xf32>
    %52 = arith.subf %51, %50 : vector<64x128xf32>
    %53 = math.exp %52 : vector<64x128xf32>
    %cst_45 = arith.constant 1.000000e+00 : f32
    %54 = vector.broadcast %cst_45 : f32 to vector<64x128xf32>
    %55 = arith.addf %54, %53 : vector<64x128xf32>
    %56 = tpu.reciprocal %55 {approx = true} : vector<64x128xf32> -> vector<64x128xf32>
    %57 = arith.mulf %48, %56 : vector<64x128xf32>
    %58 = vector.shape_cast %57 : vector<64x128xf32> to vector<8x8x128xf32>
    %c1_46 = arith.constant 1 : index
    %c0_47 = arith.constant 0 : index
    %c0_48 = arith.constant 0 : index
    %c0_49 = arith.constant 0 : index
    %59 = vector.load %arg19[%c1_46, %c0_47, %c0_48, %c0_49] : memref<4x9x9x128xf32, #tpu.memory_space<vmem>>, vector<1x8x8x128xf32>
    %60 = vector.shape_cast %59 : vector<1x8x8x128xf32> to vector<8x8x128xf32>
    %61 = vector.shape_cast %58 : vector<8x8x128xf32> to vector<1x8x8x128xf32>
    tpu.vector_store %arg19[%c1_46, %c0_47, %c0_48, %c0_49], %61 {strides = array<i32>} : memref<4x9x9x128xf32, #tpu.memory_space<vmem>>, vector<1x8x8x128xf32>,
    %cst_50 = arith.constant 0.000000e+00 : f32
    %62 = vector.broadcast %cst_50 : f32 to vector<1x9x128xf32>
    %c2 = arith.constant 2 : index
    %c8_51 = arith.constant 8 : index
    %c0_52 = arith.constant 0 : index
    %c0_53 = arith.constant 0 : index
    %63 = vector.load %arg19[%c2, %c8_51, %c0_52, %c0_53] : memref<4x9x9x128xf32, #tpu.memory_space<vmem>>, vector<1x1x9x128xf32>
    %64 = vector.shape_cast %63 : vector<1x1x9x128xf32> to vector<1x9x128xf32>
    %65 = vector.shape_cast %62 : vector<1x9x128xf32> to vector<1x1x9x128xf32>
    tpu.vector_store %arg19[%c2, %c8_51, %c0_52, %c0_53], %65 {strides = array<i32>} : memref<4x9x9x128xf32, #tpu.memory_space<vmem>>, vector<1x1x9x128xf32>,
    %cst_54 = arith.constant 0.000000e+00 : f32
    %66 = vector.broadcast %cst_54 : f32 to vector<8x1x128xf32>
    %c2_55 = arith.constant 2 : index
    %c0_56 = arith.constant 0 : index
    %c8_57 = arith.constant 8 : index
    %c0_58 = arith.constant 0 : index
    %67 = vector.load %arg19[%c2_55, %c0_56, %c8_57, %c0_58] : memref<4x9x9x128xf32, #tpu.memory_space<vmem>>, vector<1x8x1x128xf32>
    %68 = vector.shape_cast %67 : vector<1x8x1x128xf32> to vector<8x1x128xf32>
    %69 = vector.shape_cast %66 : vector<8x1x128xf32> to vector<1x8x1x128xf32>
    tpu.vector_store %arg19[%c2_55, %c0_56, %c8_57, %c0_58], %69 {strides = array<i32>} : memref<4x9x9x128xf32, #tpu.memory_space<vmem>>, vector<1x8x1x128xf32>,
    %c0_59 = arith.constant 0 : index
    %c0_60 = arith.constant 0 : index
    %c0_61 = arith.constant 0 : index
    %70 = vector.load %arg3[%c0_59, %c0_60, %c0_61] : memref<1x64x128xbf16, #tpu.memory_space<vmem>>, vector<1x64x128xbf16>
    %71 = vector.shape_cast %70 : vector<1x64x128xbf16> to vector<64x128xbf16>
    %c0_62 = arith.constant 0 : index
    %c0_63 = arith.constant 0 : index
    %72 = vector.load %arg5[%c0_62, %c0_63] : memref<128x128xbf16, #tpu.memory_space<vmem>>, vector<128x128xbf16>
    %cst_64 = arith.constant dense<0.000000e+00> : vector<64x128xf32>
    %73 = tpu.matmul %71, %72, %cst_64 {dimension_numbers = #tpu.dot_dimension_numbers<[1], [0], [0], [1], [0, 0, 1, 1], [], []>} : vector<64x128xbf16>, vector<128x128xbf16>, vector<64x128xf32> -> vector<64x128xf32>
    %c0_65 = arith.constant 0 : index
    %c0_66 = arith.constant 0 : index
    %74 = vector.load %arg6[%c0_65, %c0_66] : memref<1x128xf32, #tpu.memory_space<vmem>>, vector<1x128xf32>
    %75 = vector.broadcast %74 : vector<1x128xf32> to vector<64x128xf32>
    %76 = arith.mulf %73, %75 : vector<64x128xf32>
    %c0_67 = arith.constant 0 : index
    %c0_68 = arith.constant 0 : index
    %77 = vector.load %arg7[%c0_67, %c0_68] : memref<1x128xf32, #tpu.memory_space<vmem>>, vector<1x128xf32>
    %78 = vector.broadcast %77 : vector<1x128xf32> to vector<64x128xf32>
    %79 = arith.addf %76, %78 : vector<64x128xf32>
    %cst_69 = arith.constant -6.000000e+01 : f32
    %80 = vector.broadcast %cst_69 : f32 to vector<64x128xf32>
    %81 = arith.maximumf %79, %80 : vector<64x128xf32>
    %cst_70 = arith.constant 0.000000e+00 : f32
    %82 = vector.broadcast %cst_70 : f32 to vector<64x128xf32>
    %83 = arith.subf %82, %81 : vector<64x128xf32>
    %84 = math.exp %83 : vector<64x128xf32>
    %cst_71 = arith.constant 1.000000e+00 : f32
    %85 = vector.broadcast %cst_71 : f32 to vector<64x128xf32>
    %86 = arith.addf %85, %84 : vector<64x128xf32>
    %87 = tpu.reciprocal %86 {approx = true} : vector<64x128xf32> -> vector<64x128xf32>
    %88 = arith.mulf %79, %87 : vector<64x128xf32>
    %89 = vector.shape_cast %88 : vector<64x128xf32> to vector<8x8x128xf32>
    %c2_72 = arith.constant 2 : index
    %c0_73 = arith.constant 0 : index
    %c0_74 = arith.constant 0 : index
    %c0_75 = arith.constant 0 : index
    %90 = vector.load %arg19[%c2_72, %c0_73, %c0_74, %c0_75] : memref<4x9x9x128xf32, #tpu.memory_space<vmem>>, vector<1x8x8x128xf32>
    %91 = vector.shape_cast %90 : vector<1x8x8x128xf32> to vector<8x8x128xf32>
    %92 = vector.shape_cast %89 : vector<8x8x128xf32> to vector<1x8x8x128xf32>
    tpu.vector_store %arg19[%c2_72, %c0_73, %c0_74, %c0_75], %92 {strides = array<i32>} : memref<4x9x9x128xf32, #tpu.memory_space<vmem>>, vector<1x8x8x128xf32>,
    %cst_76 = arith.constant 0.000000e+00 : f32
    %93 = vector.broadcast %cst_76 : f32 to vector<1x9x128xf32>
    %c3 = arith.constant 3 : index
    %c8_77 = arith.constant 8 : index
    %c0_78 = arith.constant 0 : index
    %c0_79 = arith.constant 0 : index
    %94 = vector.load %arg19[%c3, %c8_77, %c0_78, %c0_79] : memref<4x9x9x128xf32, #tpu.memory_space<vmem>>, vector<1x1x9x128xf32>
    %95 = vector.shape_cast %94 : vector<1x1x9x128xf32> to vector<1x9x128xf32>
    %96 = vector.shape_cast %93 : vector<1x9x128xf32> to vector<1x1x9x128xf32>
    tpu.vector_store %arg19[%c3, %c8_77, %c0_78, %c0_79], %96 {strides = array<i32>} : memref<4x9x9x128xf32, #tpu.memory_space<vmem>>, vector<1x1x9x128xf32>,
    %cst_80 = arith.constant 0.000000e+00 : f32
    %97 = vector.broadcast %cst_80 : f32 to vector<8x1x128xf32>
    %c3_81 = arith.constant 3 : index
    %c0_82 = arith.constant 0 : index
    %c8_83 = arith.constant 8 : index
    %c0_84 = arith.constant 0 : index
    %98 = vector.load %arg19[%c3_81, %c0_82, %c8_83, %c0_84] : memref<4x9x9x128xf32, #tpu.memory_space<vmem>>, vector<1x8x1x128xf32>
    %99 = vector.shape_cast %98 : vector<1x8x1x128xf32> to vector<8x1x128xf32>
    %100 = vector.shape_cast %97 : vector<8x1x128xf32> to vector<1x8x1x128xf32>
    tpu.vector_store %arg19[%c3_81, %c0_82, %c8_83, %c0_84], %100 {strides = array<i32>} : memref<4x9x9x128xf32, #tpu.memory_space<vmem>>, vector<1x8x1x128xf32>,
    %c0_85 = arith.constant 0 : index
    %c0_86 = arith.constant 0 : index
    %c0_87 = arith.constant 0 : index
    %101 = vector.load %arg4[%c0_85, %c0_86, %c0_87] : memref<1x64x128xbf16, #tpu.memory_space<vmem>>, vector<1x64x128xbf16>
    %102 = vector.shape_cast %101 : vector<1x64x128xbf16> to vector<64x128xbf16>
    %c0_88 = arith.constant 0 : index
    %c0_89 = arith.constant 0 : index
    %103 = vector.load %arg5[%c0_88, %c0_89] : memref<128x128xbf16, #tpu.memory_space<vmem>>, vector<128x128xbf16>
    %cst_90 = arith.constant dense<0.000000e+00> : vector<64x128xf32>
    %104 = tpu.matmul %102, %103, %cst_90 {dimension_numbers = #tpu.dot_dimension_numbers<[1], [0], [0], [1], [0, 0, 1, 1], [], []>} : vector<64x128xbf16>, vector<128x128xbf16>, vector<64x128xf32> -> vector<64x128xf32>
    %c0_91 = arith.constant 0 : index
    %c0_92 = arith.constant 0 : index
    %105 = vector.load %arg6[%c0_91, %c0_92] : memref<1x128xf32, #tpu.memory_space<vmem>>, vector<1x128xf32>
    %106 = vector.broadcast %105 : vector<1x128xf32> to vector<64x128xf32>
    %107 = arith.mulf %104, %106 : vector<64x128xf32>
    %c0_93 = arith.constant 0 : index
    %c0_94 = arith.constant 0 : index
    %108 = vector.load %arg7[%c0_93, %c0_94] : memref<1x128xf32, #tpu.memory_space<vmem>>, vector<1x128xf32>
    %109 = vector.broadcast %108 : vector<1x128xf32> to vector<64x128xf32>
    %110 = arith.addf %107, %109 : vector<64x128xf32>
    %cst_95 = arith.constant -6.000000e+01 : f32
    %111 = vector.broadcast %cst_95 : f32 to vector<64x128xf32>
    %112 = arith.maximumf %110, %111 : vector<64x128xf32>
    %cst_96 = arith.constant 0.000000e+00 : f32
    %113 = vector.broadcast %cst_96 : f32 to vector<64x128xf32>
    %114 = arith.subf %113, %112 : vector<64x128xf32>
    %115 = math.exp %114 : vector<64x128xf32>
    %cst_97 = arith.constant 1.000000e+00 : f32
    %116 = vector.broadcast %cst_97 : f32 to vector<64x128xf32>
    %117 = arith.addf %116, %115 : vector<64x128xf32>
    %118 = tpu.reciprocal %117 {approx = true} : vector<64x128xf32> -> vector<64x128xf32>
    %119 = arith.mulf %110, %118 : vector<64x128xf32>
    %120 = vector.shape_cast %119 : vector<64x128xf32> to vector<8x8x128xf32>
    %c3_98 = arith.constant 3 : index
    %c0_99 = arith.constant 0 : index
    %c0_100 = arith.constant 0 : index
    %c0_101 = arith.constant 0 : index
    %121 = vector.load %arg19[%c3_98, %c0_99, %c0_100, %c0_101] : memref<4x9x9x128xf32, #tpu.memory_space<vmem>>, vector<1x8x8x128xf32>
    %122 = vector.shape_cast %121 : vector<1x8x8x128xf32> to vector<8x8x128xf32>
    %123 = vector.shape_cast %120 : vector<8x8x128xf32> to vector<1x8x8x128xf32>
    tpu.vector_store %arg19[%c3_98, %c0_99, %c0_100, %c0_101], %123 {strides = array<i32>} : memref<4x9x9x128xf32, #tpu.memory_space<vmem>>, vector<1x8x8x128xf32>,
    %cst_102 = arith.constant 0.000000e+00 : f32
    %124 = vector.broadcast %cst_102 : f32 to vector<8x8x128xf32>
    %c0_103 = arith.constant 0 : index
    %c0_104 = arith.constant 0 : index
    %c0_105 = arith.constant 0 : index
    %c0_106 = arith.constant 0 : index
    %125 = vector.load %arg19[%c0_103, %c0_104, %c0_105, %c0_106] : memref<4x9x9x128xf32, #tpu.memory_space<vmem>>, vector<1x9x8x128xf32>
    %126 = vector.shape_cast %125 : vector<1x9x8x128xf32> to vector<9x8x128xf32>
    %127 = vector.extract_strided_slice %126 {offsets = [0, 0, 0], sizes = [8, 8, 128], strides = [1, 1, 1]} : vector<9x8x128xf32> to vector<8x8x128xf32>
    %c0_107 = arith.constant 0 : index
    %c0_108 = arith.constant 0 : index
    %128 = vector.load %arg8[%c0_107, %c0_108] : memref<9x128xf32, #tpu.memory_space<vmem>>, vector<1x128xf32>
    %129 = vector.shape_cast %128 : vector<1x128xf32> to vector<1x1x128xf32>
    %130 = vector.broadcast %129 : vector<1x1x128xf32> to vector<8x8x128xf32>
    %131 = arith.mulf %127, %130 : vector<8x8x128xf32>
    %132 = arith.addf %124, %131 : vector<8x8x128xf32>
    %133 = vector.extract_strided_slice %126 {offsets = [1, 0, 0], sizes = [8, 8, 128], strides = [1, 1, 1]} : vector<9x8x128xf32> to vector<8x8x128xf32>
    %c6 = arith.constant 6 : index
    %c0_109 = arith.constant 0 : index
    %134 = vector.load %arg8[%c6, %c0_109] : memref<9x128xf32, #tpu.memory_space<vmem>>, vector<1x128xf32>
    %135 = vector.shape_cast %134 : vector<1x128xf32> to vector<1x1x128xf32>
    %136 = vector.broadcast %135 : vector<1x1x128xf32> to vector<8x8x128xf32>
    %137 = arith.mulf %133, %136 : vector<8x8x128xf32>
    %138 = arith.addf %132, %137 : vector<8x8x128xf32>
    %c2_110 = arith.constant 2 : index
    %c0_111 = arith.constant 0 : index
    %c0_112 = arith.constant 0 : index
    %c0_113 = arith.constant 0 : index
    %139 = vector.load %arg19[%c2_110, %c0_111, %c0_112, %c0_113] : memref<4x9x9x128xf32, #tpu.memory_space<vmem>>, vector<1x9x8x128xf32>
    %140 = vector.shape_cast %139 : vector<1x9x8x128xf32> to vector<9x8x128xf32>
    %141 = vector.extract_strided_slice %140 {offsets = [0, 0, 0], sizes = [8, 8, 128], strides = [1, 1, 1]} : vector<9x8x128xf32> to vector<8x8x128xf32>
    %c3_114 = arith.constant 3 : index
    %c0_115 = arith.constant 0 : index
    %142 = vector.load %arg8[%c3_114, %c0_115] : memref<9x128xf32, #tpu.memory_space<vmem>>, vector<1x128xf32>
    %143 = vector.shape_cast %142 : vector<1x128xf32> to vector<1x1x128xf32>
    %144 = vector.broadcast %143 : vector<1x1x128xf32> to vector<8x8x128xf32>
    %145 = arith.mulf %141, %144 : vector<8x8x128xf32>
    %146 = arith.addf %138, %145 : vector<8x8x128xf32>
    %c1_116 = arith.constant 1 : index
    %c0_117 = arith.constant 0 : index
    %c0_118 = arith.constant 0 : index
    %c0_119 = arith.constant 0 : index
    %147 = vector.load %arg19[%c1_116, %c0_117, %c0_118, %c0_119] : memref<4x9x9x128xf32, #tpu.memory_space<vmem>>, vector<1x9x8x128xf32>
    %148 = vector.shape_cast %147 : vector<1x9x8x128xf32> to vector<9x8x128xf32>
    %149 = vector.extract_strided_slice %148 {offsets = [0, 0, 0], sizes = [8, 8, 128], strides = [1, 1, 1]} : vector<9x8x128xf32> to vector<8x8x128xf32>
    %c1_120 = arith.constant 1 : index
    %c0_121 = arith.constant 0 : index
    %150 = vector.load %arg8[%c1_120, %c0_121] : memref<9x128xf32, #tpu.memory_space<vmem>>, vector<1x128xf32>
    %151 = vector.shape_cast %150 : vector<1x128xf32> to vector<1x1x128xf32>
    %152 = vector.broadcast %151 : vector<1x1x128xf32> to vector<8x8x128xf32>
    %153 = arith.mulf %149, %152 : vector<8x8x128xf32>
    %154 = arith.addf %146, %153 : vector<8x8x128xf32>
    %155 = vector.extract_strided_slice %148 {offsets = [1, 0, 0], sizes = [8, 8, 128], strides = [1, 1, 1]} : vector<9x8x128xf32> to vector<8x8x128xf32>
    %c7 = arith.constant 7 : index
    %c0_122 = arith.constant 0 : index
    %156 = vector.load %arg8[%c7, %c0_122] : memref<9x128xf32, #tpu.memory_space<vmem>>, vector<1x128xf32>
    %157 = vector.shape_cast %156 : vector<1x128xf32> to vector<1x1x128xf32>
    %158 = vector.broadcast %157 : vector<1x1x128xf32> to vector<8x8x128xf32>
    %159 = arith.mulf %155, %158 : vector<8x8x128xf32>
    %160 = arith.addf %154, %159 : vector<8x8x128xf32>
    %c3_123 = arith.constant 3 : index
    %c0_124 = arith.constant 0 : index
    %c0_125 = arith.constant 0 : index
    %c0_126 = arith.constant 0 : index
    %161 = vector.load %arg19[%c3_123, %c0_124, %c0_125, %c0_126] : memref<4x9x9x128xf32, #tpu.memory_space<vmem>>, vector<1x9x8x128xf32>
    %162 = vector.shape_cast %161 : vector<1x9x8x128xf32> to vector<9x8x128xf32>
    %163 = vector.extract_strided_slice %162 {offsets = [0, 0, 0], sizes = [8, 8, 128], strides = [1, 1, 1]} : vector<9x8x128xf32> to vector<8x8x128xf32>
    %c4 = arith.constant 4 : index
    %c0_127 = arith.constant 0 : index
    %164 = vector.load %arg8[%c4, %c0_127] : memref<9x128xf32, #tpu.memory_space<vmem>>, vector<1x128xf32>
    %165 = vector.shape_cast %164 : vector<1x128xf32> to vector<1x1x128xf32>
    %166 = vector.broadcast %165 : vector<1x1x128xf32> to vector<8x8x128xf32>
    %167 = arith.mulf %163, %166 : vector<8x8x128xf32>
    %168 = arith.addf %160, %167 : vector<8x8x128xf32>
    %c0_128 = arith.constant 0 : index
    %c0_129 = arith.constant 0 : index
    %c1_130 = arith.constant 1 : index
    %c0_131 = arith.constant 0 : index
    %169 = vector.load %arg19[%c0_128, %c0_129, %c1_130, %c0_131] : memref<4x9x9x128xf32, #tpu.memory_space<vmem>>, vector<1x9x8x128xf32>
    %170 = vector.shape_cast %169 : vector<1x9x8x128xf32> to vector<9x8x128xf32>
    %171 = vector.extract_strided_slice %170 {offsets = [0, 0, 0], sizes = [8, 8, 128], strides = [1, 1, 1]} : vector<9x8x128xf32> to vector<8x8x128xf32>
    %c2_132 = arith.constant 2 : index
    %c0_133 = arith.constant 0 : index
    %172 = vector.load %arg8[%c2_132, %c0_133] : memref<9x128xf32, #tpu.memory_space<vmem>>, vector<1x128xf32>
    %173 = vector.shape_cast %172 : vector<1x128xf32> to vector<1x1x128xf32>
    %174 = vector.broadcast %173 : vector<1x1x128xf32> to vector<8x8x128xf32>
    %175 = arith.mulf %171, %174 : vector<8x8x128xf32>
    %176 = arith.addf %168, %175 : vector<8x8x128xf32>
    %177 = vector.extract_strided_slice %170 {offsets = [1, 0, 0], sizes = [8, 8, 128], strides = [1, 1, 1]} : vector<9x8x128xf32> to vector<8x8x128xf32>
    %c8_134 = arith.constant 8 : index
    %c0_135 = arith.constant 0 : index
    %178 = vector.load %arg8[%c8_134, %c0_135] : memref<9x128xf32, #tpu.memory_space<vmem>>, vector<1x128xf32>
    %179 = vector.shape_cast %178 : vector<1x128xf32> to vector<1x1x128xf32>
    %180 = vector.broadcast %179 : vector<1x1x128xf32> to vector<8x8x128xf32>
    %181 = arith.mulf %177, %180 : vector<8x8x128xf32>
    %182 = arith.addf %176, %181 : vector<8x8x128xf32>
    %c2_136 = arith.constant 2 : index
    %c0_137 = arith.constant 0 : index
    %c1_138 = arith.constant 1 : index
    %c0_139 = arith.constant 0 : index
    %183 = vector.load %arg19[%c2_136, %c0_137, %c1_138, %c0_139] : memref<4x9x9x128xf32, #tpu.memory_space<vmem>>, vector<1x9x8x128xf32>
    %184 = vector.shape_cast %183 : vector<1x9x8x128xf32> to vector<9x8x128xf32>
    %185 = vector.extract_strided_slice %184 {offsets = [0, 0, 0], sizes = [8, 8, 128], strides = [1, 1, 1]} : vector<9x8x128xf32> to vector<8x8x128xf32>
    %c5 = arith.constant 5 : index
    %c0_140 = arith.constant 0 : index
    %186 = vector.load %arg8[%c5, %c0_140] : memref<9x128xf32, #tpu.memory_space<vmem>>, vector<1x128xf32>
    %187 = vector.shape_cast %186 : vector<1x128xf32> to vector<1x1x128xf32>
    %188 = vector.broadcast %187 : vector<1x1x128xf32> to vector<8x8x128xf32>
    %189 = arith.mulf %185, %188 : vector<8x8x128xf32>
    %190 = arith.addf %182, %189 : vector<8x8x128xf32>
    %c0_141 = arith.constant 0 : index
    %c0_142 = arith.constant 0 : index
    %191 = vector.load %arg9[%c0_141, %c0_142] : memref<1x128xf32, #tpu.memory_space<vmem>>, vector<1x128xf32>
    %192 = vector.shape_cast %191 : vector<1x128xf32> to vector<1x1x128xf32>
    %193 = vector.broadcast %192 : vector<1x1x128xf32> to vector<8x8x128xf32>
    %194 = arith.mulf %190, %193 : vector<8x8x128xf32>
    %c0_143 = arith.constant 0 : index
    %c0_144 = arith.constant 0 : index
    %195 = vector.load %arg10[%c0_143, %c0_144] : memref<1x128xf32, #tpu.memory_space<vmem>>, vector<1x128xf32>
    %196 = vector.shape_cast %195 : vector<1x128xf32> to vector<1x1x128xf32>
    %197 = vector.broadcast %196 : vector<1x1x128xf32> to vector<8x8x128xf32>
    %198 = arith.addf %194, %197 : vector<8x8x128xf32>
    %cst_145 = arith.constant -6.000000e+01 : f32
    %199 = vector.broadcast %cst_145 : f32 to vector<8x8x128xf32>
    %200 = arith.maximumf %198, %199 : vector<8x8x128xf32>
    %cst_146 = arith.constant 0.000000e+00 : f32
    %201 = vector.broadcast %cst_146 : f32 to vector<8x8x128xf32>
    %202 = arith.subf %201, %200 : vector<8x8x128xf32>
    %203 = math.exp %202 : vector<8x8x128xf32>
    %cst_147 = arith.constant 1.000000e+00 : f32
    %204 = vector.broadcast %cst_147 : f32 to vector<8x8x128xf32>
    %205 = arith.addf %204, %203 : vector<8x8x128xf32>
    %206 = tpu.reciprocal %205 {approx = true} : vector<8x8x128xf32> -> vector<8x8x128xf32>
    %207 = arith.mulf %198, %206 : vector<8x8x128xf32>
    %208 = vector.shape_cast %207 : vector<8x8x128xf32> to vector<64x128xf32>
    %cst_148 = arith.constant dense<0.000000e+00> : vector<128xf32>
    %209 = vector.multi_reduction <add>, %208, %cst_148 [0] : vector<64x128xf32> to vector<128xf32>
    %210 = vector.shape_cast %209 : vector<128xf32> to vector<1x128xf32>
    %cst_149 = arith.constant 1.562500e-02 : f32
    %211 = vector.broadcast %cst_149 : f32 to vector<1x128xf32>
    %212 = arith.mulf %210, %211 : vector<1x128xf32>
    %213 = arith.truncf %212 : vector<1x128xf32> to vector<1x128xbf16>
    %c0_150 = arith.constant 0 : index
    %c0_151 = arith.constant 0 : index
    %214 = vector.load %arg11[%c0_150, %c0_151] : memref<128x128xbf16, #tpu.memory_space<vmem>>, vector<128x128xbf16>
    %cst_152 = arith.constant dense<0.000000e+00> : vector<1x128xf32>
    %215 = tpu.matmul %213, %214, %cst_152 {dimension_numbers = #tpu.dot_dimension_numbers<[1], [0], [0], [1], [0, 0, 1, 1], [], []>} : vector<1x128xbf16>, vector<128x128xbf16>, vector<1x128xf32> -> vector<1x128xf32>
    %c0_153 = arith.constant 0 : index
    %c0_154 = arith.constant 0 : index
    %216 = vector.load %arg12[%c0_153, %c0_154] : memref<1x128xf32, #tpu.memory_space<vmem>>, vector<1x128xf32>
    %217 = arith.addf %215, %216 : vector<1x128xf32>
    %cst_155 = arith.constant -6.000000e+01 : f32
    %218 = vector.broadcast %cst_155 : f32 to vector<1x128xf32>
    %219 = arith.maximumf %217, %218 : vector<1x128xf32>
    %cst_156 = arith.constant 0.000000e+00 : f32
    %220 = vector.broadcast %cst_156 : f32 to vector<1x128xf32>
    %221 = arith.subf %220, %219 : vector<1x128xf32>
    %222 = math.exp %221 : vector<1x128xf32>
    %cst_157 = arith.constant 1.000000e+00 : f32
    %223 = vector.broadcast %cst_157 : f32 to vector<1x128xf32>
    %224 = arith.addf %223, %222 : vector<1x128xf32>
    %225 = tpu.reciprocal %224 {approx = true} : vector<1x128xf32> -> vector<1x128xf32>
    %226 = arith.mulf %217, %225 : vector<1x128xf32>
    %227 = arith.truncf %226 : vector<1x128xf32> to vector<1x128xbf16>
    %c0_158 = arith.constant 0 : index
    %c0_159 = arith.constant 0 : index
    %228 = vector.load %arg13[%c0_158, %c0_159] : memref<128x128xbf16, #tpu.memory_space<vmem>>, vector<128x128xbf16>
    %cst_160 = arith.constant dense<0.000000e+00> : vector<1x128xf32>
    %229 = tpu.matmul %227, %228, %cst_160 {dimension_numbers = #tpu.dot_dimension_numbers<[1], [0], [0], [1], [0, 0, 1, 1], [], []>} : vector<1x128xbf16>, vector<128x128xbf16>, vector<1x128xf32> -> vector<1x128xf32>
    %c0_161 = arith.constant 0 : index
    %c0_162 = arith.constant 0 : index
    %230 = vector.load %arg14[%c0_161, %c0_162] : memref<1x128xf32, #tpu.memory_space<vmem>>, vector<1x128xf32>
    %231 = arith.addf %229, %230 : vector<1x128xf32>
    %cst_163 = arith.constant -6.000000e+01 : f32
    %232 = vector.broadcast %cst_163 : f32 to vector<1x128xf32>
    %233 = arith.maximumf %231, %232 : vector<1x128xf32>
    %cst_164 = arith.constant 0.000000e+00 : f32
    %234 = vector.broadcast %cst_164 : f32 to vector<1x128xf32>
    %235 = arith.subf %234, %233 : vector<1x128xf32>
    %236 = math.exp %235 : vector<1x128xf32>
    %cst_165 = arith.constant 1.000000e+00 : f32
    %237 = vector.broadcast %cst_165 : f32 to vector<1x128xf32>
    %238 = arith.addf %237, %236 : vector<1x128xf32>
    %239 = tpu.reciprocal %238 {approx = true} : vector<1x128xf32> -> vector<1x128xf32>
    %240 = vector.broadcast %239 : vector<1x128xf32> to vector<64x128xf32>
    %241 = arith.mulf %208, %240 : vector<64x128xf32>
    %242 = arith.truncf %241 : vector<64x128xf32> to vector<64x128xbf16>
    %c0_166 = arith.constant 0 : index
    %c0_167 = arith.constant 0 : index
    %243 = vector.load %arg15[%c0_166, %c0_167] : memref<128x128xbf16, #tpu.memory_space<vmem>>, vector<128x128xbf16>
    %cst_168 = arith.constant dense<0.000000e+00> : vector<64x128xf32>
    %244 = tpu.matmul %242, %243, %cst_168 {dimension_numbers = #tpu.dot_dimension_numbers<[1], [0], [0], [1], [0, 0, 1, 1], [], []>} : vector<64x128xbf16>, vector<128x128xbf16>, vector<64x128xf32> -> vector<64x128xf32>
    %c0_169 = arith.constant 0 : index
    %c0_170 = arith.constant 0 : index
    %245 = vector.load %arg16[%c0_169, %c0_170] : memref<1x128xf32, #tpu.memory_space<vmem>>, vector<1x128xf32>
    %246 = vector.broadcast %245 : vector<1x128xf32> to vector<64x128xf32>
    %247 = arith.mulf %244, %246 : vector<64x128xf32>
    %c0_171 = arith.constant 0 : index
    %c0_172 = arith.constant 0 : index
    %248 = vector.load %arg17[%c0_171, %c0_172] : memref<1x128xf32, #tpu.memory_space<vmem>>, vector<1x128xf32>
    %249 = vector.broadcast %248 : vector<1x128xf32> to vector<64x128xf32>
    %250 = arith.addf %247, %249 : vector<64x128xf32>
    %251 = arith.truncf %250 : vector<64x128xf32> to vector<64x128xbf16>
    %c0_173 = arith.constant 0 : index
    %c0_174 = arith.constant 0 : index
    %c0_175 = arith.constant 0 : index
    %252 = vector.load %arg18[%c0_173, %c0_174, %c0_175] : memref<1x64x128xbf16, #tpu.memory_space<vmem>>, vector<1x64x128xbf16>
    %253 = vector.shape_cast %252 : vector<1x64x128xbf16> to vector<64x128xbf16>
    %254 = vector.shape_cast %251 : vector<64x128xbf16> to vector<1x64x128xbf16>
    tpu.vector_store %arg18[%c0_173, %c0_174, %c0_175], %254 {strides = array<i32>} : memref<1x64x128xbf16, #tpu.memory_space<vmem>>, vector<1x64x128xbf16>,
    return
  }
  func.func @transform_0(%arg0: i32) -> (i32, i32, i32) {
    %c0_i32 = arith.constant 0 : i32
    %c0_i32_0 = arith.constant 0 : i32
    %c0_i32_1 = arith.constant 0 : i32
    return %arg0, %c0_i32, %c0_i32_0 : i32, i32, i32
  }
  func.func @transform_1(%arg0: i32) -> (i32, i32, i32) {
    %c0_i32 = arith.constant 0 : i32
    %c0_i32_0 = arith.constant 0 : i32
    %c0_i32_1 = arith.constant 0 : i32
    return %arg0, %c0_i32, %c0_i32_0 : i32, i32, i32
  }
  func.func @transform_2(%arg0: i32) -> (i32, i32, i32) {
    %c0_i32 = arith.constant 0 : i32
    %c0_i32_0 = arith.constant 0 : i32
    %c0_i32_1 = arith.constant 0 : i32
    return %arg0, %c0_i32, %c0_i32_0 : i32, i32, i32
  }
  func.func @transform_3(%arg0: i32) -> (i32, i32, i32) {
    %c0_i32 = arith.constant 0 : i32
    %c0_i32_0 = arith.constant 0 : i32
    %c0_i32_1 = arith.constant 0 : i32
    return %arg0, %c0_i32, %c0_i32_0 : i32, i32, i32
  }
  func.func @transform_4(%arg0: i32) -> (i32, i32) {
    %c0_i32 = arith.constant 0 : i32
    %c0_i32_0 = arith.constant 0 : i32
    %c0_i32_1 = arith.constant 0 : i32
    return %c0_i32, %c0_i32_0 : i32, i32
  }
  func.func @transform_5(%arg0: i32) -> (i32, i32) {
    %c0_i32 = arith.constant 0 : i32
    %c0_i32_0 = arith.constant 0 : i32
    %c0_i32_1 = arith.constant 0 : i32
    return %c0_i32, %c0_i32_0 : i32, i32
  }
  func.func @transform_6(%arg0: i32) -> (i32, i32) {
    %c0_i32 = arith.constant 0 : i32
    %c0_i32_0 = arith.constant 0 : i32
    %c0_i32_1 = arith.constant 0 : i32
    return %c0_i32, %c0_i32_0 : i32, i32
  }
  func.func @transform_7(%arg0: i32) -> (i32, i32) {
    %c0_i32 = arith.constant 0 : i32
    %c0_i32_0 = arith.constant 0 : i32
    %c0_i32_1 = arith.constant 0 : i32
    return %c0_i32, %c0_i32_0 : i32, i32
  }
  func.func @transform_8(%arg0: i32) -> (i32, i32) {
    %c0_i32 = arith.constant 0 : i32
    %c0_i32_0 = arith.constant 0 : i32
    %c0_i32_1 = arith.constant 0 : i32
    return %c0_i32, %c0_i32_0 : i32, i32
  }
  func.func @transform_9(%arg0: i32) -> (i32, i32) {
    %c0_i32 = arith.constant 0 : i32
    %c0_i32_0 = arith.constant 0 : i32
    %c0_i32_1 = arith.constant 0 : i32
    return %c0_i32, %c0_i32_0 : i32, i32
  }
  func.func @transform_10(%arg0: i32) -> (i32, i32) {
    %c0_i32 = arith.constant 0 : i32
    %c0_i32_0 = arith.constant 0 : i32
    %c0_i32_1 = arith.constant 0 : i32
    return %c0_i32, %c0_i32_0 : i32, i32
  }
  func.func @transform_11(%arg0: i32) -> (i32, i32) {
    %c0_i32 = arith.constant 0 : i32
    %c0_i32_0 = arith.constant 0 : i32
    %c0_i32_1 = arith.constant 0 : i32
    return %c0_i32, %c0_i32_0 : i32, i32
  }
  func.func @transform_12(%arg0: i32) -> (i32, i32) {
    %c0_i32 = arith.constant 0 : i32
    %c0_i32_0 = arith.constant 0 : i32
    %c0_i32_1 = arith.constant 0 : i32
    return %c0_i32, %c0_i32_0 : i32, i32
  }
  func.func @transform_13(%arg0: i32) -> (i32, i32) {
    %c0_i32 = arith.constant 0 : i32
    %c0_i32_0 = arith.constant 0 : i32
    %c0_i32_1 = arith.constant 0 : i32
    return %c0_i32, %c0_i32_0 : i32, i32
  }
  func.func @transform_14(%arg0: i32) -> (i32, i32) {
    %c0_i32 = arith.constant 0 : i32
    %c0_i32_0 = arith.constant 0 : i32
    %c0_i32_1 = arith.constant 0 : i32
    return %c0_i32, %c0_i32_0 : i32, i32
  }
  func.func @transform_15(%arg0: i32) -> (i32, i32) {
    %c0_i32 = arith.constant 0 : i32
    %c0_i32_0 = arith.constant 0 : i32
    %c0_i32_1 = arith.constant 0 : i32
    return %c0_i32, %c0_i32_0 : i32, i32
  }
  func.func @transform_16(%arg0: i32) -> (i32, i32) {
    %c0_i32 = arith.constant 0 : i32
    %c0_i32_0 = arith.constant 0 : i32
    %c0_i32_1 = arith.constant 0 : i32
    return %c0_i32, %c0_i32_0 : i32, i32
  }
  func.func @transform_17(%arg0: i32) -> (i32, i32, i32) {
    %c0_i32 = arith.constant 0 : i32
    %c0_i32_0 = arith.constant 0 : i32
    %c0_i32_1 = arith.constant 0 : i32
    return %arg0, %c0_i32, %c0_i32_0 : i32, i32, i32
  }
}

module attributes {stable_mosaic.version = 11 : i64} {
  func.func @_mm_kernel(%arg0: i32, %arg1: memref<32x128xbf16, #tpu.memory_space<vmem>>, %arg2: memref<128x128xbf16, #tpu.memory_space<vmem>>, %arg3: memref<1x128xf32, #tpu.memory_space<vmem>>, %arg4: memref<1x128xf32, #tpu.memory_space<vmem>>, %arg5: memref<32x128xbf16, #tpu.memory_space<vmem>>) attributes {dimension_semantics = [#tpu.dimension_semantics<parallel>], iteration_bounds = array<i64: 1>, scalar_prefetch = 0 : i64, scratch_operands = 0 : i64, tpu.core_type = #tpu.core_type<tc>, window_params = [{transform_indices = @transform_0, window_bounds = array<i64: 32, 128>}, {pipeline_mode = #tpu.pipeline_mode<synchronous>, transform_indices = @transform_1, window_bounds = array<i64: 128, 128>}, {pipeline_mode = #tpu.pipeline_mode<synchronous>, transform_indices = @transform_2, window_bounds = array<i64: 1, 128>}, {pipeline_mode = #tpu.pipeline_mode<synchronous>, transform_indices = @transform_3, window_bounds = array<i64: 1, 128>}, {transform_indices = @transform_4, window_bounds = array<i64: 32, 128>}]} {
    %c0 = arith.constant 0 : index
    %c0_0 = arith.constant 0 : index
    %0 = vector.load %arg1[%c0, %c0_0] : memref<32x128xbf16, #tpu.memory_space<vmem>>, vector<32x128xbf16>
    %c0_1 = arith.constant 0 : index
    %c0_2 = arith.constant 0 : index
    %1 = vector.load %arg2[%c0_1, %c0_2] : memref<128x128xbf16, #tpu.memory_space<vmem>>, vector<128x128xbf16>
    %cst = arith.constant dense<0.000000e+00> : vector<32x128xf32>
    %2 = tpu.matmul %0, %1, %cst {dimension_numbers = #tpu.dot_dimension_numbers<[1], [0], [0], [1], [0, 0, 1, 1], [], []>} : vector<32x128xbf16>, vector<128x128xbf16>, vector<32x128xf32> -> vector<32x128xf32>
    %c0_3 = arith.constant 0 : index
    %c0_4 = arith.constant 0 : index
    %3 = vector.load %arg3[%c0_3, %c0_4] : memref<1x128xf32, #tpu.memory_space<vmem>>, vector<1x128xf32>
    %4 = vector.broadcast %3 : vector<1x128xf32> to vector<32x128xf32>
    %5 = arith.mulf %2, %4 : vector<32x128xf32>
    %c0_5 = arith.constant 0 : index
    %c0_6 = arith.constant 0 : index
    %6 = vector.load %arg4[%c0_5, %c0_6] : memref<1x128xf32, #tpu.memory_space<vmem>>, vector<1x128xf32>
    %7 = vector.broadcast %6 : vector<1x128xf32> to vector<32x128xf32>
    %8 = arith.addf %5, %7 : vector<32x128xf32>
    %cst_7 = arith.constant -6.000000e+01 : f32
    %9 = vector.broadcast %cst_7 : f32 to vector<32x128xf32>
    %10 = arith.maximumf %8, %9 : vector<32x128xf32>
    %cst_8 = arith.constant 0.000000e+00 : f32
    %11 = vector.broadcast %cst_8 : f32 to vector<32x128xf32>
    %12 = arith.subf %11, %10 : vector<32x128xf32>
    %13 = math.exp %12 : vector<32x128xf32>
    %cst_9 = arith.constant 1.000000e+00 : f32
    %14 = vector.broadcast %cst_9 : f32 to vector<32x128xf32>
    %15 = arith.addf %14, %13 : vector<32x128xf32>
    %16 = tpu.reciprocal %15 {approx = true} : vector<32x128xf32> -> vector<32x128xf32>
    %17 = arith.mulf %8, %16 : vector<32x128xf32>
    %18 = arith.truncf %17 : vector<32x128xf32> to vector<32x128xbf16>
    %c0_10 = arith.constant 0 : index
    %c0_11 = arith.constant 0 : index
    %19 = vector.load %arg5[%c0_10, %c0_11] : memref<32x128xbf16, #tpu.memory_space<vmem>>, vector<32x128xbf16>
    tpu.vector_store %arg5[%c0_10, %c0_11], %18 {strides = array<i32>} : memref<32x128xbf16, #tpu.memory_space<vmem>>, vector<32x128xbf16>,
    return
  }
  func.func @transform_0(%arg0: i32) -> (i32, i32) {
    %c0_i32 = arith.constant 0 : i32
    %c0_i32_0 = arith.constant 0 : i32
    return %arg0, %c0_i32 : i32, i32
  }
  func.func @transform_1(%arg0: i32) -> (i32, i32) {
    %c0_i32 = arith.constant 0 : i32
    %c0_i32_0 = arith.constant 0 : i32
    %c0_i32_1 = arith.constant 0 : i32
    return %c0_i32, %c0_i32_0 : i32, i32
  }
  func.func @transform_2(%arg0: i32) -> (i32, i32) {
    %c0_i32 = arith.constant 0 : i32
    %c0_i32_0 = arith.constant 0 : i32
    %c0_i32_1 = arith.constant 0 : i32
    return %c0_i32, %c0_i32_0 : i32, i32
  }
  func.func @transform_3(%arg0: i32) -> (i32, i32) {
    %c0_i32 = arith.constant 0 : i32
    %c0_i32_0 = arith.constant 0 : i32
    %c0_i32_1 = arith.constant 0 : i32
    return %c0_i32, %c0_i32_0 : i32, i32
  }
  func.func @transform_4(%arg0: i32) -> (i32, i32) {
    %c0_i32 = arith.constant 0 : i32
    %c0_i32_0 = arith.constant 0 : i32
    return %arg0, %c0_i32 : i32, i32
  }
}

module attributes {stable_mosaic.version = 11 : i64} {
  func.func @kernel(%arg0: i32, %arg1: memref<1x16x128xbf16, #tpu.memory_space<vmem>>, %arg2: memref<1x16x128xbf16, #tpu.memory_space<vmem>>, %arg3: memref<1x16x128xbf16, #tpu.memory_space<vmem>>, %arg4: memref<1x16x128xbf16, #tpu.memory_space<vmem>>, %arg5: memref<128x128xbf16, #tpu.memory_space<vmem>>, %arg6: memref<1x128xf32, #tpu.memory_space<vmem>>, %arg7: memref<1x128xf32, #tpu.memory_space<vmem>>, %arg8: memref<25x128xf32, #tpu.memory_space<vmem>>, %arg9: memref<1x128xf32, #tpu.memory_space<vmem>>, %arg10: memref<1x128xf32, #tpu.memory_space<vmem>>, %arg11: memref<128x128xbf16, #tpu.memory_space<vmem>>, %arg12: memref<1x128xf32, #tpu.memory_space<vmem>>, %arg13: memref<128x128xbf16, #tpu.memory_space<vmem>>, %arg14: memref<1x128xf32, #tpu.memory_space<vmem>>, %arg15: memref<128x128xbf16, #tpu.memory_space<vmem>>, %arg16: memref<1x128xf32, #tpu.memory_space<vmem>>, %arg17: memref<1x128xf32, #tpu.memory_space<vmem>>, %arg18: memref<1x16x128xbf16, #tpu.memory_space<vmem>>, %arg19: memref<4x6x6x128xf32, #tpu.memory_space<vmem>>, %arg20: memref<16x128xf32, #tpu.memory_space<vmem>>) attributes {dimension_semantics = [#tpu.dimension_semantics<parallel>], iteration_bounds = array<i64: 2>, scalar_prefetch = 0 : i64, scratch_operands = 2 : i64, tpu.core_type = #tpu.core_type<tc>, window_params = [{transform_indices = @transform_0, window_bounds = array<i64: 1, 16, 128>}, {transform_indices = @transform_1, window_bounds = array<i64: 1, 16, 128>}, {transform_indices = @transform_2, window_bounds = array<i64: 1, 16, 128>}, {transform_indices = @transform_3, window_bounds = array<i64: 1, 16, 128>}, {pipeline_mode = #tpu.pipeline_mode<synchronous>, transform_indices = @transform_4, window_bounds = array<i64: 128, 128>}, {pipeline_mode = #tpu.pipeline_mode<synchronous>, transform_indices = @transform_5, window_bounds = array<i64: 1, 128>}, {pipeline_mode = #tpu.pipeline_mode<synchronous>, transform_indices = @transform_6, window_bounds = array<i64: 1, 128>}, {pipeline_mode = #tpu.pipeline_mode<synchronous>, transform_indices = @transform_7, window_bounds = array<i64: 25, 128>}, {pipeline_mode = #tpu.pipeline_mode<synchronous>, transform_indices = @transform_8, window_bounds = array<i64: 1, 128>}, {pipeline_mode = #tpu.pipeline_mode<synchronous>, transform_indices = @transform_9, window_bounds = array<i64: 1, 128>}, {pipeline_mode = #tpu.pipeline_mode<synchronous>, transform_indices = @transform_10, window_bounds = array<i64: 128, 128>}, {pipeline_mode = #tpu.pipeline_mode<synchronous>, transform_indices = @transform_11, window_bounds = array<i64: 1, 128>}, {pipeline_mode = #tpu.pipeline_mode<synchronous>, transform_indices = @transform_12, window_bounds = array<i64: 128, 128>}, {pipeline_mode = #tpu.pipeline_mode<synchronous>, transform_indices = @transform_13, window_bounds = array<i64: 1, 128>}, {pipeline_mode = #tpu.pipeline_mode<synchronous>, transform_indices = @transform_14, window_bounds = array<i64: 128, 128>}, {pipeline_mode = #tpu.pipeline_mode<synchronous>, transform_indices = @transform_15, window_bounds = array<i64: 1, 128>}, {pipeline_mode = #tpu.pipeline_mode<synchronous>, transform_indices = @transform_16, window_bounds = array<i64: 1, 128>}, {transform_indices = @transform_17, window_bounds = array<i64: 1, 16, 128>}]} {
    %cst = arith.constant 0.000000e+00 : f32
    %0 = vector.broadcast %cst : f32 to vector<1x6x128xf32>
    %c0 = arith.constant 0 : index
    %c0_0 = arith.constant 0 : index
    %c0_1 = arith.constant 0 : index
    %c0_2 = arith.constant 0 : index
    %1 = vector.load %arg19[%c0, %c0_0, %c0_1, %c0_2] : memref<4x6x6x128xf32, #tpu.memory_space<vmem>>, vector<1x1x6x128xf32>
    %2 = vector.shape_cast %1 : vector<1x1x6x128xf32> to vector<1x6x128xf32>
    %3 = vector.shape_cast %0 : vector<1x6x128xf32> to vector<1x1x6x128xf32>
    tpu.vector_store %arg19[%c0, %c0_0, %c0_1, %c0_2], %3 {strides = array<i32>} : memref<4x6x6x128xf32, #tpu.memory_space<vmem>>, vector<1x1x6x128xf32>,
    %cst_3 = arith.constant 0.000000e+00 : f32
    %4 = vector.broadcast %cst_3 : f32 to vector<1x6x128xf32>
    %c0_4 = arith.constant 0 : index
    %c5 = arith.constant 5 : index
    %c0_5 = arith.constant 0 : index
    %c0_6 = arith.constant 0 : index
    %5 = vector.load %arg19[%c0_4, %c5, %c0_5, %c0_6] : memref<4x6x6x128xf32, #tpu.memory_space<vmem>>, vector<1x1x6x128xf32>
    %6 = vector.shape_cast %5 : vector<1x1x6x128xf32> to vector<1x6x128xf32>
    %7 = vector.shape_cast %4 : vector<1x6x128xf32> to vector<1x1x6x128xf32>
    tpu.vector_store %arg19[%c0_4, %c5, %c0_5, %c0_6], %7 {strides = array<i32>} : memref<4x6x6x128xf32, #tpu.memory_space<vmem>>, vector<1x1x6x128xf32>,
    %cst_7 = arith.constant 0.000000e+00 : f32
    %8 = vector.broadcast %cst_7 : f32 to vector<4x1x128xf32>
    %c0_8 = arith.constant 0 : index
    %c1 = arith.constant 1 : index
    %c0_9 = arith.constant 0 : index
    %c0_10 = arith.constant 0 : index
    %9 = vector.load %arg19[%c0_8, %c1, %c0_9, %c0_10] : memref<4x6x6x128xf32, #tpu.memory_space<vmem>>, vector<1x4x1x128xf32>
    %10 = vector.shape_cast %9 : vector<1x4x1x128xf32> to vector<4x1x128xf32>
    %11 = vector.shape_cast %8 : vector<4x1x128xf32> to vector<1x4x1x128xf32>
    tpu.vector_store %arg19[%c0_8, %c1, %c0_9, %c0_10], %11 {strides = array<i32>} : memref<4x6x6x128xf32, #tpu.memory_space<vmem>>, vector<1x4x1x128xf32>,
    %cst_11 = arith.constant 0.000000e+00 : f32
    %12 = vector.broadcast %cst_11 : f32 to vector<4x1x128xf32>
    %c0_12 = arith.constant 0 : index
    %c1_13 = arith.constant 1 : index
    %c5_14 = arith.constant 5 : index
    %c0_15 = arith.constant 0 : index
    %13 = vector.load %arg19[%c0_12, %c1_13, %c5_14, %c0_15] : memref<4x6x6x128xf32, #tpu.memory_space<vmem>>, vector<1x4x1x128xf32>
    %14 = vector.shape_cast %13 : vector<1x4x1x128xf32> to vector<4x1x128xf32>
    %15 = vector.shape_cast %12 : vector<4x1x128xf32> to vector<1x4x1x128xf32>
    tpu.vector_store %arg19[%c0_12, %c1_13, %c5_14, %c0_15], %15 {strides = array<i32>} : memref<4x6x6x128xf32, #tpu.memory_space<vmem>>, vector<1x4x1x128xf32>,
    %c0_16 = arith.constant 0 : index
    %c0_17 = arith.constant 0 : index
    %c0_18 = arith.constant 0 : index
    %16 = vector.load %arg1[%c0_16, %c0_17, %c0_18] : memref<1x16x128xbf16, #tpu.memory_space<vmem>>, vector<1x16x128xbf16>
    %17 = vector.shape_cast %16 : vector<1x16x128xbf16> to vector<16x128xbf16>
    %c0_19 = arith.constant 0 : index
    %c0_20 = arith.constant 0 : index
    %18 = vector.load %arg5[%c0_19, %c0_20] : memref<128x128xbf16, #tpu.memory_space<vmem>>, vector<128x128xbf16>
    %cst_21 = arith.constant dense<0.000000e+00> : vector<16x128xf32>
    %19 = tpu.matmul %17, %18, %cst_21 {dimension_numbers = #tpu.dot_dimension_numbers<[1], [0], [0], [1], [0, 0, 1, 1], [], []>} : vector<16x128xbf16>, vector<128x128xbf16>, vector<16x128xf32> -> vector<16x128xf32>
    %c0_22 = arith.constant 0 : index
    %c0_23 = arith.constant 0 : index
    %20 = vector.load %arg6[%c0_22, %c0_23] : memref<1x128xf32, #tpu.memory_space<vmem>>, vector<1x128xf32>
    %21 = vector.broadcast %20 : vector<1x128xf32> to vector<16x128xf32>
    %22 = arith.mulf %19, %21 : vector<16x128xf32>
    %c0_24 = arith.constant 0 : index
    %c0_25 = arith.constant 0 : index
    %23 = vector.load %arg7[%c0_24, %c0_25] : memref<1x128xf32, #tpu.memory_space<vmem>>, vector<1x128xf32>
    %24 = vector.broadcast %23 : vector<1x128xf32> to vector<16x128xf32>
    %25 = arith.addf %22, %24 : vector<16x128xf32>
    %cst_26 = arith.constant -6.000000e+01 : f32
    %26 = vector.broadcast %cst_26 : f32 to vector<16x128xf32>
    %27 = arith.maximumf %25, %26 : vector<16x128xf32>
    %cst_27 = arith.constant 0.000000e+00 : f32
    %28 = vector.broadcast %cst_27 : f32 to vector<16x128xf32>
    %29 = arith.subf %28, %27 : vector<16x128xf32>
    %30 = math.exp %29 : vector<16x128xf32>
    %cst_28 = arith.constant 1.000000e+00 : f32
    %31 = vector.broadcast %cst_28 : f32 to vector<16x128xf32>
    %32 = arith.addf %31, %30 : vector<16x128xf32>
    %33 = tpu.reciprocal %32 {approx = true} : vector<16x128xf32> -> vector<16x128xf32>
    %34 = arith.mulf %25, %33 : vector<16x128xf32>
    %35 = vector.extract_strided_slice %34 {offsets = [0, 0], sizes = [4, 128], strides = [1, 1]} : vector<16x128xf32> to vector<4x128xf32>
    %c0_29 = arith.constant 0 : index
    %c1_30 = arith.constant 1 : index
    %c1_31 = arith.constant 1 : index
    %c0_32 = arith.constant 0 : index
    %36 = vector.load %arg19[%c0_29, %c1_30, %c1_31, %c0_32] : memref<4x6x6x128xf32, #tpu.memory_space<vmem>>, vector<1x1x4x128xf32>
    %37 = vector.shape_cast %36 : vector<1x1x4x128xf32> to vector<4x128xf32>
    %38 = vector.shape_cast %35 : vector<4x128xf32> to vector<1x1x4x128xf32>
    tpu.vector_store %arg19[%c0_29, %c1_30, %c1_31, %c0_32], %38 {strides = array<i32>} : memref<4x6x6x128xf32, #tpu.memory_space<vmem>>, vector<1x1x4x128xf32>,
    %39 = vector.extract_strided_slice %34 {offsets = [4, 0], sizes = [4, 128], strides = [1, 1]} : vector<16x128xf32> to vector<4x128xf32>
    %c0_33 = arith.constant 0 : index
    %c2 = arith.constant 2 : index
    %c1_34 = arith.constant 1 : index
    %c0_35 = arith.constant 0 : index
    %40 = vector.load %arg19[%c0_33, %c2, %c1_34, %c0_35] : memref<4x6x6x128xf32, #tpu.memory_space<vmem>>, vector<1x1x4x128xf32>
    %41 = vector.shape_cast %40 : vector<1x1x4x128xf32> to vector<4x128xf32>
    %42 = vector.shape_cast %39 : vector<4x128xf32> to vector<1x1x4x128xf32>
    tpu.vector_store %arg19[%c0_33, %c2, %c1_34, %c0_35], %42 {strides = array<i32>} : memref<4x6x6x128xf32, #tpu.memory_space<vmem>>, vector<1x1x4x128xf32>,
    %43 = vector.extract_strided_slice %34 {offsets = [8, 0], sizes = [4, 128], strides = [1, 1]} : vector<16x128xf32> to vector<4x128xf32>
    %c0_36 = arith.constant 0 : index
    %c3 = arith.constant 3 : index
    %c1_37 = arith.constant 1 : index
    %c0_38 = arith.constant 0 : index
    %44 = vector.load %arg19[%c0_36, %c3, %c1_37, %c0_38] : memref<4x6x6x128xf32, #tpu.memory_space<vmem>>, vector<1x1x4x128xf32>
    %45 = vector.shape_cast %44 : vector<1x1x4x128xf32> to vector<4x128xf32>
    %46 = vector.shape_cast %43 : vector<4x128xf32> to vector<1x1x4x128xf32>
    tpu.vector_store %arg19[%c0_36, %c3, %c1_37, %c0_38], %46 {strides = array<i32>} : memref<4x6x6x128xf32, #tpu.memory_space<vmem>>, vector<1x1x4x128xf32>,
    %47 = vector.extract_strided_slice %34 {offsets = [12, 0], sizes = [4, 128], strides = [1, 1]} : vector<16x128xf32> to vector<4x128xf32>
    %c0_39 = arith.constant 0 : index
    %c4 = arith.constant 4 : index
    %c1_40 = arith.constant 1 : index
    %c0_41 = arith.constant 0 : index
    %48 = vector.load %arg19[%c0_39, %c4, %c1_40, %c0_41] : memref<4x6x6x128xf32, #tpu.memory_space<vmem>>, vector<1x1x4x128xf32>
    %49 = vector.shape_cast %48 : vector<1x1x4x128xf32> to vector<4x128xf32>
    %50 = vector.shape_cast %47 : vector<4x128xf32> to vector<1x1x4x128xf32>
    tpu.vector_store %arg19[%c0_39, %c4, %c1_40, %c0_41], %50 {strides = array<i32>} : memref<4x6x6x128xf32, #tpu.memory_space<vmem>>, vector<1x1x4x128xf32>,
    %cst_42 = arith.constant 0.000000e+00 : f32
    %51 = vector.broadcast %cst_42 : f32 to vector<1x6x128xf32>
    %c1_43 = arith.constant 1 : index
    %c0_44 = arith.constant 0 : index
    %c0_45 = arith.constant 0 : index
    %c0_46 = arith.constant 0 : index
    %52 = vector.load %arg19[%c1_43, %c0_44, %c0_45, %c0_46] : memref<4x6x6x128xf32, #tpu.memory_space<vmem>>, vector<1x1x6x128xf32>
    %53 = vector.shape_cast %52 : vector<1x1x6x128xf32> to vector<1x6x128xf32>
    %54 = vector.shape_cast %51 : vector<1x6x128xf32> to vector<1x1x6x128xf32>
    tpu.vector_store %arg19[%c1_43, %c0_44, %c0_45, %c0_46], %54 {strides = array<i32>} : memref<4x6x6x128xf32, #tpu.memory_space<vmem>>, vector<1x1x6x128xf32>,
    %cst_47 = arith.constant 0.000000e+00 : f32
    %55 = vector.broadcast %cst_47 : f32 to vector<1x6x128xf32>
    %c1_48 = arith.constant 1 : index
    %c5_49 = arith.constant 5 : index
    %c0_50 = arith.constant 0 : index
    %c0_51 = arith.constant 0 : index
    %56 = vector.load %arg19[%c1_48, %c5_49, %c0_50, %c0_51] : memref<4x6x6x128xf32, #tpu.memory_space<vmem>>, vector<1x1x6x128xf32>
    %57 = vector.shape_cast %56 : vector<1x1x6x128xf32> to vector<1x6x128xf32>
    %58 = vector.shape_cast %55 : vector<1x6x128xf32> to vector<1x1x6x128xf32>
    tpu.vector_store %arg19[%c1_48, %c5_49, %c0_50, %c0_51], %58 {strides = array<i32>} : memref<4x6x6x128xf32, #tpu.memory_space<vmem>>, vector<1x1x6x128xf32>,
    %cst_52 = arith.constant 0.000000e+00 : f32
    %59 = vector.broadcast %cst_52 : f32 to vector<4x2x128xf32>
    %c1_53 = arith.constant 1 : index
    %c1_54 = arith.constant 1 : index
    %c4_55 = arith.constant 4 : index
    %c0_56 = arith.constant 0 : index
    %60 = vector.load %arg19[%c1_53, %c1_54, %c4_55, %c0_56] : memref<4x6x6x128xf32, #tpu.memory_space<vmem>>, vector<1x4x2x128xf32>
    %61 = vector.shape_cast %60 : vector<1x4x2x128xf32> to vector<4x2x128xf32>
    %62 = vector.shape_cast %59 : vector<4x2x128xf32> to vector<1x4x2x128xf32>
    tpu.vector_store %arg19[%c1_53, %c1_54, %c4_55, %c0_56], %62 {strides = array<i32>} : memref<4x6x6x128xf32, #tpu.memory_space<vmem>>, vector<1x4x2x128xf32>,
    %c0_57 = arith.constant 0 : index
    %c0_58 = arith.constant 0 : index
    %c0_59 = arith.constant 0 : index
    %63 = vector.load %arg2[%c0_57, %c0_58, %c0_59] : memref<1x16x128xbf16, #tpu.memory_space<vmem>>, vector<1x16x128xbf16>
    %64 = vector.shape_cast %63 : vector<1x16x128xbf16> to vector<16x128xbf16>
    %c0_60 = arith.constant 0 : index
    %c0_61 = arith.constant 0 : index
    %65 = vector.load %arg5[%c0_60, %c0_61] : memref<128x128xbf16, #tpu.memory_space<vmem>>, vector<128x128xbf16>
    %cst_62 = arith.constant dense<0.000000e+00> : vector<16x128xf32>
    %66 = tpu.matmul %64, %65, %cst_62 {dimension_numbers = #tpu.dot_dimension_numbers<[1], [0], [0], [1], [0, 0, 1, 1], [], []>} : vector<16x128xbf16>, vector<128x128xbf16>, vector<16x128xf32> -> vector<16x128xf32>
    %c0_63 = arith.constant 0 : index
    %c0_64 = arith.constant 0 : index
    %67 = vector.load %arg6[%c0_63, %c0_64] : memref<1x128xf32, #tpu.memory_space<vmem>>, vector<1x128xf32>
    %68 = vector.broadcast %67 : vector<1x128xf32> to vector<16x128xf32>
    %69 = arith.mulf %66, %68 : vector<16x128xf32>
    %c0_65 = arith.constant 0 : index
    %c0_66 = arith.constant 0 : index
    %70 = vector.load %arg7[%c0_65, %c0_66] : memref<1x128xf32, #tpu.memory_space<vmem>>, vector<1x128xf32>
    %71 = vector.broadcast %70 : vector<1x128xf32> to vector<16x128xf32>
    %72 = arith.addf %69, %71 : vector<16x128xf32>
    %cst_67 = arith.constant -6.000000e+01 : f32
    %73 = vector.broadcast %cst_67 : f32 to vector<16x128xf32>
    %74 = arith.maximumf %72, %73 : vector<16x128xf32>
    %cst_68 = arith.constant 0.000000e+00 : f32
    %75 = vector.broadcast %cst_68 : f32 to vector<16x128xf32>
    %76 = arith.subf %75, %74 : vector<16x128xf32>
    %77 = math.exp %76 : vector<16x128xf32>
    %cst_69 = arith.constant 1.000000e+00 : f32
    %78 = vector.broadcast %cst_69 : f32 to vector<16x128xf32>
    %79 = arith.addf %78, %77 : vector<16x128xf32>
    %80 = tpu.reciprocal %79 {approx = true} : vector<16x128xf32> -> vector<16x128xf32>
    %81 = arith.mulf %72, %80 : vector<16x128xf32>
    %82 = vector.extract_strided_slice %81 {offsets = [0, 0], sizes = [4, 128], strides = [1, 1]} : vector<16x128xf32> to vector<4x128xf32>
    %c1_70 = arith.constant 1 : index
    %c1_71 = arith.constant 1 : index
    %c0_72 = arith.constant 0 : index
    %c0_73 = arith.constant 0 : index
    %83 = vector.load %arg19[%c1_70, %c1_71, %c0_72, %c0_73] : memref<4x6x6x128xf32, #tpu.memory_space<vmem>>, vector<1x1x4x128xf32>
    %84 = vector.shape_cast %83 : vector<1x1x4x128xf32> to vector<4x128xf32>
    %85 = vector.shape_cast %82 : vector<4x128xf32> to vector<1x1x4x128xf32>
    tpu.vector_store %arg19[%c1_70, %c1_71, %c0_72, %c0_73], %85 {strides = array<i32>} : memref<4x6x6x128xf32, #tpu.memory_space<vmem>>, vector<1x1x4x128xf32>,
    %86 = vector.extract_strided_slice %81 {offsets = [4, 0], sizes = [4, 128], strides = [1, 1]} : vector<16x128xf32> to vector<4x128xf32>
    %c1_74 = arith.constant 1 : index
    %c2_75 = arith.constant 2 : index
    %c0_76 = arith.constant 0 : index
    %c0_77 = arith.constant 0 : index
    %87 = vector.load %arg19[%c1_74, %c2_75, %c0_76, %c0_77] : memref<4x6x6x128xf32, #tpu.memory_space<vmem>>, vector<1x1x4x128xf32>
    %88 = vector.shape_cast %87 : vector<1x1x4x128xf32> to vector<4x128xf32>
    %89 = vector.shape_cast %86 : vector<4x128xf32> to vector<1x1x4x128xf32>
    tpu.vector_store %arg19[%c1_74, %c2_75, %c0_76, %c0_77], %89 {strides = array<i32>} : memref<4x6x6x128xf32, #tpu.memory_space<vmem>>, vector<1x1x4x128xf32>,
    %90 = vector.extract_strided_slice %81 {offsets = [8, 0], sizes = [4, 128], strides = [1, 1]} : vector<16x128xf32> to vector<4x128xf32>
    %c1_78 = arith.constant 1 : index
    %c3_79 = arith.constant 3 : index
    %c0_80 = arith.constant 0 : index
    %c0_81 = arith.constant 0 : index
    %91 = vector.load %arg19[%c1_78, %c3_79, %c0_80, %c0_81] : memref<4x6x6x128xf32, #tpu.memory_space<vmem>>, vector<1x1x4x128xf32>
    %92 = vector.shape_cast %91 : vector<1x1x4x128xf32> to vector<4x128xf32>
    %93 = vector.shape_cast %90 : vector<4x128xf32> to vector<1x1x4x128xf32>
    tpu.vector_store %arg19[%c1_78, %c3_79, %c0_80, %c0_81], %93 {strides = array<i32>} : memref<4x6x6x128xf32, #tpu.memory_space<vmem>>, vector<1x1x4x128xf32>,
    %94 = vector.extract_strided_slice %81 {offsets = [12, 0], sizes = [4, 128], strides = [1, 1]} : vector<16x128xf32> to vector<4x128xf32>
    %c1_82 = arith.constant 1 : index
    %c4_83 = arith.constant 4 : index
    %c0_84 = arith.constant 0 : index
    %c0_85 = arith.constant 0 : index
    %95 = vector.load %arg19[%c1_82, %c4_83, %c0_84, %c0_85] : memref<4x6x6x128xf32, #tpu.memory_space<vmem>>, vector<1x1x4x128xf32>
    %96 = vector.shape_cast %95 : vector<1x1x4x128xf32> to vector<4x128xf32>
    %97 = vector.shape_cast %94 : vector<4x128xf32> to vector<1x1x4x128xf32>
    tpu.vector_store %arg19[%c1_82, %c4_83, %c0_84, %c0_85], %97 {strides = array<i32>} : memref<4x6x6x128xf32, #tpu.memory_space<vmem>>, vector<1x1x4x128xf32>,
    %cst_86 = arith.constant 0.000000e+00 : f32
    %98 = vector.broadcast %cst_86 : f32 to vector<2x6x128xf32>
    %c2_87 = arith.constant 2 : index
    %c4_88 = arith.constant 4 : index
    %c0_89 = arith.constant 0 : index
    %c0_90 = arith.constant 0 : index
    %99 = vector.load %arg19[%c2_87, %c4_88, %c0_89, %c0_90] : memref<4x6x6x128xf32, #tpu.memory_space<vmem>>, vector<1x2x6x128xf32>
    %100 = vector.shape_cast %99 : vector<1x2x6x128xf32> to vector<2x6x128xf32>
    %101 = vector.shape_cast %98 : vector<2x6x128xf32> to vector<1x2x6x128xf32>
    tpu.vector_store %arg19[%c2_87, %c4_88, %c0_89, %c0_90], %101 {strides = array<i32>} : memref<4x6x6x128xf32, #tpu.memory_space<vmem>>, vector<1x2x6x128xf32>,
    %cst_91 = arith.constant 0.000000e+00 : f32
    %102 = vector.broadcast %cst_91 : f32 to vector<4x1x128xf32>
    %c2_92 = arith.constant 2 : index
    %c0_93 = arith.constant 0 : index
    %c0_94 = arith.constant 0 : index
    %c0_95 = arith.constant 0 : index
    %103 = vector.load %arg19[%c2_92, %c0_93, %c0_94, %c0_95] : memref<4x6x6x128xf32, #tpu.memory_space<vmem>>, vector<1x4x1x128xf32>
    %104 = vector.shape_cast %103 : vector<1x4x1x128xf32> to vector<4x1x128xf32>
    %105 = vector.shape_cast %102 : vector<4x1x128xf32> to vector<1x4x1x128xf32>
    tpu.vector_store %arg19[%c2_92, %c0_93, %c0_94, %c0_95], %105 {strides = array<i32>} : memref<4x6x6x128xf32, #tpu.memory_space<vmem>>, vector<1x4x1x128xf32>,
    %cst_96 = arith.constant 0.000000e+00 : f32
    %106 = vector.broadcast %cst_96 : f32 to vector<4x1x128xf32>
    %c2_97 = arith.constant 2 : index
    %c0_98 = arith.constant 0 : index
    %c5_99 = arith.constant 5 : index
    %c0_100 = arith.constant 0 : index
    %107 = vector.load %arg19[%c2_97, %c0_98, %c5_99, %c0_100] : memref<4x6x6x128xf32, #tpu.memory_space<vmem>>, vector<1x4x1x128xf32>
    %108 = vector.shape_cast %107 : vector<1x4x1x128xf32> to vector<4x1x128xf32>
    %109 = vector.shape_cast %106 : vector<4x1x128xf32> to vector<1x4x1x128xf32>
    tpu.vector_store %arg19[%c2_97, %c0_98, %c5_99, %c0_100], %109 {strides = array<i32>} : memref<4x6x6x128xf32, #tpu.memory_space<vmem>>, vector<1x4x1x128xf32>,
    %c0_101 = arith.constant 0 : index
    %c0_102 = arith.constant 0 : index
    %c0_103 = arith.constant 0 : index
    %110 = vector.load %arg3[%c0_101, %c0_102, %c0_103] : memref<1x16x128xbf16, #tpu.memory_space<vmem>>, vector<1x16x128xbf16>
    %111 = vector.shape_cast %110 : vector<1x16x128xbf16> to vector<16x128xbf16>
    %c0_104 = arith.constant 0 : index
    %c0_105 = arith.constant 0 : index
    %112 = vector.load %arg5[%c0_104, %c0_105] : memref<128x128xbf16, #tpu.memory_space<vmem>>, vector<128x128xbf16>
    %cst_106 = arith.constant dense<0.000000e+00> : vector<16x128xf32>
    %113 = tpu.matmul %111, %112, %cst_106 {dimension_numbers = #tpu.dot_dimension_numbers<[1], [0], [0], [1], [0, 0, 1, 1], [], []>} : vector<16x128xbf16>, vector<128x128xbf16>, vector<16x128xf32> -> vector<16x128xf32>
    %c0_107 = arith.constant 0 : index
    %c0_108 = arith.constant 0 : index
    %114 = vector.load %arg6[%c0_107, %c0_108] : memref<1x128xf32, #tpu.memory_space<vmem>>, vector<1x128xf32>
    %115 = vector.broadcast %114 : vector<1x128xf32> to vector<16x128xf32>
    %116 = arith.mulf %113, %115 : vector<16x128xf32>
    %c0_109 = arith.constant 0 : index
    %c0_110 = arith.constant 0 : index
    %117 = vector.load %arg7[%c0_109, %c0_110] : memref<1x128xf32, #tpu.memory_space<vmem>>, vector<1x128xf32>
    %118 = vector.broadcast %117 : vector<1x128xf32> to vector<16x128xf32>
    %119 = arith.addf %116, %118 : vector<16x128xf32>
    %cst_111 = arith.constant -6.000000e+01 : f32
    %120 = vector.broadcast %cst_111 : f32 to vector<16x128xf32>
    %121 = arith.maximumf %119, %120 : vector<16x128xf32>
    %cst_112 = arith.constant 0.000000e+00 : f32
    %122 = vector.broadcast %cst_112 : f32 to vector<16x128xf32>
    %123 = arith.subf %122, %121 : vector<16x128xf32>
    %124 = math.exp %123 : vector<16x128xf32>
    %cst_113 = arith.constant 1.000000e+00 : f32
    %125 = vector.broadcast %cst_113 : f32 to vector<16x128xf32>
    %126 = arith.addf %125, %124 : vector<16x128xf32>
    %127 = tpu.reciprocal %126 {approx = true} : vector<16x128xf32> -> vector<16x128xf32>
    %128 = arith.mulf %119, %127 : vector<16x128xf32>
    %129 = vector.extract_strided_slice %128 {offsets = [0, 0], sizes = [4, 128], strides = [1, 1]} : vector<16x128xf32> to vector<4x128xf32>
    %c2_114 = arith.constant 2 : index
    %c0_115 = arith.constant 0 : index
    %c1_116 = arith.constant 1 : index
    %c0_117 = arith.constant 0 : index
    %130 = vector.load %arg19[%c2_114, %c0_115, %c1_116, %c0_117] : memref<4x6x6x128xf32, #tpu.memory_space<vmem>>, vector<1x1x4x128xf32>
    %131 = vector.shape_cast %130 : vector<1x1x4x128xf32> to vector<4x128xf32>
    %132 = vector.shape_cast %129 : vector<4x128xf32> to vector<1x1x4x128xf32>
    tpu.vector_store %arg19[%c2_114, %c0_115, %c1_116, %c0_117], %132 {strides = array<i32>} : memref<4x6x6x128xf32, #tpu.memory_space<vmem>>, vector<1x1x4x128xf32>,
    %133 = vector.extract_strided_slice %128 {offsets = [4, 0], sizes = [4, 128], strides = [1, 1]} : vector<16x128xf32> to vector<4x128xf32>
    %c2_118 = arith.constant 2 : index
    %c1_119 = arith.constant 1 : index
    %c1_120 = arith.constant 1 : index
    %c0_121 = arith.constant 0 : index
    %134 = vector.load %arg19[%c2_118, %c1_119, %c1_120, %c0_121] : memref<4x6x6x128xf32, #tpu.memory_space<vmem>>, vector<1x1x4x128xf32>
    %135 = vector.shape_cast %134 : vector<1x1x4x128xf32> to vector<4x128xf32>
    %136 = vector.shape_cast %133 : vector<4x128xf32> to vector<1x1x4x128xf32>
    tpu.vector_store %arg19[%c2_118, %c1_119, %c1_120, %c0_121], %136 {strides = array<i32>} : memref<4x6x6x128xf32, #tpu.memory_space<vmem>>, vector<1x1x4x128xf32>,
    %137 = vector.extract_strided_slice %128 {offsets = [8, 0], sizes = [4, 128], strides = [1, 1]} : vector<16x128xf32> to vector<4x128xf32>
    %c2_122 = arith.constant 2 : index
    %c2_123 = arith.constant 2 : index
    %c1_124 = arith.constant 1 : index
    %c0_125 = arith.constant 0 : index
    %138 = vector.load %arg19[%c2_122, %c2_123, %c1_124, %c0_125] : memref<4x6x6x128xf32, #tpu.memory_space<vmem>>, vector<1x1x4x128xf32>
    %139 = vector.shape_cast %138 : vector<1x1x4x128xf32> to vector<4x128xf32>
    %140 = vector.shape_cast %137 : vector<4x128xf32> to vector<1x1x4x128xf32>
    tpu.vector_store %arg19[%c2_122, %c2_123, %c1_124, %c0_125], %140 {strides = array<i32>} : memref<4x6x6x128xf32, #tpu.memory_space<vmem>>, vector<1x1x4x128xf32>,
    %141 = vector.extract_strided_slice %128 {offsets = [12, 0], sizes = [4, 128], strides = [1, 1]} : vector<16x128xf32> to vector<4x128xf32>
    %c2_126 = arith.constant 2 : index
    %c3_127 = arith.constant 3 : index
    %c1_128 = arith.constant 1 : index
    %c0_129 = arith.constant 0 : index
    %142 = vector.load %arg19[%c2_126, %c3_127, %c1_128, %c0_129] : memref<4x6x6x128xf32, #tpu.memory_space<vmem>>, vector<1x1x4x128xf32>
    %143 = vector.shape_cast %142 : vector<1x1x4x128xf32> to vector<4x128xf32>
    %144 = vector.shape_cast %141 : vector<4x128xf32> to vector<1x1x4x128xf32>
    tpu.vector_store %arg19[%c2_126, %c3_127, %c1_128, %c0_129], %144 {strides = array<i32>} : memref<4x6x6x128xf32, #tpu.memory_space<vmem>>, vector<1x1x4x128xf32>,
    %cst_130 = arith.constant 0.000000e+00 : f32
    %145 = vector.broadcast %cst_130 : f32 to vector<2x6x128xf32>
    %c3_131 = arith.constant 3 : index
    %c4_132 = arith.constant 4 : index
    %c0_133 = arith.constant 0 : index
    %c0_134 = arith.constant 0 : index
    %146 = vector.load %arg19[%c3_131, %c4_132, %c0_133, %c0_134] : memref<4x6x6x128xf32, #tpu.memory_space<vmem>>, vector<1x2x6x128xf32>
    %147 = vector.shape_cast %146 : vector<1x2x6x128xf32> to vector<2x6x128xf32>
    %148 = vector.shape_cast %145 : vector<2x6x128xf32> to vector<1x2x6x128xf32>
    tpu.vector_store %arg19[%c3_131, %c4_132, %c0_133, %c0_134], %148 {strides = array<i32>} : memref<4x6x6x128xf32, #tpu.memory_space<vmem>>, vector<1x2x6x128xf32>,
    %cst_135 = arith.constant 0.000000e+00 : f32
    %149 = vector.broadcast %cst_135 : f32 to vector<4x2x128xf32>
    %c3_136 = arith.constant 3 : index
    %c0_137 = arith.constant 0 : index
    %c4_138 = arith.constant 4 : index
    %c0_139 = arith.constant 0 : index
    %150 = vector.load %arg19[%c3_136, %c0_137, %c4_138, %c0_139] : memref<4x6x6x128xf32, #tpu.memory_space<vmem>>, vector<1x4x2x128xf32>
    %151 = vector.shape_cast %150 : vector<1x4x2x128xf32> to vector<4x2x128xf32>
    %152 = vector.shape_cast %149 : vector<4x2x128xf32> to vector<1x4x2x128xf32>
    tpu.vector_store %arg19[%c3_136, %c0_137, %c4_138, %c0_139], %152 {strides = array<i32>} : memref<4x6x6x128xf32, #tpu.memory_space<vmem>>, vector<1x4x2x128xf32>,
    %c0_140 = arith.constant 0 : index
    %c0_141 = arith.constant 0 : index
    %c0_142 = arith.constant 0 : index
    %153 = vector.load %arg4[%c0_140, %c0_141, %c0_142] : memref<1x16x128xbf16, #tpu.memory_space<vmem>>, vector<1x16x128xbf16>
    %154 = vector.shape_cast %153 : vector<1x16x128xbf16> to vector<16x128xbf16>
    %c0_143 = arith.constant 0 : index
    %c0_144 = arith.constant 0 : index
    %155 = vector.load %arg5[%c0_143, %c0_144] : memref<128x128xbf16, #tpu.memory_space<vmem>>, vector<128x128xbf16>
    %cst_145 = arith.constant dense<0.000000e+00> : vector<16x128xf32>
    %156 = tpu.matmul %154, %155, %cst_145 {dimension_numbers = #tpu.dot_dimension_numbers<[1], [0], [0], [1], [0, 0, 1, 1], [], []>} : vector<16x128xbf16>, vector<128x128xbf16>, vector<16x128xf32> -> vector<16x128xf32>
    %c0_146 = arith.constant 0 : index
    %c0_147 = arith.constant 0 : index
    %157 = vector.load %arg6[%c0_146, %c0_147] : memref<1x128xf32, #tpu.memory_space<vmem>>, vector<1x128xf32>
    %158 = vector.broadcast %157 : vector<1x128xf32> to vector<16x128xf32>
    %159 = arith.mulf %156, %158 : vector<16x128xf32>
    %c0_148 = arith.constant 0 : index
    %c0_149 = arith.constant 0 : index
    %160 = vector.load %arg7[%c0_148, %c0_149] : memref<1x128xf32, #tpu.memory_space<vmem>>, vector<1x128xf32>
    %161 = vector.broadcast %160 : vector<1x128xf32> to vector<16x128xf32>
    %162 = arith.addf %159, %161 : vector<16x128xf32>
    %cst_150 = arith.constant -6.000000e+01 : f32
    %163 = vector.broadcast %cst_150 : f32 to vector<16x128xf32>
    %164 = arith.maximumf %162, %163 : vector<16x128xf32>
    %cst_151 = arith.constant 0.000000e+00 : f32
    %165 = vector.broadcast %cst_151 : f32 to vector<16x128xf32>
    %166 = arith.subf %165, %164 : vector<16x128xf32>
    %167 = math.exp %166 : vector<16x128xf32>
    %cst_152 = arith.constant 1.000000e+00 : f32
    %168 = vector.broadcast %cst_152 : f32 to vector<16x128xf32>
    %169 = arith.addf %168, %167 : vector<16x128xf32>
    %170 = tpu.reciprocal %169 {approx = true} : vector<16x128xf32> -> vector<16x128xf32>
    %171 = arith.mulf %162, %170 : vector<16x128xf32>
    %172 = vector.extract_strided_slice %171 {offsets = [0, 0], sizes = [4, 128], strides = [1, 1]} : vector<16x128xf32> to vector<4x128xf32>
    %c3_153 = arith.constant 3 : index
    %c0_154 = arith.constant 0 : index
    %c0_155 = arith.constant 0 : index
    %c0_156 = arith.constant 0 : index
    %173 = vector.load %arg19[%c3_153, %c0_154, %c0_155, %c0_156] : memref<4x6x6x128xf32, #tpu.memory_space<vmem>>, vector<1x1x4x128xf32>
    %174 = vector.shape_cast %173 : vector<1x1x4x128xf32> to vector<4x128xf32>
    %175 = vector.shape_cast %172 : vector<4x128xf32> to vector<1x1x4x128xf32>
    tpu.vector_store %arg19[%c3_153, %c0_154, %c0_155, %c0_156], %175 {strides = array<i32>} : memref<4x6x6x128xf32, #tpu.memory_space<vmem>>, vector<1x1x4x128xf32>,
    %176 = vector.extract_strided_slice %171 {offsets = [4, 0], sizes = [4, 128], strides = [1, 1]} : vector<16x128xf32> to vector<4x128xf32>
    %c3_157 = arith.constant 3 : index
    %c1_158 = arith.constant 1 : index
    %c0_159 = arith.constant 0 : index
    %c0_160 = arith.constant 0 : index
    %177 = vector.load %arg19[%c3_157, %c1_158, %c0_159, %c0_160] : memref<4x6x6x128xf32, #tpu.memory_space<vmem>>, vector<1x1x4x128xf32>
    %178 = vector.shape_cast %177 : vector<1x1x4x128xf32> to vector<4x128xf32>
    %179 = vector.shape_cast %176 : vector<4x128xf32> to vector<1x1x4x128xf32>
    tpu.vector_store %arg19[%c3_157, %c1_158, %c0_159, %c0_160], %179 {strides = array<i32>} : memref<4x6x6x128xf32, #tpu.memory_space<vmem>>, vector<1x1x4x128xf32>,
    %180 = vector.extract_strided_slice %171 {offsets = [8, 0], sizes = [4, 128], strides = [1, 1]} : vector<16x128xf32> to vector<4x128xf32>
    %c3_161 = arith.constant 3 : index
    %c2_162 = arith.constant 2 : index
    %c0_163 = arith.constant 0 : index
    %c0_164 = arith.constant 0 : index
    %181 = vector.load %arg19[%c3_161, %c2_162, %c0_163, %c0_164] : memref<4x6x6x128xf32, #tpu.memory_space<vmem>>, vector<1x1x4x128xf32>
    %182 = vector.shape_cast %181 : vector<1x1x4x128xf32> to vector<4x128xf32>
    %183 = vector.shape_cast %180 : vector<4x128xf32> to vector<1x1x4x128xf32>
    tpu.vector_store %arg19[%c3_161, %c2_162, %c0_163, %c0_164], %183 {strides = array<i32>} : memref<4x6x6x128xf32, #tpu.memory_space<vmem>>, vector<1x1x4x128xf32>,
    %184 = vector.extract_strided_slice %171 {offsets = [12, 0], sizes = [4, 128], strides = [1, 1]} : vector<16x128xf32> to vector<4x128xf32>
    %c3_165 = arith.constant 3 : index
    %c3_166 = arith.constant 3 : index
    %c0_167 = arith.constant 0 : index
    %c0_168 = arith.constant 0 : index
    %185 = vector.load %arg19[%c3_165, %c3_166, %c0_167, %c0_168] : memref<4x6x6x128xf32, #tpu.memory_space<vmem>>, vector<1x1x4x128xf32>
    %186 = vector.shape_cast %185 : vector<1x1x4x128xf32> to vector<4x128xf32>
    %187 = vector.shape_cast %184 : vector<4x128xf32> to vector<1x1x4x128xf32>
    tpu.vector_store %arg19[%c3_165, %c3_166, %c0_167, %c0_168], %187 {strides = array<i32>} : memref<4x6x6x128xf32, #tpu.memory_space<vmem>>, vector<1x1x4x128xf32>,
    %cst_169 = arith.constant 0.000000e+00 : f32
    %188 = vector.broadcast %cst_169 : f32 to vector<4x4x128xf32>
    %c0_170 = arith.constant 0 : index
    %c0_171 = arith.constant 0 : index
    %c0_172 = arith.constant 0 : index
    %c0_173 = arith.constant 0 : index
    %189 = vector.load %arg19[%c0_170, %c0_171, %c0_172, %c0_173] : memref<4x6x6x128xf32, #tpu.memory_space<vmem>>, vector<1x6x4x128xf32>
    %190 = vector.shape_cast %189 : vector<1x6x4x128xf32> to vector<6x4x128xf32>
    %191 = vector.extract_strided_slice %190 {offsets = [0, 0, 0], sizes = [4, 4, 128], strides = [1, 1, 1]} : vector<6x4x128xf32> to vector<4x4x128xf32>
    %c0_174 = arith.constant 0 : index
    %c0_175 = arith.constant 0 : index
    %192 = vector.load %arg8[%c0_174, %c0_175] : memref<25x128xf32, #tpu.memory_space<vmem>>, vector<1x128xf32>
    %193 = vector.shape_cast %192 : vector<1x128xf32> to vector<1x1x128xf32>
    %194 = vector.broadcast %193 : vector<1x1x128xf32> to vector<4x4x128xf32>
    %195 = arith.mulf %191, %194 : vector<4x4x128xf32>
    %196 = arith.addf %188, %195 : vector<4x4x128xf32>
    %197 = vector.extract_strided_slice %190 {offsets = [1, 0, 0], sizes = [4, 4, 128], strides = [1, 1, 1]} : vector<6x4x128xf32> to vector<4x4x128xf32>
    %c10 = arith.constant 10 : index
    %c0_176 = arith.constant 0 : index
    %198 = vector.load %arg8[%c10, %c0_176] : memref<25x128xf32, #tpu.memory_space<vmem>>, vector<1x128xf32>
    %199 = vector.shape_cast %198 : vector<1x128xf32> to vector<1x1x128xf32>
    %200 = vector.broadcast %199 : vector<1x1x128xf32> to vector<4x4x128xf32>
    %201 = arith.mulf %197, %200 : vector<4x4x128xf32>
    %202 = arith.addf %196, %201 : vector<4x4x128xf32>
    %203 = vector.extract_strided_slice %190 {offsets = [2, 0, 0], sizes = [4, 4, 128], strides = [1, 1, 1]} : vector<6x4x128xf32> to vector<4x4x128xf32>
    %c20 = arith.constant 20 : index
    %c0_177 = arith.constant 0 : index
    %204 = vector.load %arg8[%c20, %c0_177] : memref<25x128xf32, #tpu.memory_space<vmem>>, vector<1x128xf32>
    %205 = vector.shape_cast %204 : vector<1x128xf32> to vector<1x1x128xf32>
    %206 = vector.broadcast %205 : vector<1x1x128xf32> to vector<4x4x128xf32>
    %207 = arith.mulf %203, %206 : vector<4x4x128xf32>
    %208 = arith.addf %202, %207 : vector<4x4x128xf32>
    %c2_178 = arith.constant 2 : index
    %c0_179 = arith.constant 0 : index
    %c0_180 = arith.constant 0 : index
    %c0_181 = arith.constant 0 : index
    %209 = vector.load %arg19[%c2_178, %c0_179, %c0_180, %c0_181] : memref<4x6x6x128xf32, #tpu.memory_space<vmem>>, vector<1x6x4x128xf32>
    %210 = vector.shape_cast %209 : vector<1x6x4x128xf32> to vector<6x4x128xf32>
    %211 = vector.extract_strided_slice %210 {offsets = [0, 0, 0], sizes = [4, 4, 128], strides = [1, 1, 1]} : vector<6x4x128xf32> to vector<4x4x128xf32>
    %c5_182 = arith.constant 5 : index
    %c0_183 = arith.constant 0 : index
    %212 = vector.load %arg8[%c5_182, %c0_183] : memref<25x128xf32, #tpu.memory_space<vmem>>, vector<1x128xf32>
    %213 = vector.shape_cast %212 : vector<1x128xf32> to vector<1x1x128xf32>
    %214 = vector.broadcast %213 : vector<1x1x128xf32> to vector<4x4x128xf32>
    %215 = arith.mulf %211, %214 : vector<4x4x128xf32>
    %216 = arith.addf %208, %215 : vector<4x4x128xf32>
    %217 = vector.extract_strided_slice %210 {offsets = [1, 0, 0], sizes = [4, 4, 128], strides = [1, 1, 1]} : vector<6x4x128xf32> to vector<4x4x128xf32>
    %c15 = arith.constant 15 : index
    %c0_184 = arith.constant 0 : index
    %218 = vector.load %arg8[%c15, %c0_184] : memref<25x128xf32, #tpu.memory_space<vmem>>, vector<1x128xf32>
    %219 = vector.shape_cast %218 : vector<1x128xf32> to vector<1x1x128xf32>
    %220 = vector.broadcast %219 : vector<1x1x128xf32> to vector<4x4x128xf32>
    %221 = arith.mulf %217, %220 : vector<4x4x128xf32>
    %222 = arith.addf %216, %221 : vector<4x4x128xf32>
    %c1_185 = arith.constant 1 : index
    %c0_186 = arith.constant 0 : index
    %c0_187 = arith.constant 0 : index
    %c0_188 = arith.constant 0 : index
    %223 = vector.load %arg19[%c1_185, %c0_186, %c0_187, %c0_188] : memref<4x6x6x128xf32, #tpu.memory_space<vmem>>, vector<1x6x4x128xf32>
    %224 = vector.shape_cast %223 : vector<1x6x4x128xf32> to vector<6x4x128xf32>
    %225 = vector.extract_strided_slice %224 {offsets = [0, 0, 0], sizes = [4, 4, 128], strides = [1, 1, 1]} : vector<6x4x128xf32> to vector<4x4x128xf32>
    %c1_189 = arith.constant 1 : index
    %c0_190 = arith.constant 0 : index
    %226 = vector.load %arg8[%c1_189, %c0_190] : memref<25x128xf32, #tpu.memory_space<vmem>>, vector<1x128xf32>
    %227 = vector.shape_cast %226 : vector<1x128xf32> to vector<1x1x128xf32>
    %228 = vector.broadcast %227 : vector<1x1x128xf32> to vector<4x4x128xf32>
    %229 = arith.mulf %225, %228 : vector<4x4x128xf32>
    %230 = arith.addf %222, %229 : vector<4x4x128xf32>
    %231 = vector.extract_strided_slice %224 {offsets = [1, 0, 0], sizes = [4, 4, 128], strides = [1, 1, 1]} : vector<6x4x128xf32> to vector<4x4x128xf32>
    %c11 = arith.constant 11 : index
    %c0_191 = arith.constant 0 : index
    %232 = vector.load %arg8[%c11, %c0_191] : memref<25x128xf32, #tpu.memory_space<vmem>>, vector<1x128xf32>
    %233 = vector.shape_cast %232 : vector<1x128xf32> to vector<1x1x128xf32>
    %234 = vector.broadcast %233 : vector<1x1x128xf32> to vector<4x4x128xf32>
    %235 = arith.mulf %231, %234 : vector<4x4x128xf32>
    %236 = arith.addf %230, %235 : vector<4x4x128xf32>
    %237 = vector.extract_strided_slice %224 {offsets = [2, 0, 0], sizes = [4, 4, 128], strides = [1, 1, 1]} : vector<6x4x128xf32> to vector<4x4x128xf32>
    %c21 = arith.constant 21 : index
    %c0_192 = arith.constant 0 : index
    %238 = vector.load %arg8[%c21, %c0_192] : memref<25x128xf32, #tpu.memory_space<vmem>>, vector<1x128xf32>
    %239 = vector.shape_cast %238 : vector<1x128xf32> to vector<1x1x128xf32>
    %240 = vector.broadcast %239 : vector<1x1x128xf32> to vector<4x4x128xf32>
    %241 = arith.mulf %237, %240 : vector<4x4x128xf32>
    %242 = arith.addf %236, %241 : vector<4x4x128xf32>
    %c3_193 = arith.constant 3 : index
    %c0_194 = arith.constant 0 : index
    %c0_195 = arith.constant 0 : index
    %c0_196 = arith.constant 0 : index
    %243 = vector.load %arg19[%c3_193, %c0_194, %c0_195, %c0_196] : memref<4x6x6x128xf32, #tpu.memory_space<vmem>>, vector<1x6x4x128xf32>
    %244 = vector.shape_cast %243 : vector<1x6x4x128xf32> to vector<6x4x128xf32>
    %245 = vector.extract_strided_slice %244 {offsets = [0, 0, 0], sizes = [4, 4, 128], strides = [1, 1, 1]} : vector<6x4x128xf32> to vector<4x4x128xf32>
    %c6 = arith.constant 6 : index
    %c0_197 = arith.constant 0 : index
    %246 = vector.load %arg8[%c6, %c0_197] : memref<25x128xf32, #tpu.memory_space<vmem>>, vector<1x128xf32>
    %247 = vector.shape_cast %246 : vector<1x128xf32> to vector<1x1x128xf32>
    %248 = vector.broadcast %247 : vector<1x1x128xf32> to vector<4x4x128xf32>
    %249 = arith.mulf %245, %248 : vector<4x4x128xf32>
    %250 = arith.addf %242, %249 : vector<4x4x128xf32>
    %251 = vector.extract_strided_slice %244 {offsets = [1, 0, 0], sizes = [4, 4, 128], strides = [1, 1, 1]} : vector<6x4x128xf32> to vector<4x4x128xf32>
    %c16 = arith.constant 16 : index
    %c0_198 = arith.constant 0 : index
    %252 = vector.load %arg8[%c16, %c0_198] : memref<25x128xf32, #tpu.memory_space<vmem>>, vector<1x128xf32>
    %253 = vector.shape_cast %252 : vector<1x128xf32> to vector<1x1x128xf32>
    %254 = vector.broadcast %253 : vector<1x1x128xf32> to vector<4x4x128xf32>
    %255 = arith.mulf %251, %254 : vector<4x4x128xf32>
    %256 = arith.addf %250, %255 : vector<4x4x128xf32>
    %c0_199 = arith.constant 0 : index
    %c0_200 = arith.constant 0 : index
    %c1_201 = arith.constant 1 : index
    %c0_202 = arith.constant 0 : index
    %257 = vector.load %arg19[%c0_199, %c0_200, %c1_201, %c0_202] : memref<4x6x6x128xf32, #tpu.memory_space<vmem>>, vector<1x6x4x128xf32>
    %258 = vector.shape_cast %257 : vector<1x6x4x128xf32> to vector<6x4x128xf32>
    %259 = vector.extract_strided_slice %258 {offsets = [0, 0, 0], sizes = [4, 4, 128], strides = [1, 1, 1]} : vector<6x4x128xf32> to vector<4x4x128xf32>
    %c2_203 = arith.constant 2 : index
    %c0_204 = arith.constant 0 : index
    %260 = vector.load %arg8[%c2_203, %c0_204] : memref<25x128xf32, #tpu.memory_space<vmem>>, vector<1x128xf32>
    %261 = vector.shape_cast %260 : vector<1x128xf32> to vector<1x1x128xf32>
    %262 = vector.broadcast %261 : vector<1x1x128xf32> to vector<4x4x128xf32>
    %263 = arith.mulf %259, %262 : vector<4x4x128xf32>
    %264 = arith.addf %256, %263 : vector<4x4x128xf32>
    %265 = vector.extract_strided_slice %258 {offsets = [1, 0, 0], sizes = [4, 4, 128], strides = [1, 1, 1]} : vector<6x4x128xf32> to vector<4x4x128xf32>
    %c12 = arith.constant 12 : index
    %c0_205 = arith.constant 0 : index
    %266 = vector.load %arg8[%c12, %c0_205] : memref<25x128xf32, #tpu.memory_space<vmem>>, vector<1x128xf32>
    %267 = vector.shape_cast %266 : vector<1x128xf32> to vector<1x1x128xf32>
    %268 = vector.broadcast %267 : vector<1x1x128xf32> to vector<4x4x128xf32>
    %269 = arith.mulf %265, %268 : vector<4x4x128xf32>
    %270 = arith.addf %264, %269 : vector<4x4x128xf32>
    %271 = vector.extract_strided_slice %258 {offsets = [2, 0, 0], sizes = [4, 4, 128], strides = [1, 1, 1]} : vector<6x4x128xf32> to vector<4x4x128xf32>
    %c22 = arith.constant 22 : index
    %c0_206 = arith.constant 0 : index
    %272 = vector.load %arg8[%c22, %c0_206] : memref<25x128xf32, #tpu.memory_space<vmem>>, vector<1x128xf32>
    %273 = vector.shape_cast %272 : vector<1x128xf32> to vector<1x1x128xf32>
    %274 = vector.broadcast %273 : vector<1x1x128xf32> to vector<4x4x128xf32>
    %275 = arith.mulf %271, %274 : vector<4x4x128xf32>
    %276 = arith.addf %270, %275 : vector<4x4x128xf32>
    %c2_207 = arith.constant 2 : index
    %c0_208 = arith.constant 0 : index
    %c1_209 = arith.constant 1 : index
    %c0_210 = arith.constant 0 : index
    %277 = vector.load %arg19[%c2_207, %c0_208, %c1_209, %c0_210] : memref<4x6x6x128xf32, #tpu.memory_space<vmem>>, vector<1x6x4x128xf32>
    %278 = vector.shape_cast %277 : vector<1x6x4x128xf32> to vector<6x4x128xf32>
    %279 = vector.extract_strided_slice %278 {offsets = [0, 0, 0], sizes = [4, 4, 128], strides = [1, 1, 1]} : vector<6x4x128xf32> to vector<4x4x128xf32>
    %c7 = arith.constant 7 : index
    %c0_211 = arith.constant 0 : index
    %280 = vector.load %arg8[%c7, %c0_211] : memref<25x128xf32, #tpu.memory_space<vmem>>, vector<1x128xf32>
    %281 = vector.shape_cast %280 : vector<1x128xf32> to vector<1x1x128xf32>
    %282 = vector.broadcast %281 : vector<1x1x128xf32> to vector<4x4x128xf32>
    %283 = arith.mulf %279, %282 : vector<4x4x128xf32>
    %284 = arith.addf %276, %283 : vector<4x4x128xf32>
    %285 = vector.extract_strided_slice %278 {offsets = [1, 0, 0], sizes = [4, 4, 128], strides = [1, 1, 1]} : vector<6x4x128xf32> to vector<4x4x128xf32>
    %c17 = arith.constant 17 : index
    %c0_212 = arith.constant 0 : index
    %286 = vector.load %arg8[%c17, %c0_212] : memref<25x128xf32, #tpu.memory_space<vmem>>, vector<1x128xf32>
    %287 = vector.shape_cast %286 : vector<1x128xf32> to vector<1x1x128xf32>
    %288 = vector.broadcast %287 : vector<1x1x128xf32> to vector<4x4x128xf32>
    %289 = arith.mulf %285, %288 : vector<4x4x128xf32>
    %290 = arith.addf %284, %289 : vector<4x4x128xf32>
    %c1_213 = arith.constant 1 : index
    %c0_214 = arith.constant 0 : index
    %c1_215 = arith.constant 1 : index
    %c0_216 = arith.constant 0 : index
    %291 = vector.load %arg19[%c1_213, %c0_214, %c1_215, %c0_216] : memref<4x6x6x128xf32, #tpu.memory_space<vmem>>, vector<1x6x4x128xf32>
    %292 = vector.shape_cast %291 : vector<1x6x4x128xf32> to vector<6x4x128xf32>
    %293 = vector.extract_strided_slice %292 {offsets = [0, 0, 0], sizes = [4, 4, 128], strides = [1, 1, 1]} : vector<6x4x128xf32> to vector<4x4x128xf32>
    %c3_217 = arith.constant 3 : index
    %c0_218 = arith.constant 0 : index
    %294 = vector.load %arg8[%c3_217, %c0_218] : memref<25x128xf32, #tpu.memory_space<vmem>>, vector<1x128xf32>
    %295 = vector.shape_cast %294 : vector<1x128xf32> to vector<1x1x128xf32>
    %296 = vector.broadcast %295 : vector<1x1x128xf32> to vector<4x4x128xf32>
    %297 = arith.mulf %293, %296 : vector<4x4x128xf32>
    %298 = arith.addf %290, %297 : vector<4x4x128xf32>
    %299 = vector.extract_strided_slice %292 {offsets = [1, 0, 0], sizes = [4, 4, 128], strides = [1, 1, 1]} : vector<6x4x128xf32> to vector<4x4x128xf32>
    %c13 = arith.constant 13 : index
    %c0_219 = arith.constant 0 : index
    %300 = vector.load %arg8[%c13, %c0_219] : memref<25x128xf32, #tpu.memory_space<vmem>>, vector<1x128xf32>
    %301 = vector.shape_cast %300 : vector<1x128xf32> to vector<1x1x128xf32>
    %302 = vector.broadcast %301 : vector<1x1x128xf32> to vector<4x4x128xf32>
    %303 = arith.mulf %299, %302 : vector<4x4x128xf32>
    %304 = arith.addf %298, %303 : vector<4x4x128xf32>
    %305 = vector.extract_strided_slice %292 {offsets = [2, 0, 0], sizes = [4, 4, 128], strides = [1, 1, 1]} : vector<6x4x128xf32> to vector<4x4x128xf32>
    %c23 = arith.constant 23 : index
    %c0_220 = arith.constant 0 : index
    %306 = vector.load %arg8[%c23, %c0_220] : memref<25x128xf32, #tpu.memory_space<vmem>>, vector<1x128xf32>
    %307 = vector.shape_cast %306 : vector<1x128xf32> to vector<1x1x128xf32>
    %308 = vector.broadcast %307 : vector<1x1x128xf32> to vector<4x4x128xf32>
    %309 = arith.mulf %305, %308 : vector<4x4x128xf32>
    %310 = arith.addf %304, %309 : vector<4x4x128xf32>
    %c3_221 = arith.constant 3 : index
    %c0_222 = arith.constant 0 : index
    %c1_223 = arith.constant 1 : index
    %c0_224 = arith.constant 0 : index
    %311 = vector.load %arg19[%c3_221, %c0_222, %c1_223, %c0_224] : memref<4x6x6x128xf32, #tpu.memory_space<vmem>>, vector<1x6x4x128xf32>
    %312 = vector.shape_cast %311 : vector<1x6x4x128xf32> to vector<6x4x128xf32>
    %313 = vector.extract_strided_slice %312 {offsets = [0, 0, 0], sizes = [4, 4, 128], strides = [1, 1, 1]} : vector<6x4x128xf32> to vector<4x4x128xf32>
    %c8 = arith.constant 8 : index
    %c0_225 = arith.constant 0 : index
    %314 = vector.load %arg8[%c8, %c0_225] : memref<25x128xf32, #tpu.memory_space<vmem>>, vector<1x128xf32>
    %315 = vector.shape_cast %314 : vector<1x128xf32> to vector<1x1x128xf32>
    %316 = vector.broadcast %315 : vector<1x1x128xf32> to vector<4x4x128xf32>
    %317 = arith.mulf %313, %316 : vector<4x4x128xf32>
    %318 = arith.addf %310, %317 : vector<4x4x128xf32>
    %319 = vector.extract_strided_slice %312 {offsets = [1, 0, 0], sizes = [4, 4, 128], strides = [1, 1, 1]} : vector<6x4x128xf32> to vector<4x4x128xf32>
    %c18 = arith.constant 18 : index
    %c0_226 = arith.constant 0 : index
    %320 = vector.load %arg8[%c18, %c0_226] : memref<25x128xf32, #tpu.memory_space<vmem>>, vector<1x128xf32>
    %321 = vector.shape_cast %320 : vector<1x128xf32> to vector<1x1x128xf32>
    %322 = vector.broadcast %321 : vector<1x1x128xf32> to vector<4x4x128xf32>
    %323 = arith.mulf %319, %322 : vector<4x4x128xf32>
    %324 = arith.addf %318, %323 : vector<4x4x128xf32>
    %c0_227 = arith.constant 0 : index
    %c0_228 = arith.constant 0 : index
    %c2_229 = arith.constant 2 : index
    %c0_230 = arith.constant 0 : index
    %325 = vector.load %arg19[%c0_227, %c0_228, %c2_229, %c0_230] : memref<4x6x6x128xf32, #tpu.memory_space<vmem>>, vector<1x6x4x128xf32>
    %326 = vector.shape_cast %325 : vector<1x6x4x128xf32> to vector<6x4x128xf32>
    %327 = vector.extract_strided_slice %326 {offsets = [0, 0, 0], sizes = [4, 4, 128], strides = [1, 1, 1]} : vector<6x4x128xf32> to vector<4x4x128xf32>
    %c4_231 = arith.constant 4 : index
    %c0_232 = arith.constant 0 : index
    %328 = vector.load %arg8[%c4_231, %c0_232] : memref<25x128xf32, #tpu.memory_space<vmem>>, vector<1x128xf32>
    %329 = vector.shape_cast %328 : vector<1x128xf32> to vector<1x1x128xf32>
    %330 = vector.broadcast %329 : vector<1x1x128xf32> to vector<4x4x128xf32>
    %331 = arith.mulf %327, %330 : vector<4x4x128xf32>
    %332 = arith.addf %324, %331 : vector<4x4x128xf32>
    %333 = vector.extract_strided_slice %326 {offsets = [1, 0, 0], sizes = [4, 4, 128], strides = [1, 1, 1]} : vector<6x4x128xf32> to vector<4x4x128xf32>
    %c14 = arith.constant 14 : index
    %c0_233 = arith.constant 0 : index
    %334 = vector.load %arg8[%c14, %c0_233] : memref<25x128xf32, #tpu.memory_space<vmem>>, vector<1x128xf32>
    %335 = vector.shape_cast %334 : vector<1x128xf32> to vector<1x1x128xf32>
    %336 = vector.broadcast %335 : vector<1x1x128xf32> to vector<4x4x128xf32>
    %337 = arith.mulf %333, %336 : vector<4x4x128xf32>
    %338 = arith.addf %332, %337 : vector<4x4x128xf32>
    %339 = vector.extract_strided_slice %326 {offsets = [2, 0, 0], sizes = [4, 4, 128], strides = [1, 1, 1]} : vector<6x4x128xf32> to vector<4x4x128xf32>
    %c24 = arith.constant 24 : index
    %c0_234 = arith.constant 0 : index
    %340 = vector.load %arg8[%c24, %c0_234] : memref<25x128xf32, #tpu.memory_space<vmem>>, vector<1x128xf32>
    %341 = vector.shape_cast %340 : vector<1x128xf32> to vector<1x1x128xf32>
    %342 = vector.broadcast %341 : vector<1x1x128xf32> to vector<4x4x128xf32>
    %343 = arith.mulf %339, %342 : vector<4x4x128xf32>
    %344 = arith.addf %338, %343 : vector<4x4x128xf32>
    %c2_235 = arith.constant 2 : index
    %c0_236 = arith.constant 0 : index
    %c2_237 = arith.constant 2 : index
    %c0_238 = arith.constant 0 : index
    %345 = vector.load %arg19[%c2_235, %c0_236, %c2_237, %c0_238] : memref<4x6x6x128xf32, #tpu.memory_space<vmem>>, vector<1x6x4x128xf32>
    %346 = vector.shape_cast %345 : vector<1x6x4x128xf32> to vector<6x4x128xf32>
    %347 = vector.extract_strided_slice %346 {offsets = [0, 0, 0], sizes = [4, 4, 128], strides = [1, 1, 1]} : vector<6x4x128xf32> to vector<4x4x128xf32>
    %c9 = arith.constant 9 : index
    %c0_239 = arith.constant 0 : index
    %348 = vector.load %arg8[%c9, %c0_239] : memref<25x128xf32, #tpu.memory_space<vmem>>, vector<1x128xf32>
    %349 = vector.shape_cast %348 : vector<1x128xf32> to vector<1x1x128xf32>
    %350 = vector.broadcast %349 : vector<1x1x128xf32> to vector<4x4x128xf32>
    %351 = arith.mulf %347, %350 : vector<4x4x128xf32>
    %352 = arith.addf %344, %351 : vector<4x4x128xf32>
    %353 = vector.extract_strided_slice %346 {offsets = [1, 0, 0], sizes = [4, 4, 128], strides = [1, 1, 1]} : vector<6x4x128xf32> to vector<4x4x128xf32>
    %c19 = arith.constant 19 : index
    %c0_240 = arith.constant 0 : index
    %354 = vector.load %arg8[%c19, %c0_240] : memref<25x128xf32, #tpu.memory_space<vmem>>, vector<1x128xf32>
    %355 = vector.shape_cast %354 : vector<1x128xf32> to vector<1x1x128xf32>
    %356 = vector.broadcast %355 : vector<1x1x128xf32> to vector<4x4x128xf32>
    %357 = arith.mulf %353, %356 : vector<4x4x128xf32>
    %358 = arith.addf %352, %357 : vector<4x4x128xf32>
    %c0_241 = arith.constant 0 : index
    %c0_242 = arith.constant 0 : index
    %359 = vector.load %arg9[%c0_241, %c0_242] : memref<1x128xf32, #tpu.memory_space<vmem>>, vector<1x128xf32>
    %360 = vector.shape_cast %359 : vector<1x128xf32> to vector<1x1x128xf32>
    %361 = vector.broadcast %360 : vector<1x1x128xf32> to vector<4x4x128xf32>
    %362 = arith.mulf %358, %361 : vector<4x4x128xf32>
    %c0_243 = arith.constant 0 : index
    %c0_244 = arith.constant 0 : index
    %363 = vector.load %arg10[%c0_243, %c0_244] : memref<1x128xf32, #tpu.memory_space<vmem>>, vector<1x128xf32>
    %364 = vector.shape_cast %363 : vector<1x128xf32> to vector<1x1x128xf32>
    %365 = vector.broadcast %364 : vector<1x1x128xf32> to vector<4x4x128xf32>
    %366 = arith.addf %362, %365 : vector<4x4x128xf32>
    %cst_245 = arith.constant -6.000000e+01 : f32
    %367 = vector.broadcast %cst_245 : f32 to vector<4x4x128xf32>
    %368 = arith.maximumf %366, %367 : vector<4x4x128xf32>
    %cst_246 = arith.constant 0.000000e+00 : f32
    %369 = vector.broadcast %cst_246 : f32 to vector<4x4x128xf32>
    %370 = arith.subf %369, %368 : vector<4x4x128xf32>
    %371 = math.exp %370 : vector<4x4x128xf32>
    %cst_247 = arith.constant 1.000000e+00 : f32
    %372 = vector.broadcast %cst_247 : f32 to vector<4x4x128xf32>
    %373 = arith.addf %372, %371 : vector<4x4x128xf32>
    %374 = tpu.reciprocal %373 {approx = true} : vector<4x4x128xf32> -> vector<4x4x128xf32>
    %375 = arith.mulf %366, %374 : vector<4x4x128xf32>
    %376 = vector.extract_strided_slice %375 {offsets = [0, 0, 0], sizes = [1, 4, 128], strides = [1, 1, 1]} : vector<4x4x128xf32> to vector<1x4x128xf32>
    %377 = vector.shape_cast %376 : vector<1x4x128xf32> to vector<4x128xf32>
    %c0_248 = arith.constant 0 : index
    %c0_249 = arith.constant 0 : index
    %378 = vector.load %arg20[%c0_248, %c0_249] : memref<16x128xf32, #tpu.memory_space<vmem>>, vector<4x128xf32>
    tpu.vector_store %arg20[%c0_248, %c0_249], %377 {strides = array<i32>} : memref<16x128xf32, #tpu.memory_space<vmem>>, vector<4x128xf32>,
    %379 = vector.extract_strided_slice %375 {offsets = [1, 0, 0], sizes = [1, 4, 128], strides = [1, 1, 1]} : vector<4x4x128xf32> to vector<1x4x128xf32>
    %380 = vector.shape_cast %379 : vector<1x4x128xf32> to vector<4x128xf32>
    %c4_250 = arith.constant 4 : index
    %c0_251 = arith.constant 0 : index
    %381 = vector.load %arg20[%c4_250, %c0_251] : memref<16x128xf32, #tpu.memory_space<vmem>>, vector<4x128xf32>
    tpu.vector_store %arg20[%c4_250, %c0_251], %380 {strides = array<i32>} : memref<16x128xf32, #tpu.memory_space<vmem>>, vector<4x128xf32>,
    %382 = vector.extract_strided_slice %375 {offsets = [2, 0, 0], sizes = [1, 4, 128], strides = [1, 1, 1]} : vector<4x4x128xf32> to vector<1x4x128xf32>
    %383 = vector.shape_cast %382 : vector<1x4x128xf32> to vector<4x128xf32>
    %c8_252 = arith.constant 8 : index
    %c0_253 = arith.constant 0 : index
    %384 = vector.load %arg20[%c8_252, %c0_253] : memref<16x128xf32, #tpu.memory_space<vmem>>, vector<4x128xf32>
    tpu.vector_store %arg20[%c8_252, %c0_253], %383 {strides = array<i32>} : memref<16x128xf32, #tpu.memory_space<vmem>>, vector<4x128xf32>,
    %385 = vector.extract_strided_slice %375 {offsets = [3, 0, 0], sizes = [1, 4, 128], strides = [1, 1, 1]} : vector<4x4x128xf32> to vector<1x4x128xf32>
    %386 = vector.shape_cast %385 : vector<1x4x128xf32> to vector<4x128xf32>
    %c12_254 = arith.constant 12 : index
    %c0_255 = arith.constant 0 : index
    %387 = vector.load %arg20[%c12_254, %c0_255] : memref<16x128xf32, #tpu.memory_space<vmem>>, vector<4x128xf32>
    tpu.vector_store %arg20[%c12_254, %c0_255], %386 {strides = array<i32>} : memref<16x128xf32, #tpu.memory_space<vmem>>, vector<4x128xf32>,
    %c0_256 = arith.constant 0 : index
    %c0_257 = arith.constant 0 : index
    %388 = vector.load %arg20[%c0_256, %c0_257] : memref<16x128xf32, #tpu.memory_space<vmem>>, vector<16x128xf32>
    %cst_258 = arith.constant dense<0.000000e+00> : vector<128xf32>
    %389 = vector.multi_reduction <add>, %388, %cst_258 [0] : vector<16x128xf32> to vector<128xf32>
    %390 = vector.shape_cast %389 : vector<128xf32> to vector<1x128xf32>
    %cst_259 = arith.constant 6.250000e-02 : f32
    %391 = vector.broadcast %cst_259 : f32 to vector<1x128xf32>
    %392 = arith.mulf %390, %391 : vector<1x128xf32>
    %393 = arith.truncf %392 : vector<1x128xf32> to vector<1x128xbf16>
    %c0_260 = arith.constant 0 : index
    %c0_261 = arith.constant 0 : index
    %394 = vector.load %arg11[%c0_260, %c0_261] : memref<128x128xbf16, #tpu.memory_space<vmem>>, vector<128x128xbf16>
    %cst_262 = arith.constant dense<0.000000e+00> : vector<1x128xf32>
    %395 = tpu.matmul %393, %394, %cst_262 {dimension_numbers = #tpu.dot_dimension_numbers<[1], [0], [0], [1], [0, 0, 1, 1], [], []>} : vector<1x128xbf16>, vector<128x128xbf16>, vector<1x128xf32> -> vector<1x128xf32>
    %c0_263 = arith.constant 0 : index
    %c0_264 = arith.constant 0 : index
    %396 = vector.load %arg12[%c0_263, %c0_264] : memref<1x128xf32, #tpu.memory_space<vmem>>, vector<1x128xf32>
    %397 = arith.addf %395, %396 : vector<1x128xf32>
    %cst_265 = arith.constant -6.000000e+01 : f32
    %398 = vector.broadcast %cst_265 : f32 to vector<1x128xf32>
    %399 = arith.maximumf %397, %398 : vector<1x128xf32>
    %cst_266 = arith.constant 0.000000e+00 : f32
    %400 = vector.broadcast %cst_266 : f32 to vector<1x128xf32>
    %401 = arith.subf %400, %399 : vector<1x128xf32>
    %402 = math.exp %401 : vector<1x128xf32>
    %cst_267 = arith.constant 1.000000e+00 : f32
    %403 = vector.broadcast %cst_267 : f32 to vector<1x128xf32>
    %404 = arith.addf %403, %402 : vector<1x128xf32>
    %405 = tpu.reciprocal %404 {approx = true} : vector<1x128xf32> -> vector<1x128xf32>
    %406 = arith.mulf %397, %405 : vector<1x128xf32>
    %407 = arith.truncf %406 : vector<1x128xf32> to vector<1x128xbf16>
    %c0_268 = arith.constant 0 : index
    %c0_269 = arith.constant 0 : index
    %408 = vector.load %arg13[%c0_268, %c0_269] : memref<128x128xbf16, #tpu.memory_space<vmem>>, vector<128x128xbf16>
    %cst_270 = arith.constant dense<0.000000e+00> : vector<1x128xf32>
    %409 = tpu.matmul %407, %408, %cst_270 {dimension_numbers = #tpu.dot_dimension_numbers<[1], [0], [0], [1], [0, 0, 1, 1], [], []>} : vector<1x128xbf16>, vector<128x128xbf16>, vector<1x128xf32> -> vector<1x128xf32>
    %c0_271 = arith.constant 0 : index
    %c0_272 = arith.constant 0 : index
    %410 = vector.load %arg14[%c0_271, %c0_272] : memref<1x128xf32, #tpu.memory_space<vmem>>, vector<1x128xf32>
    %411 = arith.addf %409, %410 : vector<1x128xf32>
    %cst_273 = arith.constant -6.000000e+01 : f32
    %412 = vector.broadcast %cst_273 : f32 to vector<1x128xf32>
    %413 = arith.maximumf %411, %412 : vector<1x128xf32>
    %cst_274 = arith.constant 0.000000e+00 : f32
    %414 = vector.broadcast %cst_274 : f32 to vector<1x128xf32>
    %415 = arith.subf %414, %413 : vector<1x128xf32>
    %416 = math.exp %415 : vector<1x128xf32>
    %cst_275 = arith.constant 1.000000e+00 : f32
    %417 = vector.broadcast %cst_275 : f32 to vector<1x128xf32>
    %418 = arith.addf %417, %416 : vector<1x128xf32>
    %419 = tpu.reciprocal %418 {approx = true} : vector<1x128xf32> -> vector<1x128xf32>
    %420 = vector.broadcast %419 : vector<1x128xf32> to vector<16x128xf32>
    %421 = arith.mulf %388, %420 : vector<16x128xf32>
    %422 = arith.truncf %421 : vector<16x128xf32> to vector<16x128xbf16>
    %c0_276 = arith.constant 0 : index
    %c0_277 = arith.constant 0 : index
    %423 = vector.load %arg15[%c0_276, %c0_277] : memref<128x128xbf16, #tpu.memory_space<vmem>>, vector<128x128xbf16>
    %cst_278 = arith.constant dense<0.000000e+00> : vector<16x128xf32>
    %424 = tpu.matmul %422, %423, %cst_278 {dimension_numbers = #tpu.dot_dimension_numbers<[1], [0], [0], [1], [0, 0, 1, 1], [], []>} : vector<16x128xbf16>, vector<128x128xbf16>, vector<16x128xf32> -> vector<16x128xf32>
    %c0_279 = arith.constant 0 : index
    %c0_280 = arith.constant 0 : index
    %425 = vector.load %arg16[%c0_279, %c0_280] : memref<1x128xf32, #tpu.memory_space<vmem>>, vector<1x128xf32>
    %426 = vector.broadcast %425 : vector<1x128xf32> to vector<16x128xf32>
    %427 = arith.mulf %424, %426 : vector<16x128xf32>
    %c0_281 = arith.constant 0 : index
    %c0_282 = arith.constant 0 : index
    %428 = vector.load %arg17[%c0_281, %c0_282] : memref<1x128xf32, #tpu.memory_space<vmem>>, vector<1x128xf32>
    %429 = vector.broadcast %428 : vector<1x128xf32> to vector<16x128xf32>
    %430 = arith.addf %427, %429 : vector<16x128xf32>
    %431 = arith.truncf %430 : vector<16x128xf32> to vector<16x128xbf16>
    %c0_283 = arith.constant 0 : index
    %c0_284 = arith.constant 0 : index
    %c0_285 = arith.constant 0 : index
    %432 = vector.load %arg18[%c0_283, %c0_284, %c0_285] : memref<1x16x128xbf16, #tpu.memory_space<vmem>>, vector<1x16x128xbf16>
    %433 = vector.shape_cast %432 : vector<1x16x128xbf16> to vector<16x128xbf16>
    %434 = vector.shape_cast %431 : vector<16x128xbf16> to vector<1x16x128xbf16>
    tpu.vector_store %arg18[%c0_283, %c0_284, %c0_285], %434 {strides = array<i32>} : memref<1x16x128xbf16, #tpu.memory_space<vmem>>, vector<1x16x128xbf16>,
    return
  }
  func.func @transform_0(%arg0: i32) -> (i32, i32, i32) {
    %c0_i32 = arith.constant 0 : i32
    %c0_i32_0 = arith.constant 0 : i32
    %c0_i32_1 = arith.constant 0 : i32
    return %arg0, %c0_i32, %c0_i32_0 : i32, i32, i32
  }
  func.func @transform_1(%arg0: i32) -> (i32, i32, i32) {
    %c0_i32 = arith.constant 0 : i32
    %c0_i32_0 = arith.constant 0 : i32
    %c0_i32_1 = arith.constant 0 : i32
    return %arg0, %c0_i32, %c0_i32_0 : i32, i32, i32
  }
  func.func @transform_2(%arg0: i32) -> (i32, i32, i32) {
    %c0_i32 = arith.constant 0 : i32
    %c0_i32_0 = arith.constant 0 : i32
    %c0_i32_1 = arith.constant 0 : i32
    return %arg0, %c0_i32, %c0_i32_0 : i32, i32, i32
  }
  func.func @transform_3(%arg0: i32) -> (i32, i32, i32) {
    %c0_i32 = arith.constant 0 : i32
    %c0_i32_0 = arith.constant 0 : i32
    %c0_i32_1 = arith.constant 0 : i32
    return %arg0, %c0_i32, %c0_i32_0 : i32, i32, i32
  }
  func.func @transform_4(%arg0: i32) -> (i32, i32) {
    %c0_i32 = arith.constant 0 : i32
    %c0_i32_0 = arith.constant 0 : i32
    %c0_i32_1 = arith.constant 0 : i32
    return %c0_i32, %c0_i32_0 : i32, i32
  }
  func.func @transform_5(%arg0: i32) -> (i32, i32) {
    %c0_i32 = arith.constant 0 : i32
    %c0_i32_0 = arith.constant 0 : i32
    %c0_i32_1 = arith.constant 0 : i32
    return %c0_i32, %c0_i32_0 : i32, i32
  }
  func.func @transform_6(%arg0: i32) -> (i32, i32) {
    %c0_i32 = arith.constant 0 : i32
    %c0_i32_0 = arith.constant 0 : i32
    %c0_i32_1 = arith.constant 0 : i32
    return %c0_i32, %c0_i32_0 : i32, i32
  }
  func.func @transform_7(%arg0: i32) -> (i32, i32) {
    %c0_i32 = arith.constant 0 : i32
    %c0_i32_0 = arith.constant 0 : i32
    %c0_i32_1 = arith.constant 0 : i32
    return %c0_i32, %c0_i32_0 : i32, i32
  }
  func.func @transform_8(%arg0: i32) -> (i32, i32) {
    %c0_i32 = arith.constant 0 : i32
    %c0_i32_0 = arith.constant 0 : i32
    %c0_i32_1 = arith.constant 0 : i32
    return %c0_i32, %c0_i32_0 : i32, i32
  }
  func.func @transform_9(%arg0: i32) -> (i32, i32) {
    %c0_i32 = arith.constant 0 : i32
    %c0_i32_0 = arith.constant 0 : i32
    %c0_i32_1 = arith.constant 0 : i32
    return %c0_i32, %c0_i32_0 : i32, i32
  }
  func.func @transform_10(%arg0: i32) -> (i32, i32) {
    %c0_i32 = arith.constant 0 : i32
    %c0_i32_0 = arith.constant 0 : i32
    %c0_i32_1 = arith.constant 0 : i32
    return %c0_i32, %c0_i32_0 : i32, i32
  }
  func.func @transform_11(%arg0: i32) -> (i32, i32) {
    %c0_i32 = arith.constant 0 : i32
    %c0_i32_0 = arith.constant 0 : i32
    %c0_i32_1 = arith.constant 0 : i32
    return %c0_i32, %c0_i32_0 : i32, i32
  }
  func.func @transform_12(%arg0: i32) -> (i32, i32) {
    %c0_i32 = arith.constant 0 : i32
    %c0_i32_0 = arith.constant 0 : i32
    %c0_i32_1 = arith.constant 0 : i32
    return %c0_i32, %c0_i32_0 : i32, i32
  }
  func.func @transform_13(%arg0: i32) -> (i32, i32) {
    %c0_i32 = arith.constant 0 : i32
    %c0_i32_0 = arith.constant 0 : i32
    %c0_i32_1 = arith.constant 0 : i32
    return %c0_i32, %c0_i32_0 : i32, i32
  }
  func.func @transform_14(%arg0: i32) -> (i32, i32) {
    %c0_i32 = arith.constant 0 : i32
    %c0_i32_0 = arith.constant 0 : i32
    %c0_i32_1 = arith.constant 0 : i32
    return %c0_i32, %c0_i32_0 : i32, i32
  }
  func.func @transform_15(%arg0: i32) -> (i32, i32) {
    %c0_i32 = arith.constant 0 : i32
    %c0_i32_0 = arith.constant 0 : i32
    %c0_i32_1 = arith.constant 0 : i32
    return %c0_i32, %c0_i32_0 : i32, i32
  }
  func.func @transform_16(%arg0: i32) -> (i32, i32) {
    %c0_i32 = arith.constant 0 : i32
    %c0_i32_0 = arith.constant 0 : i32
    %c0_i32_1 = arith.constant 0 : i32
    return %c0_i32, %c0_i32_0 : i32, i32
  }
  func.func @transform_17(%arg0: i32) -> (i32, i32, i32) {
    %c0_i32 = arith.constant 0 : i32
    %c0_i32_0 = arith.constant 0 : i32
    %c0_i32_1 = arith.constant 0 : i32
    return %arg0, %c0_i32, %c0_i32_0 : i32, i32, i32
  }
}

</mosaic_0001>

<bundles_post_ra>
// kernel: encoder_forward.5
= control target key start
LH: loop header
LB: loop body
LE: loop exit
PB: predicated region body
PF: predicated region fallthrough
CT: control target
= control target key end

     0   :  { %vm258_vm0 = vcmask 261120   ;;  %s3035_s1 = inlined_call_operand.vmem [shape: bf16[32,128], index: 1, kind: input, shape index: {}]   ;;  %s3036_s0 = inlined_call_operand.vmem [shape: bf16[512,32], index: 0, kind: input, shape index: {}]   ;;  %s3037_s2 = inlined_call_operand.vmem [shape: f32[1,128], index: 2, kind: input, shape index: {}]   ;;  %s3038_s3 = inlined_call_operand.vmem [shape: f32[1,128], index: 3, kind: input, shape index: {}]   ;;  %s3039_s4 = inlined_call_operand.vmem [shape: bf16[512,128], index: 4, kind: output, shape index: {}]  }
   0x1   :  { %v2051_v0 = vld [vmem:[%s3035_s1 + $0x8] sm:$0xff]   ;;  %v2052_v1 = vld [vmem:[%s3035_s1] sm:$0xff]   ;;  %v2057_v6 = vld [vmem:[%s3036_s0 + $0x10] sm:$0xff]  }
   0x2   :  { %1979 = vmatprep.subr.bf16.mxu0 %v2051_v0  ;;  %2047 = vmatprep.subr.bf16.mxu1 %v2051_v0  ;;  %v2053_v2 = vld [vmem:[%s3036_s0] sm:$0xff]   ;;  %v2055_v4 = vld [vmem:[%s3036_s0 + $0x8] sm:$0xff]   ;;  %v2058_v7 = vld [vmem:[%s3036_s0 + $0x90] sm:$0xff]  }
   0x3   :  { %1980 = vmatpush3.bf16.msra.mxu0 %v2051_v0  ;;  %2049 = vmatpush3.bf16.msra.mxu1 %v2051_v0  ;;  %v2054_v3 = vld [vmem:[%s3036_s0 + $0x80] sm:$0xff]   ;;  %v2056_v5 = vld [vmem:[%s3036_s0 + $0x88] sm:$0xff]   ;;  %v2059_v8 = vld [vmem:[%s3036_s0 + $0x18] sm:$0xff]  }
   0x4   :  { %1981 = vmatprep.subr.bf16.mxu0 %v2052_v1  ;;  %2048 = vmatprep.subr.bf16.mxu1 %v2052_v1  ;;  %v2060_v9 = vld [vmem:[%s3036_s0 + $0x98] sm:$0xff]   ;;  %v2061_v10 = vld [vmem:[%s3036_s0 + $0x20] sm:$0xff]   ;;  %v2063_v12 = vld [vmem:[%s3036_s0 + $0x28] sm:$0xff]  }
   0x5   :  { %1983 = vmatprep.mubr.msk.bf16.mxu0 %vm258_vm0, %v2053_v2  ;;  %2015 = vmatprep.mubr.msk.bf16.mxu1 %vm258_vm0, %v2054_v3  ;;  %v2062_v11 = vld [vmem:[%s3036_s0 + $0xa0] sm:$0xff]   ;;  %v2064_v13 = vld [vmem:[%s3036_s0 + $0xa8] sm:$0xff]   ;;  %v2065_v14 = vld [vmem:[%s3036_s0 + $0x30] sm:$0xff]  }
   0x6   :  { %v2066_v15 = vld [vmem:[%s3036_s0 + $0xb0] sm:$0xff]   ;;  %v2067_v16 = vld [vmem:[%s3036_s0 + $0x38] sm:$0xff]   ;;  %v2069_v18 = vld [vmem:[%s3036_s0 + $0x40] sm:$0xff]  }
   0x7   :  { %1982 = vmatpush3.bf16.msra.mxu0 %v2052_v1  ;;  %2050 = vmatpush3.bf16.msra.mxu1 %v2052_v1  ;;  %v2068_v17 = vld [vmem:[%s3036_s0 + $0xb8] sm:$0xff]   ;;  %v2070_v19 = vld [vmem:[%s3036_s0 + $0xc0] sm:$0xff]   ;;  %v2071_v20 = vld [vmem:[%s3036_s0 + $0x48] sm:$0xff]  }
   0x8   :  { %v2072_v21 = vld [vmem:[%s3036_s0 + $0xc8] sm:$0xff]   ;;  %v2073_v22 = vld [vmem:[%s3036_s0 + $0x50] sm:$0xff]   ;;  %v2075_v24 = vld [vmem:[%s3036_s0 + $0x58] sm:$0xff]  }
   0x9   :  { %v2074_v23 = vld [vmem:[%s3036_s0 + $0xd0] sm:$0xff]   ;;  %v2076_v25 = vld [vmem:[%s3036_s0 + $0xd8] sm:$0xff]   ;;  %v2077_v26 = vld [vmem:[%s3036_s0 + $0x60] sm:$0xff]  }
   0xa   :  { %1984 = vmatmul.mubr.msk.bf16.vlgmr.msra.gmra.mxu0 %vm258_vm0, %v2055_v4  ;;  %2016 = vmatmul.mubr.msk.bf16.vlgmr.msra.gmra.mxu1 %vm258_vm0, %v2056_v5  ;;  %v2078_v27 = vld [vmem:[%s3036_s0 + $0xe0] sm:$0xff]   ;;  %v2079_v28 = vld [vmem:[%s3036_s0 + $0x68] sm:$0xff]   ;;  %v2081_v30 = vld [vmem:[%s3036_s0 + $0x70] sm:$0xff]  }
   0xb   :  { %1987 = vmatprep.mubr.msk.bf16.mxu0 %vm258_vm0, %v2057_v6  ;;  %2019 = vmatprep.mubr.msk.bf16.mxu1 %vm258_vm0, %v2058_v7  ;;  %v2080_v29 = vld [vmem:[%s3036_s0 + $0xe8] sm:$0xff]   ;;  %v2082_v31 = vld [vmem:[%s3036_s0 + $0xf0] sm:$0xff]   ;;  %v2083_v32 = vld [vmem:[%s3036_s0 + $0x78] sm:$0xff]  }
   0xc   :  { %v2084_v33 = vld [vmem:[%s3036_s0 + $0xf8] sm:$0xff]   ;;  %v2505_v34 = vld [vmem:[%s3037_s2] ss:$0 sm:$0xff] }
   0xd   :  { %v2510_v36 = vld [vmem:[%s3038_s3] ss:$0 sm:$0xff] }
  0x12   :  { %1988 = vmatmul.mubr.msk.bf16.gmra.mxu0 %vm258_vm0, %v2059_v8  ;;  %2020 = vmatmul.mubr.msk.bf16.gmra.mxu1 %vm258_vm0, %v2060_v9 }
  0x13   :  { %1991 = vmatprep.mubr.msk.bf16.mxu0 %vm258_vm0, %v2061_v10  ;;  %2023 = vmatprep.mubr.msk.bf16.mxu1 %vm258_vm0, %v2062_v11 }
  0x1a   :  { %1992 = vmatmul.mubr.msk.bf16.gmra.mxu0 %vm258_vm0, %v2063_v12  ;;  %2024 = vmatmul.mubr.msk.bf16.gmra.mxu1 %vm258_vm0, %v2064_v13 }
  0x1b   :  { %1995 = vmatprep.mubr.msk.bf16.mxu0 %vm258_vm0, %v2065_v14  ;;  %2027 = vmatprep.mubr.msk.bf16.mxu1 %vm258_vm0, %v2066_v15 }
  0x22   :  { %1996 = vmatmul.mubr.msk.bf16.gmra.mxu0 %vm258_vm0, %v2067_v16  ;;  %2028 = vmatmul.mubr.msk.bf16.gmra.mxu1 %vm258_vm0, %v2068_v17 }
  0x23   :  { %1999 = vmatprep.mubr.msk.bf16.mxu0 %vm258_vm0, %v2069_v18  ;;  %2031 = vmatprep.mubr.msk.bf16.mxu1 %vm258_vm0, %v2070_v19 }
  0x2a   :  { %2000 = vmatmul.mubr.msk.bf16.gmra.mxu0 %vm258_vm0, %v2071_v20  ;;  %2032 = vmatmul.mubr.msk.bf16.gmra.mxu1 %vm258_vm0, %v2072_v21 }
  0x2b   :  { %2003 = vmatprep.mubr.msk.bf16.mxu0 %vm258_vm0, %v2073_v22  ;;  %2035 = vmatprep.mubr.msk.bf16.mxu1 %vm258_vm0, %v2074_v23 }
  0x32   :  { %2004 = vmatmul.mubr.msk.bf16.gmra.mxu0 %vm258_vm0, %v2075_v24  ;;  %2036 = vmatmul.mubr.msk.bf16.gmra.mxu1 %vm258_vm0, %v2076_v25 }
  0x33   :  { %2007 = vmatprep.mubr.msk.bf16.mxu0 %vm258_vm0, %v2077_v26  ;;  %2039 = vmatprep.mubr.msk.bf16.mxu1 %vm258_vm0, %v2078_v27 }
  0x3a   :  { %2008 = vmatmul.mubr.msk.bf16.gmra.mxu0 %vm258_vm0, %v2079_v28  ;;  %2040 = vmatmul.mubr.msk.bf16.gmra.mxu1 %vm258_vm0, %v2080_v29 }
  0x3b   :  { %2011 = vmatprep.mubr.msk.bf16.mxu0 %vm258_vm0, %v2081_v30  ;;  %2043 = vmatprep.mubr.msk.bf16.mxu1 %vm258_vm0, %v2082_v31 }
  0x42   :  { %2012 = vmatmul.mubr.msk.bf16.gmra.mxu0 %vm258_vm0, %v2083_v32  ;;  %2044 = vmatmul.mubr.msk.bf16.gmra.mxu1 %vm258_vm0, %v2084_v33 }
  0xca   :  { %v1985_v35 = vpop.f32.mrf.mxu0  ;;  %v2017_v37 = vpop.f32.mrf.mxu1 }
  0xcb   :  { %v653_v38 = vmul.f32 %v1985_v35, %v2505_v34  ;;  %v685_v39 = vmul.f32 %v2017_v37, %v2505_v34 }
  0xcc   :  { %v389_v40 = vpop.f32.mrf.mxu0  ;;  %v517_v41 = vpop.f32.mrf.mxu1 }
  0xcd   :  { %v2515_v42 = vadd.f32 %v2510_v36, %v653_v38  ;;  %v2518_v43 = vadd.f32 %v2510_v36, %v685_v39  ;;  %v651_v44 = vmul.f32 %v2505_v34, %v389_v40  ;;  %v683_v45 = vmul.f32 %v2505_v34, %v517_v41 }
  0xce   :  { %v1986_v46 = vpop.f32.mrf.mxu0  ;;  %v2018_v47 = vpop.f32.mrf.mxu1 }
  0xcf   :  { %v788_v48 = vmax.f32 %v2515_v42, -60.0  ;;  %v820_v49 = vmax.f32 %v2518_v43, -60.0  ;;  %v2525_v50 = vadd.f32 %v2510_v36, %v651_v44  ;;  %v2528_v51 = vadd.f32 %v2510_v36, %v683_v45 }
  0xd0   :  { %v654_v52 = vmul.f32 %v1986_v46, %v2505_v34  ;;  %v686_v53 = vmul.f32 %v2018_v47, %v2505_v34  ;;  %v392_v54 = vpop.f32.mrf.mxu0  ;;  %v520_v55 = vpop.f32.mrf.mxu1 }
  0xd1   :  { %v852_v56 = vsub.f32 0.0, %v788_v48  ;;  %v884_v57 = vsub.f32 0.0, %v820_v49  ;;  %v786_v58 = vmax.f32 %v2525_v50, -60.0  ;;  %v818_v59 = vmax.f32 %v2528_v51, -60.0 }
  0xd2   :  { %v2535_v60 = vadd.f32 %v2510_v36, %v654_v52  ;;  %v2538_v61 = vadd.f32 %v2510_v36, %v686_v53  ;;  %v652_v62 = vmul.f32 %v2505_v34, %v392_v54  ;;  %v684_v63 = vmul.f32 %v2505_v34, %v520_v55  ;;  %v1989_v0 = vpop.f32.mrf.mxu0  ;;  %v2021_v1 = vpop.f32.mrf.mxu1 }
  0xd3   :  { %v918_v2 = vmul.f32 1.442695, %v852_v56  ;;  %v982_v3 = vmul.f32 1.442695, %v884_v57  ;;  %v850_v4 = vsub.f32 0.0, %v786_v58  ;;  %v882_v5 = vsub.f32 0.0, %v818_v59 }
  0xd4   :  { %v789_v6 = vmax.f32 %v2535_v60, -60.0  ;;  %v821_v7 = vmax.f32 %v2538_v61, -60.0  ;;  %v2545_v8 = vadd.f32 %v2510_v36, %v652_v62  ;;  %v2548_v9 = vadd.f32 %v2510_v36, %v684_v63  ;;  %v405_v10 = vpop.f32.mrf.mxu0  ;;  %v533_v11 = vpop.f32.mrf.mxu1 }
  0xd5   :  { %2085 = vpow2.f32 %v918_v2  ;;  %v914_v12 = vmul.f32 1.442695, %v850_v4  ;;  %v978_v13 = vmul.f32 1.442695, %v882_v5  ;;  %v657_v14 = vmul.f32 %v1989_v0, %v2505_v34 }
  0xd6   :  { %2087 = vpow2.f32 %v982_v3  ;;  %v853_v15 = vsub.f32 0.0, %v789_v6  ;;  %v885_v16 = vsub.f32 0.0, %v821_v7  ;;  %v787_v17 = vmax.f32 %v2545_v8, -60.0  ;;  %v1990_v18 = vpop.f32.mrf.mxu0  ;;  %v2022_v22 = vpop.f32.mrf.mxu1 }
  0xd7   :  { %2089 = vpow2.f32 %v914_v12  ;;  %v819_v19 = vmax.f32 %v2548_v9, -60.0  ;;  %v2554_v20 = vadd.f32 %v2510_v36, %v657_v14  ;;  %v689_v21 = vmul.f32 %v2021_v1, %v2505_v34 }
  0xd8   :  { %2091 = vpow2.f32 %v978_v13  ;;  %v920_v23 = vmul.f32 1.442695, %v853_v15  ;;  %v984_v24 = vmul.f32 1.442695, %v885_v16  ;;  %v851_v25 = vsub.f32 0.0, %v787_v17  ;;  %v408_v33 = vpop.f32.mrf.mxu0  ;;  %v536_v39 = vpop.f32.mrf.mxu1 }
  0xd9   :  { %v883_v26 = vsub.f32 0.0, %v819_v19  ;;  %v792_v27 = vmax.f32 %v2554_v20, -60.0  ;;  %v2559_v28 = vadd.f32 %v2510_v36, %v689_v21  ;;  %v655_v29 = vmul.f32 %v2505_v34, %v405_v10 }
  0xda   :  { %2093 = vpow2.f32 %v920_v23  ;;  %v916_v30 = vmul.f32 1.442695, %v851_v25  ;;  %v687_v31 = vmul.f32 %v2505_v34, %v533_v11  ;;  %v658_v32 = vmul.f32 %v1990_v18, %v2505_v34  ;;  %v1993_v54 = vpop.f32.mrf.mxu0  ;;  %v2025_v58 = vpop.f32.mrf.mxu1 }
  0xdb   :  { %2095 = vpow2.f32 %v984_v24  ;;  %v980_v35 = vmul.f32 1.442695, %v883_v26  ;;  %v856_v37 = vsub.f32 0.0, %v792_v27  ;;  %v824_v38 = vmax.f32 %v2559_v28, -60.0 }
  0xdc   :  { %2097 = vpow2.f32 %v916_v30  ;;  %v2566_v40 = vadd.f32 %v2510_v36, %v655_v29  ;;  %v2569_v41 = vadd.f32 %v2510_v36, %v687_v31  ;;  %v2572_v44 = vadd.f32 %v2510_v36, %v658_v32  ;;  %v421_v11 = vpop.f32.mrf.mxu0  ;;  %v549_v26 = vpop.f32.mrf.mxu1 }
  0xdd   :  { %2099 = vpow2.f32 %v980_v35  ;;  %v926_v45 = vmul.f32 1.442695, %v856_v37  ;;  %v888_v46 = vsub.f32 0.0, %v824_v38  ;;  %v690_v47 = vmul.f32 %v2022_v22, %v2505_v34 }
  0xde   :  { %v790_v48 = vmax.f32 %v2566_v40, -60.0  ;;  %v822_v49 = vmax.f32 %v2569_v41, -60.0  ;;  %v793_v52 = vmax.f32 %v2572_v44, -60.0  ;;  %v656_v53 = vmul.f32 %v2505_v34, %v408_v33  ;;  %v1994_v31 = vpop.f32.mrf.mxu0 }
  0xdf   :  { %2101 = vpow2.f32 %v926_v45  ;;  %v990_v55 = vmul.f32 1.442695, %v888_v46  ;;  %v2580_v56 = vadd.f32 %v2510_v36, %v690_v47  ;;  %v688_v57 = vmul.f32 %v2505_v34, %v536_v39 }
  0xe0   :  { %v854_v59 = vsub.f32 0.0, %v790_v48  ;;  %v886_v62 = vsub.f32 0.0, %v822_v49  ;;  %v857_v63 = vsub.f32 0.0, %v793_v52  ;;  %v2584_v0 = vadd.f32 %v2510_v36, %v656_v53  ;;  %v2026_v53 = vpop.f32.mrf.mxu1 }
  0xe1   :  { %2103 = vpow2.f32 %v990_v55  ;;  %v825_v1 = vmax.f32 %v2580_v56, -60.0  ;;  %v2588_v2 = vadd.f32 %v2510_v36, %v688_v57  ;;  %v661_v3 = vmul.f32 %v1993_v54, %v2505_v34 }
  0xe2   :  { %v2086_v4 = vpop.eup %2085  ;;  %v922_v5 = vmul.f32 1.442695, %v854_v59  ;;  %v986_v6 = vmul.f32 1.442695, %v886_v62  ;;  %v928_v7 = vmul.f32 1.442695, %v857_v63  ;;  %v693_v10 = vmul.f32 %v2025_v58, %v2505_v34  ;;  %v424_v59 = vpop.f32.mrf.mxu0 }
  0xe3   :  { %v2088_v12 = vpop.eup %2087  ;;  %v1044_v13 = vadd.f32 1.0, %v2086_v4  ;;  %v889_v14 = vsub.f32 0.0, %v825_v1  ;;  %v791_v15 = vmax.f32 %v2584_v0, -60.0  ;;  %v823_v16 = vmax.f32 %v2588_v2, -60.0 }
  0xe4   :  { %v2090_v17 = vpop.eup %2089  ;;  %v1076_v18 = vadd.f32 1.0, %v2088_v12  ;;  %2105 = vpow2.f32 %v922_v5  ;;  %v2595_v19 = vadd.f32 %v2510_v36, %v661_v3  ;;  %v2598_v21 = vadd.f32 %v2510_v36, %v693_v10 }
  0xe5   :  { %v2092_v22 = vpop.eup %2091  ;;  %2107 = vrcp.f32 %v1044_v13  ;;  %v1042_v23 = vadd.f32 1.0, %v2090_v17  ;;  %v992_v24 = vmul.f32 1.442695, %v889_v14  ;;  %v855_v25 = vsub.f32 0.0, %v791_v15  ;;  %v552_v17 = vpop.f32.mrf.mxu1 }
  0xe6   :  { %2109 = vrcp.f32 %v1076_v18  ;;  %v1074_v27 = vadd.f32 1.0, %v2092_v22  ;;  %v887_v29 = vsub.f32 0.0, %v823_v16  ;;  %v796_v30 = vmax.f32 %v2595_v19, -60.0  ;;  %v1997_v18 = vpop.f32.mrf.mxu0 }
  0xe7   :  { %v2094_v32 = vpop.eup %2093  ;;  %2111 = vrcp.f32 %v1042_v23  ;;  %v924_v33 = vmul.f32 1.442695, %v855_v25  ;;  %v828_v35 = vmax.f32 %v2598_v21, -60.0  ;;  %v659_v37 = vmul.f32 %v2505_v34, %v421_v11 }
  0xe8   :  { %v2096_v38 = vpop.eup %2095  ;;  %2113 = vrcp.f32 %v1074_v27  ;;  %v1045_v39 = vadd.f32 1.0, %v2094_v32  ;;  %v988_v45 = vmul.f32 1.442695, %v887_v29  ;;  %v860_v46 = vsub.f32 0.0, %v796_v30 }
  0xe9   :  { %v2098_v47 = vpop.eup %2097  ;;  %v1077_v48 = vadd.f32 1.0, %v2096_v38  ;;  %2115 = vpow2.f32 %v986_v6  ;;  %v892_v49 = vsub.f32 0.0, %v828_v35  ;;  %v2604_v52 = vadd.f32 %v2510_v36, %v659_v37 }
  0xea   :  { %v2100_v54 = vpop.eup %2099  ;;  %2117 = vrcp.f32 %v1045_v39  ;;  %v1043_v55 = vadd.f32 1.0, %v2098_v47  ;;  %v934_v57 = vmul.f32 1.442695, %v860_v46  ;;  %v691_v58 = vmul.f32 %v2505_v34, %v549_v26 }
  0xeb   :  { %2119 = vrcp.f32 %v1077_v48  ;;  %v1075_v62 = vadd.f32 1.0, %v2100_v54  ;;  %v998_v63 = vmul.f32 1.442695, %v892_v49  ;;  %v794_v1 = vmax.f32 %v2604_v52, -60.0 }
  0xec   :  { %v2102_v3 = vpop.eup %2101  ;;  %2121 = vrcp.f32 %v1043_v55  ;;  %v2609_v4 = vadd.f32 %v2510_v36, %v691_v58  ;;  %v662_v5 = vmul.f32 %v1994_v31, %v2505_v34  ;;  %v694_v6 = vmul.f32 %v2026_v53, %v2505_v34  ;;  %v2029_v58 = vpop.f32.mrf.mxu1 }
  0xed   :  { %2123 = vrcp.f32 %v1075_v62  ;;  %v1048_v10 = vadd.f32 1.0, %v2102_v3  ;;  %v858_v11 = vsub.f32 0.0, %v794_v1  ;;  %v660_v12 = vmul.f32 %v2505_v34, %v424_v59  ;;  %v437_v59 = vpop.f32.mrf.mxu0 }
  0xee   :  { %v2104_v13 = vpop.eup %2103  ;;  %2125 = vpow2.f32 %v928_v7  ;;  %v826_v14 = vmax.f32 %v2609_v4, -60.0  ;;  %v2616_v15 = vadd.f32 %v2510_v36, %v662_v5  ;;  %v2619_v16 = vadd.f32 %v2510_v36, %v694_v6 }
  0xef   :  { %2127 = vrcp.f32 %v1048_v10  ;;  %v1080_v22 = vadd.f32 1.0, %v2104_v13  ;;  %v930_v23 = vmul.f32 1.442695, %v858_v11  ;;  %v2622_v25 = vadd.f32 %v2510_v36, %v660_v12 }
  0xf0   :  { %2129 = vpow2.f32 %v992_v24  ;;  %v890_v26 = vsub.f32 0.0, %v826_v14  ;;  %v797_v7 = vmax.f32 %v2616_v15, -60.0  ;;  %v829_v27 = vmax.f32 %v2619_v16, -60.0 }
  0xf1   :  { %v2106_v29 = vpop.eup %2105  ;;  %2131 = vrcp.f32 %v1080_v22  ;;  %v795_v30 = vmax.f32 %v2622_v25, -60.0  ;;  %v692_v31 = vmul.f32 %v2505_v34, %v552_v17  ;;  %v665_v32 = vmul.f32 %v1997_v18, %v2505_v34 }
  0xf2   :  { %v2108_v35 = vpop.eup %2107  ;;  %v1046_v37 = vadd.f32 1.0, %v2106_v29  ;;  %2133 = vpow2.f32 %v924_v33  ;;  %v994_v38 = vmul.f32 1.442695, %v890_v26  ;;  %v861_v39 = vsub.f32 0.0, %v797_v7  ;;  %v565_v7 = vpop.f32.mrf.mxu1 }
  0xf3   :  { %v2110_v46 = vpop.eup %2109  ;;  %v1172_v24 = vmul.f32 %v2108_v35, %v2515_v42  ;;  %2135 = vpow2.f32 %v988_v45  ;;  %v893_v47 = vsub.f32 0.0, %v829_v27  ;;  %v859_v48 = vsub.f32 0.0, %v795_v30 }
  0xf4   :  { %v2112_v49 = vpop.eup %2111  ;;  %v1204_v53 = vmul.f32 %v2110_v46, %v2518_v43  ;;  %2137 = vrcp.f32 %v1046_v37  ;;  %v936_v54 = vmul.f32 1.442695, %v861_v39  ;;  %v2632_v55 = vadd.f32 %v2510_v36, %v692_v31  ;;  %v1998_v31 = vpop.f32.mrf.mxu0 }
  0xf5   :  { %v2114_v62 = vpop.eup %2113  ;;  %v1170_v33 = vmul.f32 %v2112_v49, %v2525_v50  ;;  %2139 = vpow2.f32 %v934_v57  ;;  %v1000_v1 = vmul.f32 1.442695, %v893_v47  ;;  %v932_v3 = vmul.f32 1.442695, %v859_v48 }
  0xf6   :  { %v2116_v42 = vpop.eup %2115  ;;  %v1202_v45 = vmul.f32 %v2114_v62, %v2528_v51  ;;  %2141 = vpow2.f32 %v998_v63  ;;  %v827_v5 = vmax.f32 %v2632_v55, -60.0  ;;  %v2638_v43 = vadd.f32 %v2510_v36, %v665_v32  ;;  %v440_v62 = vpop.f32.mrf.mxu0 }
  0xf7   :  { %v2118_v6 = vpop.eup %2117  ;;  %v1078_v10 = vadd.f32 1.0, %v2116_v42  ;;  %2143 = vpow2.f32 %v930_v23  ;;  %v697_v11 = vmul.f32 %v2029_v58, %v2505_v34  ;;  %v663_v12 = vmul.f32 %v2505_v34, %v437_v59 }
  0xf8   :  { %v2120_v50 = vpop.eup %2119  ;;  %v1173_v57 = vmul.f32 %v2118_v6, %v2535_v60  ;;  %2145 = vpow2.f32 %v994_v38  ;;  %v891_v13 = vsub.f32 0.0, %v827_v5  ;;  %v800_v51 = vmax.f32 %v2638_v43, -60.0 }
  0xf9   :  { %v2122_v63 = vpop.eup %2121  ;;  %v1205_v14 = vmul.f32 %v2120_v50, %v2538_v61  ;;  %2147 = vrcp.f32 %v1078_v10  ;;  %v2646_v17 = vadd.f32 %v2510_v36, %v697_v11  ;;  %v2649_v18 = vadd.f32 %v2510_v36, %v663_v12 }
  0xfa   :  { %v2124_v22 = vpop.eup %2123  ;;  %v1762_v23 = vpack.c.bf16 %v1173_v57, %v1172_v24  ;;  %v1171_v26 = vmul.f32 %v2122_v63, %v2545_v8  ;;  %2149 = vpow2.f32 %v936_v54  ;;  %v996_v60 = vmul.f32 1.442695, %v891_v13 }
  0xfb   :  { %v2126_v27 = vpop.eup %2125  ;;  %v1842_v29 = vpack.c.bf16 %v1205_v14, %v1204_v53  ;;  %v1203_v30 = vmul.f32 %v2124_v22, %v2548_v9  ;;  %2151 = vpow2.f32 %v1000_v1  ;;  %v864_v61 = vsub.f32 0.0, %v800_v51  ;;  %v2030_v53 = vpop.f32.mrf.mxu1 }
  0xfc   :  { %v2128_v32 = vpop.eup %2127  ;;  %1914 = vst [vmem:[%s3039_s4 + $0x8] sm:$0xff] %v1762_v23   ;;  %v1757_v35 = vpack.c.bf16 %v1171_v26, %v1170_v33  ;;  %v1049_v37 = vadd.f32 1.0, %v2126_v27  ;;  %2153 = vpow2.f32 %v932_v3  ;;  %v832_v8 = vmax.f32 %v2646_v17, -60.0 }
  0xfd   :  { %v2130_v38 = vpop.eup %2129  ;;  %1930 = vst [vmem:[%s3039_s4 + $0x88] sm:$0xff] %v1842_v29   ;;  %v1837_v39 = vpack.c.bf16 %v1203_v30, %v1202_v45  ;;  %v2661_v9 = vmul.f32 %v2128_v32, %v2554_v20  ;;  %2155 = vpow2.f32 %v996_v60  ;;  %v942_v46 = vmul.f32 1.442695, %v864_v61  ;;  %v568_v30 = vpop.f32.mrf.mxu1 }
  0xfe   :  { %v2132_v24 = vpop.eup %2131  ;;  %1758 = vst [vmem:[%s3039_s4] sm:$0xff] %v1757_v35   ;;  %2157 = vrcp.f32 %v1049_v37  ;;  %v1081_v47 = vadd.f32 1.0, %v2130_v38  ;;  %v896_v48 = vsub.f32 0.0, %v832_v8  ;;  %v798_v49 = vmax.f32 %v2649_v18, -60.0  ;;  %v2001_v61 = vpop.f32.mrf.mxu0 }
  0xff   :  { %v2134_v54 = vpop.eup %2133  ;;  %1929 = vst [vmem:[%s3039_s4 + $0x80] sm:$0xff] %v1837_v39   ;;  %v2671_v20 = vmul.f32 %v2132_v24, %v2559_v28  ;;  %2159 = vpow2.f32 %v942_v46  ;;  %v695_v58 = vmul.f32 %v2505_v34, %v565_v7  ;;  %v666_v59 = vmul.f32 %v1998_v31, %v2505_v34 }
 0x100   :  { %v2136_v33 = vpop.eup %2135  ;;  %2161 = vrcp.f32 %v1081_v47  ;;  %v1047_v1 = vadd.f32 1.0, %v2134_v54  ;;  %v1006_v3 = vmul.f32 1.442695, %v896_v48  ;;  %v862_v42 = vsub.f32 0.0, %v798_v49 }
 0x101   :  { %v2138_v45 = vpop.eup %2137  ;;  %v1079_v5 = vadd.f32 1.0, %v2136_v33  ;;  %v2676_v6 = vadd.f32 %v2510_v36, %v695_v58  ;;  %v2679_v10 = vadd.f32 %v2510_v36, %v666_v59  ;;  %v698_v28 = vmul.f32 %v2030_v53, %v2505_v34  ;;  %v453_v33 = vpop.f32.mrf.mxu0 }
 0x102   :  { %v2140_v11 = vpop.eup %2139  ;;  %v2683_v12 = vmul.f32 %v2138_v45, %v2566_v40  ;;  %2163 = vrcp.f32 %v1047_v1  ;;  %v938_v50 = vmul.f32 1.442695, %v862_v42  ;;  %v664_v57 = vmul.f32 %v2505_v34, %v440_v62  ;;  %v2033_v62 = vpop.f32.mrf.mxu1 }
 0x103   :  { %v2142_v13 = vpop.eup %2141  ;;  %2165 = vrcp.f32 %v1079_v5  ;;  %v1052_v51 = vadd.f32 1.0, %v2140_v11  ;;  %v830_v63 = vmax.f32 %v2676_v6, -60.0  ;;  %v801_v14 = vmax.f32 %v2679_v10, -60.0 }
 0x104   :  { %v2144_v22 = vpop.eup %2143  ;;  %v1084_v23 = vadd.f32 1.0, %v2142_v13  ;;  %2167 = vpow2.f32 %v1006_v3  ;;  %v2689_v26 = vadd.f32 %v2510_v36, %v698_v28  ;;  %v2692_v40 = vadd.f32 %v2510_v36, %v664_v57 }
 0x105   :  { %v2146_v60 = vpop.eup %2145  ;;  %2169 = vrcp.f32 %v1052_v51  ;;  %v1050_v7 = vadd.f32 1.0, %v2144_v22  ;;  %v894_v27 = vsub.f32 0.0, %v830_v63  ;;  %v865_v29 = vsub.f32 0.0, %v801_v14 }
 0x106   :  { %v2148_v31 = vpop.eup %2147  ;;  %2171 = vrcp.f32 %v1084_v23  ;;  %v1082_v32 = vadd.f32 1.0, %v2146_v60  ;;  %v833_v35 = vmax.f32 %v2689_v26, -60.0  ;;  %v799_v37 = vmax.f32 %v2692_v40, -60.0  ;;  %v581_v60 = vpop.f32.mrf.mxu1 }
 0x107   :  { %v2150_v8 = vpop.eup %2149  ;;  %v2697_v38 = vmul.f32 %v2148_v31, %v2569_v41  ;;  %2173 = vrcp.f32 %v1050_v7  ;;  %v1002_v39 = vmul.f32 1.442695, %v894_v27  ;;  %v944_v46 = vmul.f32 1.442695, %v865_v29 }
 0x108   :  { %v2152_v24 = vpop.eup %2151  ;;  %2175 = vrcp.f32 %v1082_v32  ;;  %v1053_v47 = vadd.f32 1.0, %v2150_v8  ;;  %v897_v48 = vsub.f32 0.0, %v833_v35  ;;  %v863_v49 = vsub.f32 0.0, %v799_v37  ;;  %v2002_v37 = vpop.f32.mrf.mxu0 }
 0x109   :  { %v2154_v53 = vpop.eup %2153  ;;  %v1085_v54 = vadd.f32 1.0, %v2152_v24  ;;  %2177 = vpow2.f32 %v938_v50  ;;  %v696_v58 = vmul.f32 %v2505_v34, %v568_v30  ;;  %v669_v59 = vmul.f32 %v2001_v61, %v2505_v34 }
 0x10a   :  { %v2156_v1 = vpop.eup %2155  ;;  %2179 = vrcp.f32 %v1053_v47  ;;  %v1051_v41 = vadd.f32 1.0, %v2154_v53  ;;  %v1008_v3 = vmul.f32 1.442695, %v897_v48  ;;  %v940_v42 = vmul.f32 1.442695, %v863_v49  ;;  %v2034_v48 = vpop.f32.mrf.mxu1 }
 0x10b   :  { %v2158_v45 = vpop.eup %2157  ;;  %2181 = vrcp.f32 %v1085_v54  ;;  %v1083_v5 = vadd.f32 1.0, %v2156_v1  ;;  %v2702_v28 = vadd.f32 %v2510_v36, %v696_v58  ;;  %v2705_v11 = vadd.f32 %v2510_v36, %v669_v59  ;;  %v456_v1 = vpop.f32.mrf.mxu0 }
 0x10c   :  { %v2160_v50 = vpop.eup %2159  ;;  %v1177_v57 = vmul.f32 %v2158_v45, %v2572_v44  ;;  %2183 = vrcp.f32 %v1051_v41  ;;  %v701_v13 = vmul.f32 %v2033_v62, %v2505_v34  ;;  %v667_v51 = vmul.f32 %v2505_v34, %v453_v33 }
 0x10d   :  { %v2162_v63 = vpop.eup %2161  ;;  %2185 = vrcp.f32 %v1083_v5  ;;  %v1056_v14 = vadd.f32 1.0, %v2160_v50  ;;  %v831_v22 = vmax.f32 %v2702_v28, -60.0  ;;  %v804_v23 = vmax.f32 %v2705_v11, -60.0 }
 0x10e   :  { %v1772_v7 = vpack.c.bf16 %v1177_v57, %v2661_v9  ;;  %v1209_v27 = vmul.f32 %v2162_v63, %v2580_v56  ;;  %2187 = vpow2.f32 %v1002_v39  ;;  %v2715_v44 = vadd.f32 %v2510_v36, %v701_v13 }
 0x10f   :  { %v2164_v29 = vpop.eup %2163  ;;  %2189 = vrcp.f32 %v1056_v14  ;;  %v895_v30 = vsub.f32 0.0, %v831_v22  ;;  %v868_v61 = vsub.f32 0.0, %v804_v23  ;;  %v2718_v31 = vadd.f32 %v2510_v36, %v667_v51 }
 0x110   :  { %v2166_v32 = vpop.eup %2165  ;;  %1916 = vst [vmem:[%s3039_s4 + $0x18] sm:$0xff] %v1772_v7   ;;  %v1852_v9 = vpack.c.bf16 %v1209_v27, %v2671_v20  ;;  %v1175_v56 = vmul.f32 %v2164_v29, %v2584_v0  ;;  %2191 = vpow2.f32 %v944_v46  ;;  %v836_v35 = vmax.f32 %v2715_v44, -60.0 }
 0x111   :  { %v2168_v8 = vpop.eup %2167  ;;  %v1207_v39 = vmul.f32 %v2166_v32, %v2588_v2  ;;  %2193 = vpow2.f32 %v1008_v3  ;;  %v1004_v24 = vmul.f32 1.442695, %v895_v30  ;;  %v950_v47 = vmul.f32 1.442695, %v868_v61 }
 0x112   :  { %v2170_v49 = vpop.eup %2169  ;;  %1932 = vst [vmem:[%s3039_s4 + $0x98] sm:$0xff] %v1852_v9   ;;  %v1767_v20 = vpack.c.bf16 %v1175_v56, %v2683_v12  ;;  %v1088_v53 = vadd.f32 1.0, %v2168_v8  ;;  %2195 = vpow2.f32 %v940_v42  ;;  %v900_v0 = vsub.f32 0.0, %v836_v35  ;;  %v584_v42 = vpop.f32.mrf.mxu1 }
 0x113   :  { %v2172_v46 = vpop.eup %2171  ;;  %v1847_v54 = vpack.c.bf16 %v1207_v39, %v2697_v38  ;;  %v1180_v58 = vmul.f32 %v2170_v49, %v2595_v19  ;;  %2197 = vpow2.f32 %v1004_v24  ;;  %v802_v2 = vmax.f32 %v2718_v31, -60.0 }
 0x114   :  { %v2174_v59 = vpop.eup %2173  ;;  %1915 = vst [vmem:[%s3039_s4 + $0x10] sm:$0xff] %v1767_v20   ;;  %v1212_v62 = vmul.f32 %v2172_v46, %v2598_v21  ;;  %2199 = vrcp.f32 %v1088_v53  ;;  %v1014_v12 = vmul.f32 1.442695, %v900_v0  ;;  %v699_v33 = vmul.f32 %v2505_v34, %v581_v60  ;;  %v2037_v24 = vpop.f32.mrf.mxu1 }
 0x115   :  { %v2176_v41 = vpop.eup %2175  ;;  %1931 = vst [vmem:[%s3039_s4 + $0x90] sm:$0xff] %v1847_v54   ;;  %v1178_v19 = vmul.f32 %v2174_v59, %v2604_v52  ;;  %2201 = vpow2.f32 %v950_v47  ;;  %v866_v38 = vsub.f32 0.0, %v802_v2  ;;  %v670_v3 = vmul.f32 %v2002_v37, %v2505_v34 }
 0x116   :  { %v2178_v45 = vpop.eup %2177  ;;  %v1210_v21 = vmul.f32 %v2176_v41, %v2609_v4  ;;  %2203 = vpow2.f32 %v1014_v12  ;;  %v2746_v5 = vadd.f32 %v2510_v36, %v699_v33  ;;  %v702_v50 = vmul.f32 %v2034_v48, %v2505_v34 }
 0x117   :  { %v2180_v57 = vpop.eup %2179  ;;  %v1054_v13 = vadd.f32 1.0, %v2178_v45  ;;  %v946_v51 = vmul.f32 1.442695, %v866_v38  ;;  %v2750_v63 = vadd.f32 %v2510_v36, %v670_v3  ;;  %v668_v52 = vmul.f32 %v2505_v34, %v456_v1 }
 0x118   :  { %v2182_v14 = vpop.eup %2181  ;;  %v1181_v22 = vmul.f32 %v2180_v57, %v2616_v15  ;;  %v834_v23 = vmax.f32 %v2746_v5, -60.0  ;;  %v2756_v4 = vadd.f32 %v2510_v36, %v702_v50  ;;  %v700_v60 = vmul.f32 %v2505_v34, %v584_v42 }
 0x119   :  { %v2184_v7 = vpop.eup %2183  ;;  %v1213_v27 = vmul.f32 %v2182_v14, %v2619_v16  ;;  %2205 = vrcp.f32 %v1054_v13  ;;  %v805_v29 = vmax.f32 %v2750_v63, -60.0  ;;  %v2762_v30 = vadd.f32 %v2510_v36, %v668_v52  ;;  %v2005_v16 = vpop.f32.mrf.mxu0 }
 0x11a   :  { %v2186_v61 = vpop.eup %2185  ;;  %v1782_v32 = vpack.c.bf16 %v1181_v22, %v1180_v58  ;;  %v1179_v15 = vmul.f32 %v2184_v7, %v2622_v25  ;;  %2207 = vpow2.f32 %v946_v51  ;;  %v898_v9 = vsub.f32 0.0, %v834_v23 }
 0x11b   :  { %v2188_v56 = vpop.eup %2187  ;;  %v1862_v35 = vpack.c.bf16 %v1213_v27, %v1212_v62  ;;  %v1211_v37 = vmul.f32 %v2186_v61, %v2632_v55  ;;  %v869_v8 = vsub.f32 0.0, %v805_v29  ;;  %v837_v39 = vmax.f32 %v2756_v4, -60.0  ;;  %v469_v41 = vpop.f32.mrf.mxu0 }
 0x11c   :  { %v2190_v47 = vpop.eup %2189  ;;  %1918 = vst [vmem:[%s3039_s4 + $0x28] sm:$0xff] %v1782_v32   ;;  %v1777_v48 = vpack.c.bf16 %v1179_v15, %v1178_v19  ;;  %v1086_v49 = vadd.f32 1.0, %v2188_v56  ;;  %v1010_v20 = vmul.f32 1.442695, %v898_v9  ;;  %v803_v25 = vmax.f32 %v2762_v30, -60.0  ;;  %v597_v19 = vpop.f32.mrf.mxu1 }
 0x11d   :  { %v2192_v53 = vpop.eup %2191  ;;  %1934 = vst [vmem:[%s3039_s4 + $0xa8] sm:$0xff] %v1862_v35   ;;  %v1857_v55 = vpack.c.bf16 %v1211_v37, %v1210_v21  ;;  %v2775_v0 = vmul.f32 %v2190_v47, %v2638_v43  ;;  %v952_v46 = vmul.f32 1.442695, %v869_v8  ;;  %v901_v54 = vsub.f32 0.0, %v837_v39  ;;  %v2006_v29 = vpop.f32.mrf.mxu0 }
 0x11e   :  { %v2194_v58 = vpop.eup %2193  ;;  %1917 = vst [vmem:[%s3039_s4 + $0x20] sm:$0xff] %v1777_v48   ;;  %2209 = vrcp.f32 %v1086_v49  ;;  %v1057_v2 = vadd.f32 1.0, %v2192_v53  ;;  %v867_v59 = vsub.f32 0.0, %v803_v25  ;;  %v2781_v62 = vadd.f32 %v2510_v36, %v700_v60  ;;  %v2038_v61 = vpop.f32.mrf.mxu1 }
 0x11f   :  { %v2196_v12 = vpop.eup %2195  ;;  %1933 = vst [vmem:[%s3039_s4 + $0xa0] sm:$0xff] %v1857_v55   ;;  %v1089_v43 = vadd.f32 1.0, %v2194_v58  ;;  %2211 = vpow2.f32 %v1010_v20  ;;  %v1016_v33 = vmul.f32 1.442695, %v901_v54  ;;  %v673_v1 = vmul.f32 %v2005_v16, %v2505_v34  ;;  %v472_v20 = vpop.f32.mrf.mxu0 }
 0x120   :  { %v2198_v38 = vpop.eup %2197  ;;  %2213 = vrcp.f32 %v1057_v2  ;;  %v1055_v3 = vadd.f32 1.0, %v2196_v12  ;;  %v948_v42 = vmul.f32 1.442695, %v867_v59  ;;  %v835_v45 = vmax.f32 %v2781_v62, -60.0 }
 0x121   :  { %v2200_v21 = vpop.eup %2199  ;;  %2215 = vrcp.f32 %v1089_v43  ;;  %v1087_v50 = vadd.f32 1.0, %v2198_v38  ;;  %v2789_v57 = vadd.f32 %v2510_v36, %v673_v1  ;;  %v705_v13 = vmul.f32 %v2037_v24, %v2505_v34 }
 0x122   :  { %v2202_v51 = vpop.eup %2201  ;;  %v2793_v52 = vmul.f32 %v2200_v21, %v2646_v17  ;;  %2217 = vrcp.f32 %v1055_v3  ;;  %v899_v14 = vsub.f32 0.0, %v835_v45  ;;  %v671_v22 = vmul.f32 %v2505_v34, %v469_v41  ;;  %v2009_v45 = vpop.f32.mrf.mxu0 }
 0x123   :  { %v2204_v23 = vpop.eup %2203  ;;  %2219 = vrcp.f32 %v1087_v50  ;;  %v1060_v60 = vadd.f32 1.0, %v2202_v51  ;;  %v808_v7 = vmax.f32 %v2789_v57, -60.0  ;;  %v2798_v27 = vadd.f32 %v2510_v36, %v705_v13 }
 0x124   :  { %v1092_v32 = vadd.f32 1.0, %v2204_v23  ;;  %2221 = vpow2.f32 %v952_v46  ;;  %v1012_v15 = vmul.f32 1.442695, %v899_v14  ;;  %v2801_v17 = vadd.f32 %v2510_v36, %v671_v22  ;;  %v600_v46 = vpop.f32.mrf.mxu1 }
 0x125   :  { %2223 = vrcp.f32 %v1060_v60  ;;  %v872_v9 = vsub.f32 0.0, %v808_v7  ;;  %v840_v56 = vmax.f32 %v2798_v27, -60.0  ;;  %v703_v35 = vmul.f32 %v2505_v34, %v597_v19 }
 0x126   :  { %v2206_v37 = vpop.eup %2205  ;;  %2225 = vrcp.f32 %v1092_v32  ;;  %v806_v8 = vmax.f32 %v2801_v17, -60.0  ;;  %v674_v39 = vmul.f32 %v2006_v29, %v2505_v34  ;;  %v706_v16 = vmul.f32 %v2038_v61, %v2505_v34  ;;  %v2041_v32 = vpop.f32.mrf.mxu1 }
 0x127   :  { %v2208_v24 = vpop.eup %2207  ;;  %v2809_v47 = vmul.f32 %v2206_v37, %v2649_v18  ;;  %2227 = vpow2.f32 %v1016_v33  ;;  %v958_v48 = vmul.f32 1.442695, %v872_v9  ;;  %v904_v49 = vsub.f32 0.0, %v840_v56 }
 0x128   :  { %v1058_v25 = vadd.f32 1.0, %v2208_v24  ;;  %2229 = vpow2.f32 %v948_v42  ;;  %v870_v53 = vsub.f32 0.0, %v806_v8  ;;  %v2812_v55 = vadd.f32 %v2510_v36, %v703_v35  ;;  %v485_v35 = vpop.f32.mrf.mxu0 }
 0x129   :  { %2231 = vpow2.f32 %v1012_v15  ;;  %v1022_v54 = vmul.f32 1.442695, %v904_v49  ;;  %v2815_v58 = vadd.f32 %v2510_v36, %v674_v39  ;;  %v2818_v2 = vadd.f32 %v2510_v36, %v706_v16 }
 0x12a   :  { %2233 = vrcp.f32 %v1058_v25  ;;  %v954_v18 = vmul.f32 1.442695, %v870_v53  ;;  %v838_v59 = vmax.f32 %v2812_v55, -60.0  ;;  %v672_v12 = vmul.f32 %v2505_v34, %v472_v20  ;;  %v2858_v20 = vld [vmem:[%s3037_s2] ss:$0 sm:$0xff]  ;;  %v613_v25 = vpop.f32.mrf.mxu1 }
 0x12b   :  { %v2210_v43 = vpop.eup %2209  ;;  %2235 = vpow2.f32 %v958_v48  ;;  %v809_v33 = vmax.f32 %v2815_v58, -60.0  ;;  %v841_v1 = vmax.f32 %v2818_v2, -60.0  ;;  %v704_v41 = vmul.f32 %v2505_v34, %v600_v46 }
 0x12c   :  { %v2212_v19 = vpop.eup %2211  ;;  %v1214_v38 = vmul.f32 %v2210_v43, %v2676_v6  ;;  %2237 = vpow2.f32 %v1022_v54  ;;  %v902_v3 = vsub.f32 0.0, %v838_v59  ;;  %v2827_v42 = vadd.f32 %v2510_v36, %v672_v12  ;;  %v2834_v6 = vld [vmem:[%s3038_s3] ss:$0 sm:$0xff] }
 0x12d   :  { %v2214_v21 = vpop.eup %2213  ;;  %v1090_v50 = vadd.f32 1.0, %v2212_v19  ;;  %2239 = vpow2.f32 %v954_v18  ;;  %v873_v13 = vsub.f32 0.0, %v809_v33  ;;  %v905_v51 = vsub.f32 0.0, %v841_v1  ;;  %v2010_v18 = vpop.f32.mrf.mxu0 }
 0x12e   :  { %v2216_v14 = vpop.eup %2215  ;;  %v1185_v22 = vmul.f32 %v2214_v21, %v2679_v10  ;;  %v1018_v23 = vmul.f32 1.442695, %v902_v3  ;;  %v807_v34 = vmax.f32 %v2827_v42, -60.0  ;;  %v2837_v36 = vadd.f32 %v2834_v6, %v704_v41 }
 0x12f   :  { %v2218_v60 = vpop.eup %2217  ;;  %v1217_v7 = vmul.f32 %v2216_v14, %v2689_v26  ;;  %2241 = vrcp.f32 %v1090_v50  ;;  %v960_v29 = vmul.f32 1.442695, %v873_v13  ;;  %v1024_v61 = vmul.f32 1.442695, %v905_v51 }
 0x130   :  { %v2220_v15 = vpop.eup %2219  ;;  %v1792_v10 = vpack.c.bf16 %v1185_v22, %v2775_v0  ;;  %v1183_v9 = vmul.f32 %v2218_v60, %v2692_v40  ;;  %2243 = vpow2.f32 %v1018_v23  ;;  %v871_v56 = vsub.f32 0.0, %v807_v34 }
 0x131   :  { %v2222_v37 = vpop.eup %2221  ;;  %v1872_v8 = vpack.c.bf16 %v1217_v7, %v2793_v52  ;;  %v1215_v39 = vmul.f32 %v2220_v15, %v2702_v28  ;;  %2245 = vpow2.f32 %v960_v29  ;;  %v839_v26 = vmax.f32 %v2837_v36, -60.0 }
 0x132   :  { %v2224_v16 = vpop.eup %2223  ;;  %1920 = vst [vmem:[%s3039_s4 + $0x38] sm:$0xff] %v1792_v10   ;;  %v1787_v0 = vpack.c.bf16 %v1183_v9, %v2809_v47  ;;  %v1061_v24 = vadd.f32 1.0, %v2222_v37  ;;  %2247 = vpow2.f32 %v1024_v61  ;;  %v956_v40 = vmul.f32 1.442695, %v871_v56  ;;  %v2042_v10 = vpop.f32.mrf.mxu1 }
 0x133   :  { %v2226_v48 = vpop.eup %2225  ;;  %1936 = vst [vmem:[%s3039_s4 + $0xb8] sm:$0xff] %v1872_v8   ;;  %v1867_v52 = vpack.c.bf16 %v1215_v39, %v1214_v38  ;;  %v2853_v28 = vmul.f32 %v2224_v16, %v2705_v11  ;;  %v903_v49 = vsub.f32 0.0, %v839_v26  ;;  %v677_v47 = vmul.f32 %v2858_v20, %v2009_v45 }
 0x134   :  { %v2228_v53 = vpop.eup %2227  ;;  %1919 = vst [vmem:[%s3039_s4 + $0x30] sm:$0xff] %v1787_v0   ;;  %v2865_v46 = vmul.f32 %v2226_v48, %v2715_v44  ;;  %2249 = vrcp.f32 %v1061_v24  ;;  %v709_v11 = vmul.f32 %v2858_v20, %v2041_v32  ;;  %v675_v54 = vmul.f32 %v2858_v20, %v485_v35 }
 0x135   :  { %v2230_v59 = vpop.eup %2229  ;;  %1935 = vst [vmem:[%s3039_s4 + $0xb0] sm:$0xff] %v1867_v52   ;;  %v1093_v12 = vadd.f32 1.0, %v2228_v53  ;;  %2251 = vpow2.f32 %v956_v40  ;;  %v1020_v43 = vmul.f32 1.442695, %v903_v49  ;;  %v2873_v33 = vadd.f32 %v2834_v6, %v677_v47 }
 0x136   :  { %v2232_v1 = vpop.eup %2231  ;;  %v1059_v44 = vadd.f32 1.0, %v2230_v59  ;;  %v2876_v41 = vadd.f32 %v2834_v6, %v709_v11  ;;  %v2879_v19 = vadd.f32 %v2834_v6, %v675_v54  ;;  %v707_v38 = vmul.f32 %v2858_v20, %v613_v25  ;;  %v616_v25 = vpop.f32.mrf.mxu1 }
 0x137   :  { %v2234_v3 = vpop.eup %2233  ;;  %2253 = vrcp.f32 %v1093_v12  ;;  %v1091_v45 = vadd.f32 1.0, %v2232_v1  ;;  %v812_v21 = vmax.f32 %v2873_v33, -60.0  ;;  %v678_v50 = vmul.f32 %v2858_v20, %v2010_v18 }
 0x138   :  { %v2236_v13 = vpop.eup %2235  ;;  %v2885_v51 = vmul.f32 %v2234_v3, %v2718_v31  ;;  %2255 = vrcp.f32 %v1059_v44  ;;  %v844_v14 = vmax.f32 %v2876_v41, -60.0  ;;  %v810_v22 = vmax.f32 %v2879_v19, -60.0  ;;  %v488_v31 = vpop.f32.mrf.mxu0 }
 0x139   :  { %v2238_v23 = vpop.eup %2237  ;;  %2257 = vrcp.f32 %v1091_v45  ;;  %v1064_v34 = vadd.f32 1.0, %v2236_v13  ;;  %v876_v60 = vsub.f32 0.0, %v812_v21  ;;  %v2890_v7 = vadd.f32 %v2834_v6, %v707_v38 }
 0x13a   :  { %v2240_v29 = vpop.eup %2239  ;;  %v1096_v61 = vadd.f32 1.0, %v2238_v23  ;;  %2259 = vpow2.f32 %v1020_v43  ;;  %v908_v32 = vsub.f32 0.0, %v844_v14  ;;  %v874_v15 = vsub.f32 0.0, %v810_v22  ;;  %v2013_v53 = vpop.f32.mrf.mxu0 }
 0x13b   :  { %2261 = vrcp.f32 %v1064_v34  ;;  %v1062_v9 = vadd.f32 1.0, %v2240_v29  ;;  %v966_v56 = vmul.f32 1.442695, %v876_v60  ;;  %v842_v35 = vmax.f32 %v2890_v7, -60.0  ;;  %v2045_v14 = vpop.f32.mrf.mxu1 }
 0x13c   :  { %v2242_v37 = vpop.eup %2241  ;;  %2263 = vrcp.f32 %v1096_v61  ;;  %v1030_v8 = vmul.f32 1.442695, %v908_v32  ;;  %v962_v39 = vmul.f32 1.442695, %v874_v15  ;;  %v2894_v26 = vadd.f32 %v2834_v6, %v678_v50 }
 0x13d   :  { %v2244_v16 = vpop.eup %2243  ;;  %v2897_v0 = vmul.f32 %v2242_v37, %v2746_v5  ;;  %2265 = vrcp.f32 %v1062_v9  ;;  %v906_v24 = vsub.f32 0.0, %v842_v35  ;;  %v710_v40 = vmul.f32 %v2858_v20, %v2042_v10  ;;  %v501_v9 = vpop.f32.mrf.mxu0 }
 0x13e   :  { %v2246_v48 = vpop.eup %2245  ;;  %v1094_v52 = vadd.f32 1.0, %v2244_v16  ;;  %2267 = vpow2.f32 %v966_v56  ;;  %v813_v49 = vmax.f32 %v2894_v26, -60.0  ;;  %v676_v47 = vmul.f32 %v2858_v20, %v488_v31 }
 0x13f   :  { %v2248_v11 = vpop.eup %2247  ;;  %v1065_v54 = vadd.f32 1.0, %v2246_v48  ;;  %2269 = vpow2.f32 %v1030_v8  ;;  %v1026_v18 = vmul.f32 1.442695, %v906_v24  ;;  %v2903_v5 = vadd.f32 %v2834_v6, %v710_v40  ;;  %v629_v8 = vpop.f32.mrf.mxu1 }
 0x140   :  { %2271 = vrcp.f32 %v1094_v52  ;;  %v1097_v59 = vadd.f32 1.0, %v2248_v11  ;;  %v877_v12 = vsub.f32 0.0, %v813_v49  ;;  %v2906_v43 = vadd.f32 %v2834_v6, %v676_v47 }
 0x141   :  { %v2250_v1 = vpop.eup %2249  ;;  %2273 = vrcp.f32 %v1065_v54  ;;  %v845_v44 = vmax.f32 %v2903_v5, -60.0  ;;  %v708_v38 = vmul.f32 %v2858_v20, %v616_v25  ;;  %v681_v3 = vmul.f32 %v2858_v20, %v2013_v53  ;;  %v2014_v53 = vpop.f32.mrf.mxu0 }
 0x142   :  { %v2252_v45 = vpop.eup %2251  ;;  %v1189_v21 = vmul.f32 %v2250_v1, %v2750_v63  ;;  %2275 = vrcp.f32 %v1097_v59  ;;  %v968_v50 = vmul.f32 1.442695, %v877_v12  ;;  %v811_v13 = vmax.f32 %v2906_v43, -60.0  ;;  %v2046_v54 = vpop.f32.mrf.mxu1 }
 0x143   :  { %v1063_v22 = vadd.f32 1.0, %v2252_v45  ;;  %2277 = vpow2.f32 %v962_v39  ;;  %v909_v23 = vsub.f32 0.0, %v845_v44  ;;  %v2914_v34 = vadd.f32 %v2834_v6, %v708_v38 }
 0x144   :  { %v2254_v60 = vpop.eup %2253  ;;  %v1802_v29 = vpack.c.bf16 %v1189_v21, %v2853_v28  ;;  %2279 = vpow2.f32 %v1026_v18  ;;  %v875_v61 = vsub.f32 0.0, %v811_v13  ;;  %v2918_v32 = vadd.f32 %v2834_v6, %v681_v3 }
 0x145   :  { %v2256_v63 = vpop.eup %2255  ;;  %v1221_v15 = vmul.f32 %v2254_v60, %v2756_v4  ;;  %2281 = vrcp.f32 %v1063_v22  ;;  %v1032_v10 = vmul.f32 1.442695, %v909_v23  ;;  %v843_v31 = vmax.f32 %v2914_v34, -60.0 }
 0x146   :  { %v2258_v56 = vpop.eup %2257  ;;  %1922 = vst [vmem:[%s3039_s4 + $0x48] sm:$0xff] %v1802_v29   ;;  %v1187_v28 = vmul.f32 %v2256_v63, %v2762_v30  ;;  %2283 = vpow2.f32 %v968_v50  ;;  %v964_v35 = vmul.f32 1.442695, %v875_v61  ;;  %v816_v37 = vmax.f32 %v2918_v32, -60.0 }
 0x147   :  { %v2260_v39 = vpop.eup %2259  ;;  %v1882_v4 = vpack.c.bf16 %v1221_v15, %v2865_v46  ;;  %v1219_v16 = vmul.f32 %v2258_v56, %v2781_v62  ;;  %2285 = vpow2.f32 %v1032_v10  ;;  %v907_v24 = vsub.f32 0.0, %v843_v31 }
 0x148   :  { %v2262_v40 = vpop.eup %2261  ;;  %v1797_v48 = vpack.c.bf16 %v1187_v28, %v2885_v51  ;;  %v1095_v52 = vadd.f32 1.0, %v2260_v39  ;;  %2287 = vpow2.f32 %v964_v35  ;;  %v880_v49 = vsub.f32 0.0, %v816_v37 }
 0x149   :  { %v2264_v47 = vpop.eup %2263  ;;  %1938 = vst [vmem:[%s3039_s4 + $0xc8] sm:$0xff] %v1882_v4   ;;  %v1877_v30 = vpack.c.bf16 %v1219_v16, %v2897_v0  ;;  %v1028_v25 = vmul.f32 1.442695, %v907_v24  ;;  %v713_v46 = vmul.f32 %v2858_v20, %v2045_v14  ;;  %v679_v11 = vmul.f32 %v2858_v20, %v501_v9  ;;  %v504_v4 = vpop.f32.mrf.mxu0 }
 0x14a   :  { %v2266_v62 = vpop.eup %2265  ;;  %1921 = vst [vmem:[%s3039_s4 + $0x40] sm:$0xff] %v1797_v48   ;;  %2289 = vrcp.f32 %v1095_v52  ;;  %v974_v51 = vmul.f32 1.442695, %v880_v49  ;;  %v1192_v0 = vmul.f32 %v2262_v40, %v2789_v57  ;;  %v711_v12 = vmul.f32 %v2858_v20, %v629_v8 }
 0x14b   :  { %v2268_v18 = vpop.eup %2267  ;;  %1937 = vst [vmem:[%s3039_s4 + $0xc0] sm:$0xff] %v1877_v30   ;;  %2291 = vpow2.f32 %v1028_v25  ;;  %v2944_v59 = vadd.f32 %v2834_v6, %v713_v46  ;;  %v1224_v44 = vmul.f32 %v2264_v47, %v2798_v27  ;;  %v2949_v3 = vadd.f32 %v2834_v6, %v679_v11  ;;  %v632_v47 = vpop.f32.mrf.mxu1 }
 0x14c   :  { %v2270_v1 = vpop.eup %2269  ;;  %v1068_v38 = vadd.f32 1.0, %v2268_v18  ;;  %v682_v45 = vmul.f32 %v2858_v20, %v2014_v53  ;;  %v1190_v50 = vmul.f32 %v2266_v62, %v2801_v17  ;;  %v2955_v13 = vadd.f32 %v2834_v6, %v711_v12 }
 0x14d   :  { %v2272_v21 = vpop.eup %2271  ;;  %v848_v57 = vmax.f32 %v2944_v59, -60.0  ;;  %v714_v14 = vmul.f32 %v2858_v20, %v2046_v54  ;;  %v1100_v23 = vadd.f32 1.0, %v2270_v1  ;;  %2293 = vpow2.f32 %v974_v51 }
 0x14e   :  { %v2274_v22 = vpop.eup %2273  ;;  %v814_v27 = vmax.f32 %v2949_v3, -60.0  ;;  %v2960_v60 = vadd.f32 %v2834_v6, %v682_v45  ;;  %2295 = vrcp.f32 %v1068_v38  ;;  %v846_v63 = vmax.f32 %v2955_v13, -60.0 }
 0x14f   :  { %v2276_v29 = vpop.eup %2275  ;;  %v1193_v61 = vmul.f32 %v2274_v22, %v2815_v58  ;;  %v912_v17 = vsub.f32 0.0, %v848_v57  ;;  %v2967_v56 = vadd.f32 %v2834_v6, %v714_v14  ;;  %2297 = vrcp.f32 %v1100_v23 }
 0x150   :  { %v2278_v15 = vpop.eup %2277  ;;  %v1225_v10 = vmul.f32 %v2276_v29, %v2818_v2  ;;  %v878_v31 = vsub.f32 0.0, %v814_v27  ;;  %v817_v9 = vmax.f32 %v2960_v60, -60.0  ;;  %v910_v39 = vsub.f32 0.0, %v846_v63 }
 0x151   :  { %v2280_v28 = vpop.eup %2279  ;;  %v1812_v35 = vpack.c.bf16 %v1193_v61, %v1192_v0  ;;  %v1066_v37 = vadd.f32 1.0, %v2278_v15  ;;  %v1038_v8 = vmul.f32 1.442695, %v912_v17  ;;  %v849_v49 = vmax.f32 %v2967_v56, -60.0 }
 0x152   :  { %v2282_v58 = vpop.eup %2281  ;;  %v1892_v16 = vpack.c.bf16 %v1225_v10, %v1224_v44  ;;  %v1098_v24 = vadd.f32 1.0, %v2280_v28  ;;  %v970_v40 = vmul.f32 1.442695, %v878_v31  ;;  %v881_v52 = vsub.f32 0.0, %v817_v9 }
 0x153   :  { %v2284_v48 = vpop.eup %2283  ;;  %1924 = vst [vmem:[%s3039_s4 + $0x58] sm:$0xff] %v1812_v35   ;;  %v1191_v2 = vmul.f32 %v2282_v58, %v2827_v42  ;;  %2299 = vrcp.f32 %v1066_v37  ;;  %v1034_v46 = vmul.f32 1.442695, %v910_v39  ;;  %v680_v53 = vmul.f32 %v2858_v20, %v504_v4 }
 0x154   :  { %v2286_v30 = vpop.eup %2285  ;;  %1940 = vst [vmem:[%s3039_s4 + $0xd8] sm:$0xff] %v1892_v16   ;;  %2301 = vrcp.f32 %v1098_v24  ;;  %v1069_v25 = vadd.f32 1.0, %v2284_v48  ;;  %v913_v42 = vsub.f32 0.0, %v849_v49  ;;  %v712_v0 = vmul.f32 %v2858_v20, %v632_v47 }
 0x155   :  { %v2288_v62 = vpop.eup %2287  ;;  %v1807_v51 = vpack.c.bf16 %v1191_v2, %v1190_v50  ;;  %v1101_v11 = vadd.f32 1.0, %v2286_v30  ;;  %2303 = vpow2.f32 %v1038_v8  ;;  %v2979_v18 = vadd.f32 %v2834_v6, %v680_v53 }
 0x156   :  { %2305 = vrcp.f32 %v1069_v25  ;;  %v1067_v54 = vadd.f32 1.0, %v2288_v62  ;;  %v1222_v1 = vmul.f32 %v2272_v21, %v2812_v55  ;;  %v2989_v50 = vadd.f32 %v2834_v6, %v712_v0 }
 0x157   :  { %v2290_v12 = vpop.eup %2289  ;;  %1923 = vst [vmem:[%s3039_s4 + $0x50] sm:$0xff] %v1807_v51   ;;  %2307 = vrcp.f32 %v1101_v11  ;;  %v815_v45 = vmax.f32 %v2979_v18, -60.0  ;;  %v976_v20 = vmul.f32 1.442695, %v881_v52  ;;  %v1040_v55 = vmul.f32 1.442695, %v913_v42 }
 0x158   :  { %v2292_v44 = vpop.eup %2291  ;;  %v1223_v38 = vmul.f32 %v2290_v12, %v2837_v36  ;;  %2309 = vrcp.f32 %v1067_v54  ;;  %v847_v23 = vmax.f32 %v2989_v50, -60.0 }
 0x159   :  { %v1099_v57 = vadd.f32 1.0, %v2292_v44  ;;  %2311 = vpow2.f32 %v970_v40  ;;  %v879_v21 = vsub.f32 0.0, %v815_v45 }
 0x15a   :  { %v1887_v14 = vpack.c.bf16 %v1223_v38, %v1222_v1  ;;  %2313 = vpow2.f32 %v1034_v46  ;;  %v2294_v22 = vpop.eup %2293  ;;  %v911_v6 = vsub.f32 0.0, %v847_v23 }
 0x15b   :  { %2315 = vrcp.f32 %v1099_v57  ;;  %v2296_v27 = vpop.eup %2295  ;;  %v972_v36 = vmul.f32 1.442695, %v879_v21  ;;  %v1072_v39 = vadd.f32 1.0, %v2294_v22 }
 0x15c   :  { %1939 = vst [vmem:[%s3039_s4 + $0xd0] sm:$0xff] %v1887_v14   ;;  %2317 = vpow2.f32 %v976_v20  ;;  %v2298_v29 = vpop.eup %2297  ;;  %v1036_v61 = vmul.f32 1.442695, %v911_v6  ;;  %v1196_v9 = vmul.f32 %v2296_v27, %v2873_v33 }
 0x15d   :  { %2319 = vpow2.f32 %v1040_v55  ;;  %v1228_v37 = vmul.f32 %v2298_v29, %v2876_v41 }
 0x15e   :  { %2321 = vpow2.f32 %v972_v36 }
 0x15f   :  { %2323 = vpow2.f32 %v1036_v61 }
 0x160   :  { %v2300_v17 = vpop.eup %2299  ;;  %2325 = vrcp.f32 %v1072_v39 }
 0x161   :  { %v2302_v63 = vpop.eup %2301  ;;  %v1194_v58 = vmul.f32 %v2300_v17, %v2879_v19 }
 0x162   :  { %v2304_v15 = vpop.eup %2303 }
 0x163   :  { %v2306_v10 = vpop.eup %2305  ;;  %v1104_v40 = vadd.f32 1.0, %v2304_v15 }
 0x164   :  { %v2308_v31 = vpop.eup %2307  ;;  %v1197_v28 = vmul.f32 %v2306_v10, %v2894_v26  ;;  %v1226_v26 = vmul.f32 %v2302_v63, %v2890_v7 }
 0x165   :  { %v2310_v35 = vpop.eup %2309  ;;  %v1229_v8 = vmul.f32 %v2308_v31, %v2903_v5  ;;  %2327 = vrcp.f32 %v1104_v40 }
 0x166   :  { %v2312_v4 = vpop.eup %2311  ;;  %v1822_v16 = vpack.c.bf16 %v1197_v28, %v1196_v9  ;;  %v1195_v24 = vmul.f32 %v2310_v35, %v2906_v43 }
 0x167   :  { %v2314_v48 = vpop.eup %2313  ;;  %v1902_v2 = vpack.c.bf16 %v1229_v8, %v1228_v37  ;;  %v1070_v52 = vadd.f32 1.0, %v2312_v4 }
 0x168   :  { %v2316_v49 = vpop.eup %2315  ;;  %1926 = vst [vmem:[%s3039_s4 + $0x68] sm:$0xff] %v1822_v16   ;;  %v1817_v33 = vpack.c.bf16 %v1195_v24, %v1194_v58  ;;  %v1102_v41 = vadd.f32 1.0, %v2314_v48 }
 0x169   :  { %1942 = vst [vmem:[%s3039_s4 + $0xe8] sm:$0xff] %v1902_v2   ;;  %v1227_v19 = vmul.f32 %v2316_v49, %v2914_v34  ;;  %v2318_v5 = vpop.eup %2317  ;;  %2329 = vrcp.f32 %v1070_v52 }
 0x16a   :  { %1925 = vst [vmem:[%s3039_s4 + $0x60] sm:$0xff] %v1817_v33   ;;  %v2320_v43 = vpop.eup %2319  ;;  %v1073_v30 = vadd.f32 1.0, %v2318_v5  ;;  %2331 = vrcp.f32 %v1102_v41 }
 0x16b   :  { %v1897_v47 = vpack.c.bf16 %v1227_v19, %v1226_v26  ;;  %v2322_v25 = vpop.eup %2321  ;;  %v1105_v7 = vadd.f32 1.0, %v2320_v43 }
 0x16c   :  { %2333 = vrcp.f32 %v1073_v30  ;;  %v1071_v34 = vadd.f32 1.0, %v2322_v25  ;;  %v2324_v46 = vpop.eup %2323 }
 0x16d   :  { %1941 = vst [vmem:[%s3039_s4 + $0xe0] sm:$0xff] %v1897_v47   ;;  %2335 = vrcp.f32 %v1105_v7  ;;  %v1103_v53 = vadd.f32 1.0, %v2324_v46  ;;  %v2326_v62 = vpop.eup %2325 }
 0x16e   :  { %2337 = vrcp.f32 %v1071_v34  ;;  %v1200_v12 = vmul.f32 %v2326_v62, %v2918_v32 }
 0x16f   :  { %2339 = vrcp.f32 %v1103_v53 }
 0x172   :  { %v2328_v51 = vpop.eup %2327 }
 0x173   :  { %v1232_v38 = vmul.f32 %v2328_v51, %v2944_v59 }
 0x176   :  { %v2330_v11 = vpop.eup %2329 }
 0x177   :  { %v2332_v42 = vpop.eup %2331  ;;  %v1198_v57 = vmul.f32 %v2330_v11, %v2949_v3 }
 0x178   :  { %v1230_v22 = vmul.f32 %v2332_v42, %v2955_v13 }
 0x179   :  { %v2334_v54 = vpop.eup %2333 }
 0x17a   :  { %v2336_v0 = vpop.eup %2335  ;;  %v1201_v1 = vmul.f32 %v2334_v54, %v2960_v60 }
 0x17b   :  { %v2338_v44 = vpop.eup %2337  ;;  %v1233_v45 = vmul.f32 %v2336_v0, %v2967_v56 }
 0x17c   :  { %v1832_v20 = vpack.c.bf16 %v1201_v1, %v1200_v12  ;;  %v1199_v14 = vmul.f32 %v2338_v44, %v2979_v18  ;;  %v2340_v55 = vpop.eup %2339 }
 0x17d   :  { %v1912_v21 = vpack.c.bf16 %v1233_v45, %v1232_v38  ;;  %v1231_v60 = vmul.f32 %v2340_v55, %v2989_v50 }
 0x17e   :  { %1928 = vst [vmem:[%s3039_s4 + $0x78] sm:$0xff] %v1832_v20   ;;  %v1827_v32 = vpack.c.bf16 %v1199_v14, %v1198_v57 }
 0x17f   :  { %1944 = vst [vmem:[%s3039_s4 + $0xf8] sm:$0xff] %v1912_v21   ;;  %v1907_v59 = vpack.c.bf16 %v1231_v60, %v1230_v22 }
 0x180   :  { %1927 = vst [vmem:[%s3039_s4 + $0x70] sm:$0xff] %v1827_v32  }
 0x181   :  { %1943 = vst [vmem:[%s3039_s4 + $0xf0] sm:$0xff] %v1907_v59  }

// kernel: encoder_forward.6
= control target key start
LH: loop header
LB: loop body
LE: loop exit
PB: predicated region body
PF: predicated region fallthrough
CT: control target
= control target key end

     0   :  { %s3222_s17 = smov 0   ;;  %s5150_s0 = inlined_call_operand.vmem [shape: bf16[2,256,128], index: 0, kind: input, shape index: {}]   ;;  %s5151_s1 = inlined_call_operand.vmem [shape: f32[9,128], index: 1, kind: input, shape index: {}]   ;;  %s5152_s2 = inlined_call_operand.vmem [shape: f32[1,128], index: 2, kind: input, shape index: {}]   ;;  %s5153_s3 = inlined_call_operand.vmem [shape: f32[1,128], index: 3, kind: input, shape index: {}]   ;;  %s5154_s4 = inlined_call_operand.vmem [shape: bf16[128,128], index: 4, kind: input, shape index: {}]   ;;  %s5155_s5 = inlined_call_operand.vmem [shape: f32[1,128], index: 5, kind: input, shape index: {}]   ;;  %s5156_s6 = inlined_call_operand.vmem [shape: bf16[128,128], index: 6, kind: input, shape index: {}]   ;;  %s5157_s7 = inlined_call_operand.vmem [shape: f32[1,128], index: 7, kind: input, shape index: {}]   ;;  %s5158_s8 = inlined_call_operand.vmem [shape: bf16[128,128], index: 8, kind: input, shape index: {}]   ;;  %s5159_s9 = inlined_call_operand.vmem [shape: f32[1,128], index: 9, kind: input, shape index: {}]   ;;  %s5160_s10 = inlined_call_operand.vmem [shape: f32[1,128], index: 10, kind: input, shape index: {}]   ;;  %s5161_s11 = inlined_call_operand.vmem [shape: bf16[2,256,128], index: 11, kind: output, shape index: {}]  }
   0x1 LB: > { %s2484_s18 = sadd.s32 4294967295, %s3158_s17   ;;  %p2488_p0 = scmp.ge.s32.totalorder %s3158_s17, 1  ;;  %s3158_s17 = sphi %s3222_s17, %s21_s17  }
   0x2   : > { %p337_p1 = scmp.lt.s32.totalorder %s3158_s17, 3 }
   0x4   : > { %p338_p2 = pnand %p2488_p0, %p337_p1 }
   0x6   : > { %341 = sbr.rel (%p338_p2) target bundleno = 1075 (0x433), region = 64 }
   0xb   : > { %v2991_v0 = vld [vmem:[%s5154_s4 + $0x38] sm:$0xff]   ;;  %v3160_v1 = vmov 0.0   ;;  %v2992_v2 = vld [vmem:[%s5154_s4 + $0x30] sm:$0xff]   ;;  %vm3161_vm0 = vmmov 0   ;;  %p377_p3 = scmp.lt.s32.totalorder %s2484_s18, 1  ;;  %v2993_v3 = vld [vmem:[%s5154_s4 + $0x28] sm:$0xff]  }
   0xc   : > { %2893 = vmatprep.subr.bf16.mxu1 %v3160_v1  ;;  %388 = vst [vmem:[#allocation2] sm:$0xff] %v3160_v1  ;;  %389 = vst [vmem:[#allocation2 + $0x8] sm:$0xff] %v3160_v1  ;;  %2909 = vmatprep.mubr.msk.bf16.mxu1 %vm3161_vm0, %v3160_v1  ;;  %v2994_v4 = vld [vmem:[%s5154_s4 + $0x20] sm:$0xff]   ;;  %v2995_v41 = vld [vmem:[%s5154_s4 + $0x18] sm:$0xff]  }
   0xd   : > { %390 = vst [vmem:[#allocation2 + $0x10] sm:$0x3] %v3160_v1  ;;  %392 = vst [vmem:[#allocation2 + $0x198] sm:$0xff] %v3160_v1  ;;  %2894 = vmatpush3.bf16.msra.mxu1 %v2991_v0  ;;  %s5724_s18 = smov (!%p377_p3, %s2484_s18), 1  ;;  %v2996_v54 = vld [vmem:[%s5154_s4 + $0x10] sm:$0xff]   ;;  %v2997_v55 = vld [vmem:[%s5154_s4 + $0x8] sm:$0xff]  }
   0xe   : > { %393 = vst [vmem:[#allocation2 + $0x1a0] sm:$0xff] %v3160_v1  ;;  %394 = vst [vmem:[#allocation2 + $0x1a8] sm:$0x3] %v3160_v1  ;;  %2895 = vmatprep.subr.bf16.mxu1 %v3160_v1  ;;  %s2564_s25 = sshll.u32 %s5724_s18, 7  ;;  %v2998_v56 = vld [vmem:[%s5154_s4] sm:$0xff]  }
   0xf   : > { %396 = vst [vmem:[#allocation2 + $0x18] sm:$0x1] %v3160_v1  ;;  %397 = vst [vmem:[#allocation2 + $0x30] sm:$0x1] %v3160_v1  ;;  %s3294_s28 = scalar_lea.vmem %s5150_s0, %s2564_s25  ;;  %v3432_v57 = vld [vmem:[%s5151_s1] ss:$0 sm:$0xff]  ;;  %s5061_s27 = scalar_lea.vmem %s5161_s11, %s2564_s25 }
  0x10   : > { %398 = vst [vmem:[#allocation2 + $0x48] sm:$0x1] %v3160_v1  ;;  %399 = vst [vmem:[#allocation2 + $0x60] sm:$0x1] %v3160_v1  ;;  %v2599_v5 = vld [vmem:[%s3294_s28] sm:$0xff]   ;;  %v2806_v6 = vld [vmem:[%s3294_s28 + $0x8] sm:$0xff]  }
  0x11   : > { %400 = vst [vmem:[#allocation2 + $0x78] sm:$0x1] %v3160_v1  ;;  %401 = vst [vmem:[#allocation2 + $0x90] sm:$0x1] %v3160_v1  ;;  %2896 = vmatpush3.bf16.msra.mxu1 %v2992_v2  ;;  %v2807_v7 = vld [vmem:[%s3294_s28 + $0x10] sm:$0xff]   ;;  %v3302_v8 = vunpack.c.l.bf16 %v2599_v5  ;;  %v3304_v9 = vunpack.c.h.bf16 %v2599_v5  ;;  %v3306_v10 = vunpack.c.l.bf16 %v2806_v6  ;;  %v3308_v11 = vunpack.c.h.bf16 %v2806_v6  ;;  %v2808_v12 = vld [vmem:[%s3294_s28 + $0x18] sm:$0xff]  }
  0x12   : > { %402 = vst [vmem:[#allocation2 + $0xa8] sm:$0x1] %v3160_v1  ;;  %403 = vst [vmem:[#allocation2 + $0xc0] sm:$0x1] %v3160_v1  ;;  %2897 = vmatprep.subr.bf16.mxu1 %v3160_v1  ;;  %v2809_v13 = vld [vmem:[%s3294_s28 + $0x20] sm:$0xff]   ;;  %v2810_v14 = vld [vmem:[%s3294_s28 + $0x28] sm:$0xff]   ;;  %v3313_v15 = vunpack.c.l.bf16 %v2807_v7  ;;  %v3315_v16 = vunpack.c.h.bf16 %v2807_v7  ;;  %v3317_v17 = vunpack.c.l.bf16 %v2808_v12  ;;  %v3319_v18 = vunpack.c.h.bf16 %v2808_v12 }
  0x13   : > { %404 = vst [vmem:[#allocation2 + $0xd8] sm:$0x1] %v3160_v1  ;;  %405 = vst [vmem:[#allocation2 + $0xf0] sm:$0x1] %v3160_v1  ;;  %v2811_v19 = vld [vmem:[%s3294_s28 + $0x30] sm:$0xff]   ;;  %v2812_v20 = vld [vmem:[%s3294_s28 + $0x38] sm:$0xff]   ;;  %v3325_v22 = vunpack.c.l.bf16 %v2809_v13  ;;  %v3327_v23 = vunpack.c.h.bf16 %v2809_v13  ;;  %v3329_v24 = vunpack.c.l.bf16 %v2810_v14  ;;  %v3331_v25 = vunpack.c.h.bf16 %v2810_v14 }
  0x14   : > { %406 = vst [vmem:[#allocation2 + $0x108] sm:$0x1] %v3160_v1  ;;  %407 = vst [vmem:[#allocation2 + $0x120] sm:$0x1] %v3160_v1  ;;  %v2813_v21 = vld [vmem:[%s3294_s28 + $0x40] sm:$0xff]   ;;  %v2814_v26 = vld [vmem:[%s3294_s28 + $0x48] sm:$0xff]   ;;  %v3340_v29 = vunpack.c.l.bf16 %v2811_v19  ;;  %v3342_v30 = vunpack.c.h.bf16 %v2811_v19  ;;  %v3344_v31 = vunpack.c.l.bf16 %v2812_v20  ;;  %v3346_v32 = vunpack.c.h.bf16 %v2812_v20 }
  0x15   : > { %408 = vst [vmem:[#allocation2 + $0x138] sm:$0x1] %v3160_v1  ;;  %409 = vst [vmem:[#allocation2 + $0x150] sm:$0x1] %v3160_v1  ;;  %2898 = vmatpush3.bf16.msra.mxu1 %v2993_v3  ;;  %v2815_v27 = vld [vmem:[%s3294_s28 + $0x50] sm:$0xff]   ;;  %v2816_v28 = vld [vmem:[%s3294_s28 + $0x58] sm:$0xff]   ;;  %v3354_v35 = vunpack.c.l.bf16 %v2813_v21  ;;  %v3356_v36 = vunpack.c.h.bf16 %v2813_v21  ;;  %v3358_v37 = vunpack.c.l.bf16 %v2814_v26  ;;  %v3360_v38 = vunpack.c.h.bf16 %v2814_v26 }
  0x16   : > { %410 = vst [vmem:[#allocation2 + $0x168] sm:$0x1] %v3160_v1  ;;  %411 = vst [vmem:[#allocation2 + $0x180] sm:$0x1] %v3160_v1  ;;  %2899 = vmatprep.subr.bf16.mxu1 %v3160_v1  ;;  %v2817_v33 = vld [vmem:[%s3294_s28 + $0x60] sm:$0xff]   ;;  %v2818_v34 = vld [vmem:[%s3294_s28 + $0x68] sm:$0xff]   ;;  %v3371_v42 = vunpack.c.l.bf16 %v2815_v27  ;;  %v3373_v43 = vunpack.c.h.bf16 %v2815_v27  ;;  %v3375_v44 = vunpack.c.l.bf16 %v2816_v28  ;;  %v3377_v45 = vunpack.c.h.bf16 %v2816_v28 }
  0x17   : > { %412 = vst [vmem:[#allocation2 + $0x29] sm:$0x1] %v3160_v1  ;;  %413 = vst [vmem:[#allocation2 + $0x41] sm:$0x1] %v3160_v1  ;;  %v2819_v39 = vld [vmem:[%s3294_s28 + $0x70] sm:$0xff]   ;;  %v2820_v40 = vld [vmem:[%s3294_s28 + $0x78] sm:$0xff]   ;;  %v3384_v46 = vunpack.c.l.bf16 %v2817_v33  ;;  %v3386_v47 = vunpack.c.h.bf16 %v2817_v33  ;;  %v3388_v48 = vunpack.c.l.bf16 %v2818_v34  ;;  %v3390_v49 = vunpack.c.h.bf16 %v2818_v34 }
  0x18   : > { %414 = vst [vmem:[#allocation2 + $0x59] sm:$0x1] %v3160_v1  ;;  %415 = vst [vmem:[#allocation2 + $0x71] sm:$0x1] %v3160_v1  ;;  %v3396_v50 = vunpack.c.l.bf16 %v2819_v39  ;;  %v3398_v51 = vunpack.c.h.bf16 %v2819_v39  ;;  %v3400_v52 = vunpack.c.l.bf16 %v2820_v40  ;;  %v3402_v53 = vunpack.c.h.bf16 %v2820_v40  ;;  %v767_v58 = vld [vmem:[#allocation2 + $0x1] sm:$0xff]  ;;  %v768_v59 = vld [vmem:[#allocation2 + $0x9] sm:$0xff] }
  0x19   : > { %416 = vst [vmem:[#allocation2 + $0x89] sm:$0x1] %v3160_v1  ;;  %417 = vst [vmem:[#allocation2 + $0xa1] sm:$0x1] %v3160_v1  ;;  %2900 = vmatpush3.bf16.msra.mxu1 %v2994_v4  ;;  %v3437_v60 = vld [vmem:[%s5151_s1 + $0x1] ss:$0 sm:$0xff] }
  0x1a   : > { %418 = vst [vmem:[#allocation2 + $0xb9] sm:$0x1] %v3160_v1  ;;  %419 = vst [vmem:[#allocation2 + $0xd1] sm:$0x1] %v3160_v1  ;;  %2901 = vmatprep.subr.bf16.mxu1 %v3160_v1  ;;  %v3442_v61 = vld [vmem:[%s5151_s1 + $0x3] ss:$0 sm:$0xff]  ;;  %v3456_v3 = vmul.f32 %v3437_v60, %v767_v58  ;;  %v3459_v4 = vmul.f32 %v3437_v60, %v768_v59  ;;  %v3463_v5 = vmul.f32 %v3302_v8, %v3437_v60 }
  0x1b   : > { %420 = vst [vmem:[#allocation2 + $0xe9] sm:$0x1] %v3160_v1  ;;  %421 = vst [vmem:[#allocation2 + $0x101] sm:$0x1] %v3160_v1  ;;  %v3447_v62 = vld [vmem:[%s5151_s1 + $0x6] ss:$0 sm:$0xff]  ;;  %v3474_v13 = vmul.f32 %v3304_v9, %v3437_v60  ;;  %v3478_v14 = vmul.f32 %v3306_v10, %v3437_v60  ;;  %v3482_v19 = vmul.f32 %v3308_v11, %v3437_v60 }
  0x1c   : > { %422 = vst [vmem:[#allocation2 + $0x119] sm:$0x1] %v3160_v1  ;;  %423 = vst [vmem:[#allocation2 + $0x131] sm:$0x1] %v3160_v1  ;;  %v3450_v0 = vmul.f32 0.0, %v3432_v57  ;;  %v3453_v2 = vmul.f32 0.0, %v3447_v62 }
  0x1d   : > { %424 = vst [vmem:[#allocation2 + $0x149] sm:$0x1] %v3160_v1  ;;  %425 = vst [vmem:[#allocation2 + $0x161] sm:$0x1] %v3160_v1  ;;  %2902 = vmatpush3.bf16.msra.mxu1 %v2995_v41 }
  0x1e   : > { %426 = vst [vmem:[#allocation2 + $0x179] sm:$0x1] %v3160_v1  ;;  %427 = vst [vmem:[#allocation2 + $0x191] sm:$0x1] %v3160_v1  ;;  %2903 = vmatprep.subr.bf16.mxu1 %v3160_v1 }
  0x1f   : > { %5316 = vst [vmem:[#allocation3_spill] sm:$0xff] %v3302_v8  ;;  %5317 = vst [vmem:[#allocation4_spill] sm:$0xff] %v3304_v9 }
  0x20   : > { %5318 = vst [vmem:[#allocation5_spill] sm:$0xff] %v3306_v10  ;;  %5319 = vst [vmem:[#allocation6_spill] sm:$0xff] %v3308_v11 }
  0x21   : > { %5320 = vst [vmem:[#allocation7_spill] sm:$0xff] %v3313_v15  ;;  %5321 = vst [vmem:[#allocation8_spill] sm:$0xff] %v3315_v16  ;;  %2904 = vmatpush3.bf16.msra.mxu1 %v2996_v54 }
  0x22   : > { %5322 = vst [vmem:[#allocation9_spill] sm:$0xff] %v3317_v17  ;;  %5323 = vst [vmem:[#allocation10_spill] sm:$0xff] %v3319_v18  ;;  %2905 = vmatprep.subr.bf16.mxu1 %v3160_v1 }
  0x23   : > { %5324 = vst [vmem:[#allocation11_spill] sm:$0xff] %v3325_v22  ;;  %5325 = vst [vmem:[#allocation12_spill] sm:$0xff] %v3327_v23 }
  0x24   : > { %5326 = vst [vmem:[#allocation13_spill] sm:$0xff] %v3329_v24  ;;  %5327 = vst [vmem:[#allocation14_spill] sm:$0xff] %v3331_v25 }
  0x25   : > { %492 = vst [vmem:[#allocation2 + $0x19] sm:$0xff] %v3302_v8  ;;  %493 = vst [vmem:[#allocation2 + $0x21] sm:$0xff] %v3304_v9  ;;  %2906 = vmatpush3.bf16.msra.mxu1 %v2997_v55 }
  0x26   : > { %494 = vst [vmem:[#allocation2 + $0x31] sm:$0xff] %v3306_v10  ;;  %495 = vst [vmem:[#allocation2 + $0x39] sm:$0xff] %v3308_v11  ;;  %2907 = vmatprep.subr.bf16.mxu1 %v3160_v1 }
  0x27   : > { %5328 = vst [vmem:[#allocation15_spill] sm:$0xff] %v3340_v29  ;;  %5329 = vst [vmem:[#allocation16_spill] sm:$0xff] %v3342_v30 }
  0x28   : > { %5330 = vst [vmem:[#allocation17_spill] sm:$0xff] %v3344_v31  ;;  %5331 = vst [vmem:[#allocation18_spill] sm:$0xff] %v3346_v32 }
  0x29   : > { %496 = vst [vmem:[#allocation2 + $0x49] sm:$0xff] %v3313_v15  ;;  %497 = vst [vmem:[#allocation2 + $0x51] sm:$0xff] %v3315_v16  ;;  %2908 = vmatpush3.bf16.msra.mxu1 %v2998_v56 }
  0x2a   : > { %498 = vst [vmem:[#allocation2 + $0x61] sm:$0xff] %v3317_v17  ;;  %499 = vst [vmem:[#allocation2 + $0x69] sm:$0xff] %v3319_v18  ;;  %2913 = vmatprep.subr.bf16.mxu1 %v3160_v1 }
  0x2b   : > { %5332 = vst [vmem:[#allocation19_spill] sm:$0xff] %v3354_v35  ;;  %5333 = vst [vmem:[#allocation20_spill] sm:$0xff] %v3356_v36 }
  0x2c   : > { %5334 = vst [vmem:[#allocation21_spill] sm:$0xff] %v3358_v37  ;;  %5335 = vst [vmem:[#allocation22_spill] sm:$0xff] %v3360_v38  ;;  %v526_v63 = vld [vmem:[#allocation2 + $0x18] sm:$0xff]  ;;  %v527_v1 = vld [vmem:[#allocation2 + $0x20] sm:$0xff] }
  0x2d   : > { %500 = vst [vmem:[#allocation2 + $0x79] sm:$0xff] %v3325_v22  ;;  %501 = vst [vmem:[#allocation2 + $0x81] sm:$0xff] %v3327_v23  ;;  %v3465_v6 = vld [vmem:[#allocation2 + $0x30] sm:$0xff]  ;;  %v3467_v7 = vld [vmem:[#allocation2 + $0x38] sm:$0xff]  ;;  %v3470_v12 = vmul.f32 %v3432_v57, %v526_v63  ;;  %v3491_v27 = vmul.f32 %v3432_v57, %v527_v1  ;;  %v3502_v34 = vmul.f32 %v3442_v61, %v526_v63 }
  0x2e   : > { %502 = vst [vmem:[#allocation2 + $0x91] sm:$0xff] %v3329_v24  ;;  %503 = vst [vmem:[#allocation2 + $0x99] sm:$0xff] %v3331_v25  ;;  %v3495_v28 = vmul.f32 %v3432_v57, %v3465_v6  ;;  %v3499_v33 = vmul.f32 %v3432_v57, %v3467_v7  ;;  %v3523_v58 = vmul.f32 %v3442_v61, %v527_v1 }
  0x2f   : > { %5336 = vst [vmem:[#allocation23_spill] sm:$0xff] %v3371_v42  ;;  %5337 = vst [vmem:[#allocation24_spill] sm:$0xff] %v3373_v43  ;;  %v3545_v1 = vmul.f32 %v3442_v61, %v3465_v6 }
  0x30   : > { %5338 = vst [vmem:[#allocation25_spill] sm:$0xff] %v3375_v44  ;;  %5339 = vst [vmem:[#allocation26_spill] sm:$0xff] %v3377_v45  ;;  %v3484_v20 = vld [vmem:[#allocation2 + $0x48] sm:$0xff]  ;;  %v3486_v21 = vld [vmem:[#allocation2 + $0x50] sm:$0xff] }
  0x31   : > { %504 = vst [vmem:[#allocation2 + $0xa9] sm:$0xff] %v3340_v29  ;;  %505 = vst [vmem:[#allocation2 + $0xb1] sm:$0xff] %v3342_v30  ;;  %v3488_v26 = vld [vmem:[#allocation2 + $0x60] sm:$0xff]  ;;  %v3504_v39 = vld [vmem:[#allocation2 + $0x68] sm:$0xff]  ;;  %v3512_v54 = vmul.f32 %v3432_v57, %v3484_v20  ;;  %v3516_v55 = vmul.f32 %v3432_v57, %v3486_v21 }
  0x32   : > { %506 = vst [vmem:[#allocation2 + $0xc1] sm:$0xff] %v3344_v31  ;;  %507 = vst [vmem:[#allocation2 + $0xc9] sm:$0xff] %v3346_v32  ;;  %v3520_v56 = vmul.f32 %v3432_v57, %v3488_v26  ;;  %v640_v24 = vmul.f32 %v3442_v61, %v3488_v26 }
  0x33   : > { %5340 = vst [vmem:[#allocation27_spill] sm:$0xff] %v3384_v46  ;;  %5341 = vst [vmem:[#allocation28_spill] sm:$0xff] %v3386_v47 }
  0x34   : > { %5342 = vst [vmem:[#allocation29_spill] sm:$0xff] %v3388_v48  ;;  %5343 = vst [vmem:[#allocation30_spill] sm:$0xff] %v3390_v49  ;;  %v3506_v40 = vld [vmem:[#allocation2 + $0x78] sm:$0xff]  ;;  %v3508_v41 = vld [vmem:[#allocation2 + $0x80] sm:$0xff] }
  0x35   : > { %508 = vst [vmem:[#allocation2 + $0xd9] sm:$0xff] %v3354_v35  ;;  %509 = vst [vmem:[#allocation2 + $0xe1] sm:$0xff] %v3356_v36  ;;  %v3525_v59 = vld [vmem:[#allocation2 + $0x90] sm:$0xff]  ;;  %v3527_v63 = vld [vmem:[#allocation2 + $0x98] sm:$0xff]  ;;  %v3537_v11 = vmul.f32 %v3432_v57, %v3506_v40  ;;  %v3541_v10 = vmul.f32 %v3432_v57, %v3508_v41  ;;  %v639_v36 = vmul.f32 %v3442_v61, %v3486_v21 }
  0x36   : > { %510 = vst [vmem:[#allocation2 + $0xf1] sm:$0xff] %v3358_v37  ;;  %511 = vst [vmem:[#allocation2 + $0xf9] sm:$0xff] %v3360_v38 }
  0x37   : > { %5344 = vst [vmem:[#allocation31_spill] sm:$0xff] %v3396_v50  ;;  %5345 = vst [vmem:[#allocation32_spill] sm:$0xff] %v3398_v51 }
  0x38   : > { %5346 = vst [vmem:[#allocation33_spill] sm:$0xff] %v3400_v52  ;;  %5347 = vst [vmem:[#allocation34_spill] sm:$0xff] %v3402_v53  ;;  %v3547_v9 = vld [vmem:[#allocation2 + $0xb0] sm:$0xff] }
  0x39   : > { %512 = vst [vmem:[#allocation2 + $0x109] sm:$0xff] %v3371_v42  ;;  %513 = vst [vmem:[#allocation2 + $0x111] sm:$0xff] %v3373_v43  ;;  %v3549_v8 = vld [vmem:[#allocation2 + $0xc0] sm:$0xff] }
  0x3a   : > { %514 = vst [vmem:[#allocation2 + $0x121] sm:$0xff] %v3375_v44  ;;  %515 = vst [vmem:[#allocation2 + $0x129] sm:$0xff] %v3377_v45 }
  0x3b   : > { %516 = vst [vmem:[#allocation2 + $0x139] sm:$0xff] %v3384_v46  ;;  %517 = vst [vmem:[#allocation2 + $0x141] sm:$0xff] %v3386_v47  ;;  %v638_v46 = vmul.f32 %v3442_v61, %v3484_v20 }
  0x3c   : > { %518 = vst [vmem:[#allocation2 + $0x151] sm:$0xff] %v3388_v48  ;;  %519 = vst [vmem:[#allocation2 + $0x159] sm:$0xff] %v3390_v49  ;;  %v3577_v49 = vmul.f32 %v3432_v57, %v3547_v9  ;;  %v3581_v48 = vmul.f32 %v3432_v57, %v3549_v8 }
  0x3d   : > { %520 = vst [vmem:[#allocation2 + $0x169] sm:$0xff] %v3396_v50  ;;  %521 = vst [vmem:[#allocation2 + $0x171] sm:$0xff] %v3398_v51  ;;  %v3571_v51 = vld [vmem:[#allocation2 + $0xe0] sm:$0xff]  ;;  %v3573_v50 = vld [vmem:[#allocation2 + $0xf0] sm:$0xff] }
  0x3e   : > { %522 = vst [vmem:[#allocation2 + $0x181] sm:$0xff] %v3400_v52  ;;  %523 = vst [vmem:[#allocation2 + $0x189] sm:$0xff] %v3402_v53  ;;  %v3529_v53 = vld [vmem:[#allocation2 + $0xa8] sm:$0xff]  ;;  %v3533_v52 = vmul.f32 %v3432_v57, %v3504_v39  ;;  %v3589_v45 = vld [vmem:[#allocation2 + $0xf8] sm:$0xff]  ;;  %v3601_v38 = vmul.f32 %v3432_v57, %v3571_v51  ;;  %v3605_v37 = vmul.f32 %v3432_v57, %v3573_v50 }
  0x3f   : > { %5348 = vst [vmem:[#allocation35_spill] sm:$0xff] %v3437_v60  ;;  %5349 = vst [vmem:[#allocation36_spill] sm:$0xff] %v3447_v62  ;;  %v3617_v30 = vmul.f32 %v3432_v57, %v3589_v45  ;;  %v641_v60 = vmul.f32 %v3442_v61, %v3504_v39  ;;  %v642_v62 = vmul.f32 %v3442_v61, %v3506_v40 }
  0x40   : > { %5350 = vst [vmem:[#allocation37_spill] sm:$0xff] %v3453_v2  ;;  %5351 = vst [vmem:[#allocation38_spill] sm:$0xff] %v3456_v3  ;;  %v3569_v3 = vld [vmem:[#allocation2 + $0xd8] sm:$0xff]  ;;  %v3591_v44 = vld [vmem:[#allocation2 + $0x108] sm:$0xff] }
  0x41   : > { %5352 = vst [vmem:[#allocation39_spill] sm:$0xff] %v3459_v4  ;;  %5353 = vst [vmem:[#allocation40_spill] sm:$0xff] %v3463_v5  ;;  %v3563_v5 = vmul.f32 %v3432_v57, %v3529_v53  ;;  %v3567_v4 = vmul.f32 %v3442_v61, %v3467_v7  ;;  %v3593_v43 = vld [vmem:[#allocation2 + $0x110] sm:$0xff]  ;;  %v3597_v42 = vmul.f32 %v3432_v57, %v3569_v3  ;;  %v3609_v35 = vld [vmem:[#allocation2 + $0x120] sm:$0xff] }
  0x42   : > { %5354 = vst [vmem:[#allocation41_spill] sm:$0xff] %v3465_v6  ;;  %5355 = vst [vmem:[#allocation42_spill] sm:$0xff] %v3467_v7  ;;  %v3611_v32 = vld [vmem:[#allocation2 + $0x128] sm:$0xff]  ;;  %v3613_v31 = vld [vmem:[#allocation2 + $0x138] sm:$0xff]  ;;  %v3621_v29 = vmul.f32 %v3432_v57, %v3591_v44  ;;  %v3625_v25 = vmul.f32 %v3432_v57, %v3593_v43  ;;  %v589_v17 = vmul.f32 %v3432_v57, %v3609_v35 }
  0x43   : > { %5356 = vst [vmem:[#allocation43_spill] sm:$0xff] %v3474_v13  ;;  %5357 = vst [vmem:[#allocation44_spill] sm:$0xff] %v3478_v14  ;;  %v3555_v14 = vmul.f32 %v3432_v57, %v3525_v59  ;;  %v3559_v13 = vmul.f32 %v3432_v57, %v3527_v63  ;;  %v3629_v23 = vld [vmem:[#allocation2 + $0x140] sm:$0xff]  ;;  %v3631_v22 = vld [vmem:[#allocation2 + $0x150] sm:$0xff]  ;;  %v590_v16 = vmul.f32 %v3432_v57, %v3611_v32 }
  0x44   : > { %5358 = vst [vmem:[#allocation45_spill] sm:$0xff] %v3482_v19  ;;  %5359 = vst [vmem:[#allocation46_spill] sm:$0xff] %v3484_v20  ;;  %v3551_v19 = vld [vmem:[#allocation2 + $0xc8] sm:$0xff]  ;;  %v3633_v18 = vld [vmem:[#allocation2 + $0x158] sm:$0xff]  ;;  %v591_v15 = vmul.f32 %v3432_v57, %v3613_v31  ;;  %v593_v20 = vmul.f32 %v3432_v57, %v3631_v22 }
  0x45   : > { %5360 = vst [vmem:[#allocation47_spill] sm:$0xff] %v3486_v21  ;;  %5361 = vst [vmem:[#allocation48_spill] sm:$0xff] %v3488_v26  ;;  %v3585_v47 = vmul.f32 %v3432_v57, %v3551_v19  ;;  %v3643_v2 = vld [vmem:[#allocation2 + $0x168] sm:$0xff]  ;;  %v3645_v26 = vld [vmem:[#allocation2 + $0x170] sm:$0xff]  ;;  %v592_v21 = vmul.f32 %v3432_v57, %v3629_v23  ;;  %v594_v7 = vmul.f32 %v3432_v57, %v3633_v18 }
  0x46   : > { %5362 = vst [vmem:[#allocation49_spill] sm:$0xff] %v3504_v39  ;;  %5363 = vst [vmem:[#allocation50_spill] sm:$0xff] %v3506_v40  ;;  %v595_v6 = vmul.f32 %v3432_v57, %v3643_v2  ;;  %v596_v39 = vmul.f32 %v3432_v57, %v3645_v26  ;;  %v647_v40 = vmul.f32 %v3442_v61, %v3547_v9 }
  0x47   : > { %5364 = vst [vmem:[#allocation51_spill] sm:$0xff] %v3508_v41  ;;  %5365 = vst [vmem:[#allocation52_spill] sm:$0xff] %v3525_v59  ;;  %v649_v57 = vmul.f32 %v3442_v61, %v3551_v19 }
  0x48   : > { %5366 = vst [vmem:[#allocation53_spill] sm:$0xff] %v3527_v63  ;;  %5367 = vst [vmem:[#allocation54_spill] sm:$0xff] %v3529_v53 }
  0x49   : > { %5368 = vst [vmem:[#allocation55_spill] sm:$0xff] %v3547_v9  ;;  %5369 = vst [vmem:[#allocation56_spill] sm:$0xff] %v3549_v8  ;;  %v654_v9 = vmul.f32 %v3442_v61, %v3591_v44 }
  0x4a   : > { %5370 = vst [vmem:[#allocation57_spill] sm:$0xff] %v3551_v19  ;;  %5371 = vst [vmem:[#allocation58_spill] sm:$0xff] %v3569_v3  ;;  %v656_v19 = vmul.f32 %v3442_v61, %v3609_v35 }
  0x4b   : > { %5372 = vst [vmem:[#allocation59_spill] sm:$0xff] %v3571_v51  ;;  %5373 = vst [vmem:[#allocation60_spill] sm:$0xff] %v3573_v50 }
  0x4c   : > { %5374 = vst [vmem:[#allocation61_spill] sm:$0xff] %v3581_v48  ;;  %5375 = vst [vmem:[#allocation62_spill] sm:$0xff] %v3585_v47  ;;  %v667_v47 = vadd.f32 %v3523_v58, %v3450_v0  ;;  %v671_v48 = vadd.f32 %v639_v36, %v3499_v33  ;;  %v681_v36 = vadd.f32 %v649_v57, %v3577_v49 }
  0x4d   : > { %5376 = vst [vmem:[#allocation63_spill] sm:$0xff] %v3589_v45  ;;  %5377 = vst [vmem:[#allocation64_spill] sm:$0xff] %v3591_v44  ;;  %v660_v44 = vmul.f32 %v3442_v61, %v3631_v22 }
  0x4e   : > { %5378 = vst [vmem:[#allocation65_spill] sm:$0xff] %v3593_v43  ;;  %5379 = vst [vmem:[#allocation66_spill] sm:$0xff] %v3597_v42  ;;  %v3687_v42 = vld [vmem:[#allocation2 + $0x180] sm:$0xff] }
  0x4f   : > { %5380 = vst [vmem:[#allocation67_spill] sm:$0xff] %v3601_v38  ;;  %5381 = vst [vmem:[#allocation68_spill] sm:$0xff] %v3605_v37  ;;  %v646_v37 = vmul.f32 %v3442_v61, %v3529_v53  ;;  %v648_v38 = vmul.f32 %v3442_v61, %v3549_v8  ;;  %v653_v53 = vmul.f32 %v3442_v61, %v3589_v45 }
  0x50   : > { %5382 = vst [vmem:[#allocation69_spill] sm:$0xff] %v3609_v35  ;;  %5383 = vst [vmem:[#allocation70_spill] sm:$0xff] %v3611_v32  ;;  %v655_v8 = vmul.f32 %v3442_v61, %v3593_v43  ;;  %v659_v45 = vmul.f32 %v3442_v61, %v3629_v23  ;;  %v661_v43 = vmul.f32 %v3442_v61, %v3633_v18 }
  0x51   : > { %5384 = vst [vmem:[#allocation71_spill] sm:$0xff] %v3613_v31  ;;  %5385 = vst [vmem:[#allocation72_spill] sm:$0xff] %v3617_v30  ;;  %v645_v30 = vmul.f32 %v3442_v61, %v3527_v63  ;;  %v652_v63 = vmul.f32 %v3442_v61, %v3573_v50  ;;  %v658_v50 = vmul.f32 %v3442_v61, %v3613_v31 }
  0x52   : > { %5386 = vst [vmem:[#allocation73_spill] sm:$0xff] %v3621_v29  ;;  %5387 = vst [vmem:[#allocation74_spill] sm:$0xff] %v3625_v25  ;;  %v643_v25 = vmul.f32 %v3442_v61, %v3508_v41  ;;  %v644_v29 = vmul.f32 %v3442_v61, %v3525_v59  ;;  %v650_v41 = vmul.f32 %v3442_v61, %v3569_v3  ;;  %v3697_v3 = vld [vmem:[#allocation2 + $0x188] sm:$0xff] }
  0x53   : > { %5388 = vst [vmem:[#allocation75_spill] sm:$0xff] %v3629_v23  ;;  %5389 = vst [vmem:[#allocation76_spill] sm:$0xff] %v3631_v22  ;;  %v651_v59 = vmul.f32 %v3442_v61, %v3571_v51  ;;  %v657_v51 = vmul.f32 %v3442_v61, %v3611_v32  ;;  %v662_v35 = vmul.f32 %v3442_v61, %v3643_v2 }
  0x54   : > { %5390 = vst [vmem:[#allocation77_spill] sm:$0xff] %v3633_v18  ;;  %5391 = vst [vmem:[#allocation78_spill] sm:$0xff] %v3643_v2  ;;  %v663_v32 = vmul.f32 %v3442_v61, %v3645_v26  ;;  %v664_v31 = vmul.f32 %v3442_v61, %v3687_v42  ;;  %v665_v23 = vmul.f32 %v3442_v61, %v3697_v3 }
  0x55   : > { %5392 = vst [vmem:[#allocation79_spill] sm:$0xff] %v3645_v26  ;;  %5393 = vst [vmem:[#allocation80_spill] sm:$0xff] %v3687_v42  ;;  %v666_v22 = vadd.f32 %v3502_v34, %v3450_v0  ;;  %v668_v18 = vadd.f32 %v3545_v1, %v3470_v12  ;;  %v669_v2 = vadd.f32 %v3567_v4, %v3491_v27  ;;  %v5395_v27 = vld [vmem:[#allocation61_spill] sm:$0xff]  ;;  %v5397_v33 = vld [vmem:[#allocation66_spill] sm:$0xff] }
  0x56   : > { %5394 = vst [vmem:[#allocation81_spill] sm:$0xff] %v3697_v3  ;;  %v670_v26 = vadd.f32 %v638_v46, %v3495_v28  ;;  %v672_v42 = vadd.f32 %v640_v24, %v3512_v54  ;;  %v673_v61 = vadd.f32 %v641_v60, %v3516_v55  ;;  %v674_v3 = vadd.f32 %v642_v62, %v3520_v56  ;;  %v5396_v28 = vld [vmem:[#allocation62_spill] sm:$0xff]  ;;  %v5398_v54 = vld [vmem:[#allocation67_spill] sm:$0xff]  ;;  %v5403_v1 = vld [vmem:[#allocation41_spill] sm:$0xff] }
  0x57   : > { %v675_v34 = vadd.f32 %v643_v25, %v3533_v52  ;;  %v676_v0 = vadd.f32 %v644_v29, %v3537_v11  ;;  %v677_v58 = vadd.f32 %v645_v30, %v3541_v10  ;;  %v678_v12 = vadd.f32 %v646_v37, %v3555_v14  ;;  %v5399_v52 = vld [vmem:[#allocation68_spill] sm:$0xff] }
  0x58   : > { %v679_v4 = vadd.f32 %v647_v40, %v3559_v13  ;;  %v680_v46 = vadd.f32 %v648_v38, %v3563_v5  ;;  %v682_v24 = vadd.f32 %v650_v41, %v5395_v27  ;;  %v683_v60 = vadd.f32 %v651_v59, %v5396_v28  ;;  %v5400_v29 = vld [vmem:[#allocation72_spill] sm:$0xff]  ;;  %v5406_v27 = vld [vmem:[#allocation46_spill] sm:$0xff] }
  0x59   : > { %v684_v62 = vadd.f32 %v652_v63, %v5397_v33  ;;  %v685_v25 = vadd.f32 %v653_v53, %v5398_v54  ;;  %v686_v11 = vadd.f32 %v654_v9, %v5399_v52  ;;  %v687_v10 = vadd.f32 %v655_v8, %v5400_v29  ;;  %v5401_v30 = vld [vmem:[#allocation73_spill] sm:$0xff]  ;;  %v5402_v14 = vld [vmem:[#allocation74_spill] sm:$0xff]  ;;  %v5404_v63 = vld [vmem:[#allocation36_spill] sm:$0xff] }
  0x5a   : > { %v688_v37 = vadd.f32 %v656_v19, %v5401_v30  ;;  %v689_v13 = vadd.f32 %v657_v51, %v5402_v14  ;;  %v690_v40 = vadd.f32 %v658_v50, %v589_v17  ;;  %v691_v38 = vadd.f32 %v659_v45, %v590_v16  ;;  %v5405_v53 = vld [vmem:[#allocation42_spill] sm:$0xff]  ;;  %v5407_v19 = vld [vmem:[#allocation47_spill] sm:$0xff]  ;;  %v5408_v17 = vld [vmem:[#allocation48_spill] sm:$0xff] }
  0x5b   : > { %v692_v5 = vadd.f32 %v660_v44, %v591_v15  ;;  %v693_v49 = vadd.f32 %v661_v43, %v592_v21  ;;  %v694_v55 = vadd.f32 %v662_v35, %v593_v20  ;;  %v695_v41 = vadd.f32 %v663_v32, %v594_v7  ;;  %v5409_v16 = vld [vmem:[#allocation49_spill] sm:$0xff]  ;;  %v5411_v35 = vld [vmem:[#allocation51_spill] sm:$0xff]  ;;  %v5412_v44 = vld [vmem:[#allocation52_spill] sm:$0xff] }
  0x5c   : > { %v696_v56 = vadd.f32 %v664_v31, %v595_v6  ;;  %v697_v59 = vadd.f32 %v665_v23, %v596_v39  ;;  %v703_v57 = vmul.f32 %v5404_v63, %v5403_v1  ;;  %v704_v9 = vmul.f32 %v5404_v63, %v5405_v53  ;;  %v5410_v31 = vld [vmem:[#allocation50_spill] sm:$0xff]  ;;  %v5413_v50 = vld [vmem:[#allocation53_spill] sm:$0xff]  ;;  %v5415_v21 = vld [vmem:[#allocation55_spill] sm:$0xff] }
  0x5d   : > { %v705_v8 = vmul.f32 %v5404_v63, %v5406_v27  ;;  %v706_v51 = vmul.f32 %v5404_v63, %v5407_v19  ;;  %v707_v15 = vmul.f32 %v5404_v63, %v5408_v17  ;;  %v708_v32 = vmul.f32 %v5404_v63, %v5409_v16  ;;  %v5414_v7 = vld [vmem:[#allocation54_spill] sm:$0xff]  ;;  %v5416_v28 = vld [vmem:[#allocation56_spill] sm:$0xff]  ;;  %v5417_v54 = vld [vmem:[#allocation57_spill] sm:$0xff] }
  0x5e   : > { %v709_v23 = vmul.f32 %v5404_v63, %v5410_v31  ;;  %v710_v43 = vmul.f32 %v5404_v63, %v5411_v35  ;;  %v711_v45 = vmul.f32 %v5404_v63, %v5412_v44  ;;  %v712_v6 = vmul.f32 %v5404_v63, %v5413_v50  ;;  %v5418_v29 = vld [vmem:[#allocation58_spill] sm:$0xff]  ;;  %v5419_v14 = vld [vmem:[#allocation59_spill] sm:$0xff]  ;;  %v5420_v53 = vld [vmem:[#allocation60_spill] sm:$0xff] }
  0x5f   : > { %v713_v20 = vmul.f32 %v5404_v63, %v5414_v7  ;;  %v714_v39 = vmul.f32 %v5404_v63, %v5415_v21  ;;  %v715_v33 = vmul.f32 %v5404_v63, %v5416_v28  ;;  %v716_v52 = vmul.f32 %v5404_v63, %v5417_v54  ;;  %v5421_v19 = vld [vmem:[#allocation63_spill] sm:$0xff]  ;;  %v5422_v16 = vld [vmem:[#allocation64_spill] sm:$0xff]  ;;  %v5423_v35 = vld [vmem:[#allocation65_spill] sm:$0xff] }
  0x60   : > { %v717_v30 = vmul.f32 %v5404_v63, %v5418_v29  ;;  %v718_v1 = vmul.f32 %v5404_v63, %v5419_v14  ;;  %v719_v27 = vmul.f32 %v5404_v63, %v5420_v53  ;;  %v720_v17 = vmul.f32 %v5404_v63, %v5421_v19  ;;  %v5424_v50 = vld [vmem:[#allocation69_spill] sm:$0xff]  ;;  %v5425_v21 = vld [vmem:[#allocation70_spill] sm:$0xff]  ;;  %v5426_v54 = vld [vmem:[#allocation71_spill] sm:$0xff] }
  0x61   : > { %v721_v31 = vmul.f32 %v5404_v63, %v5422_v16  ;;  %v722_v44 = vmul.f32 %v5404_v63, %v5423_v35  ;;  %v723_v7 = vmul.f32 %v5404_v63, %v5424_v50  ;;  %v724_v28 = vmul.f32 %v5404_v63, %v5425_v21  ;;  %v5427_v14 = vld [vmem:[#allocation75_spill] sm:$0xff]  ;;  %v5428_v19 = vld [vmem:[#allocation76_spill] sm:$0xff]  ;;  %v5429_v35 = vld [vmem:[#allocation77_spill] sm:$0xff] }
  0x62   : > { %v725_v29 = vmul.f32 %v5404_v63, %v5426_v54  ;;  %v726_v53 = vmul.f32 %v5404_v63, %v5427_v14  ;;  %v727_v16 = vmul.f32 %v5404_v63, %v5428_v19  ;;  %v728_v50 = vmul.f32 %v5404_v63, %v5429_v35  ;;  %v5430_v21 = vld [vmem:[#allocation78_spill] sm:$0xff]  ;;  %v5431_v14 = vld [vmem:[#allocation79_spill] sm:$0xff]  ;;  %v5432_v35 = vld [vmem:[#allocation80_spill] sm:$0xff] }
  0x63   : > { %v729_v54 = vmul.f32 %v5404_v63, %v5430_v21  ;;  %v730_v19 = vmul.f32 %v5404_v63, %v5431_v14  ;;  %v731_v21 = vmul.f32 %v5404_v63, %v5432_v35  ;;  %v5433_v14 = vld [vmem:[#allocation81_spill] sm:$0xff] }
  0x64   : > { %v732_v35 = vmul.f32 %v5404_v63, %v5433_v14  ;;  %v735_v14 = vadd.f32 %v703_v57, %v666_v22  ;;  %v736_v63 = vadd.f32 %v704_v9, %v667_v47  ;;  %v737_v22 = vadd.f32 %v705_v8, %v668_v18 }
  0x65   : > { %v738_v57 = vadd.f32 %v706_v51, %v669_v2  ;;  %v739_v9 = vadd.f32 %v707_v15, %v670_v26  ;;  %v740_v47 = vadd.f32 %v708_v32, %v671_v48  ;;  %v741_v8 = vadd.f32 %v709_v23, %v672_v42 }
  0x66   : > { %v742_v18 = vadd.f32 %v710_v43, %v673_v61  ;;  %v743_v2 = vadd.f32 %v711_v45, %v674_v3  ;;  %v744_v51 = vadd.f32 %v712_v6, %v675_v34  ;;  %v745_v15 = vadd.f32 %v713_v20, %v676_v0 }
  0x67   : > { %v746_v26 = vadd.f32 %v714_v39, %v677_v58  ;;  %v747_v32 = vadd.f32 %v715_v33, %v678_v12  ;;  %v748_v48 = vadd.f32 %v716_v52, %v679_v4  ;;  %v749_v23 = vadd.f32 %v717_v30, %v680_v46  ;;  %v5434_v30 = vld [vmem:[#allocation37_spill] sm:$0xff] }
  0x68   : > { %v750_v42 = vadd.f32 %v718_v1, %v681_v36  ;;  %v751_v43 = vadd.f32 %v719_v27, %v682_v24  ;;  %v752_v61 = vadd.f32 %v720_v17, %v683_v60  ;;  %v753_v3 = vadd.f32 %v721_v31, %v684_v62  ;;  %v5435_v36 = vld [vmem:[#allocation35_spill] sm:$0xff]  ;;  %v5437_v60 = vld [vmem:[#allocation8_spill] sm:$0xff] }
  0x69   : > { %v754_v45 = vadd.f32 %v722_v44, %v685_v25  ;;  %v755_v6 = vadd.f32 %v723_v7, %v686_v11  ;;  %v756_v34 = vadd.f32 %v724_v28, %v687_v10  ;;  %v757_v0 = vadd.f32 %v725_v29, %v688_v37  ;;  %v5436_v24 = vld [vmem:[#allocation7_spill] sm:$0xff]  ;;  %v5438_v25 = vld [vmem:[#allocation9_spill] sm:$0xff]  ;;  %v5439_v10 = vld [vmem:[#allocation10_spill] sm:$0xff] }
  0x6a   : > { %v758_v20 = vadd.f32 %v726_v53, %v689_v13  ;;  %v759_v39 = vadd.f32 %v727_v16, %v690_v40  ;;  %v760_v58 = vadd.f32 %v728_v50, %v691_v38  ;;  %v761_v12 = vadd.f32 %v729_v54, %v692_v5  ;;  %v5440_v13 = vld [vmem:[#allocation11_spill] sm:$0xff]  ;;  %v5441_v38 = vld [vmem:[#allocation12_spill] sm:$0xff]  ;;  %v5446_v7 = vld [vmem:[#allocation17_spill] sm:$0xff] }
  0x6b   : > { %v762_v33 = vadd.f32 %v730_v19, %v693_v49  ;;  %v763_v4 = vadd.f32 %v731_v21, %v694_v55  ;;  %v764_v52 = vadd.f32 %v732_v35, %v695_v41  ;;  %v765_v46 = vadd.f32 %v5434_v30, %v696_v56  ;;  %v5442_v49 = vld [vmem:[#allocation13_spill] sm:$0xff]  ;;  %v5443_v41 = vld [vmem:[#allocation14_spill] sm:$0xff]  ;;  %v5445_v31 = vld [vmem:[#allocation16_spill] sm:$0xff] }
  0x6c   : > { %v766_v1 = vadd.f32 %v5434_v30, %v697_v59  ;;  %v814_v27 = vmul.f32 %v5436_v24, %v5435_v36  ;;  %v815_v62 = vmul.f32 %v5437_v60, %v5435_v36  ;;  %v816_v11 = vmul.f32 %v5438_v25, %v5435_v36  ;;  %v5444_v59 = vld [vmem:[#allocation15_spill] sm:$0xff]  ;;  %v5447_v29 = vld [vmem:[#allocation18_spill] sm:$0xff]  ;;  %v5449_v54 = vld [vmem:[#allocation20_spill] sm:$0xff] }
  0x6d   : > { %v817_v37 = vmul.f32 %v5439_v10, %v5435_v36  ;;  %v818_v40 = vmul.f32 %v5440_v13, %v5435_v36  ;;  %v819_v5 = vmul.f32 %v5441_v38, %v5435_v36  ;;  %v820_v55 = vmul.f32 %v5442_v49, %v5435_v36  ;;  %v5448_v16 = vld [vmem:[#allocation19_spill] sm:$0xff]  ;;  %v5450_v21 = vld [vmem:[#allocation21_spill] sm:$0xff]  ;;  %v5451_v30 = vld [vmem:[#allocation22_spill] sm:$0xff] }
  0x6e   : > { %v821_v56 = vmul.f32 %v5443_v41, %v5435_v36  ;;  %v822_v17 = vmul.f32 %v5444_v59, %v5435_v36  ;;  %v823_v44 = vmul.f32 %v5445_v31, %v5435_v36  ;;  %v824_v28 = vmul.f32 %v5446_v7, %v5435_v36  ;;  %v5452_v31 = vld [vmem:[#allocation23_spill] sm:$0xff]  ;;  %v5453_v7 = vld [vmem:[#allocation24_spill] sm:$0xff] }
  0x6f   : > { %v825_v53 = vmul.f32 %v5447_v29, %v5435_v36  ;;  %v826_v50 = vmul.f32 %v5448_v16, %v5435_v36  ;;  %v827_v19 = vmul.f32 %v5449_v54, %v5435_v36  ;;  %v828_v35 = vmul.f32 %v5450_v21, %v5435_v36  ;;  %v5454_v29 = vld [vmem:[#allocation25_spill] sm:$0xff]  ;;  %v5455_v16 = vld [vmem:[#allocation26_spill] sm:$0xff]  ;;  %v5456_v54 = vld [vmem:[#allocation27_spill] sm:$0xff] }
  0x70   : > { %v829_v59 = vmul.f32 %v5451_v30, %v5435_v36  ;;  %v830_v41 = vmul.f32 %v5452_v31, %v5435_v36  ;;  %v831_v49 = vmul.f32 %v5453_v7, %v5435_v36  ;;  %v832_v38 = vmul.f32 %v5454_v29, %v5435_v36  ;;  %v5457_v21 = vld [vmem:[#allocation28_spill] sm:$0xff]  ;;  %v5458_v30 = vld [vmem:[#allocation29_spill] sm:$0xff]  ;;  %v5459_v31 = vld [vmem:[#allocation30_spill] sm:$0xff] }
  0x71   : > { %v833_v13 = vmul.f32 %v5455_v16, %v5435_v36  ;;  %v834_v10 = vmul.f32 %v5456_v54, %v5435_v36  ;;  %v835_v25 = vmul.f32 %v5457_v21, %v5435_v36  ;;  %v836_v60 = vmul.f32 %v5458_v30, %v5435_v36  ;;  %v5460_v7 = vld [vmem:[#allocation31_spill] sm:$0xff]  ;;  %v5461_v16 = vld [vmem:[#allocation32_spill] sm:$0xff]  ;;  %v5462_v21 = vld [vmem:[#allocation38_spill] sm:$0xff] }
  0x72   : > { %v837_v24 = vmul.f32 %v5459_v31, %v5435_v36  ;;  %v838_v29 = vmul.f32 %v5460_v7, %v5435_v36  ;;  %v839_v54 = vmul.f32 %v5461_v16, %v5435_v36  ;;  %v3852_v30 = vadd.f32 %v5462_v21, %v735_v14  ;;  %v5464_v31 = vld [vmem:[#allocation39_spill] sm:$0xff]  ;;  %v5466_v16 = vld [vmem:[#allocation40_spill] sm:$0xff] }
  0x73   : > { %v3855_v7 = vadd.f32 %v5464_v31, %v736_v63  ;;  %v3858_v36 = vadd.f32 %v5466_v16, %v737_v22  ;;  %v5468_v14 = vld [vmem:[#allocation43_spill] sm:$0xff]  ;;  %v5472_v63 = vld [vmem:[#allocation45_spill] sm:$0xff]  ;;  %v3869_v16 = vadd.f32 %v814_v27, %v741_v8  ;;  %v3871_v22 = vadd.f32 %v815_v62, %v742_v18 }
  0x74   : > { %5463 = vst [vmem:[#allocation61_spill] sm:$0xff] %v3852_v30  ;;  %v3861_v21 = vadd.f32 %v5468_v14, %v738_v57  ;;  %v5470_v30 = vld [vmem:[#allocation44_spill] sm:$0xff]  ;;  %v3875_v14 = vadd.f32 %v817_v37, %v744_v51  ;;  %v3877_v57 = vadd.f32 %v818_v40, %v745_v15  ;;  %v3889_v8 = vadd.f32 %v824_v28, %v751_v43  ;;  %v5482_v27 = vld [vmem:[#allocation3_spill] sm:$0xff]  ;;  %v5496_v28 = vld [vmem:[#allocation17_spill] sm:$0xff] }
  0x75   : > { %5465 = vst [vmem:[#allocation62_spill] sm:$0xff] %v3855_v7  ;;  %5467 = vst [vmem:[#allocation66_spill] sm:$0xff] %v3858_v36  ;;  %v3864_v31 = vadd.f32 %v5470_v30, %v739_v9  ;;  %v3867_v7 = vadd.f32 %v5472_v63, %v740_v47  ;;  %v3873_v36 = vadd.f32 %v816_v11, %v743_v2 }
  0x76   : > { %5469 = vst [vmem:[#allocation67_spill] sm:$0xff] %v3861_v21  ;;  %v3879_v21 = vadd.f32 %v819_v5, %v746_v26  ;;  %v3881_v9 = vadd.f32 %v820_v55, %v747_v32  ;;  %v3883_v30 = vadd.f32 %v821_v56, %v748_v48  ;;  %v3887_v47 = vadd.f32 %v823_v44, %v750_v42  ;;  %v2497_v48 = vld [vmem:[%s5151_s1 + $0x4] ss:$0 sm:$0xff]  ;;  %v5493_v55 = vld [vmem:[#allocation14_spill] sm:$0xff]  ;;  %v5494_v56 = vld [vmem:[#allocation15_spill] sm:$0xff] }
  0x77   : > { %5471 = vst [vmem:[#allocation68_spill] sm:$0xff] %v3864_v31  ;;  %v3885_v31 = vadd.f32 %v822_v17, %v749_v23  ;;  %v3891_v18 = vadd.f32 %v825_v53, %v752_v61  ;;  %v3893_v2 = vadd.f32 %v826_v50, %v753_v3  ;;  %v3895_v51 = vadd.f32 %v827_v19, %v754_v45  ;;  %v5492_v5 = vld [vmem:[#allocation13_spill] sm:$0xff]  ;;  %v5495_v17 = vld [vmem:[#allocation16_spill] sm:$0xff]  ;;  %v5497_v53 = vld [vmem:[#allocation18_spill] sm:$0xff] }
  0x78   : > { %v3897_v15 = vadd.f32 %v828_v35, %v755_v6  ;;  %v3899_v26 = vadd.f32 %v829_v59, %v756_v34  ;;  %v3901_v32 = vadd.f32 %v830_v41, %v757_v0  ;;  %v3906_v23 = vadd.f32 %v831_v49, %v758_v20  ;;  %v5483_v20 = vld [vmem:[#allocation4_spill] sm:$0xff] }
  0x79   : > { %v3908_v42 = vadd.f32 %v832_v38, %v759_v39  ;;  %v3910_v43 = vadd.f32 %v833_v13, %v760_v58  ;;  %v3912_v61 = vadd.f32 %v834_v10, %v761_v12  ;;  %v3914_v3 = vadd.f32 %v835_v25, %v762_v33  ;;  %v5484_v39 = vld [vmem:[#allocation5_spill] sm:$0xff]  ;;  %v5485_v58 = vld [vmem:[#allocation6_spill] sm:$0xff]  ;;  %v5486_v12 = vld [vmem:[#allocation7_spill] sm:$0xff] }
  0x7a   : > { %5473 = vst [vmem:[#allocation72_spill] sm:$0xff] %v3906_v23  ;;  %v3916_v45 = vadd.f32 %v836_v60, %v763_v4  ;;  %v3918_v6 = vadd.f32 %v837_v24, %v764_v52  ;;  %v3920_v34 = vadd.f32 %v838_v29, %v765_v46  ;;  %v3922_v0 = vadd.f32 %v839_v54, %v766_v1  ;;  %v5487_v33 = vld [vmem:[#allocation8_spill] sm:$0xff]  ;;  %v5488_v4 = vld [vmem:[#allocation9_spill] sm:$0xff]  ;;  %v5489_v52 = vld [vmem:[#allocation10_spill] sm:$0xff] }
  0x7b   : > { %5474 = vst [vmem:[#allocation73_spill] sm:$0xff] %v3908_v42  ;;  %5475 = vst [vmem:[#allocation74_spill] sm:$0xff] %v3910_v43  ;;  %v877_v62 = vmul.f32 %v5482_v27, %v2497_v48  ;;  %v878_v11 = vmul.f32 %v5483_v20, %v2497_v48  ;;  %v879_v37 = vmul.f32 %v5484_v39, %v2497_v48  ;;  %v5490_v46 = vld [vmem:[#allocation11_spill] sm:$0xff]  ;;  %v5491_v1 = vld [vmem:[#allocation12_spill] sm:$0xff] }
  0x7c   : > { %5476 = vst [vmem:[#allocation41_spill] sm:$0xff] %v3912_v61  ;;  %5477 = vst [vmem:[#allocation36_spill] sm:$0xff] %v3914_v3  ;;  %v880_v13 = vmul.f32 %v5485_v58, %v2497_v48  ;;  %v881_v10 = vmul.f32 %v5486_v12, %v2497_v48  ;;  %v882_v25 = vmul.f32 %v5487_v33, %v2497_v48  ;;  %v5498_v54 = vld [vmem:[#allocation19_spill] sm:$0xff]  ;;  %v5499_v35 = vld [vmem:[#allocation20_spill] sm:$0xff] }
  0x7d   : > { %5478 = vst [vmem:[#allocation42_spill] sm:$0xff] %v3916_v45  ;;  %5479 = vst [vmem:[#allocation46_spill] sm:$0xff] %v3918_v6  ;;  %v883_v60 = vmul.f32 %v5488_v4, %v2497_v48  ;;  %v884_v24 = vmul.f32 %v5489_v52, %v2497_v48  ;;  %v885_v40 = vmul.f32 %v5490_v46, %v2497_v48  ;;  %v5500_v27 = vld [vmem:[#allocation21_spill] sm:$0xff]  ;;  %v5501_v46 = vld [vmem:[#allocation22_spill] sm:$0xff] }
  0x7e   : > { %5480 = vst [vmem:[#allocation47_spill] sm:$0xff] %v3920_v34  ;;  %5481 = vst [vmem:[#allocation48_spill] sm:$0xff] %v3922_v0  ;;  %v886_v38 = vmul.f32 %v5491_v1, %v2497_v48  ;;  %v887_v49 = vmul.f32 %v5492_v5, %v2497_v48  ;;  %v888_v41 = vmul.f32 %v5493_v55, %v2497_v48  ;;  %v5502_v52 = vld [vmem:[#allocation23_spill] sm:$0xff]  ;;  %v5503_v4 = vld [vmem:[#allocation24_spill] sm:$0xff] }
  0x7f   : > { %v889_v59 = vmul.f32 %v5494_v56, %v2497_v48  ;;  %v890_v44 = vmul.f32 %v5495_v17, %v2497_v48  ;;  %v891_v29 = vmul.f32 %v5496_v28, %v2497_v48  ;;  %v892_v50 = vmul.f32 %v5497_v53, %v2497_v48  ;;  %v5504_v33 = vld [vmem:[#allocation25_spill] sm:$0xff]  ;;  %v5505_v12 = vld [vmem:[#allocation26_spill] sm:$0xff]  ;;  %v5506_v58 = vld [vmem:[#allocation27_spill] sm:$0xff] }
  0x80   : > { %v893_v19 = vmul.f32 %v5498_v54, %v2497_v48  ;;  %v894_v63 = vmul.f32 %v5499_v35, %v2497_v48  ;;  %v895_v20 = vmul.f32 %v5500_v27, %v2497_v48  ;;  %v896_v1 = vmul.f32 %v5501_v46, %v2497_v48  ;;  %v5507_v39 = vld [vmem:[#allocation28_spill] sm:$0xff]  ;;  %v5508_v0 = vld [vmem:[#allocation29_spill] sm:$0xff]  ;;  %v5509_v34 = vld [vmem:[#allocation30_spill] sm:$0xff] }
  0x81   : > { %v897_v5 = vmul.f32 %v5502_v52, %v2497_v48  ;;  %v898_v55 = vmul.f32 %v5503_v4, %v2497_v48  ;;  %v899_v56 = vmul.f32 %v5504_v33, %v2497_v48  ;;  %v900_v17 = vmul.f32 %v5505_v12, %v2497_v48  ;;  %v5510_v6 = vld [vmem:[#allocation31_spill] sm:$0xff]  ;;  %v5511_v45 = vld [vmem:[#allocation32_spill] sm:$0xff]  ;;  %v5512_v3 = vld [vmem:[#allocation33_spill] sm:$0xff] }
  0x82   : > { %v901_v28 = vmul.f32 %v5506_v58, %v2497_v48  ;;  %v902_v53 = vmul.f32 %v5507_v39, %v2497_v48  ;;  %v903_v54 = vmul.f32 %v5508_v0, %v2497_v48  ;;  %v904_v35 = vmul.f32 %v5509_v34, %v2497_v48  ;;  %v5513_v61 = vld [vmem:[#allocation34_spill] sm:$0xff]  ;;  %v5514_v43 = vld [vmem:[#allocation61_spill] sm:$0xff]  ;;  %v5517_v0 = vld [vmem:[#allocation67_spill] sm:$0xff] }
  0x83   : > { %v905_v27 = vmul.f32 %v5510_v6, %v2497_v48  ;;  %v906_v46 = vmul.f32 %v5511_v45, %v2497_v48  ;;  %v907_v52 = vmul.f32 %v5512_v3, %v2497_v48  ;;  %v908_v4 = vmul.f32 %v5513_v61, %v2497_v48  ;;  %v5515_v12 = vld [vmem:[#allocation62_spill] sm:$0xff]  ;;  %v5518_v34 = vld [vmem:[#allocation68_spill] sm:$0xff] }
  0x84   : > { %v3957_v33 = vadd.f32 %v877_v62, %v5514_v43  ;;  %v3960_v42 = vadd.f32 %v878_v11, %v5515_v12  ;;  %v5516_v58 = vld [vmem:[#allocation66_spill] sm:$0xff]  ;;  %v3966_v23 = vadd.f32 %v880_v13, %v5517_v0  ;;  %v3969_v6 = vadd.f32 %v881_v10, %v5518_v34 }
  0x85   : > { %v3963_v39 = vadd.f32 %v879_v37, %v5516_v58  ;;  %v3972_v45 = vadd.f32 %v882_v25, %v3867_v7  ;;  %v3975_v48 = vadd.f32 %v883_v60, %v3869_v16  ;;  %v3978_v43 = vadd.f32 %v884_v24, %v3871_v22  ;;  %v5534_v60 = vld [vmem:[#allocation46_spill] sm:$0xff] }
  0x86   : > { %v3981_v62 = vadd.f32 %v885_v40, %v3873_v36  ;;  %v3984_v11 = vadd.f32 %v886_v38, %v3875_v14  ;;  %v3987_v0 = vadd.f32 %v887_v49, %v3877_v57  ;;  %v3990_v34 = vadd.f32 %v888_v41, %v3879_v21  ;;  %v5536_v40 = vld [vmem:[#allocation47_spill] sm:$0xff]  ;;  %v5538_v38 = vld [vmem:[#allocation48_spill] sm:$0xff]  ;;  %v5540_v49 = vld [vmem:[#allocation5_spill] sm:$0xff] }
  0x87   : > { %v3993_v7 = vadd.f32 %v889_v59, %v3881_v9  ;;  %v3996_v16 = vadd.f32 %v890_v44, %v3883_v30  ;;  %v3999_v22 = vadd.f32 %v891_v29, %v3885_v31  ;;  %v4002_v36 = vadd.f32 %v892_v50, %v3887_v47  ;;  %v5541_v41 = vld [vmem:[#allocation6_spill] sm:$0xff]  ;;  %v5542_v59 = vld [vmem:[#allocation7_spill] sm:$0xff]  ;;  %v5543_v44 = vld [vmem:[#allocation8_spill] sm:$0xff] }
  0x88   : > { %v4005_v14 = vadd.f32 %v893_v19, %v3889_v8  ;;  %v4008_v57 = vadd.f32 %v894_v63, %v3891_v18  ;;  %v4011_v21 = vadd.f32 %v895_v20, %v3893_v2  ;;  %v4014_v9 = vadd.f32 %v896_v1, %v3895_v51  ;;  %v2498_v8 = vld [vmem:[%s5151_s1 + $0x7] ss:$0 sm:$0xff]  ;;  %v5522_v18 = vld [vmem:[#allocation72_spill] sm:$0xff]  ;;  %v5526_v51 = vld [vmem:[#allocation74_spill] sm:$0xff] }
  0x89   : > { %v4017_v30 = vadd.f32 %v897_v5, %v3897_v15  ;;  %v4020_v31 = vadd.f32 %v898_v55, %v3899_v26  ;;  %v4023_v47 = vadd.f32 %v899_v56, %v3901_v32  ;;  %v4029_v37 = vadd.f32 %v900_v17, %v5522_v18  ;;  %v5524_v2 = vld [vmem:[#allocation73_spill] sm:$0xff]  ;;  %v5530_v26 = vld [vmem:[#allocation36_spill] sm:$0xff]  ;;  %v5532_v32 = vld [vmem:[#allocation42_spill] sm:$0xff] }
  0x8a   : > { %v4032_v58 = vadd.f32 %v901_v28, %v5524_v2  ;;  %v4035_v13 = vadd.f32 %v902_v53, %v5526_v51  ;;  %v5528_v15 = vld [vmem:[#allocation41_spill] sm:$0xff]  ;;  %v4041_v10 = vadd.f32 %v904_v35, %v5530_v26  ;;  %v4044_v25 = vadd.f32 %v905_v27, %v5532_v32  ;;  %v5545_v50 = vld [vmem:[#allocation10_spill] sm:$0xff]  ;;  %v5547_v35 = vld [vmem:[#allocation12_spill] sm:$0xff] }
  0x8b   : > { %5519 = vst [vmem:[#allocation49_spill] sm:$0xff] %v4017_v30  ;;  %5520 = vst [vmem:[#allocation50_spill] sm:$0xff] %v4020_v31  ;;  %v4038_v12 = vadd.f32 %v903_v54, %v5528_v15  ;;  %v4047_v24 = vadd.f32 %v906_v46, %v5534_v60  ;;  %v4050_v1 = vadd.f32 %v907_v52, %v5536_v40  ;;  %v5544_v29 = vld [vmem:[#allocation9_spill] sm:$0xff]  ;;  %v5546_v46 = vld [vmem:[#allocation11_spill] sm:$0xff] }
  0x8c   : > { %5521 = vst [vmem:[#allocation51_spill] sm:$0xff] %v4023_v47  ;;  %5523 = vst [vmem:[#allocation52_spill] sm:$0xff] %v4029_v37  ;;  %v4053_v5 = vadd.f32 %v908_v4, %v5538_v38  ;;  %v946_v55 = vmul.f32 %v5540_v49, %v2498_v8  ;;  %v947_v56 = vmul.f32 %v5541_v41, %v2498_v8  ;;  %v5548_v63 = vld [vmem:[#allocation13_spill] sm:$0xff]  ;;  %v5549_v4 = vld [vmem:[#allocation14_spill] sm:$0xff] }
  0x8d   : > { %5525 = vst [vmem:[#allocation53_spill] sm:$0xff] %v4032_v58  ;;  %5527 = vst [vmem:[#allocation54_spill] sm:$0xff] %v4035_v13  ;;  %v948_v17 = vmul.f32 %v5542_v59, %v2498_v8  ;;  %v949_v28 = vmul.f32 %v5543_v44, %v2498_v8  ;;  %v950_v53 = vmul.f32 %v5544_v29, %v2498_v8  ;;  %v5550_v18 = vld [vmem:[#allocation15_spill] sm:$0xff]  ;;  %v5551_v51 = vld [vmem:[#allocation16_spill] sm:$0xff] }
  0x8e   : > { %5529 = vst [vmem:[#allocation55_spill] sm:$0xff] %v4038_v12  ;;  %5531 = vst [vmem:[#allocation56_spill] sm:$0xff] %v4041_v10  ;;  %v951_v54 = vmul.f32 %v5545_v50, %v2498_v8  ;;  %v952_v19 = vmul.f32 %v5546_v46, %v2498_v8  ;;  %v953_v52 = vmul.f32 %v5547_v35, %v2498_v8  ;;  %v5552_v26 = vld [vmem:[#allocation17_spill] sm:$0xff]  ;;  %v5553_v60 = vld [vmem:[#allocation18_spill] sm:$0xff] }
  0x8f   : > { %5533 = vst [vmem:[#allocation57_spill] sm:$0xff] %v4044_v25  ;;  %5535 = vst [vmem:[#allocation58_spill] sm:$0xff] %v4047_v24  ;;  %v954_v27 = vmul.f32 %v5548_v63, %v2498_v8  ;;  %v955_v20 = vmul.f32 %v5549_v4, %v2498_v8  ;;  %v956_v2 = vmul.f32 %v5550_v18, %v2498_v8  ;;  %v5554_v38 = vld [vmem:[#allocation19_spill] sm:$0xff]  ;;  %v801_v41 = vld [vmem:[#allocation2 + $0x199] sm:$0xff] }
  0x90   : > { %5537 = vst [vmem:[#allocation59_spill] sm:$0xff] %v4050_v1  ;;  %5539 = vst [vmem:[#allocation60_spill] sm:$0xff] %v4053_v5  ;;  %v957_v15 = vmul.f32 %v5551_v51, %v2498_v8  ;;  %v958_v32 = vmul.f32 %v5552_v26, %v2498_v8  ;;  %v959_v40 = vmul.f32 %v5553_v60, %v2498_v8  ;;  %v5555_v59 = vld [vmem:[#allocation20_spill] sm:$0xff]  ;;  %v5556_v29 = vld [vmem:[#allocation21_spill] sm:$0xff] }
  0x91   : > { %v960_v49 = vmul.f32 %v5554_v38, %v2498_v8  ;;  %v961_v44 = vmul.f32 %v5555_v59, %v2498_v8  ;;  %v962_v50 = vmul.f32 %v5556_v29, %v2498_v8  ;;  %v5557_v46 = vld [vmem:[#allocation22_spill] sm:$0xff]  ;;  %v5558_v63 = vld [vmem:[#allocation23_spill] sm:$0xff]  ;;  %v5559_v1 = vld [vmem:[#allocation24_spill] sm:$0xff]  ;;  %v976_v30 = vmul.f32 %v2498_v8, %v801_v41 }
  0x92   : > { %v963_v35 = vmul.f32 %v5557_v46, %v2498_v8  ;;  %v964_v5 = vmul.f32 %v5558_v63, %v2498_v8  ;;  %v802_v4 = vld [vmem:[#allocation2 + $0x1a1] sm:$0xff]  ;;  %v965_v18 = vmul.f32 %v5559_v1, %v2498_v8  ;;  %v5562_v10 = vld [vmem:[#allocation27_spill] sm:$0xff]  ;;  %v5563_v12 = vld [vmem:[#allocation28_spill] sm:$0xff]  ;;  %v974_v63 = vmul.f32 %v5512_v3, %v2498_v8 }
  0x93   : > { %v5560_v24 = vld [vmem:[#allocation25_spill] sm:$0xff]  ;;  %v5561_v25 = vld [vmem:[#allocation26_spill] sm:$0xff]  ;;  %v968_v60 = vmul.f32 %v5562_v10, %v2498_v8  ;;  %v969_v38 = vmul.f32 %v5563_v12, %v2498_v8  ;;  %v5566_v29 = vld [vmem:[#allocation31_spill] sm:$0xff]  ;;  %v975_v1 = vmul.f32 %v5513_v61, %v2498_v8  ;;  %v4089_v10 = vadd.f32 %v947_v56, %v3960_v42 }
  0x94   : > { %v966_v51 = vmul.f32 %v5560_v24, %v2498_v8  ;;  %v967_v26 = vmul.f32 %v5561_v25, %v2498_v8  ;;  %v5564_v13 = vld [vmem:[#allocation29_spill] sm:$0xff]  ;;  %v5565_v59 = vld [vmem:[#allocation30_spill] sm:$0xff]  ;;  %v972_v47 = vmul.f32 %v5566_v29, %v2498_v8  ;;  %v5567_v46 = vld [vmem:[#allocation32_spill] sm:$0xff]  ;;  %v977_v24 = vmul.f32 %v2498_v8, %v802_v4 }
  0x95   : > { %v970_v58 = vmul.f32 %v5564_v13, %v2498_v8  ;;  %v971_v37 = vmul.f32 %v5565_v59, %v2498_v8  ;;  %v973_v31 = vmul.f32 %v5567_v46, %v2498_v8  ;;  %v4086_v25 = vadd.f32 %v946_v55, %v3957_v33  ;;  %v4195_v4 = vld [vmem:[#allocation2 + $0x62] sm:$0xff] }
  0x96   : > { %v4092_v13 = vadd.f32 %v948_v17, %v3963_v39  ;;  %v4095_v12 = vadd.f32 %v949_v28, %v3966_v23  ;;  %v4098_v59 = vadd.f32 %v950_v53, %v3969_v6  ;;  %v4101_v3 = vadd.f32 %v951_v54, %v3972_v45  ;;  %v4154_v28 = vld [vmem:[#allocation2 + $0x1a] sm:$0xff]  ;;  %v5575_v54 = vld [vmem:[#allocation54_spill] sm:$0xff]  ;;  %5592 = vst [vmem:[#allocation37_spill] sm:$0xff] %v4195_v4 }
  0x97   : > { %v4104_v61 = vadd.f32 %v952_v19, %v3975_v48  ;;  %v4107_v33 = vadd.f32 %v953_v52, %v3978_v43  ;;  %v4110_v42 = vadd.f32 %v954_v27, %v3981_v62  ;;  %v4113_v39 = vadd.f32 %v955_v20, %v3984_v11  ;;  %5571 = vst [vmem:[#allocation63_spill] sm:$0xff] %v4154_v28  ;;  %v5577_v52 = vld [vmem:[#allocation55_spill] sm:$0xff]  ;;  %v4173_v20 = vld [vmem:[#allocation2 + $0x22] sm:$0xff] }
  0x98   : > { %v4116_v23 = vadd.f32 %v956_v2, %v3987_v0  ;;  %v4119_v6 = vadd.f32 %v957_v15, %v3990_v34  ;;  %v4122_v45 = vadd.f32 %v958_v32, %v3993_v7  ;;  %v4125_v48 = vadd.f32 %v959_v40, %v3996_v16  ;;  %v1010_v7 = vld [vmem:[#allocation2 + $0x2] sm:$0xff]  ;;  %5579 = vst [vmem:[#allocation70_spill] sm:$0xff] %v4173_v20  ;;  %v4175_v2 = vld [vmem:[#allocation2 + $0x32] sm:$0xff]  ;;  %v4177_v15 = vld [vmem:[#allocation2 + $0x3a] sm:$0xff] }
  0x99   : > { %v4128_v43 = vadd.f32 %v960_v49, %v3999_v22  ;;  %v4131_v62 = vadd.f32 %v961_v44, %v4002_v36  ;;  %v4134_v11 = vadd.f32 %v962_v50, %v4005_v14  ;;  %v4137_v0 = vadd.f32 %v963_v35, %v4008_v57  ;;  %v5568_v16 = vld [vmem:[#allocation49_spill] sm:$0xff]  ;;  %v5569_v22 = vld [vmem:[#allocation50_spill] sm:$0xff]  ;;  %v5570_v36 = vld [vmem:[#allocation51_spill] sm:$0xff]  ;;  %5580 = vst [vmem:[#allocation71_spill] sm:$0xff] %v4175_v2 }
  0x9a   : > { %v4140_v34 = vadd.f32 %v964_v5, %v4011_v21  ;;  %v4143_v8 = vadd.f32 %v965_v18, %v4014_v9  ;;  %v4146_v55 = vadd.f32 %v966_v51, %v5568_v16  ;;  %v4149_v56 = vadd.f32 %v967_v26, %v5569_v22  ;;  %v1011_v14 = vld [vmem:[#allocation2 + $0xa] sm:$0xff]  ;;  %v4159_v57 = vld [vmem:[%s5151_s1 + $0x2] ss:$0 sm:$0xff]  ;;  %v5572_v21 = vld [vmem:[#allocation52_spill] sm:$0xff]  ;;  %5581 = vst [vmem:[#allocation75_spill] sm:$0xff] %v4177_v15 }
  0x9b   : > { %v4152_v17 = vadd.f32 %v968_v60, %v5570_v36  ;;  %v4162_v9 = vadd.f32 %v969_v38, %v5572_v21  ;;  %v5573_v5 = vld [vmem:[#allocation53_spill] sm:$0xff]  ;;  %v4168_v19 = vadd.f32 %v971_v37, %v5575_v54  ;;  %v4171_v27 = vadd.f32 %v972_v47, %v5577_v52  ;;  %v4179_v32 = vld [vmem:[#allocation2 + $0x4a] sm:$0xff]  ;;  %v5583_v40 = vld [vmem:[#allocation56_spill] sm:$0xff] }
  0x9c   : > { %v4165_v53 = vadd.f32 %v970_v58, %v5573_v5  ;;  %5582 = vst [vmem:[#allocation76_spill] sm:$0xff] %v4179_v32  ;;  %v4182_v49 = vadd.f32 %v973_v31, %v5583_v40  ;;  %v5585_v41 = vld [vmem:[#allocation57_spill] sm:$0xff]  ;;  %v5587_v44 = vld [vmem:[#allocation58_spill] sm:$0xff]  ;;  %v5589_v50 = vld [vmem:[#allocation59_spill] sm:$0xff]  ;;  %v1051_v29 = vmul.f32 %v4159_v57, %v1010_v7  ;;  %v1053_v46 = vmul.f32 %v4159_v57, %v4154_v28 }
  0x9d   : > { %5576 = vst [vmem:[#allocation65_spill] sm:$0xff] %v4168_v19  ;;  %5578 = vst [vmem:[#allocation69_spill] sm:$0xff] %v4171_v27  ;;  %v4185_v58 = vadd.f32 %v974_v63, %v5585_v41  ;;  %v4188_v37 = vadd.f32 %v975_v1, %v5587_v44  ;;  %v4191_v47 = vadd.f32 %v976_v30, %v5589_v50  ;;  %v4193_v35 = vld [vmem:[#allocation2 + $0x52] sm:$0xff]  ;;  %v4197_v18 = vld [vmem:[#allocation2 + $0x6a] sm:$0xff] }
  0x9e   : > { %5574 = vst [vmem:[#allocation64_spill] sm:$0xff] %v4165_v53  ;;  %5584 = vst [vmem:[#allocation77_spill] sm:$0xff] %v4182_v49  ;;  %v5594_v51 = vld [vmem:[#allocation60_spill] sm:$0xff]  ;;  %v4204_v60 = vld [vmem:[#allocation2 + $0x82] sm:$0xff]  ;;  %v1052_v30 = vmul.f32 %v4159_v57, %v1011_v14  ;;  %v1055_v22 = vmul.f32 %v4159_v57, %v4175_v2  ;;  %v1056_v7 = vmul.f32 %v4159_v57, %v4177_v15 }
  0x9f   : > { %5586 = vst [vmem:[#allocation78_spill] sm:$0xff] %v4185_v58  ;;  %5588 = vst [vmem:[#allocation79_spill] sm:$0xff] %v4188_v37  ;;  %v4200_v26 = vadd.f32 %v977_v24, %v5594_v51  ;;  %v4202_v31 = vld [vmem:[#allocation2 + $0x7a] sm:$0xff]  ;;  %v4206_v38 = vld [vmem:[#allocation2 + $0x92] sm:$0xff]  ;;  %v1054_v24 = vmul.f32 %v4159_v57, %v4173_v20  ;;  %v1057_v36 = vmul.f32 %v4159_v57, %v4179_v32 }
  0xa0   : > { %5590 = vst [vmem:[#allocation80_spill] sm:$0xff] %v4191_v47  ;;  %5591 = vst [vmem:[#allocation81_spill] sm:$0xff] %v4193_v35  ;;  %v4212_v63 = vld [vmem:[#allocation2 + $0x9a] sm:$0xff]  ;;  %v4214_v1 = vld [vmem:[#allocation2 + $0xaa] sm:$0xff]  ;;  %v1058_v54 = vmul.f32 %v4159_v57, %v4193_v35  ;;  %v1059_v52 = vmul.f32 %v4159_v57, %v4195_v4  ;;  %v1060_v40 = vmul.f32 %v4159_v57, %v4197_v18 }
  0xa1   : > { %5593 = vst [vmem:[#allocation35_spill] sm:$0xff] %v4197_v18  ;;  %5595 = vst [vmem:[#allocation38_spill] sm:$0xff] %v4200_v26  ;;  %v4216_v16 = vld [vmem:[#allocation2 + $0xb2] sm:$0xff]  ;;  %v4226_v14 = vld [vmem:[#allocation2 + $0xc2] sm:$0xff]  ;;  %v1061_v41 = vmul.f32 %v4159_v57, %v4202_v31  ;;  %v1062_v32 = vmul.f32 %v4159_v57, %v4204_v60  ;;  %v1063_v35 = vmul.f32 %v4159_v57, %v4206_v38 }
  0xa2   : > { %5596 = vst [vmem:[#allocation39_spill] sm:$0xff] %v4202_v31  ;;  %5597 = vst [vmem:[#allocation40_spill] sm:$0xff] %v4204_v60  ;;  %v4228_v21 = vld [vmem:[#allocation2 + $0xca] sm:$0xff]  ;;  %v4230_v5 = vld [vmem:[#allocation2 + $0xda] sm:$0xff]  ;;  %v1064_v4 = vmul.f32 %v4159_v57, %v4212_v63  ;;  %v1065_v18 = vmul.f32 %v4159_v57, %v4214_v1  ;;  %v1066_v20 = vmul.f32 %v4159_v57, %v4216_v16 }
  0xa3   : > { %5598 = vst [vmem:[#allocation43_spill] sm:$0xff] %v4206_v38  ;;  %5599 = vst [vmem:[#allocation44_spill] sm:$0xff] %v4212_v63  ;;  %v4240_v44 = vld [vmem:[#allocation2 + $0xe2] sm:$0xff]  ;;  %v4242_v50 = vld [vmem:[#allocation2 + $0xf2] sm:$0xff]  ;;  %v1067_v60 = vmul.f32 %v4159_v57, %v4226_v14  ;;  %v1068_v38 = vmul.f32 %v4159_v57, %v4228_v21  ;;  %v1069_v63 = vmul.f32 %v4159_v57, %v4230_v5 }
  0xa4   : > { %5600 = vst [vmem:[#allocation45_spill] sm:$0xff] %v4214_v1  ;;  %5601 = vst [vmem:[#allocation3_spill] sm:$0xff] %v4216_v16  ;;  %v4244_v51 = vld [vmem:[#allocation2 + $0xfa] sm:$0xff]  ;;  %v4254_v15 = vld [vmem:[#allocation2 + $0x10a] sm:$0xff]  ;;  %v1070_v47 = vmul.f32 %v4159_v57, %v4240_v44  ;;  %v1071_v16 = vmul.f32 %v4159_v57, %v4242_v50  ;;  %v4309_v53 = vadd.f32 %v1051_v29, %v4086_v25 }
  0xa5   : > { %5602 = vst [vmem:[#allocation4_spill] sm:$0xff] %v4226_v14  ;;  %5603 = vst [vmem:[#allocation33_spill] sm:$0xff] %v4228_v21  ;;  %v4256_v31 = vld [vmem:[#allocation2 + $0x112] sm:$0xff]  ;;  %v4258_v2 = vld [vmem:[#allocation2 + $0x122] sm:$0xff]  ;;  %v1072_v14 = vmul.f32 %v4159_v57, %v4244_v51  ;;  %v1073_v21 = vmul.f32 %v4159_v57, %v4254_v15  ;;  %v4330_v25 = vadd.f32 %v1058_v54, %v4107_v33 }
  0xa6   : > { %5604 = vst [vmem:[#allocation34_spill] sm:$0xff] %v4230_v5  ;;  %5605 = vst [vmem:[#allocation61_spill] sm:$0xff] %v4240_v44  ;;  %v4268_v28 = vld [vmem:[#allocation2 + $0x12a] sm:$0xff]  ;;  %v4270_v1 = vld [vmem:[#allocation2 + $0x13a] sm:$0xff]  ;;  %v1074_v49 = vmul.f32 %v4159_v57, %v4256_v31  ;;  %v1075_v44 = vmul.f32 %v4159_v57, %v4258_v2  ;;  %v4351_v33 = vadd.f32 %v1065_v18, %v4128_v43 }
  0xa7   : > { %5606 = vst [vmem:[#allocation62_spill] sm:$0xff] %v4242_v50  ;;  %5607 = vst [vmem:[#allocation66_spill] sm:$0xff] %v4244_v51  ;;  %v4272_v26 = vld [vmem:[#allocation2 + $0x142] sm:$0xff]  ;;  %v4282_v37 = vld [vmem:[#allocation2 + $0x152] sm:$0xff]  ;;  %v1076_v50 = vmul.f32 %v4159_v57, %v4268_v28  ;;  %v1077_v51 = vmul.f32 %v4159_v57, %v4270_v1  ;;  %v4372_v43 = vadd.f32 %v1072_v14, %v4149_v56 }
  0xa8   : > { %5608 = vst [vmem:[#allocation67_spill] sm:$0xff] %v4254_v15  ;;  %5609 = vst [vmem:[#allocation68_spill] sm:$0xff] %v4256_v31  ;;  %v4284_v5 = vld [vmem:[#allocation2 + $0x15a] sm:$0xff]  ;;  %v4286_v58 = vld [vmem:[#allocation2 + $0x16a] sm:$0xff]  ;;  %v1078_v15 = vmul.f32 %v4159_v57, %v4272_v26  ;;  %v1079_v19 = vmul.f32 %v4159_v57, %v4282_v37 }
  0xa9   : > { %5610 = vst [vmem:[#allocation72_spill] sm:$0xff] %v4258_v2  ;;  %5611 = vst [vmem:[#allocation73_spill] sm:$0xff] %v4268_v28  ;;  %v4296_v27 = vld [vmem:[#allocation2 + $0x172] sm:$0xff]  ;;  %v1080_v31 = vmul.f32 %v4159_v57, %v4284_v5  ;;  %v1081_v2 = vmul.f32 %v4159_v57, %v4286_v58  ;;  %v5626_v56 = vld [vmem:[#allocation77_spill] sm:$0xff] }
  0xaa   : > { %5612 = vst [vmem:[#allocation74_spill] sm:$0xff] %v4270_v1  ;;  %5613 = vst [vmem:[#allocation41_spill] sm:$0xff] %v4272_v26  ;;  %v1082_v28 = vmul.f32 %v4159_v57, %v4296_v27  ;;  %v4312_v1 = vadd.f32 %v1052_v30, %v4089_v10  ;;  %v4315_v26 = vadd.f32 %v1053_v46, %v4092_v13  ;;  %v5630_v18 = vld [vmem:[#allocation79_spill] sm:$0xff]  ;;  %v5641_v14 = vld [vmem:[#allocation81_spill] sm:$0xff] }
  0xab   : > { %5614 = vst [vmem:[#allocation36_spill] sm:$0xff] %v4282_v37  ;;  %5615 = vst [vmem:[#allocation42_spill] sm:$0xff] %v4284_v5  ;;  %v4318_v37 = vadd.f32 %v1054_v24, %v4095_v12  ;;  %v4321_v5 = vadd.f32 %v1055_v22, %v4098_v59  ;;  %v4327_v57 = vadd.f32 %v1057_v36, %v4104_v61  ;;  %v5636_v30 = vld [vmem:[#allocation63_spill] sm:$0xff]  ;;  %v5640_v36 = vld [vmem:[#allocation76_spill] sm:$0xff] }
  0xac   : > { %5616 = vst [vmem:[#allocation46_spill] sm:$0xff] %v4286_v58  ;;  %v4324_v58 = vadd.f32 %v1056_v7, %v4101_v3  ;;  %v4333_v10 = vadd.f32 %v1059_v52, %v4110_v42  ;;  %v4336_v13 = vadd.f32 %v1060_v40, %v4113_v39  ;;  %v4339_v12 = vadd.f32 %v1061_v41, %v4116_v23  ;;  %v5638_v24 = vld [vmem:[#allocation71_spill] sm:$0xff] }
  0xad   : > { %v4342_v59 = vadd.f32 %v1062_v32, %v4119_v6  ;;  %v4345_v3 = vadd.f32 %v1063_v35, %v4122_v45  ;;  %v4348_v61 = vadd.f32 %v1064_v4, %v4125_v48  ;;  %v4354_v42 = vadd.f32 %v1066_v20, %v4131_v62  ;;  %5617 = vst [vmem:[#allocation47_spill] sm:$0xff] %v4372_v43  ;;  %v5643_v52 = vld [vmem:[#allocation35_spill] sm:$0xff] }
  0xae   : > { %v4357_v39 = vadd.f32 %v1067_v60, %v4134_v11  ;;  %v4360_v23 = vadd.f32 %v1068_v38, %v4137_v0  ;;  %v4363_v6 = vadd.f32 %v1069_v63, %v4140_v34  ;;  %v4366_v45 = vadd.f32 %v1070_v47, %v4143_v8  ;;  %v2500_v11 = vld [vmem:[%s5151_s1 + $0x5] ss:$0 sm:$0xff]  ;;  %v5620_v34 = vld [vmem:[#allocation64_spill] sm:$0xff]  ;;  %v5634_v38 = vld [vmem:[#allocation38_spill] sm:$0xff] }
  0xaf   : > { %v4369_v48 = vadd.f32 %v1071_v16, %v4146_v55  ;;  %v4375_v62 = vadd.f32 %v1073_v21, %v4152_v17  ;;  %v4381_v0 = vadd.f32 %v1074_v49, %v4162_v9  ;;  %v4384_v20 = vadd.f32 %v1075_v44, %v5620_v34  ;;  %v5622_v8 = vld [vmem:[#allocation65_spill] sm:$0xff]  ;;  %v5628_v17 = vld [vmem:[#allocation78_spill] sm:$0xff]  ;;  %v5632_v9 = vld [vmem:[#allocation80_spill] sm:$0xff] }
  0xb0   : > { %v4387_v32 = vadd.f32 %v1076_v50, %v5622_v8  ;;  %v5624_v55 = vld [vmem:[#allocation69_spill] sm:$0xff]  ;;  %v4393_v35 = vadd.f32 %v1078_v15, %v5626_v56  ;;  %v4396_v4 = vadd.f32 %v1079_v19, %v5628_v17  ;;  %v4399_v60 = vadd.f32 %v1080_v31, %v5630_v18  ;;  %v5637_v63 = vld [vmem:[#allocation70_spill] sm:$0xff]  ;;  %v5639_v15 = vld [vmem:[#allocation75_spill] sm:$0xff] }
  0xb1   : > { %5618 = vst [vmem:[#allocation48_spill] sm:$0xff] %v4375_v62  ;;  %5619 = vst [vmem:[#allocation5_spill] sm:$0xff] %v4381_v0  ;;  %v4390_v47 = vadd.f32 %v1077_v51, %v5624_v55  ;;  %v4402_v49 = vadd.f32 %v1081_v2, %v5632_v9  ;;  %v4405_v29 = vadd.f32 %v1082_v28, %v5634_v38  ;;  %v5642_v31 = vld [vmem:[#allocation37_spill] sm:$0xff]  ;;  %v5644_v40 = vld [vmem:[#allocation39_spill] sm:$0xff] }
  0xb2   : > { %5621 = vst [vmem:[#allocation6_spill] sm:$0xff] %v4384_v20  ;;  %5623 = vst [vmem:[#allocation7_spill] sm:$0xff] %v4387_v32  ;;  %v1120_v46 = vmul.f32 %v2500_v11, %v5636_v30  ;;  %v1121_v16 = vmul.f32 %v2500_v11, %v5637_v63  ;;  %v1122_v22 = vmul.f32 %v2500_v11, %v5638_v24  ;;  %v5645_v28 = vld [vmem:[#allocation40_spill] sm:$0xff]  ;;  %v5646_v50 = vld [vmem:[#allocation43_spill] sm:$0xff] }
  0xb3   : > { %5625 = vst [vmem:[#allocation8_spill] sm:$0xff] %v4390_v47  ;;  %5627 = vst [vmem:[#allocation9_spill] sm:$0xff] %v4393_v35  ;;  %v1123_v7 = vmul.f32 %v2500_v11, %v5639_v15  ;;  %v1124_v19 = vmul.f32 %v2500_v11, %v5640_v36  ;;  %v1125_v21 = vmul.f32 %v2500_v11, %v5641_v14  ;;  %v5647_v34 = vld [vmem:[#allocation44_spill] sm:$0xff]  ;;  %v5648_v55 = vld [vmem:[#allocation45_spill] sm:$0xff] }
  0xb4   : > { %5629 = vst [vmem:[#allocation10_spill] sm:$0xff] %v4396_v4  ;;  %5631 = vst [vmem:[#allocation11_spill] sm:$0xff] %v4399_v60  ;;  %v1126_v54 = vmul.f32 %v2500_v11, %v5642_v31  ;;  %v1127_v2 = vmul.f32 %v2500_v11, %v5643_v52  ;;  %v1128_v41 = vmul.f32 %v2500_v11, %v5644_v40  ;;  %v5649_v17 = vld [vmem:[#allocation3_spill] sm:$0xff]  ;;  %v5650_v9 = vld [vmem:[#allocation4_spill] sm:$0xff] }
  0xb5   : > { %5633 = vst [vmem:[#allocation12_spill] sm:$0xff] %v4402_v49  ;;  %5635 = vst [vmem:[#allocation13_spill] sm:$0xff] %v4405_v29  ;;  %v1129_v44 = vmul.f32 %v2500_v11, %v5645_v28  ;;  %v1130_v51 = vmul.f32 %v2500_v11, %v5646_v50  ;;  %v1131_v8 = vmul.f32 %v2500_v11, %v5647_v34  ;;  %v5651_v30 = vld [vmem:[#allocation33_spill] sm:$0xff]  ;;  %v5652_v14 = vld [vmem:[#allocation34_spill] sm:$0xff] }
  0xb6   : > { %v1132_v56 = vmul.f32 %v2500_v11, %v5648_v55  ;;  %v1133_v18 = vmul.f32 %v2500_v11, %v5649_v17  ;;  %v1134_v38 = vmul.f32 %v2500_v11, %v5650_v9  ;;  %v1135_v63 = vmul.f32 %v2500_v11, %v5651_v30  ;;  %v5653_v36 = vld [vmem:[#allocation61_spill] sm:$0xff]  ;;  %v5654_v15 = vld [vmem:[#allocation62_spill] sm:$0xff]  ;;  %v5656_v49 = vld [vmem:[#allocation67_spill] sm:$0xff] }
  0xb7   : > { %v1136_v31 = vmul.f32 %v2500_v11, %v5652_v14  ;;  %v1137_v52 = vmul.f32 %v2500_v11, %v5653_v36  ;;  %v1138_v40 = vmul.f32 %v2500_v11, %v5654_v15  ;;  %v5655_v29 = vld [vmem:[#allocation66_spill] sm:$0xff]  ;;  %v1140_v50 = vmul.f32 %v2500_v11, %v5656_v49  ;;  %v5657_v24 = vld [vmem:[#allocation68_spill] sm:$0xff]  ;;  %v5660_v17 = vld [vmem:[#allocation73_spill] sm:$0xff] }
  0xb8   : > { %v1139_v28 = vmul.f32 %v2500_v11, %v5655_v29  ;;  %v1141_v34 = vmul.f32 %v2500_v11, %v5657_v24  ;;  %v5658_v60 = vld [vmem:[#allocation72_spill] sm:$0xff]  ;;  %v4430_v4 = vld [vmem:[#allocation2 + $0x182] sm:$0xff]  ;;  %v1143_v9 = vmul.f32 %v2500_v11, %v5660_v17  ;;  %v4436_v20 = vld [vmem:[#allocation2 + $0x18a] sm:$0xff]  ;;  %v1149_v24 = vmul.f32 %v2500_v11, %v4296_v27 }
  0xb9   : > { %v1142_v55 = vmul.f32 %v2500_v11, %v5658_v60  ;;  %5659 = vst [vmem:[#allocation14_spill] sm:$0xff] %v4430_v4  ;;  %v5661_v35 = vld [vmem:[#allocation74_spill] sm:$0xff]  ;;  %v5662_v47 = vld [vmem:[#allocation41_spill] sm:$0xff]  ;;  %v5663_v32 = vld [vmem:[#allocation36_spill] sm:$0xff]  ;;  %v1150_v60 = vmul.f32 %v2500_v11, %v4430_v4  ;;  %v1151_v62 = vmul.f32 %v2500_v11, %v4436_v20  ;;  %v1152_v17 = vadd.f32 %v1120_v46, %v4309_v53 }
  0xba   : > { %v1144_v30 = vmul.f32 %v2500_v11, %v5661_v35  ;;  %v1145_v14 = vmul.f32 %v2500_v11, %v5662_v47  ;;  %v1146_v36 = vmul.f32 %v2500_v11, %v5663_v32  ;;  %v5664_v15 = vld [vmem:[#allocation42_spill] sm:$0xff]  ;;  %v1153_v35 = vadd.f32 %v1121_v16, %v4312_v1 }
  0xbb   : > { %v1147_v29 = vmul.f32 %v2500_v11, %v5664_v15  ;;  %v5665_v0 = vld [vmem:[#allocation46_spill] sm:$0xff]  ;;  %v1154_v47 = vadd.f32 %v1122_v22, %v4315_v26  ;;  %v1155_v32 = vadd.f32 %v1123_v7, %v4318_v37  ;;  %v1156_v43 = vadd.f32 %v1124_v19, %v4321_v5  ;;  %v5672_v22 = vld [vmem:[#allocation7_spill] sm:$0xff] }
  0xbc   : > { %v1148_v49 = vmul.f32 %v2500_v11, %v5665_v0  ;;  %v4449_v15 = vadd.f32 %v1125_v21, %v4324_v58  ;;  %v4452_v0 = vadd.f32 %v1126_v54, %v4327_v57  ;;  %v4455_v4 = vadd.f32 %v1127_v2, %v4330_v25 }
  0xbd   : > { %v4458_v11 = vadd.f32 %v1128_v41, %v4333_v10  ;;  %v4461_v53 = vadd.f32 %v1129_v44, %v4336_v13  ;;  %v4464_v26 = vadd.f32 %v1130_v51, %v4339_v12  ;;  %v4467_v37 = vadd.f32 %v1131_v8, %v4342_v59  ;;  %v2501_v12 = vld [vmem:[%s5151_s1 + $0x8] ss:$0 sm:$0xff]  ;;  %v5687_v51 = vld [vmem:[#allocation75_spill] sm:$0xff] }
  0xbe   : > { %v4470_v58 = vadd.f32 %v1132_v56, %v4345_v3  ;;  %v4473_v1 = vadd.f32 %v1133_v18, %v4348_v61  ;;  %v4476_v5 = vadd.f32 %v1134_v38, %v4351_v33  ;;  %v4479_v57 = vadd.f32 %v1135_v63, %v4354_v42  ;;  %v5666_v61 = vld [vmem:[#allocation47_spill] sm:$0xff]  ;;  %v5667_v42 = vld [vmem:[#allocation48_spill] sm:$0xff]  ;;  %v5690_v56 = vld [vmem:[#allocation37_spill] sm:$0xff] }
  0xbf   : > { %v4482_v25 = vadd.f32 %v1136_v31, %v4357_v39  ;;  %v4485_v10 = vadd.f32 %v1137_v52, %v4360_v23  ;;  %v4488_v13 = vadd.f32 %v1138_v40, %v4363_v6  ;;  %v4494_v59 = vadd.f32 %v1139_v28, %v4366_v45  ;;  %v5668_v23 = vld [vmem:[#allocation5_spill] sm:$0xff]  ;;  %v5670_v6 = vld [vmem:[#allocation6_spill] sm:$0xff]  ;;  %v5674_v45 = vld [vmem:[#allocation8_spill] sm:$0xff] }
  0xc0   : > { %v4497_v3 = vadd.f32 %v1140_v50, %v4369_v48  ;;  %v4500_v33 = vadd.f32 %v1141_v34, %v5666_v61  ;;  %v4503_v39 = vadd.f32 %v1142_v55, %v5667_v42  ;;  %v4506_v46 = vadd.f32 %v1143_v9, %v5668_v23  ;;  %v5676_v48 = vld [vmem:[#allocation9_spill] sm:$0xff]  ;;  %v5678_v31 = vld [vmem:[#allocation10_spill] sm:$0xff]  ;;  %v5680_v52 = vld [vmem:[#allocation11_spill] sm:$0xff] }
  0xc1   : > { %v4509_v16 = vadd.f32 %v1144_v30, %v5670_v6  ;;  %v4512_v7 = vadd.f32 %v1145_v14, %v5672_v22  ;;  %v4515_v19 = vadd.f32 %v1146_v36, %v5674_v45  ;;  %v4518_v21 = vadd.f32 %v1147_v29, %v5676_v48  ;;  %v5682_v40 = vld [vmem:[#allocation71_spill] sm:$0xff]  ;;  %v5683_v28 = vld [vmem:[#allocation12_spill] sm:$0xff]  ;;  %v5685_v50 = vld [vmem:[#allocation13_spill] sm:$0xff] }
  0xc2   : > { %5669 = vst [vmem:[#allocation15_spill] sm:$0xff] %v4506_v46  ;;  %v4521_v54 = vadd.f32 %v1148_v49, %v5678_v31  ;;  %v4524_v2 = vadd.f32 %v1149_v24, %v5680_v52  ;;  %v1189_v41 = vmul.f32 %v2501_v12, %v5682_v40  ;;  %v4528_v44 = vadd.f32 %v1150_v60, %v5683_v28  ;;  %v5688_v34 = vld [vmem:[#allocation76_spill] sm:$0xff]  ;;  %v5689_v29 = vld [vmem:[#allocation81_spill] sm:$0xff]  ;;  %v5691_v18 = vld [vmem:[#allocation35_spill] sm:$0xff] }
  0xc3   : > { %5671 = vst [vmem:[#allocation16_spill] sm:$0xff] %v4509_v16  ;;  %5673 = vst [vmem:[#allocation17_spill] sm:$0xff] %v4512_v7  ;;  %v4531_v14 = vadd.f32 %v1151_v62, %v5685_v50  ;;  %v1190_v36 = vmul.f32 %v2501_v12, %v5687_v51  ;;  %v1191_v8 = vmul.f32 %v2501_v12, %v5688_v34  ;;  %v5692_v24 = vld [vmem:[#allocation39_spill] sm:$0xff]  ;;  %v5693_v30 = vld [vmem:[#allocation40_spill] sm:$0xff] }
  0xc4   : > { %5675 = vst [vmem:[#allocation18_spill] sm:$0xff] %v4515_v19  ;;  %5677 = vst [vmem:[#allocation19_spill] sm:$0xff] %v4518_v21  ;;  %v1192_v55 = vmul.f32 %v2501_v12, %v5689_v29  ;;  %v1193_v49 = vmul.f32 %v2501_v12, %v5690_v56  ;;  %v1194_v9 = vmul.f32 %v2501_v12, %v5691_v18  ;;  %v5694_v61 = vld [vmem:[#allocation43_spill] sm:$0xff]  ;;  %v5695_v42 = vld [vmem:[#allocation44_spill] sm:$0xff] }
  0xc5   : > { %5679 = vst [vmem:[#allocation20_spill] sm:$0xff] %v4521_v54  ;;  %5681 = vst [vmem:[#allocation21_spill] sm:$0xff] %v4524_v2  ;;  %v1195_v38 = vmul.f32 %v2501_v12, %v5692_v24  ;;  %v1196_v63 = vmul.f32 %v2501_v12, %v5693_v30  ;;  %v1197_v60 = vmul.f32 %v2501_v12, %v5694_v61  ;;  %v5696_v62 = vld [vmem:[#allocation45_spill] sm:$0xff]  ;;  %v5697_v22 = vld [vmem:[#allocation3_spill] sm:$0xff] }
  0xc6   : > { %5684 = vst [vmem:[#allocation22_spill] sm:$0xff] %v4528_v44  ;;  %5686 = vst [vmem:[#allocation23_spill] sm:$0xff] %v4531_v14  ;;  %v1198_v23 = vmul.f32 %v2501_v12, %v5695_v42  ;;  %v1199_v6 = vmul.f32 %v2501_v12, %v5696_v62  ;;  %v1200_v45 = vmul.f32 %v2501_v12, %v5697_v22  ;;  %v5698_v48 = vld [vmem:[#allocation4_spill] sm:$0xff]  ;;  %v5699_v52 = vld [vmem:[#allocation33_spill] sm:$0xff] }
  0xc7   : > { %v1201_v31 = vmul.f32 %v2501_v12, %v5698_v48  ;;  %v1202_v40 = vmul.f32 %v2501_v12, %v5699_v52  ;;  %v1221_v28 = vadd.f32 %v1189_v41, %v1152_v17  ;;  %v5700_v50 = vld [vmem:[#allocation34_spill] sm:$0xff]  ;;  %v5701_v34 = vld [vmem:[#allocation61_spill] sm:$0xff]  ;;  %v1222_v24 = vadd.f32 %v1190_v36, %v1153_v35  ;;  %v5704_v62 = vld [vmem:[#allocation67_spill] sm:$0xff] }
  0xc8   : > { %v1203_v51 = vmul.f32 %v2501_v12, %v5700_v50  ;;  %v1204_v29 = vmul.f32 %v2501_v12, %v5701_v34  ;;  %v5702_v56 = vld [vmem:[#allocation62_spill] sm:$0xff]  ;;  %v4552_v30 = vld [vmem:[%s5152_s2] ss:$0 sm:$0xff]  ;;  %v1207_v22 = vmul.f32 %v2501_v12, %v5704_v62  ;;  %v5705_v48 = vld [vmem:[#allocation68_spill] sm:$0xff]  ;;  %v1223_v52 = vadd.f32 %v1191_v8, %v1154_v47 }
  0xc9   : > { %v1205_v18 = vmul.f32 %v2501_v12, %v5702_v56  ;;  %v5703_v61 = vld [vmem:[#allocation66_spill] sm:$0xff]  ;;  %v1208_v14 = vmul.f32 %v2501_v12, %v5705_v48  ;;  %v5706_v17 = vld [vmem:[#allocation72_spill] sm:$0xff]  ;;  %v5707_v50 = vld [vmem:[#allocation73_spill] sm:$0xff]  ;;  %v1224_v56 = vadd.f32 %v1192_v55, %v1155_v32  ;;  %v1225_v16 = vadd.f32 %v1193_v49, %v1156_v43 }
  0xca   : > { %v1206_v42 = vmul.f32 %v2501_v12, %v5703_v61  ;;  %v1209_v41 = vmul.f32 %v2501_v12, %v5706_v17  ;;  %v1210_v44 = vmul.f32 %v2501_v12, %v5707_v50  ;;  %v5708_v34 = vld [vmem:[#allocation74_spill] sm:$0xff]  ;;  %v1044_v35 = vld [vmem:[#allocation2 + $0x19a] sm:$0xff]  ;;  %v1260_v61 = vmul.f32 %v4552_v30, %v1221_v28 }
  0xcb   : > { %v1211_v2 = vmul.f32 %v2501_v12, %v5708_v34  ;;  %v1045_v36 = vld [vmem:[#allocation2 + $0x1a2] sm:$0xff]  ;;  %v5710_v19 = vld [vmem:[#allocation36_spill] sm:$0xff]  ;;  %v1226_v8 = vadd.f32 %v1194_v9, %v4449_v15  ;;  %v1261_v17 = vmul.f32 %v4552_v30, %v1222_v24  ;;  %v4570_v32 = vld [vmem:[%s5153_s3] ss:$0 sm:$0xff]  ;;  %v4579_v55 = vmul.f32 %v2501_v12, %v4436_v20 }
  0xcc   : > { %v5709_v54 = vld [vmem:[#allocation41_spill] sm:$0xff]  ;;  %v1213_v7 = vmul.f32 %v2501_v12, %v5710_v19  ;;  %v5711_v62 = vld [vmem:[#allocation42_spill] sm:$0xff]  ;;  %v1262_v49 = vmul.f32 %v4552_v30, %v1223_v52  ;;  %v4582_v28 = vmul.f32 %v2501_v12, %v1044_v35  ;;  %v4584_v15 = vmul.f32 %v2501_v12, %v1045_v36 }
  0xcd   : > { %v1212_v21 = vmul.f32 %v2501_v12, %v5709_v54  ;;  %v1214_v46 = vmul.f32 %v2501_v12, %v5711_v62  ;;  %v5712_v48 = vld [vmem:[#allocation46_spill] sm:$0xff]  ;;  %v4573_v54 = vmul.f32 %v2501_v12, %v4296_v27  ;;  %v1227_v9 = vadd.f32 %v1195_v38, %v4452_v0 }
  0xce   : > { %v1215_v47 = vmul.f32 %v2501_v12, %v5712_v48  ;;  %v5713_v19 = vld [vmem:[#allocation14_spill] sm:$0xff]  ;;  %v1263_v24 = vmul.f32 %v4552_v30, %v1224_v56  ;;  %v1228_v50 = vadd.f32 %v1196_v63, %v4455_v4  ;;  %v1229_v27 = vadd.f32 %v1197_v60, %v4458_v11 }
  0xcf   : > { %v4576_v43 = vmul.f32 %v2501_v12, %v5713_v19  ;;  %v1264_v34 = vmul.f32 %v4552_v30, %v1225_v16  ;;  %v4592_v62 = vadd.f32 %v4570_v32, %v1260_v61  ;;  %v1230_v20 = vadd.f32 %v1198_v23, %v4461_v53  ;;  %v5717_v36 = vld [vmem:[#allocation18_spill] sm:$0xff] }
  0xd0   : > { %v1231_v52 = vadd.f32 %v1199_v6, %v4464_v26  ;;  %v1265_v12 = vmul.f32 %v4552_v30, %v1226_v8  ;;  %v4598_v35 = vadd.f32 %v4570_v32, %v1261_v17  ;;  %v1232_v0 = vadd.f32 %v1200_v45, %v4467_v37 }
  0xd1   : > { %v1233_v4 = vadd.f32 %v1201_v31, %v4470_v58  ;;  %v1234_v11 = vadd.f32 %v1202_v40, %v4473_v1  ;;  %v4604_v16 = vadd.f32 %v4570_v32, %v1262_v49  ;;  %v1235_v38 = vadd.f32 %v1203_v51, %v4476_v5 }
  0xd2   : > { %v1236_v53 = vadd.f32 %v1204_v29, %v4479_v57  ;;  %v1266_v26 = vmul.f32 %v4552_v30, %v1227_v9  ;;  %v4610_v63 = vadd.f32 %v4570_v32, %v1263_v24  ;;  %v4613_v60 = vadd.f32 %v1205_v18, %v4482_v25 }
  0xd3   : > { %v4616_v37 = vadd.f32 %v1206_v42, %v4485_v10  ;;  %v4619_v58 = vadd.f32 %v4570_v32, %v1264_v34  ;;  %v1331_v1 = vmax.f32 %v4592_v62, -60.0  ;;  %v4623_v5 = vadd.f32 %v1207_v22, %v4488_v13 }
  0xd4   : > { %v1267_v57 = vmul.f32 %v4552_v30, %v1228_v50  ;;  %v4627_v23 = vadd.f32 %v4570_v32, %v1265_v12  ;;  %v1332_v6 = vmax.f32 %v4598_v35, -60.0  ;;  %v4631_v25 = vadd.f32 %v1208_v14, %v4494_v59  ;;  %v5714_v59 = vld [vmem:[#allocation15_spill] sm:$0xff] }
  0xd5   : > { %v4634_v10 = vadd.f32 %v1209_v41, %v4497_v3  ;;  %v4637_v45 = vadd.f32 %v1210_v44, %v4500_v33  ;;  %v1333_v31 = vmax.f32 %v4604_v16, -60.0  ;;  %v4641_v13 = vadd.f32 %v1211_v2, %v4503_v39  ;;  %v5715_v3 = vld [vmem:[#allocation16_spill] sm:$0xff]  ;;  %v5716_v41 = vld [vmem:[#allocation17_spill] sm:$0xff] }
  0xd6   : > { %v1268_v40 = vmul.f32 %v4552_v30, %v1229_v27  ;;  %v4645_v51 = vadd.f32 %v4570_v32, %v1266_v26  ;;  %v1334_v29 = vmax.f32 %v4610_v63, -60.0  ;;  %v4649_v14 = vadd.f32 %v1212_v21, %v5714_v59 }
  0xd7   : > { %v4652_v18 = vadd.f32 %v1213_v7, %v5715_v3  ;;  %v1335_v33 = vmax.f32 %v4619_v58, -60.0  ;;  %v1363_v44 = vsub.f32 0.0, %v1331_v1  ;;  %v1269_v42 = vmul.f32 %v4552_v30, %v1230_v20 }
  0xd8   : > { %v4657_v39 = vadd.f32 %v4570_v32, %v1267_v57  ;;  %v1336_v2 = vmax.f32 %v4627_v23, -60.0  ;;  %v1364_v22 = vsub.f32 0.0, %v1332_v6  ;;  %v4661_v56 = vadd.f32 %v1214_v46, %v5716_v41  ;;  %v5719_v41 = vld [vmem:[#allocation20_spill] sm:$0xff] }
  0xd9   : > { %v4664_v21 = vadd.f32 %v1215_v47, %v5717_v36  ;;  %v1270_v7 = vmul.f32 %v4552_v30, %v1231_v52  ;;  %v1365_v61 = vsub.f32 0.0, %v1333_v31  ;;  %v1271_v48 = vmul.f32 %v4552_v30, %v1232_v0 }
  0xda   : > { %v4669_v8 = vadd.f32 %v4570_v32, %v1268_v40  ;;  %v1337_v17 = vmax.f32 %v4645_v51, -60.0  ;;  %v1366_v19 = vsub.f32 0.0, %v1334_v29  ;;  %v1272_v49 = vmul.f32 %v4552_v30, %v1233_v4 }
  0xdb   : > { %v1273_v9 = vmul.f32 %v4552_v30, %v1234_v11  ;;  %v1367_v46 = vsub.f32 0.0, %v1335_v33  ;;  %v1395_v24 = vmul.f32 1.442695, %v1363_v44  ;;  %v4675_v47 = vadd.f32 %v4570_v32, %v1269_v42 }
  0xdc   : > { %v1338_v50 = vmax.f32 %v4657_v39, -60.0  ;;  %v1368_v27 = vsub.f32 0.0, %v1336_v2  ;;  %v1397_v34 = vmul.f32 1.442695, %v1364_v22  ;;  %v1274_v20 = vmul.f32 %v4552_v30, %v1235_v38  ;;  %v5718_v2 = vld [vmem:[#allocation19_spill] sm:$0xff] }
  0xdd   : > { %v1275_v52 = vmul.f32 %v4552_v30, %v1236_v53  ;;  %v4681_v12 = vadd.f32 %v4570_v32, %v1270_v7  ;;  %v1399_v0 = vmul.f32 1.442695, %v1365_v61  ;;  %v4684_v4 = vadd.f32 %v4570_v32, %v1271_v48 }
  0xde   : > { %v1339_v11 = vmax.f32 %v4669_v8, -60.0  ;;  %v1369_v26 = vsub.f32 0.0, %v1337_v17  ;;  %v1401_v1 = vmul.f32 1.442695, %v1366_v19  ;;  %v4688_v57 = vadd.f32 %v4570_v32, %v1272_v49  ;;  %v5720_v19 = vld [vmem:[#allocation21_spill] sm:$0xff] }
  0xdf   : > { %v4691_v6 = vadd.f32 %v4570_v32, %v1273_v9  ;;  %3015 = vpow2.f32 %v1395_v24  ;;  %v1403_v38 = vmul.f32 1.442695, %v1367_v46  ;;  %v1340_v53 = vmax.f32 %v4675_v47, -60.0 }
  0xe0   : > { %v1370_v31 = vsub.f32 0.0, %v1338_v50  ;;  %3017 = vpow2.f32 %v1397_v34  ;;  %v1405_v40 = vmul.f32 1.442695, %v1368_v27  ;;  %v4695_v29 = vadd.f32 %v4570_v32, %v1274_v20  ;;  %v5721_v27 = vld [vmem:[#allocation22_spill] sm:$0xff]  ;;  %v5722_v20 = vld [vmem:[#allocation23_spill] sm:$0xff] }
  0xe1   : > { %v4698_v59 = vadd.f32 %v4570_v32, %v1275_v52  ;;  %v1341_v3 = vmax.f32 %v4681_v12, -60.0  ;;  %3019 = vpow2.f32 %v1399_v0  ;;  %v1342_v33 = vmax.f32 %v4684_v4, -60.0 }
  0xe2   : > { %v1371_v44 = vsub.f32 0.0, %v1339_v11  ;;  %3021 = vpow2.f32 %v1401_v1  ;;  %v1407_v42 = vmul.f32 1.442695, %v1369_v26  ;;  %v1248_v22 = vadd.f32 %v4573_v54, %v5718_v2 }
  0xe3   : > { %v4706_v36 = vadd.f32 %v4576_v43, %v5719_v41  ;;  %v1343_v7 = vmax.f32 %v4688_v57, -60.0  ;;  %3023 = vpow2.f32 %v1403_v38  ;;  %v1344_v61 = vmax.f32 %v4691_v6, -60.0 }
  0xe4   : > { %v1372_v48 = vsub.f32 0.0, %v1340_v53  ;;  %3025 = vpow2.f32 %v1405_v40  ;;  %v1409_v17 = vmul.f32 1.442695, %v1370_v31  ;;  %v4712_v49 = vadd.f32 %v4579_v55, %v5720_v19 }
  0xe5   : > { %v1276_v9 = vmul.f32 %v4552_v30, %v4613_v60  ;;  %v1345_v54 = vmax.f32 %v4695_v29, -60.0  ;;  %v1373_v46 = vsub.f32 0.0, %v1341_v3  ;;  %v1346_v43 = vmax.f32 %v4698_v59, -60.0 }
  0xe6   : > { %v1374_v24 = vsub.f32 0.0, %v1342_v33  ;;  %3027 = vpow2.f32 %v1407_v42  ;;  %v1411_v50 = vmul.f32 1.442695, %v1371_v44  ;;  %v4720_v34 = vadd.f32 %v4582_v28, %v5721_v27 }
  0xe7   : > { %v4724_v52 = vadd.f32 %v4584_v15, %v5722_v20  ;;  %v1277_v55 = vmul.f32 %v4552_v30, %v4616_v37  ;;  %v1375_v60 = vsub.f32 0.0, %v1343_v7  ;;  %v1278_v0 = vmul.f32 %v4552_v30, %v4623_v5 }
  0xe8   : > { %v1376_v11 = vsub.f32 0.0, %v1344_v61  ;;  %3029 = vpow2.f32 %v1409_v17  ;;  %v1413_v26 = vmul.f32 1.442695, %v1372_v48  ;;  %v1279_v1 = vmul.f32 %v4552_v30, %v4631_v25 }
  0xe9   : > { %v4733_v28 = vadd.f32 %v4570_v32, %v1276_v9  ;;  %v1377_v38 = vsub.f32 0.0, %v1345_v54  ;;  %v1415_v53 = vmul.f32 1.442695, %v1373_v46  ;;  %v1280_v15 = vmul.f32 %v4552_v30, %v4634_v10 }
  0xea   : > { %v1378_v31 = vsub.f32 0.0, %v1346_v43  ;;  %3031 = vpow2.f32 %v1411_v50  ;;  %v1417_v37 = vmul.f32 1.442695, %v1374_v24  ;;  %v1281_v5 = vmul.f32 %v4552_v30, %v4637_v45 }
  0xeb   : > { %v1282_v40 = vmul.f32 %v4552_v30, %v4641_v13  ;;  %v4742_v3 = vadd.f32 %v4570_v32, %v1277_v55  ;;  %v1419_v25 = vmul.f32 1.442695, %v1375_v60  ;;  %v1283_v44 = vmul.f32 %v4552_v30, %v4649_v14 }
  0xec   : > { %v3016_v33 = vpop.eup %3015  ;;  %v1284_v10 = vmul.f32 %v4552_v30, %v4652_v18  ;;  %3033 = vpow2.f32 %v1413_v26  ;;  %v1421_v42 = vmul.f32 1.442695, %v1376_v11  ;;  %v4749_v41 = vadd.f32 %v4570_v32, %v1278_v0 }
  0xed   : > { %v3018_v2 = vpop.eup %3017  ;;  %v1347_v45 = vmax.f32 %v4733_v28, -60.0  ;;  %3035 = vpow2.f32 %v1415_v53  ;;  %v1423_v13 = vmul.f32 1.442695, %v1377_v38  ;;  %v1285_v61 = vmul.f32 %v4552_v30, %v4661_v56 }
  0xee   : > { %v3020_v7 = vpop.eup %3019  ;;  %v1286_v14 = vmul.f32 %v4552_v30, %v4664_v21  ;;  %3037 = vpow2.f32 %v1417_v37  ;;  %v1425_v48 = vmul.f32 1.442695, %v1378_v31  ;;  %v4757_v17 = vadd.f32 %v4570_v32, %v1279_v1 }
  0xef   : > { %v3022_v18 = vpop.eup %3021  ;;  %v1348_v19 = vmax.f32 %v4742_v3, -60.0  ;;  %3039 = vpow2.f32 %v1419_v25  ;;  %v1459_v9 = vadd.f32 1.0, %v3016_v33  ;;  %v1287_v46 = vmul.f32 %v4552_v30, %v1248_v22 }
  0xf0   : > { %v3024_v54 = vpop.eup %3023  ;;  %v4762_v43 = vadd.f32 %v4570_v32, %v1280_v15  ;;  %3041 = vpow2.f32 %v1421_v42  ;;  %v1460_v56 = vadd.f32 1.0, %v3018_v2  ;;  %v1349_v21 = vmax.f32 %v4749_v41, -60.0 }
  0xf1   : > { %v3026_v24 = vpop.eup %3025  ;;  %v1379_v50 = vsub.f32 0.0, %v1347_v45  ;;  %3043 = vpow2.f32 %v1423_v13  ;;  %v1461_v27 = vadd.f32 1.0, %v3020_v7  ;;  %v1288_v20 = vmul.f32 %v4552_v30, %v4706_v36 }
  0xf2   : > { %v4768_v55 = vadd.f32 %v4570_v32, %v1281_v5  ;;  %3045 = vpow2.f32 %v1425_v48  ;;  %v1462_v60 = vadd.f32 1.0, %v3022_v18  ;;  %v1350_v0 = vmax.f32 %v4757_v17, -60.0 }
  0xf3   : > { %v3028_v22 = vpop.eup %3027  ;;  %v1380_v11 = vsub.f32 0.0, %v1348_v19  ;;  %v1463_v26 = vadd.f32 1.0, %v3024_v54  ;;  %3047 = vrcp.f32 %v1459_v9  ;;  %v1289_v1 = vmul.f32 %v4552_v30, %v4712_v49 }
  0xf4   : > { %v4774_v38 = vadd.f32 %v4570_v32, %v1282_v40  ;;  %v1464_v53 = vadd.f32 1.0, %v3026_v24  ;;  %3049 = vrcp.f32 %v1460_v56  ;;  %v1351_v15 = vmax.f32 %v4762_v43, -60.0 }
  0xf5   : > { %v3030_v36 = vpop.eup %3029  ;;  %v1381_v31 = vsub.f32 0.0, %v1349_v21  ;;  %v1427_v37 = vmul.f32 1.442695, %v1379_v50  ;;  %3051 = vrcp.f32 %v1461_v27  ;;  %v1290_v5 = vmul.f32 %v4552_v30, %v4720_v34 }
  0xf6   : > { %v4780_v25 = vadd.f32 %v4570_v32, %v1283_v44  ;;  %v1465_v33 = vadd.f32 1.0, %v3028_v22  ;;  %3053 = vrcp.f32 %v1462_v60  ;;  %v1352_v40 = vmax.f32 %v4768_v55, -60.0 }
  0xf7   : > { %v3032_v49 = vpop.eup %3031  ;;  %v1382_v42 = vsub.f32 0.0, %v1350_v0  ;;  %v1429_v2 = vmul.f32 1.442695, %v1380_v11  ;;  %3055 = vrcp.f32 %v1463_v26  ;;  %v1291_v45 = vmul.f32 %v4552_v30, %v4724_v52 }
  0xf8   : > { %v4786_v13 = vadd.f32 %v4570_v32, %v1284_v10  ;;  %v1466_v7 = vadd.f32 1.0, %v3030_v36  ;;  %3057 = vrcp.f32 %v1464_v53  ;;  %v1353_v44 = vmax.f32 %v4774_v38, -60.0 }
  0xf9   : > { %v3034_v34 = vpop.eup %3033  ;;  %v1383_v48 = vsub.f32 0.0, %v1351_v15  ;;  %3059 = vpow2.f32 %v1427_v37  ;;  %v1431_v18 = vmul.f32 1.442695, %v1381_v31  ;;  %v4790_v9 = vadd.f32 %v4570_v32, %v1285_v61 }
  0xfa   : > { %v3036_v19 = vpop.eup %3035  ;;  %v4793_v54 = vadd.f32 %v4570_v32, %v1286_v14  ;;  %v1467_v56 = vadd.f32 1.0, %v3032_v49  ;;  %3061 = vrcp.f32 %v1465_v33  ;;  %v1354_v52 = vmax.f32 %v4780_v25, -60.0 }
  0xfb   : > { %v3038_v30 = vpop.eup %3037  ;;  %v1384_v10 = vsub.f32 0.0, %v1352_v40  ;;  %3063 = vpow2.f32 %v1429_v2  ;;  %v1433_v24 = vmul.f32 1.442695, %v1382_v42  ;;  %v4797_v50 = vadd.f32 %v4570_v32, %v1287_v46 }
  0xfc   : > { %v3040_v21 = vpop.eup %3039  ;;  %v4800_v27 = vadd.f32 %v4570_v32, %v1288_v20  ;;  %v1468_v61 = vadd.f32 1.0, %v3034_v34  ;;  %3065 = vrcp.f32 %v1466_v7  ;;  %v1355_v14 = vmax.f32 %v4786_v13, -60.0 }
  0xfd   : > { %v3042_v60 = vpop.eup %3041  ;;  %v1385_v22 = vsub.f32 0.0, %v1353_v44  ;;  %3067 = vpow2.f32 %v1431_v18  ;;  %v1435_v0 = vmul.f32 1.442695, %v1383_v48  ;;  %v4804_v26 = vadd.f32 %v4570_v32, %v1289_v1 }
  0xfe   : > { %v3044_v11 = vpop.eup %3043  ;;  %v4807_v53 = vadd.f32 %v4570_v32, %v1290_v5  ;;  %v1469_v46 = vadd.f32 1.0, %v3036_v19  ;;  %3069 = vrcp.f32 %v1467_v56  ;;  %v1356_v20 = vmax.f32 %v4790_v9, -60.0 }
  0xff   : > { %v3046_v36 = vpop.eup %3045  ;;  %v1386_v15 = vsub.f32 0.0, %v1354_v52  ;;  %3071 = vpow2.f32 %v1433_v24  ;;  %v1437_v31 = vmul.f32 1.442695, %v1384_v10  ;;  %v4811_v33 = vadd.f32 %v4570_v32, %v1291_v45 }
 0x100   : > { %v3048_v37 = vpop.eup %3047  ;;  %v1357_v49 = vmax.f32 %v4793_v54, -60.0  ;;  %v1470_v40 = vadd.f32 1.0, %v3038_v30  ;;  %3073 = vrcp.f32 %v1468_v61  ;;  %v1387_v42 = vsub.f32 0.0, %v1355_v14 }
 0x101   : > { %v3050_v1 = vpop.eup %3049  ;;  %3075 = vpow2.f32 %v1435_v0  ;;  %v1439_v5 = vmul.f32 1.442695, %v1385_v22  ;;  %v4815_v2 = vmul.f32 %v3048_v37, %v4592_v62  ;;  %v1358_v34 = vmax.f32 %v4797_v50, -60.0 }
 0x102   : > { %v3052_v7 = vpop.eup %3051  ;;  %v1471_v44 = vadd.f32 1.0, %v3040_v21  ;;  %3077 = vrcp.f32 %v1469_v46  ;;  %v4819_v48 = vmul.f32 %v3050_v1, %v4598_v35  ;;  %v1388_v45 = vsub.f32 0.0, %v1356_v20 }
 0x103   : > { %v3054_v32 = vpop.eup %3053  ;;  %3079 = vpow2.f32 %v1437_v31  ;;  %v1441_v18 = vmul.f32 1.442695, %v1386_v15  ;;  %v4822_v19 = vmul.f32 %v3052_v7, %v4604_v16  ;;  %v1472_v30 = vadd.f32 1.0, %v3042_v60 }
 0x104   : > { %v3056_v56 = vpop.eup %3055  ;;  %3081 = vrcp.f32 %v1470_v40  ;;  %v4825_v62 = vmul.f32 %v3054_v32, %v4610_v63  ;;  %v1555_v52 = vadd.f32 %v4819_v48, %v4815_v2  ;;  %v1359_v35 = vmax.f32 %v4800_v27, -60.0 }
 0x105   : > { %v3058_v10 = vpop.eup %3057  ;;  %v1389_v24 = vsub.f32 0.0, %v1357_v49  ;;  %3083 = vpow2.f32 %v1439_v5  ;;  %v1443_v21 = vmul.f32 1.442695, %v1387_v42  ;;  %v1473_v14 = vadd.f32 1.0, %v3044_v11 }
 0x106   : > { %v3060_v61 = vpop.eup %3059  ;;  %3085 = vrcp.f32 %v1471_v44  ;;  %v4831_v16 = vmul.f32 %v3056_v56, %v4619_v58  ;;  %v1556_v60 = vadd.f32 %v1555_v52, %v4822_v19  ;;  %v1360_v63 = vmax.f32 %v4804_v26, -60.0 }
 0x107   : > { %v3062_v22 = vpop.eup %3061  ;;  %v1390_v0 = vsub.f32 0.0, %v1358_v34  ;;  %3087 = vpow2.f32 %v1441_v18  ;;  %v1445_v46 = vmul.f32 1.442695, %v1388_v45  ;;  %v1474_v15 = vadd.f32 1.0, %v3046_v36 }
 0x108   : > { %v3064_v20 = vpop.eup %3063  ;;  %3089 = vrcp.f32 %v1472_v30  ;;  %v4836_v31 = vmul.f32 %v3058_v10, %v4627_v23  ;;  %v1557_v11 = vadd.f32 %v1556_v60, %v4825_v62  ;;  %v1361_v58 = vmax.f32 %v4807_v53, -60.0 }
 0x109   : > { %v3066_v37 = vpop.eup %3065  ;;  %v1391_v49 = vsub.f32 0.0, %v1359_v35  ;;  %3091 = vpow2.f32 %v1443_v21  ;;  %v1447_v40 = vmul.f32 1.442695, %v1389_v24  ;;  %v1475_v42 = vadd.f32 1.0, %v3060_v61 }
 0x10a   : > { %v3068_v1 = vpop.eup %3067  ;;  %3093 = vrcp.f32 %v1473_v14  ;;  %v4841_v5 = vmul.f32 %v3062_v22, %v4645_v51  ;;  %v1558_v36 = vadd.f32 %v1557_v11, %v4831_v16  ;;  %v1362_v23 = vmax.f32 %v4811_v33, -60.0 }
 0x10b   : > { %v3070_v7 = vpop.eup %3069  ;;  %v1392_v34 = vsub.f32 0.0, %v1360_v63  ;;  %3095 = vpow2.f32 %v1445_v46  ;;  %v1449_v44 = vmul.f32 1.442695, %v1390_v0  ;;  %v1476_v45 = vadd.f32 1.0, %v3064_v20 }
 0x10c   : > { %v3072_v32 = vpop.eup %3071  ;;  %3097 = vrcp.f32 %v1474_v15  ;;  %v4846_v18 = vmul.f32 %v3066_v37, %v4657_v39  ;;  %v1559_v56 = vadd.f32 %v1558_v36, %v4836_v31  ;;  %v1393_v52 = vsub.f32 0.0, %v1361_v58 }
 0x10d   : > { %v3074_v30 = vpop.eup %3073  ;;  %3099 = vpow2.f32 %v1447_v40  ;;  %v1451_v51 = vmul.f32 1.442695, %v1391_v49  ;;  %v1477_v35 = vadd.f32 1.0, %v3068_v1  ;;  %v4850_v24 = vmul.f32 %v3070_v7, %v4669_v8 }
 0x10e   : > { %v3076_v10 = vpop.eup %3075  ;;  %3101 = vrcp.f32 %v1475_v42  ;;  %v1560_v21 = vadd.f32 %v1559_v56, %v4841_v5  ;;  %v1394_v14 = vsub.f32 0.0, %v1362_v23  ;;  %v1453_v60 = vmul.f32 1.442695, %v1392_v34 }
 0x10f   : > { %v3078_v61 = vpop.eup %3077  ;;  %3103 = vpow2.f32 %v1449_v44  ;;  %v1478_v22 = vadd.f32 1.0, %v3072_v32  ;;  %v4854_v63 = vmul.f32 %v3074_v30, %v4675_v47  ;;  %v1455_v20 = vmul.f32 1.442695, %v1393_v52 }
 0x110   : > { %v3080_v39 = vpop.eup %3079  ;;  %3105 = vrcp.f32 %v1476_v45  ;;  %v1561_v0 = vadd.f32 %v1560_v21, %v4846_v18  ;;  %v1479_v8 = vadd.f32 1.0, %v3076_v10  ;;  %v4858_v11 = vmul.f32 %v3078_v61, %v4681_v12 }
 0x111   : > { %v3082_v46 = vpop.eup %3081  ;;  %3107 = vpow2.f32 %v1451_v51  ;;  %v1457_v49 = vmul.f32 1.442695, %v1394_v14  ;;  %v1480_v1 = vadd.f32 1.0, %v3080_v39 }
 0x112   : > { %v3084_v15 = vpop.eup %3083  ;;  %3109 = vrcp.f32 %v1477_v35  ;;  %v1562_v37 = vadd.f32 %v1561_v0, %v4850_v24  ;;  %v4862_v47 = vmul.f32 %v3082_v46, %v4684_v4 }
 0x113   : > { %v3086_v58 = vpop.eup %3085  ;;  %3111 = vpow2.f32 %v1453_v60  ;;  %v1481_v23 = vadd.f32 1.0, %v3084_v15 }
 0x114   : > { %v3088_v40 = vpop.eup %3087  ;;  %3113 = vrcp.f32 %v1478_v22  ;;  %v1563_v42 = vadd.f32 %v1562_v37, %v4854_v63  ;;  %v4866_v12 = vmul.f32 %v3086_v58, %v4688_v57 }
 0x115   : > { %v3090_v36 = vpop.eup %3089  ;;  %3115 = vpow2.f32 %v1455_v20  ;;  %v1482_v45 = vadd.f32 1.0, %v3088_v40 }
 0x116   : > { %v3092_v7 = vpop.eup %3091  ;;  %3117 = vrcp.f32 %v1479_v8  ;;  %v1564_v34 = vadd.f32 %v1563_v42, %v4858_v11  ;;  %v4870_v4 = vmul.f32 %v3090_v36, %v4691_v6 }
 0x117   : > { %v3094_v44 = vpop.eup %3093  ;;  %3119 = vpow2.f32 %v1457_v49  ;;  %v1483_v51 = vadd.f32 1.0, %v3092_v7 }
 0x118   : > { %v3096_v32 = vpop.eup %3095  ;;  %3121 = vrcp.f32 %v1480_v1  ;;  %v1565_v56 = vadd.f32 %v1564_v34, %v4862_v47  ;;  %v4874_v10 = vmul.f32 %v3094_v44, %v4695_v29 }
 0x119   : > { %v3098_v30 = vpop.eup %3097  ;;  %3123 = vrcp.f32 %v1481_v23  ;;  %v1484_v61 = vadd.f32 1.0, %v3096_v32 }
 0x11a   : > { %v3100_v52 = vpop.eup %3099  ;;  %v1566_v57 = vadd.f32 %v1565_v56, %v4866_v12  ;;  %3125 = vrcp.f32 %v1482_v45  ;;  %v4878_v14 = vmul.f32 %v3098_v30, %v4698_v59 }
 0x11b   : > { %v3102_v35 = vpop.eup %3101  ;;  %v1485_v22 = vadd.f32 1.0, %v3100_v52  ;;  %3127 = vrcp.f32 %v1483_v51 }
 0x11c   : > { %v3104_v21 = vpop.eup %3103  ;;  %v1567_v6 = vadd.f32 %v1566_v57, %v4870_v4  ;;  %v4882_v0 = vmul.f32 %v3102_v35, %v4733_v28  ;;  %3129 = vrcp.f32 %v1484_v61 }
 0x11d   : > { %v3106_v60 = vpop.eup %3105  ;;  %v1486_v15 = vadd.f32 1.0, %v3104_v21  ;;  %3131 = vrcp.f32 %v1485_v22 }
 0x11e   : > { %v3108_v39 = vpop.eup %3107  ;;  %v1568_v29 = vadd.f32 %v1567_v6, %v4874_v10  ;;  %v4886_v8 = vmul.f32 %v3106_v60, %v4742_v3 }
 0x11f   : > { %v3110_v46 = vpop.eup %3109  ;;  %v1487_v49 = vadd.f32 1.0, %v3108_v39  ;;  %3133 = vrcp.f32 %v1486_v15 }
 0x120   : > { %v3112_v20 = vpop.eup %3111  ;;  %v1569_v59 = vadd.f32 %v1568_v29, %v4878_v14  ;;  %v4890_v40 = vmul.f32 %v3110_v46, %v4749_v41 }
 0x121   : > { %v3114_v37 = vpop.eup %3113  ;;  %v1488_v36 = vadd.f32 1.0, %v3112_v20  ;;  %3135 = vrcp.f32 %v1487_v49 }
 0x122   : > { %v3116_v58 = vpop.eup %3115  ;;  %v1570_v28 = vadd.f32 %v1569_v59, %v4882_v0  ;;  %v4894_v7 = vmul.f32 %v3114_v37, %v4757_v17 }
 0x123   : > { %v3118_v1 = vpop.eup %3117  ;;  %v1489_v34 = vadd.f32 1.0, %v3116_v58  ;;  %3137 = vrcp.f32 %v1488_v36 }
 0x124   : > { %v3120_v42 = vpop.eup %3119  ;;  %v1571_v3 = vadd.f32 %v1570_v28, %v4886_v8  ;;  %v4898_v44 = vmul.f32 %v3118_v1, %v4762_v43 }
 0x125   : > { %v3122_v23 = vpop.eup %3121  ;;  %v1490_v45 = vadd.f32 1.0, %v3120_v42  ;;  %3139 = vrcp.f32 %v1489_v34 }
 0x126   : > { %v1572_v41 = vadd.f32 %v1571_v3, %v4890_v40  ;;  %v3124_v32 = vpop.eup %3123  ;;  %v4902_v56 = vmul.f32 %v3122_v23, %v4768_v55 }
 0x127   : > { %v3126_v17 = vpop.eup %3125  ;;  %v4906_v52 = vmul.f32 %v3124_v32, %v4774_v38  ;;  %3141 = vrcp.f32 %v1490_v45  ;;  %v3151_v45 = vld [vmem:[#allocation2] sm:$0xff] }
 0x128   : > { %v1573_v30 = vadd.f32 %v1572_v41, %v4894_v7  ;;  %v3128_v57 = vpop.eup %3127  ;;  %v4910_v43 = vmul.f32 %v3126_v17, %v4780_v25  ;;  %v3001_v17 = vld [vmem:[%s5156_s6 + $0x28] sm:$0xff]  }
 0x129   : > { %v3130_v21 = vpop.eup %3129  ;;  %v4914_v55 = vmul.f32 %v3128_v57, %v4786_v13  ;;  %v3003_v57 = vld [vmem:[%s5156_s6 + $0x18] sm:$0xff]  }
 0x12a   : > { %v1574_v51 = vadd.f32 %v1573_v30, %v4898_v44  ;;  %v3132_v6 = vpop.eup %3131  ;;  %v4918_v60 = vmul.f32 %v3130_v21, %v4790_v9  ;;  %v3000_v30 = vld [vmem:[%s5156_s6 + $0x30] sm:$0xff]   ;;  %v3005_v21 = vld [vmem:[%s5156_s6 + $0x8] sm:$0xff]  }
 0x12b   : > { %v4922_v22 = vmul.f32 %v3132_v6, %v4793_v54  ;;  %v1610_v6 = vld [vmem:[%s5155_s5] sm:$0x1] }
 0x12c   : > { %v1575_v35 = vadd.f32 %v1574_v51, %v4902_v56  ;;  %v3134_v39 = vpop.eup %3133  ;;  %v3002_v51 = vld [vmem:[%s5156_s6 + $0x20] sm:$0xff]  }
 0x12d   : > { %v4926_v46 = vmul.f32 %v3134_v39, %v4797_v50 }
 0x12e   : > { %v1576_v61 = vadd.f32 %v1575_v35, %v4906_v52  ;;  %v3136_v29 = vpop.eup %3135  ;;  %v3004_v35 = vld [vmem:[%s5156_s6 + $0x10] sm:$0xff]  }
 0x12f   : > { %v4930_v15 = vmul.f32 %v3136_v29, %v4800_v27 }
 0x130   : > { %v1577_v38 = vadd.f32 %v1576_v61, %v4910_v43  ;;  %v3138_v20 = vpop.eup %3137  ;;  %v3006_v61 = vld [vmem:[%s5156_s6] sm:$0xff]  }
 0x131   : > { %v4934_v37 = vmul.f32 %v3138_v20, %v4804_v26 }
 0x132   : > { %v1578_v25 = vadd.f32 %v1577_v38, %v4914_v55  ;;  %v3140_v59 = vpop.eup %3139 }
 0x133   : > { %v4938_v49 = vmul.f32 %v3140_v59, %v4807_v53 }
 0x134   : > { %v1579_v13 = vadd.f32 %v1578_v25, %v4918_v60  ;;  %v3142_v58 = vpop.eup %3141 }
 0x135   : > { %v4942_v28 = vmul.f32 %v3142_v58, %v4811_v33  ;;  %v2999_v33 = vld [vmem:[%s5156_s6 + $0x38] sm:$0xff]  }
 0x136   : > { %v1580_v9 = vadd.f32 %v1579_v13, %v4922_v22 }
 0x138   : > { %v1581_v54 = vadd.f32 %v1580_v9, %v4926_v46 }
 0x13a   : > { %v1582_v50 = vadd.f32 %v1581_v54, %v4930_v15 }
 0x13c   : > { %v1583_v27 = vadd.f32 %v1582_v50, %v4934_v37 }
 0x13e   : > { %v1584_v1 = vadd.f32 %v1583_v27, %v4938_v49 }
 0x140   : > { %v1585_v42 = vadd.f32 %v1584_v1, %v4942_v28 }
 0x142   : > { %v1586_v36 = vrot.slane %v1585_v42, 4 }
 0x144   : > { %v1587_v26 = vadd.f32 %v1586_v36, %v1585_v42  ;;  %v3007_v42 = vld [vmem:[%s5158_s8 + $0x38] sm:$0xff]   ;;  %v3008_v36 = vld [vmem:[%s5158_s8 + $0x30] sm:$0xff]  }
 0x145   : > { %2933 = vmatprep.subr.bf16.mxu0 %v3007_v42 }
 0x146   : > { %v1588_v3 = vrot.slane %v1587_v26, 2  ;;  %2934 = vmatpush3.bf16.msra.mxu0 %v3007_v42 }
 0x147   : > { %2935 = vmatprep.subr.bf16.mxu0 %v3008_v36 }
 0x148   : > { %v1589_v23 = vadd.f32 %v1588_v3, %v1587_v26  ;;  %v3009_v26 = vld [vmem:[%s5158_s8 + $0x28] sm:$0xff]   ;;  %v3010_v3 = vld [vmem:[%s5158_s8 + $0x20] sm:$0xff]  }
 0x14a   : > { %v1590_v34 = vrot.slane %v1589_v23, 1  ;;  %2936 = vmatpush3.bf16.msra.mxu0 %v3008_v36 }
 0x14b   : > { %2937 = vmatprep.subr.bf16.mxu0 %v3009_v26 }
 0x14c   : > { %v1591_v41 = vadd.f32 %v1590_v34, %v1589_v23  ;;  %v3011_v23 = vld [vmem:[%s5158_s8 + $0x18] sm:$0xff]   ;;  %v3012_v34 = vld [vmem:[%s5158_s8 + $0x10] sm:$0xff]  }
 0x14e   : > { %v1592_v32 = vmul.f32 0.00390625, %v1591_v41  ;;  %2938 = vmatpush3.bf16.msra.mxu0 %v3009_v26  ;;  %v3013_v41 = vld [vmem:[%s5158_s8 + $0x8] sm:$0xff]  }
 0x14f   : > { %2939 = vmatprep.subr.bf16.mxu0 %v3010_v3 }
 0x150   : > { %v1593_v53 = vpack.c.bf16 %v1592_v32, %v1592_v32  ;;  %v3014_v32 = vld [vmem:[%s5158_s8] sm:$0xff]  }
 0x152   : > { %2910 = vmatmul.mubr.bf16.vlgmr.msra.gmra.mxu1 %v1593_v53  ;;  %2940 = vmatpush3.bf16.msra.mxu0 %v3010_v3  ;;  %v1723_v53 = vld [vmem:[%s5157_s7] sm:$0x1] }
 0x153   : > { %2929 = vmatprep.mubr.msk.bf16.mxu1 %vm3161_vm0, %v3151_v45  ;;  %2914 = vmatpush3.bf16.msra.mxu1 %v2999_v33 }
 0x154   : > { %2915 = vmatprep.subr.bf16.mxu1 %v3151_v45  ;;  %2941 = vmatprep.subr.bf16.mxu0 %v3011_v23 }
 0x156   : > { %2942 = vmatpush3.bf16.msra.mxu0 %v3011_v23 }
 0x157   : > { %2916 = vmatpush3.bf16.msra.mxu1 %v3000_v30  ;;  %2943 = vmatprep.subr.bf16.mxu0 %v3012_v34 }
 0x158   : > { %2917 = vmatprep.subr.bf16.mxu1 %v3151_v45 }
 0x15a   : > { %2944 = vmatpush3.bf16.msra.mxu0 %v3012_v34 }
 0x15b   : > { %2918 = vmatpush3.bf16.msra.mxu1 %v3001_v17  ;;  %2945 = vmatprep.subr.bf16.mxu0 %v3013_v41 }
 0x15c   : > { %2919 = vmatprep.subr.bf16.mxu1 %v3151_v45 }
 0x15e   : > { %2946 = vmatpush3.bf16.msra.mxu0 %v3013_v41 }
 0x15f   : > { %2920 = vmatpush3.bf16.msra.mxu1 %v3002_v51  ;;  %2947 = vmatprep.subr.bf16.mxu0 %v3014_v32 }
 0x160   : > { %2921 = vmatprep.subr.bf16.mxu1 %v3151_v45 }
 0x162   : > { %2948 = vmatpush3.bf16.msra.mxu0 %v3014_v32 }
 0x163   : > { %2922 = vmatpush3.bf16.msra.mxu1 %v3003_v57 }
 0x164   : > { %2923 = vmatprep.subr.bf16.mxu1 %v3151_v45 }
 0x167   : > { %2924 = vmatpush3.bf16.msra.mxu1 %v3004_v35 }
 0x168   : > { %2925 = vmatprep.subr.bf16.mxu1 %v3151_v45 }
 0x16b   : > { %2926 = vmatpush3.bf16.msra.mxu1 %v3005_v21 }
 0x16c   : > { %2927 = vmatprep.subr.bf16.mxu1 %v3151_v45 }
 0x16f   : > { %2928 = vmatpush3.bf16.msra.mxu1 %v3006_v61 }
 0x212   : > { %v1693_v38 = vpop.f32.mrf.mxu1 }
 0x213   : > { %v1694_v39 = vadd.f32 %v1693_v38, %v1610_v6  ;;  %v1818_v38 = vlaneseq }
 0x214   : > { %v2911_v25 = vpop.f32.mrf.mxu1 }
 0x215   : > { %v1699_v29 = vmax.f32 %v1694_v39, -60.0 }
 0x216   : > { %v1696_v13 = vpop.f32.mrf.mxu1 }
 0x217   : > { %v1700_v20 = vsub.f32 0.0, %v1699_v29 }
 0x218   : > { %v2912_v9 = vpop.f32.mrf.mxu1 }
 0x219   : > { %v1701_v59 = vmul.f32 1.442695, %v1700_v20 }
 0x21b   : > { %3143 = vpow2.f32 %v1701_v59 }
 0x228   : > { %v3144_v54 = vpop.eup %3143 }
 0x229   : > { %v1703_v58 = vadd.f32 1.0, %v3144_v54 }
 0x22b   : > { %3145 = vrcp.f32 %v1703_v58 }
 0x238   : > { %v3146_v50 = vpop.eup %3145 }
 0x239   : > { %v1705_v27 = vmul.f32 %v3146_v50, %v1694_v39  ;;  %v1819_v39 = vshrl.u32 %v1818_v38, 7 }
 0x23b   : > { %v1706_v1 = vpack.c.bf16 %v1705_v27, %v1705_v27  ;;  %v1820_v25 = vsub.s32 0, %v1819_v39 }
 0x23d   : > { %2930 = vmatmul.mubr.bf16.vlgmr.msra.gmra.mxu1 %v1706_v1 }
 0x2fd   : > { %v1806_v45 = vpop.f32.mrf.mxu1 }
 0x2fe   : > { %v1807_v33 = vadd.f32 %v1806_v45, %v1723_v53 }
 0x2ff   : > { %v2931_v30 = vpop.f32.mrf.mxu1 }
 0x300   : > { %v1812_v17 = vmax.f32 %v1807_v33, -60.0 }
 0x301   : > { %v1809_v51 = vpop.f32.mrf.mxu1 }
 0x302   : > { %v1813_v57 = vsub.f32 0.0, %v1812_v17 }
 0x303   : > { %v2932_v35 = vpop.f32.mrf.mxu1 }
 0x304   : > { %v1814_v21 = vmul.f32 1.442695, %v1813_v57  ;;  %v2821_v57 = vld [vmem:[%s3294_s28 + $0x8] sm:$0xff]  }
 0x305   : > { %v2669_v39 = vunpack.c.h.bf16 %v2821_v57 }
 0x306   : > { %3147 = vpow2.f32 %v1814_v21 }
 0x313   : > { %v3148_v61 = vpop.eup %3147 }
 0x314   : > { %v1816_v6 = vadd.f32 1.0, %v3148_v61 }
 0x316   : > { %3149 = vrcp.f32 %v1816_v6  ;;  %v2668_v6 = vunpack.c.l.bf16 %v2821_v57 }
 0x323   : > { %v3150_v29 = vpop.eup %3149 }
 0x324   : > { %v1821_v13 = vrot.slane %v3150_v29, %v1820_v25 }
 0x326   : > { %v1822_v20 = vmul.f32 %v1821_v13, %v4815_v2  ;;  %v1823_v9 = vmul.f32 %v1821_v13, %v4819_v48  ;;  %v1824_v59 = vmul.f32 %v1821_v13, %v4822_v19  ;;  %v1825_v54 = vmul.f32 %v1821_v13, %v4825_v62 }
 0x327   : > { %v1826_v58 = vmul.f32 %v1821_v13, %v4831_v16  ;;  %v1827_v50 = vmul.f32 %v1821_v13, %v4836_v31  ;;  %v1828_v36 = vmul.f32 %v1821_v13, %v4841_v5  ;;  %v1829_v2 = vmul.f32 %v1821_v13, %v4846_v18 }
 0x328   : > { %v1854_v27 = vpack.c.bf16 %v1823_v9, %v1822_v20  ;;  %v1855_v1 = vpack.c.bf16 %v1825_v54, %v1824_v59  ;;  %v1830_v48 = vmul.f32 %v1821_v13, %v4850_v24  ;;  %v1831_v19 = vmul.f32 %v1821_v13, %v4854_v63 }
 0x329   : > { %v1856_v42 = vpack.c.bf16 %v1827_v50, %v1826_v58  ;;  %v1857_v26 = vpack.c.bf16 %v1829_v2, %v1828_v36  ;;  %v1832_v16 = vmul.f32 %v1821_v13, %v4858_v11  ;;  %v1833_v31 = vmul.f32 %v1821_v13, %v4862_v47 }
 0x32a   : > { %2949 = vmatprep.mubr.bf16.mxu0 %v1854_v27  ;;  %v1858_v62 = vpack.c.bf16 %v1831_v19, %v1830_v48  ;;  %v1834_v3 = vmul.f32 %v1821_v13, %v4866_v12  ;;  %v1835_v23 = vmul.f32 %v1821_v13, %v4870_v4  ;;  %v1836_v18 = vmul.f32 %v1821_v13, %v4874_v10 }
 0x32b   : > { %2950 = vmatmul.mubr.bf16.vlgmr.msra.gmra.mxu0 %v1855_v1  ;;  %v1859_v34 = vpack.c.bf16 %v1833_v31, %v1832_v16  ;;  %v1837_v24 = vmul.f32 %v1821_v13, %v4878_v14  ;;  %v1838_v63 = vmul.f32 %v1821_v13, %v4882_v0  ;;  %v1839_v41 = vmul.f32 %v1821_v13, %v4886_v8 }
 0x32c   : > { %2953 = vmatprep.mubr.bf16.mxu0 %v1856_v42  ;;  %v1860_v5 = vpack.c.bf16 %v1835_v23, %v1834_v3  ;;  %v1840_v47 = vmul.f32 %v1821_v13, %v4890_v40  ;;  %v1841_v12 = vmul.f32 %v1821_v13, %v4894_v7  ;;  %v1842_v4 = vmul.f32 %v1821_v13, %v4898_v44  ;;  %v2823_v42 = vld [vmem:[%s3294_s28 + $0x18] sm:$0xff]  }
 0x32d   : > { %v1861_v32 = vpack.c.bf16 %v1837_v24, %v1836_v18  ;;  %v1862_v11 = vpack.c.bf16 %v1839_v41, %v1838_v63  ;;  %v1843_v53 = vmul.f32 %v1821_v13, %v4902_v56  ;;  %v1844_v14 = vmul.f32 %v1821_v13, %v4906_v52 }
 0x32e   : > { %v1863_v45 = vpack.c.bf16 %v1841_v12, %v1840_v47  ;;  %v1845_v0 = vmul.f32 %v1821_v13, %v4910_v43  ;;  %v1846_v8 = vmul.f32 %v1821_v13, %v4914_v55  ;;  %v1847_v33 = vmul.f32 %v1821_v13, %v4918_v60 }
 0x32f   : > { %v1864_v10 = vpack.c.bf16 %v1843_v53, %v1842_v4  ;;  %v1848_v7 = vmul.f32 %v1821_v13, %v4922_v22  ;;  %v1849_v44 = vmul.f32 %v1821_v13, %v4926_v46  ;;  %v1850_v56 = vmul.f32 %v1821_v13, %v4930_v15  ;;  %v5037_v22 = vld [vmem:[%s5159_s9] ss:$0 sm:$0xff] }
 0x330   : > { %v1865_v30 = vpack.c.bf16 %v1845_v0, %v1844_v14  ;;  %v1866_v40 = vpack.c.bf16 %v1847_v33, %v1846_v8  ;;  %v1851_v17 = vmul.f32 %v1821_v13, %v4934_v37  ;;  %v1852_v55 = vmul.f32 %v1821_v13, %v4938_v49  ;;  %v5043_v37 = vld [vmem:[%s5160_s10] ss:$0 sm:$0xff] }
 0x331   : > { %v1867_v52 = vpack.c.bf16 %v1849_v44, %v1848_v7  ;;  %v1853_v60 = vmul.f32 %v1821_v13, %v4942_v28  ;;  %v2663_v28 = vld [vmem:[%s3294_s28] sm:$0xff]   ;;  %v2676_v16 = vunpack.c.l.bf16 %v2823_v42 }
 0x332   : > { %v1868_v43 = vpack.c.bf16 %v1851_v17, %v1850_v56  ;;  %v2664_v25 = vunpack.c.l.bf16 %v2663_v28  ;;  %v2665_v59 = vunpack.c.h.bf16 %v2663_v28 }
 0x333   : > { %2954 = vmatmul.mubr.bf16.gmra.mxu0 %v1857_v26  ;;  %v1869_v51 = vpack.c.bf16 %v1853_v60, %v1852_v55 }
 0x334   : > { %2957 = vmatprep.mubr.bf16.mxu0 %v1858_v62  ;;  %v2822_v62 = vld [vmem:[%s3294_s28 + $0x10] sm:$0xff]  }
 0x335   : > { %v2672_v18 = vunpack.c.l.bf16 %v2822_v62 }
 0x33b   : > { %2958 = vmatmul.mubr.bf16.gmra.mxu0 %v1859_v34 }
 0x33c   : > { %2961 = vmatprep.mubr.bf16.mxu0 %v1860_v5  ;;  %v2677_v5 = vunpack.c.h.bf16 %v2823_v42 }
 0x343   : > { %2962 = vmatmul.mubr.bf16.gmra.mxu0 %v1861_v32 }
 0x344   : > { %2965 = vmatprep.mubr.bf16.mxu0 %v1862_v11  ;;  %v2673_v11 = vunpack.c.h.bf16 %v2822_v62 }
 0x34b   : > { %2966 = vmatmul.mubr.bf16.gmra.mxu0 %v1863_v45 }
 0x34c   : > { %2969 = vmatprep.mubr.bf16.mxu0 %v1864_v10  ;;  %v2825_v10 = vld [vmem:[%s3294_s28 + $0x28] sm:$0xff]  }
 0x34d   : > { %v2684_v7 = vunpack.c.l.bf16 %v2825_v10 }
 0x353   : > { %2970 = vmatmul.mubr.bf16.gmra.mxu0 %v1865_v30 }
 0x354   : > { %2973 = vmatprep.mubr.bf16.mxu0 %v1866_v40  ;;  %v2824_v40 = vld [vmem:[%s3294_s28 + $0x20] sm:$0xff]  }
 0x355   : > { %v2680_v55 = vunpack.c.l.bf16 %v2824_v40  ;;  %v2681_v57 = vunpack.c.h.bf16 %v2824_v40 }
 0x35b   : > { %2974 = vmatmul.mubr.bf16.gmra.mxu0 %v1867_v52 }
 0x35c   : > { %2977 = vmatprep.mubr.bf16.mxu0 %v1868_v43  ;;  %v2685_v43 = vunpack.c.h.bf16 %v2825_v10 }
 0x363   : > { %2978 = vmatmul.mubr.bf16.gmra.mxu0 %v1869_v51 }
 0x3eb   : > { %v2951_v46 = vpop.f32.mrf.mxu0 }
 0x3ec   : > { %v2104_v15 = vmul.f32 %v2951_v46, %v5037_v22 }
 0x3ed   : > { %v1968_v35 = vpop.f32.mrf.mxu0 }
 0x3ee   : > { %v2102_v49 = vmul.f32 %v5037_v22, %v1968_v35  ;;  %v2143_v61 = vadd.f32 %v5043_v37, %v2104_v15 }
 0x3ef   : > { %v2952_v21 = vpop.f32.mrf.mxu0 }
 0x3f0   : > { %v2105_v38 = vmul.f32 %v2952_v21, %v5037_v22  ;;  %v2141_v13 = vadd.f32 %v5043_v37, %v2102_v49  ;;  %v2239_v58 = vadd.f32 %v2668_v6, %v2143_v61  ;;  %v2827_v6 = vld [vmem:[%s3294_s28 + $0x38] sm:$0xff]  }
 0x3f1   : > { %v1971_v29 = vpop.f32.mrf.mxu0 }
 0x3f2   : > { %v2144_v20 = vadd.f32 %v5043_v37, %v2105_v38  ;;  %v2103_v9 = vmul.f32 %v5037_v22, %v1971_v29  ;;  %v2237_v2 = vadd.f32 %v2664_v25, %v2141_v13 }
 0x3f3   : > { %v2955_v54 = vpop.f32.mrf.mxu0 }
 0x3f4   : > { %v2240_v50 = vadd.f32 %v2669_v39, %v2144_v20  ;;  %v2142_v27 = vadd.f32 %v5043_v37, %v2103_v9  ;;  %v2108_v1 = vmul.f32 %v2955_v54, %v5037_v22  ;;  %v2826_v20 = vld [vmem:[%s3294_s28 + $0x30] sm:$0xff]   ;;  %v2692_v9 = vunpack.c.l.bf16 %v2827_v6 }
 0x3f5   : > { %v1984_v36 = vpop.f32.mrf.mxu0 }
 0x3f6   : > { %v2734_v48 = vpack.c.bf16 %v2240_v50, %v2239_v58  ;;  %v2238_v19 = vadd.f32 %v2665_v59, %v2142_v27  ;;  %v2106_v26 = vmul.f32 %v5037_v22, %v1984_v36  ;;  %v2147_v23 = vadd.f32 %v5043_v37, %v2108_v1 }
 0x3f7   : > { %v2956_v31 = vpop.f32.mrf.mxu0  ;;  %v2693_v27 = vunpack.c.h.bf16 %v2827_v6  ;;  %v2688_v1 = vunpack.c.l.bf16 %v2826_v20 }
 0x3f8   : > { %2836 = vst [vmem:[%s5061_s27 + $0x8] sm:$0xff] %v2734_v48   ;;  %v2729_v3 = vpack.c.bf16 %v2238_v19, %v2237_v2  ;;  %v2109_v34 = vmul.f32 %v2956_v31, %v5037_v22  ;;  %v2145_v63 = vadd.f32 %v5043_v37, %v2106_v26  ;;  %v2243_v12 = vadd.f32 %v2676_v16, %v2147_v23  ;;  %v2829_v23 = vld [vmem:[%s3294_s28 + $0x48] sm:$0xff]  }
 0x3f9   : > { %v1987_v24 = vpop.f32.mrf.mxu0  ;;  %v2689_v19 = vunpack.c.h.bf16 %v2826_v20 }
 0x3fa   : > { %2730 = vst [vmem:[%s5061_s27] sm:$0xff] %v2729_v3   ;;  %v2148_v41 = vadd.f32 %v5043_v37, %v2109_v34  ;;  %v2107_v32 = vmul.f32 %v5037_v22, %v1987_v24  ;;  %v2241_v0 = vadd.f32 %v2672_v18, %v2145_v63 }
 0x3fb   : > { %v2959_v47 = vpop.f32.mrf.mxu0 }
 0x3fc   : > { %v2244_v4 = vadd.f32 %v2677_v5, %v2148_v41  ;;  %v2146_v53 = vadd.f32 %v5043_v37, %v2107_v32  ;;  %v2112_v45 = vmul.f32 %v2959_v47, %v5037_v22  ;;  %v2828_v41 = vld [vmem:[%s3294_s28 + $0x40] sm:$0xff]   ;;  %v2700_v32 = vunpack.c.l.bf16 %v2829_v23 }
 0x3fd   : > { %v2000_v14 = vpop.f32.mrf.mxu0 }
 0x3fe   : > { %v2744_v8 = vpack.c.bf16 %v2244_v4, %v2243_v12  ;;  %v2242_v33 = vadd.f32 %v2673_v11, %v2146_v53  ;;  %v2110_v30 = vmul.f32 %v5037_v22, %v2000_v14  ;;  %v2151_v17 = vadd.f32 %v5043_v37, %v2112_v45 }
 0x3ff   : > { %v2960_v44 = vpop.f32.mrf.mxu0  ;;  %v2701_v53 = vunpack.c.h.bf16 %v2829_v23  ;;  %v2696_v45 = vunpack.c.l.bf16 %v2828_v41 }
 0x400   : > { %2838 = vst [vmem:[%s5061_s27 + $0x18] sm:$0xff] %v2744_v8   ;;  %v2739_v56 = vpack.c.bf16 %v2242_v33, %v2241_v0  ;;  %v2113_v52 = vmul.f32 %v2960_v44, %v5037_v22  ;;  %v2149_v51 = vadd.f32 %v5043_v37, %v2110_v30  ;;  %v2247_v49 = vadd.f32 %v2684_v7, %v2151_v17  ;;  %v2831_v17 = vld [vmem:[%s3294_s28 + $0x58] sm:$0xff]  }
 0x401   : > { %v2003_v60 = vpop.f32.mrf.mxu0  ;;  %v2697_v33 = vunpack.c.h.bf16 %v2828_v41 }
 0x402   : > { %2837 = vst [vmem:[%s5061_s27 + $0x10] sm:$0xff] %v2739_v56   ;;  %v2152_v46 = vadd.f32 %v5043_v37, %v2113_v52  ;;  %v2111_v15 = vmul.f32 %v5037_v22, %v2003_v60  ;;  %v2245_v39 = vadd.f32 %v2680_v55, %v2149_v51 }
 0x403   : > { %v2963_v35 = vpop.f32.mrf.mxu0 }
 0x404   : > { %v2248_v28 = vadd.f32 %v2685_v43, %v2152_v46  ;;  %v2150_v21 = vadd.f32 %v5043_v37, %v2111_v15  ;;  %v2116_v61 = vmul.f32 %v2963_v35, %v5037_v22  ;;  %v2830_v46 = vld [vmem:[%s3294_s28 + $0x50] sm:$0xff]   ;;  %v2708_v15 = vunpack.c.l.bf16 %v2831_v17 }
 0x405   : > { %v2016_v38 = vpop.f32.mrf.mxu0 }
 0x406   : > { %v2754_v25 = vpack.c.bf16 %v2248_v28, %v2247_v49  ;;  %v2246_v29 = vadd.f32 %v2681_v57, %v2150_v21  ;;  %v2114_v13 = vmul.f32 %v5037_v22, %v2016_v38  ;;  %v2155_v58 = vadd.f32 %v5043_v37, %v2116_v61 }
 0x407   : > { %v2964_v59 = vpop.f32.mrf.mxu0  ;;  %v2709_v21 = vunpack.c.h.bf16 %v2831_v17  ;;  %v2704_v61 = vunpack.c.l.bf16 %v2830_v46 }
 0x408   : > { %2840 = vst [vmem:[%s5061_s27 + $0x28] sm:$0xff] %v2754_v25   ;;  %v2749_v54 = vpack.c.bf16 %v2246_v29, %v2245_v39  ;;  %v2117_v50 = vmul.f32 %v2964_v59, %v5037_v22  ;;  %v2153_v36 = vadd.f32 %v5043_v37, %v2114_v13  ;;  %v2251_v62 = vadd.f32 %v2692_v9, %v2155_v58  ;;  %v2833_v58 = vld [vmem:[%s3294_s28 + $0x68] sm:$0xff]  }
 0x409   : > { %v2019_v42 = vpop.f32.mrf.mxu0  ;;  %v2705_v29 = vunpack.c.h.bf16 %v2830_v46 }
 0x40a   : > { %2839 = vst [vmem:[%s5061_s27 + $0x20] sm:$0xff] %v2749_v54   ;;  %v2156_v2 = vadd.f32 %v5043_v37, %v2117_v50  ;;  %v2115_v48 = vmul.f32 %v5037_v22, %v2019_v42  ;;  %v2249_v5 = vadd.f32 %v2688_v1, %v2153_v36 }
 0x40b   : > { %v2967_v26 = vpop.f32.mrf.mxu0 }
 0x40c   : > { %v2252_v16 = vadd.f32 %v2693_v27, %v2156_v2  ;;  %v2154_v31 = vadd.f32 %v5043_v37, %v2115_v48  ;;  %v2120_v3 = vmul.f32 %v2967_v26, %v5037_v22  ;;  %v2832_v2 = vld [vmem:[%s3294_s28 + $0x60] sm:$0xff]   ;;  %v2716_v48 = vunpack.c.l.bf16 %v2833_v58 }
 0x40d   : > { %v2032_v34 = vpop.f32.mrf.mxu0 }
 0x40e   : > { %v2764_v18 = vpack.c.bf16 %v2252_v16, %v2251_v62  ;;  %v2250_v24 = vadd.f32 %v2689_v19, %v2154_v31  ;;  %v2118_v63 = vmul.f32 %v5037_v22, %v2032_v34  ;;  %v2159_v12 = vadd.f32 %v5043_v37, %v2120_v3 }
 0x40f   : > { %v2968_v11 = vpop.f32.mrf.mxu0  ;;  %v2717_v31 = vunpack.c.h.bf16 %v2833_v58  ;;  %v2712_v3 = vunpack.c.l.bf16 %v2832_v2 }
 0x410   : > { %2842 = vst [vmem:[%s5061_s27 + $0x38] sm:$0xff] %v2764_v18   ;;  %v2759_v47 = vpack.c.bf16 %v2250_v24, %v2249_v5  ;;  %v2121_v4 = vmul.f32 %v2968_v11, %v5037_v22  ;;  %v2157_v14 = vadd.f32 %v5043_v37, %v2118_v63  ;;  %v2255_v40 = vadd.f32 %v2700_v32, %v2159_v12  ;;  %v2835_v12 = vld [vmem:[%s3294_s28 + $0x78] sm:$0xff]  }
 0x411   : > { %v2035_v10 = vpop.f32.mrf.mxu0  ;;  %v2713_v24 = vunpack.c.h.bf16 %v2832_v2 }
 0x412   : > { %2841 = vst [vmem:[%s5061_s27 + $0x30] sm:$0xff] %v2759_v47   ;;  %v2160_v0 = vadd.f32 %v5043_v37, %v2121_v4  ;;  %v2119_v8 = vmul.f32 %v5037_v22, %v2035_v10  ;;  %v2253_v43 = vadd.f32 %v2696_v45, %v2157_v14 }
 0x413   : > { %v2971_v30 = vpop.f32.mrf.mxu0 }
 0x414   : > { %v2256_v7 = vadd.f32 %v2701_v53, %v2160_v0  ;;  %v2158_v44 = vadd.f32 %v5043_v37, %v2119_v8  ;;  %v2124_v56 = vmul.f32 %v2971_v30, %v5037_v22  ;;  %v2834_v0 = vld [vmem:[%s3294_s28 + $0x70] sm:$0xff]   ;;  %v2724_v8 = vunpack.c.l.bf16 %v2835_v12 }
 0x415   : > { %v2048_v52 = vpop.f32.mrf.mxu0 }
 0x416   : > { %v2774_v55 = vpack.c.bf16 %v2256_v7, %v2255_v40  ;;  %v2254_v60 = vadd.f32 %v2697_v33, %v2158_v44  ;;  %v2122_v51 = vmul.f32 %v5037_v22, %v2048_v52  ;;  %v2163_v49 = vadd.f32 %v5043_v37, %v2124_v56 }
 0x417   : > { %v2972_v57 = vpop.f32.mrf.mxu0  ;;  %v2725_v44 = vunpack.c.h.bf16 %v2835_v12  ;;  %v2720_v56 = vunpack.c.l.bf16 %v2834_v0 }
 0x418   : > { %2844 = vst [vmem:[%s5061_s27 + $0x48] sm:$0xff] %v2774_v55   ;;  %v2769_v35 = vpack.c.bf16 %v2254_v60, %v2253_v43  ;;  %v2125_v28 = vmul.f32 %v2972_v57, %v5037_v22  ;;  %v2161_v38 = vadd.f32 %v5043_v37, %v2122_v51  ;;  %v2259_v20 = vadd.f32 %v2708_v15, %v2163_v49 }
 0x419   : > { %v2051_v6 = vpop.f32.mrf.mxu0  ;;  %v2721_v60 = vunpack.c.h.bf16 %v2834_v0 }
 0x41a   : > { %2843 = vst [vmem:[%s5061_s27 + $0x40] sm:$0xff] %v2769_v35   ;;  %v2164_v39 = vadd.f32 %v5043_v37, %v2125_v28  ;;  %v2123_v25 = vmul.f32 %v5037_v22, %v2051_v6  ;;  %v2257_v27 = vadd.f32 %v2704_v61, %v2161_v38 }
 0x41b   : > { %v2975_v13 = vpop.f32.mrf.mxu0 }
 0x41c   : > { %v2260_v9 = vadd.f32 %v2709_v21, %v2164_v39  ;;  %v2162_v59 = vadd.f32 %v5043_v37, %v2123_v25  ;;  %v2128_v54 = vmul.f32 %v2975_v13, %v5037_v22 }
 0x41d   : > { %v2064_v50 = vpop.f32.mrf.mxu0 }
 0x41e   : > { %v2784_v1 = vpack.c.bf16 %v2260_v9, %v2259_v20  ;;  %v2258_v42 = vadd.f32 %v2705_v29, %v2162_v59  ;;  %v2126_v36 = vmul.f32 %v5037_v22, %v2064_v50  ;;  %v2167_v62 = vadd.f32 %v5043_v37, %v2128_v54 }
 0x41f   : > { %v2976_v19 = vpop.f32.mrf.mxu0 }
 0x420   : > { %2846 = vst [vmem:[%s5061_s27 + $0x58] sm:$0xff] %v2784_v1   ;;  %v2779_v26 = vpack.c.bf16 %v2258_v42, %v2257_v27  ;;  %v2129_v16 = vmul.f32 %v2976_v19, %v5037_v22  ;;  %v2165_v34 = vadd.f32 %v5043_v37, %v2126_v36  ;;  %v2263_v41 = vadd.f32 %v2716_v48, %v2167_v62 }
 0x421   : > { %v2067_v23 = vpop.f32.mrf.mxu0 }
 0x422   : > { %2845 = vst [vmem:[%s5061_s27 + $0x50] sm:$0xff] %v2779_v26   ;;  %v2168_v5 = vadd.f32 %v5043_v37, %v2129_v16  ;;  %v2127_v18 = vmul.f32 %v5037_v22, %v2067_v23  ;;  %v2261_v53 = vadd.f32 %v2712_v3, %v2165_v34 }
 0x423   : > { %v2979_v63 = vpop.f32.mrf.mxu0 }
 0x424   : > { %v2264_v32 = vadd.f32 %v2717_v31, %v2168_v5  ;;  %v2166_v11 = vadd.f32 %v5043_v37, %v2127_v18  ;;  %v2132_v47 = vmul.f32 %v2979_v63, %v5037_v22 }
 0x425   : > { %v2080_v4 = vpop.f32.mrf.mxu0 }
 0x426   : > { %v2794_v45 = vpack.c.bf16 %v2264_v32, %v2263_v41  ;;  %v2262_v10 = vadd.f32 %v2713_v24, %v2166_v11  ;;  %v2130_v14 = vmul.f32 %v5037_v22, %v2080_v4  ;;  %v2171_v40 = vadd.f32 %v5043_v37, %v2132_v47 }
 0x427   : > { %v2980_v33 = vpop.f32.mrf.mxu0 }
 0x428   : > { %2848 = vst [vmem:[%s5061_s27 + $0x68] sm:$0xff] %v2794_v45   ;;  %v2789_v30 = vpack.c.bf16 %v2262_v10, %v2261_v53  ;;  %v2133_v7 = vmul.f32 %v2980_v33, %v5037_v22  ;;  %v2169_v52 = vadd.f32 %v5043_v37, %v2130_v14  ;;  %v2267_v51 = vadd.f32 %v2724_v8, %v2171_v40 }
 0x429   : > { %v2083_v17 = vpop.f32.mrf.mxu0 }
 0x42a   : > { %2847 = vst [vmem:[%s5061_s27 + $0x60] sm:$0xff] %v2789_v30   ;;  %v2172_v43 = vadd.f32 %v5043_v37, %v2133_v7  ;;  %v2131_v55 = vmul.f32 %v5037_v22, %v2083_v17  ;;  %v2265_v57 = vadd.f32 %v2720_v56, %v2169_v52 }
 0x42c   : > { %v2268_v46 = vadd.f32 %v2725_v44, %v2172_v43  ;;  %v2170_v15 = vadd.f32 %v5043_v37, %v2131_v55 }
 0x42e   : > { %v2804_v35 = vpack.c.bf16 %v2268_v46, %v2267_v51  ;;  %v2266_v49 = vadd.f32 %v2721_v60, %v2170_v15 }
 0x430   : > { %2850 = vst [vmem:[%s5061_s27 + $0x78] sm:$0xff] %v2804_v35   ;;  %v2799_v28 = vpack.c.bf16 %v2266_v49, %v2265_v57 }
 0x432   : > { %2849 = vst [vmem:[%s5061_s27 + $0x70] sm:$0xff] %v2799_v28  }
 0x433 PF: > { %s21_s17 = sadd.s32 1, %s3158_s17  }
 0x434   : > { %p18_p4 = scmp.ge.s32.totalorder %s21_s17, 4  }
 0x436   :  { %20 = sbr.rel (!%p18_p4) target bundleno = 1 (0x1), region = 96 }

// kernel: encoder_forward.7
= control target key start
LH: loop header
LB: loop body
LE: loop exit
PB: predicated region body
PF: predicated region fallthrough
CT: control target
= control target key end

     0   :  { %s3291_s24 = smov 0   ;;  %s4132_s0 = inlined_call_operand.vmem [shape: bf16[2,64,128], index: 0, kind: input, shape index: {}]   ;;  %s4133_s1 = inlined_call_operand.vmem [shape: bf16[2,64,128], index: 1, kind: input, shape index: {}]   ;;  %s4134_s2 = inlined_call_operand.vmem [shape: bf16[2,64,128], index: 2, kind: input, shape index: {}]   ;;  %s4135_s3 = inlined_call_operand.vmem [shape: bf16[2,64,128], index: 3, kind: input, shape index: {}]   ;;  %s4136_s4 = inlined_call_operand.vmem [shape: bf16[128,128], index: 4, kind: input, shape index: {}]   ;;  %s4137_s5 = inlined_call_operand.vmem [shape: f32[1,128], index: 5, kind: input, shape index: {}]   ;;  %s4138_s6 = inlined_call_operand.vmem [shape: f32[1,128], index: 6, kind: input, shape index: {}]   ;;  %s4139_s7 = inlined_call_operand.vmem [shape: f32[9,128], index: 7, kind: input, shape index: {}]   ;;  %s4140_s8 = inlined_call_operand.vmem [shape: f32[1,128], index: 8, kind: input, shape index: {}]   ;;  %s4141_s9 = inlined_call_operand.vmem [shape: f32[1,128], index: 9, kind: input, shape index: {}]   ;;  %s4142_s10 = inlined_call_operand.vmem [shape: bf16[128,128], index: 10, kind: input, shape index: {}]   ;;  %s4143_s11 = inlined_call_operand.vmem [shape: f32[1,128], index: 11, kind: input, shape index: {}]   ;;  %s4144_s12 = inlined_call_operand.vmem [shape: bf16[128,128], index: 12, kind: input, shape index: {}]   ;;  %s4145_s13 = inlined_call_operand.vmem [shape: f32[1,128], index: 13, kind: input, shape index: {}]   ;;  %s4146_s14 = inlined_call_operand.vmem [shape: bf16[128,128], index: 14, kind: input, shape index: {}]   ;;  %s4147_s15 = inlined_call_operand.vmem [shape: f32[1,128], index: 15, kind: input, shape index: {}]   ;;  %s4148_s16 = inlined_call_operand.vmem [shape: f32[1,128], index: 16, kind: input, shape index: {}]   ;;  %s4149_s17 = inlined_call_operand.vmem [shape: bf16[2,64,128], index: 17, kind: output, shape index: {}]  }
   0x1   :  { %4152 = sst [smem:[#allocation10_spill]] %s4132_s0 }
   0x2   :  { %4153 = sst [smem:[#allocation11_spill]] %s4133_s1 }
   0x3 LB: > { %s2548_s25 = sadd.s32 4294967295, %s3197_s24   ;;  %p2552_p0 = scmp.ge.s32.totalorder %s3197_s24, 1  ;;  %s3197_s24 = sphi %s3291_s24, %s27_s24  }
   0x4   : > { %p517_p1 = scmp.lt.s32.totalorder %s3197_s24, 3 }
   0x6   : > { %p518_p2 = pnand %p2552_p0, %p517_p1 }
   0x8   : > { %521 = sbr.rel (%p518_p2) target bundleno = 1124 (0x464), region = 88 }
   0xd   : > { %v2950_v0 = vld [vmem:[%s4136_s4 + $0x38] sm:$0xff]   ;;  %v2952_v2 = vld [vmem:[%s4136_s4 + $0x30] sm:$0xff]   ;;  %p3310_p3 = scmp.lt.s32.totalorder %s2548_s25, 1  ;;  %v3199_v3 = vmov 0.0   ;;  %v2954_v5 = vld [vmem:[%s4136_s4 + $0x28] sm:$0xff]   ;;  %s4155_s22 = sld [smem:[#allocation10_spill]] }
   0xe   : > { %v2951_v1 = vld [vmem:[%s4136_s4 + $0x38] sm:$0xff]   ;;  %2780 = vmatprep.subr.bf16.mxu1 %v2950_v0  ;;  %615 = vst [vmem:[#allocation2 + $0x28] sm:$0x1] %v3199_v3  ;;  %611 = vst [vmem:[#allocation2 + $0x80] sm:$0xff] %v3199_v3  ;;  %v2953_v4 = vld [vmem:[%s4136_s4 + $0x30] sm:$0xff]   ;;  %s4156_s21 = sld [smem:[#allocation11_spill]] }
   0xf   : > { %612 = vst [vmem:[#allocation2 + $0x88] sm:$0x1] %v3199_v3  ;;  %613 = vst [vmem:[#allocation2 + $0x8] sm:$0x1] %v3199_v3  ;;  %2781 = vmatpush3.bf16.msra.mxu1 %v2950_v0  ;;  %2828 = vmatprep.subr.bf16.mxu0 %v2951_v1  ;;  %v2955_v6 = vld [vmem:[%s4136_s4 + $0x28] sm:$0xff]   ;;  %s4172_s25 = smov (!%p3310_p3, %s2548_s25), 1 }
  0x10   : > { %614 = vst [vmem:[#allocation2 + $0x18] sm:$0x1] %v3199_v3  ;;  %616 = vst [vmem:[#allocation2 + $0x38] sm:$0x1] %v3199_v3  ;;  %2829 = vmatpush3.bf16.msra.mxu0 %v2951_v1  ;;  %2782 = vmatprep.subr.bf16.mxu1 %v2952_v2  ;;  %v2956_v7 = vld [vmem:[%s4136_s4 + $0x20] sm:$0xff]   ;;  %s3351_s0 = sshll.u32 %s4172_s25, 5 }
  0x11   : > { %617 = vst [vmem:[#allocation2 + $0x48] sm:$0x1] %v3199_v3  ;;  %618 = vst [vmem:[#allocation2 + $0x58] sm:$0x1] %v3199_v3  ;;  %2830 = vmatprep.subr.bf16.mxu0 %v2953_v4  ;;  %v2957_v8 = vld [vmem:[%s4136_s4 + $0x20] sm:$0xff]   ;;  %v2958_v9 = vld [vmem:[%s4136_s4 + $0x18] sm:$0xff]   ;;  %s3373_s29 = scalar_lea.vmem %s4134_s2, %s3351_s0  ;;  %s3421_s19 = scalar_lea.vmem %s4135_s3, %s3351_s0 }
  0x12   : > { %619 = vst [vmem:[#allocation2 + $0x68] sm:$0x1] %v3199_v3  ;;  %620 = vst [vmem:[#allocation2 + $0x78] sm:$0x1] %v3199_v3  ;;  %v2959_v10 = vld [vmem:[%s4136_s4 + $0x18] sm:$0xff]   ;;  %v2960_v11 = vld [vmem:[%s4136_s4 + $0x10] sm:$0xff]  }
  0x13   : > { %1147 = vst [vmem:[#allocation2 + $0x128] sm:$0x1] %v3199_v3  ;;  %1148 = vst [vmem:[#allocation2 + $0x138] sm:$0x1] %v3199_v3  ;;  %2783 = vmatpush3.bf16.msra.mxu1 %v2952_v2  ;;  %s3363_s23 = scalar_lea.vmem %s4155_s22, %s3351_s0  ;;  %v2961_v13 = vld [vmem:[%s4136_s4 + $0x10] sm:$0xff]   ;;  %v2969_v14 = vld [vmem:[%s3373_s29] sm:$0xff]  }
  0x14   : > { %1149 = vst [vmem:[#allocation2 + $0x148] sm:$0x1] %v3199_v3  ;;  %1150 = vst [vmem:[#allocation2 + $0x158] sm:$0x1] %v3199_v3  ;;  %2831 = vmatpush3.bf16.msra.mxu0 %v2953_v4  ;;  %2784 = vmatprep.subr.bf16.mxu1 %v2954_v5  ;;  %v2966_v12 = vld [vmem:[%s3363_s23] sm:$0xff]   ;;  %v2962_v15 = vld [vmem:[%s4136_s4 + $0x8] sm:$0xff]   ;;  %s3403_s22 = scalar_lea.vmem %s4156_s21, %s3351_s0 }
  0x15   : > { %1151 = vst [vmem:[#allocation2 + $0x168] sm:$0x1] %v3199_v3  ;;  %1152 = vst [vmem:[#allocation2 + $0x178] sm:$0x1] %v3199_v3  ;;  %2832 = vmatprep.subr.bf16.mxu0 %v2955_v6  ;;  %2796 = vmatprep.mubr.bf16.mxu1 %v2966_v12  ;;  %v2963_v16 = vld [vmem:[%s4136_s4 + $0x8] sm:$0xff]   ;;  %v2964_v17 = vld [vmem:[%s4136_s4] sm:$0xff]  }
  0x16   : > { %1153 = vst [vmem:[#allocation2 + $0x188] sm:$0x1] %v3199_v3  ;;  %1154 = vst [vmem:[#allocation2 + $0x198] sm:$0x1] %v3199_v3  ;;  %2844 = vmatprep.mubr.bf16.mxu0 %v2969_v14  ;;  %v2965_v18 = vld [vmem:[%s4136_s4] sm:$0xff]   ;;  %v2968_v19 = vld [vmem:[%s4136_s4 + $0x38] sm:$0xff]  }
  0x17   : > { %2785 = vmatpush3.bf16.msra.mxu1 %v2954_v5  ;;  %v2967_v20 = vld [vmem:[%s3363_s23 + $0x8] sm:$0xff]   ;;  %v2971_v22 = vld [vmem:[%s4136_s4 + $0x30] sm:$0xff]   ;;  %v2973_v26 = vld [vmem:[%s3363_s23 + $0x18] sm:$0xff]   ;;  %vm3200_vm0 = vmmov 0  }
  0x18   : > { %2833 = vmatpush3.bf16.msra.mxu0 %v2955_v6  ;;  %2786 = vmatprep.subr.bf16.mxu1 %v2956_v7  ;;  %v2970_v21 = vld [vmem:[%s3373_s29 + $0x8] sm:$0xff]   ;;  %v2972_v23 = vld [vmem:[%s3363_s23 + $0x10] sm:$0xff]   ;;  %v2976_v27 = vld [vmem:[%s3373_s29 + $0x18] sm:$0xff]  }
  0x19   : > { %2834 = vmatprep.subr.bf16.mxu0 %v2957_v8  ;;  %v2975_v24 = vld [vmem:[%s3373_s29 + $0x10] sm:$0xff]   ;;  %v2974_v25 = vld [vmem:[%s4136_s4 + $0x28] sm:$0xff]   ;;  %v2977_v28 = vld [vmem:[%s4136_s4 + $0x20] sm:$0xff]  }
  0x1a   : > { %v2982_v29 = vld [vmem:[%s3403_s22] sm:$0xff]   ;;  %v2978_v30 = vld [vmem:[%s4136_s4 + $0x18] sm:$0xff]   ;;  %v2979_v31 = vld [vmem:[%s4136_s4 + $0x10] sm:$0xff]  }
  0x1b   : > { %2787 = vmatpush3.bf16.msra.mxu1 %v2956_v7  ;;  %v2980_v32 = vld [vmem:[%s4136_s4 + $0x8] sm:$0xff]   ;;  %v2981_v33 = vld [vmem:[%s4136_s4] sm:$0xff]   ;;  %v2984_v34 = vld [vmem:[%s4136_s4 + $0x38] sm:$0xff]  }
  0x1c   : > { %2835 = vmatpush3.bf16.msra.mxu0 %v2957_v8  ;;  %2788 = vmatprep.subr.bf16.mxu1 %v2958_v9  ;;  %v2983_v35 = vld [vmem:[%s3403_s22 + $0x8] sm:$0xff]   ;;  %v2986_v36 = vld [vmem:[%s3403_s22 + $0x10] sm:$0xff]   ;;  %v2987_v39 = vld [vmem:[%s3403_s22 + $0x18] sm:$0xff]  }
  0x1d   : > { %2836 = vmatprep.subr.bf16.mxu0 %v2959_v10  ;;  %v2985_v37 = vld [vmem:[%s4136_s4 + $0x30] sm:$0xff]   ;;  %v2988_v38 = vld [vmem:[%s4136_s4 + $0x28] sm:$0xff]   ;;  %v2994_v40 = vld [vmem:[%s3421_s19] sm:$0xff]  }
  0x1e   : > { %v2989_v41 = vld [vmem:[%s4136_s4 + $0x20] sm:$0xff]   ;;  %v2990_v42 = vld [vmem:[%s4136_s4 + $0x18] sm:$0xff]   ;;  %v2991_v43 = vld [vmem:[%s4136_s4 + $0x10] sm:$0xff]  }
  0x1f   : > { %2789 = vmatpush3.bf16.msra.mxu1 %v2958_v9  ;;  %v2992_v44 = vld [vmem:[%s4136_s4 + $0x8] sm:$0xff]   ;;  %v2993_v45 = vld [vmem:[%s4136_s4] sm:$0xff]   ;;  %v2996_v47 = vld [vmem:[%s3421_s19 + $0x10] sm:$0xff]  }
  0x20   : > { %2837 = vmatpush3.bf16.msra.mxu0 %v2959_v10  ;;  %2790 = vmatprep.subr.bf16.mxu1 %v2960_v11  ;;  %v2995_v46 = vld [vmem:[%s3421_s19 + $0x8] sm:$0xff]   ;;  %v2997_v48 = vld [vmem:[%s3421_s19 + $0x18] sm:$0xff]   ;;  %v3470_v49 = vld [vmem:[%s4137_s5] ss:$0 sm:$0xff]  ;;  %s608_s19 = scalar_lea.vmem %s4149_s17, %s3351_s0 }
  0x21   : > { %2838 = vmatprep.subr.bf16.mxu0 %v2961_v13  ;;  %v2998_v50 = vld [vmem:[%s4142_s10 + $0x38] sm:$0xff]   ;;  %v3480_v52 = vld [vmem:[%s4138_s6] ss:$0 sm:$0xff]  ;;  %v2999_v53 = vld [vmem:[%s4142_s10 + $0x30] sm:$0xff]  }
  0x22   : > { %v3000_v0 = vld [vmem:[%s4142_s10 + $0x28] sm:$0xff]  }
  0x23   : > { %2791 = vmatpush3.bf16.msra.mxu1 %v2960_v11 }
  0x24   : > { %2839 = vmatpush3.bf16.msra.mxu0 %v2961_v13  ;;  %2792 = vmatprep.subr.bf16.mxu1 %v2962_v15 }
  0x25   : > { %2840 = vmatprep.subr.bf16.mxu0 %v2963_v16 }
  0x27   : > { %2793 = vmatpush3.bf16.msra.mxu1 %v2962_v15 }
  0x28   : > { %2841 = vmatpush3.bf16.msra.mxu0 %v2963_v16  ;;  %2794 = vmatprep.subr.bf16.mxu1 %v2964_v17 }
  0x29   : > { %2842 = vmatprep.subr.bf16.mxu0 %v2965_v18 }
  0x2b   : > { %2795 = vmatpush3.bf16.msra.mxu1 %v2964_v17 }
  0x2c   : > { %2843 = vmatpush3.bf16.msra.mxu0 %v2965_v18  ;;  %2804 = vmatprep.subr.bf16.mxu1 %v2968_v19 }
  0x2d   : > { %2876 = vmatprep.subr.bf16.mxu0 %v3199_v3 }
  0x2e   : > { %2797 = vmatmul.mubr.bf16.vlgmr.msra.gmra.mxu1 %v2967_v20  ;;  %v3001_v20 = vld [vmem:[%s4142_s10 + $0x20] sm:$0xff]  }
  0x2f   : > { %2805 = vmatpush3.bf16.msra.mxu1 %v2968_v19  ;;  %2845 = vmatmul.mubr.bf16.vlgmr.msra.gmra.mxu0 %v2970_v21 }
  0x30   : > { %2806 = vmatprep.subr.bf16.mxu1 %v2971_v22  ;;  %2800 = vmatprep.mubr.bf16.mxu1 %v2972_v23 }
  0x31   : > { %2848 = vmatprep.mubr.bf16.mxu0 %v2975_v24  ;;  %2877 = vmatpush3.bf16.msra.mxu0 %v2998_v50 }
  0x32   : > { %2878 = vmatprep.subr.bf16.mxu0 %v3199_v3 }
  0x33   : > { %2807 = vmatpush3.bf16.msra.mxu1 %v2971_v22 }
  0x34   : > { %2808 = vmatprep.subr.bf16.mxu1 %v2974_v25 }
  0x35   : > { %2879 = vmatpush3.bf16.msra.mxu0 %v2999_v53 }
  0x36   : > { %2801 = vmatmul.mubr.bf16.gmra.mxu1 %v2973_v26  ;;  %2880 = vmatprep.subr.bf16.mxu0 %v3199_v3 }
  0x37   : > { %2809 = vmatpush3.bf16.msra.mxu1 %v2974_v25  ;;  %2849 = vmatmul.mubr.bf16.gmra.mxu0 %v2976_v27 }
  0x38   : > { %2810 = vmatprep.subr.bf16.mxu1 %v2977_v28  ;;  %2820 = vmatprep.mubr.bf16.mxu1 %v2982_v29 }
  0x39   : > { %2892 = vmatprep.mubr.msk.bf16.mxu0 %vm3200_vm0, %v3199_v3  ;;  %2881 = vmatpush3.bf16.msra.mxu0 %v3000_v0 }
  0x3a   : > { %2882 = vmatprep.subr.bf16.mxu0 %v3199_v3 }
  0x3b   : > { %2811 = vmatpush3.bf16.msra.mxu1 %v2977_v28 }
  0x3c   : > { %2812 = vmatprep.subr.bf16.mxu1 %v2978_v30 }
  0x3d   : > { %2883 = vmatpush3.bf16.msra.mxu0 %v3001_v20 }
  0x3e   : > { %2884 = vmatprep.subr.bf16.mxu0 %v3199_v3 }
  0x3f   : > { %2813 = vmatpush3.bf16.msra.mxu1 %v2978_v30 }
  0x40   : > { %2814 = vmatprep.subr.bf16.mxu1 %v2979_v31 }
  0x43   : > { %2815 = vmatpush3.bf16.msra.mxu1 %v2979_v31 }
  0x44   : > { %2816 = vmatprep.subr.bf16.mxu1 %v2980_v32 }
  0x47   : > { %2817 = vmatpush3.bf16.msra.mxu1 %v2980_v32 }
  0x48   : > { %2818 = vmatprep.subr.bf16.mxu1 %v2981_v33 }
  0x4b   : > { %2819 = vmatpush3.bf16.msra.mxu1 %v2981_v33 }
  0x4c   : > { %2852 = vmatprep.subr.bf16.mxu1 %v2984_v34 }
  0x4e   : > { %2821 = vmatmul.mubr.bf16.vlgmr.msra.gmra.mxu1 %v2983_v35 }
  0x4f   : > { %2853 = vmatpush3.bf16.msra.mxu1 %v2984_v34  ;;  %2824 = vmatprep.mubr.bf16.mxu1 %v2986_v36 }
  0x50   : > { %2854 = vmatprep.subr.bf16.mxu1 %v2985_v37 }
  0x53   : > { %2855 = vmatpush3.bf16.msra.mxu1 %v2985_v37 }
  0x54   : > { %2856 = vmatprep.subr.bf16.mxu1 %v2988_v38 }
  0x56   : > { %2825 = vmatmul.mubr.bf16.gmra.mxu1 %v2987_v39  ;;  %v3002_v39 = vld [vmem:[%s4142_s10 + $0x18] sm:$0xff]  }
  0x57   : > { %2857 = vmatpush3.bf16.msra.mxu1 %v2988_v38  ;;  %2868 = vmatprep.mubr.bf16.mxu1 %v2994_v40 }
  0x58   : > { %2858 = vmatprep.subr.bf16.mxu1 %v2989_v41  ;;  %2885 = vmatpush3.bf16.msra.mxu0 %v3002_v39 }
  0x59   : > { %2886 = vmatprep.subr.bf16.mxu0 %v3199_v3 }
  0x5b   : > { %2859 = vmatpush3.bf16.msra.mxu1 %v2989_v41 }
  0x5c   : > { %2860 = vmatprep.subr.bf16.mxu1 %v2990_v42 }
  0x5f   : > { %2861 = vmatpush3.bf16.msra.mxu1 %v2990_v42 }
  0x60   : > { %2862 = vmatprep.subr.bf16.mxu1 %v2991_v43 }
  0x63   : > { %2863 = vmatpush3.bf16.msra.mxu1 %v2991_v43 }
  0x64   : > { %2864 = vmatprep.subr.bf16.mxu1 %v2992_v44 }
  0x67   : > { %2865 = vmatpush3.bf16.msra.mxu1 %v2992_v44 }
  0x68   : > { %2866 = vmatprep.subr.bf16.mxu1 %v2993_v45 }
  0x6b   : > { %2867 = vmatpush3.bf16.msra.mxu1 %v2993_v45 }
  0x6c   : > { %2896 = vmatprep.subr.bf16.mxu1 %v3199_v3 }
  0x6e   : > { %2869 = vmatmul.mubr.bf16.vlgmr.msra.gmra.mxu1 %v2995_v46 }
  0x6f   : > { %2872 = vmatprep.mubr.bf16.mxu1 %v2996_v47 }
  0x76   : > { %2873 = vmatmul.mubr.bf16.gmra.mxu1 %v2997_v48 }
  0x77   : > { %2912 = vmatprep.mubr.msk.bf16.mxu1 %vm3200_vm0, %v3199_v3 }
  0xee   : > { %v2798_v51 = vpop.f32.mrf.mxu1 }
  0xef   : > { %v791_v54 = vmul.f32 %v2798_v51, %v3470_v49  ;;  %v2846_v55 = vpop.f32.mrf.mxu0 }
  0xf0   : > { %v751_v56 = vpop.f32.mrf.mxu1  ;;  %v1325_v57 = vmul.f32 %v2846_v55, %v3470_v49 }
  0xf1   : > { %v3489_v58 = vadd.f32 %v3480_v52, %v791_v54  ;;  %v789_v59 = vmul.f32 %v3470_v49, %v751_v56  ;;  %v1285_v60 = vpop.f32.mrf.mxu0  ;;  %v3003_v56 = vld [vmem:[%s4142_s10 + $0x10] sm:$0xff]  }
  0xf2   : > { %v3493_v61 = vadd.f32 %v3480_v52, %v1325_v57  ;;  %v2799_v62 = vpop.f32.mrf.mxu1  ;;  %v1323_v63 = vmul.f32 %v3470_v49, %v1285_v60  ;;  %2887 = vmatpush3.bf16.msra.mxu0 %v3003_v56 }
  0xf3   : > { %v814_v1 = vmax.f32 %v3489_v58, -60.0  ;;  %v3501_v2 = vadd.f32 %v3480_v52, %v789_v59  ;;  %v792_v4 = vmul.f32 %v2799_v62, %v3470_v49  ;;  %v2847_v5 = vpop.f32.mrf.mxu0  ;;  %2888 = vmatprep.subr.bf16.mxu0 %v3199_v3 }
  0xf4   : > { %v1348_v6 = vmax.f32 %v3493_v61, -60.0  ;;  %v3507_v7 = vadd.f32 %v3480_v52, %v1323_v63  ;;  %v754_v8 = vpop.f32.mrf.mxu1  ;;  %v1326_v9 = vmul.f32 %v2847_v5, %v3470_v49 }
  0xf5   : > { %v822_v10 = vsub.f32 0.0, %v814_v1  ;;  %v812_v11 = vmax.f32 %v3501_v2, -60.0  ;;  %v3512_v12 = vadd.f32 %v3480_v52, %v792_v4  ;;  %v790_v13 = vmul.f32 %v3470_v49, %v754_v8  ;;  %v1288_v14 = vpop.f32.mrf.mxu0 }
  0xf6   : > { %v1356_v15 = vsub.f32 0.0, %v1348_v6  ;;  %v1346_v16 = vmax.f32 %v3507_v7, -60.0  ;;  %v3517_v17 = vadd.f32 %v3480_v52, %v1326_v9  ;;  %v2802_v18 = vpop.f32.mrf.mxu1  ;;  %v1324_v19 = vmul.f32 %v3470_v49, %v1288_v14  ;;  %v3004_v14 = vld [vmem:[%s4142_s10 + $0x8] sm:$0xff]  }
  0xf7   : > { %v832_v21 = vmul.f32 1.442695, %v822_v10  ;;  %v820_v22 = vsub.f32 0.0, %v812_v11  ;;  %v815_v23 = vmax.f32 %v3512_v12, -60.0  ;;  %v3525_v24 = vadd.f32 %v3480_v52, %v790_v13  ;;  %v2850_v25 = vpop.f32.mrf.mxu0  ;;  %2889 = vmatpush3.bf16.msra.mxu0 %v3004_v14 }
  0xf8   : > { %v1366_v26 = vmul.f32 1.442695, %v1356_v15  ;;  %v1354_v27 = vsub.f32 0.0, %v1346_v16  ;;  %v1349_v28 = vmax.f32 %v3517_v17, -60.0  ;;  %v795_v29 = vmul.f32 %v2802_v18, %v3470_v49  ;;  %v767_v30 = vpop.f32.mrf.mxu1  ;;  %2890 = vmatprep.subr.bf16.mxu0 %v3199_v3 }
  0xf9   : > { %3022 = vpow2.f32 %v832_v21  ;;  %v828_v31 = vmul.f32 1.442695, %v820_v22  ;;  %v823_v32 = vsub.f32 0.0, %v815_v23  ;;  %v813_v33 = vmax.f32 %v3525_v24, -60.0  ;;  %v1301_v34 = vpop.f32.mrf.mxu0 }
  0xfa   : > { %3024 = vpow2.f32 %v1366_v26  ;;  %v1362_v35 = vmul.f32 1.442695, %v1354_v27  ;;  %v1357_v36 = vsub.f32 0.0, %v1349_v28  ;;  %v3532_v37 = vadd.f32 %v3480_v52, %v795_v29  ;;  %v2803_v38 = vpop.f32.mrf.mxu1  ;;  %v3005_v28 = vld [vmem:[%s4142_s10] sm:$0xff]  }
  0xfb   : > { %3026 = vpow2.f32 %v828_v31  ;;  %v834_v40 = vmul.f32 1.442695, %v823_v32  ;;  %v821_v41 = vsub.f32 0.0, %v813_v33  ;;  %v3538_v42 = vadd.f32 %v3480_v52, %v1324_v19  ;;  %v2851_v51 = vpop.f32.mrf.mxu0  ;;  %2891 = vmatpush3.bf16.msra.mxu0 %v3005_v28 }
  0xfc   : > { %3028 = vpow2.f32 %v1362_v35  ;;  %v1368_v43 = vmul.f32 1.442695, %v1357_v36  ;;  %v818_v44 = vmax.f32 %v3532_v37, -60.0  ;;  %v793_v45 = vmul.f32 %v3470_v49, %v767_v30  ;;  %v770_v50 = vpop.f32.mrf.mxu1 }
  0xfd   : > { %3030 = vpow2.f32 %v834_v40  ;;  %v830_v46 = vmul.f32 1.442695, %v821_v41  ;;  %v1347_v47 = vmax.f32 %v3538_v42, -60.0  ;;  %v1329_v48 = vmul.f32 %v2850_v25, %v3470_v49  ;;  %v1304_v9 = vpop.f32.mrf.mxu0 }
  0xfe   : > { %3032 = vpow2.f32 %v1368_v43  ;;  %v826_v53 = vsub.f32 0.0, %v818_v44  ;;  %v3546_v54 = vadd.f32 %v3480_v52, %v793_v45  ;;  %v796_v55 = vmul.f32 %v2803_v38, %v3470_v49 }
  0xff   : > { %3034 = vpow2.f32 %v830_v46  ;;  %v1355_v57 = vsub.f32 0.0, %v1347_v47  ;;  %v3553_v59 = vadd.f32 %v3480_v52, %v1329_v48  ;;  %v1327_v60 = vmul.f32 %v3470_v49, %v1301_v34 }
 0x100   : > { %v840_v62 = vmul.f32 1.442695, %v826_v53  ;;  %v816_v63 = vmax.f32 %v3546_v54, -60.0  ;;  %v3559_v0 = vadd.f32 %v3480_v52, %v796_v55  ;;  %v794_v1 = vmul.f32 %v3470_v49, %v770_v50 }
 0x101   : > { %v1364_v4 = vmul.f32 1.442695, %v1355_v57  ;;  %v1352_v5 = vmax.f32 %v3553_v59, -60.0  ;;  %v3564_v6 = vadd.f32 %v3480_v52, %v1327_v60  ;;  %v1330_v8 = vmul.f32 %v2851_v51, %v3470_v49 }
 0x102   : > { %3036 = vpow2.f32 %v840_v62  ;;  %v824_v10 = vsub.f32 0.0, %v816_v63  ;;  %v819_v11 = vmax.f32 %v3559_v0, -60.0  ;;  %v3569_v13 = vadd.f32 %v3480_v52, %v794_v1 }
 0x103   : > { %3038 = vpow2.f32 %v1364_v4  ;;  %v1360_v15 = vsub.f32 0.0, %v1352_v5  ;;  %v1350_v16 = vmax.f32 %v3564_v6, -60.0  ;;  %v3577_v20 = vadd.f32 %v3480_v52, %v1330_v8 }
 0x104   : > { %v836_v18 = vmul.f32 1.442695, %v824_v10  ;;  %v827_v19 = vsub.f32 0.0, %v819_v11  ;;  %v1328_v21 = vmul.f32 %v3470_v49, %v1304_v9  ;;  %v817_v23 = vmax.f32 %v3569_v13, -60.0 }
 0x105   : > { %v1374_v22 = vmul.f32 1.442695, %v1360_v15  ;;  %v1358_v31 = vsub.f32 0.0, %v1350_v16  ;;  %v1353_v34 = vmax.f32 %v3577_v20, -60.0 }
 0x106   : > { %v3023_v25 = vpop.eup %3022  ;;  %3040 = vpow2.f32 %v836_v18  ;;  %v842_v26 = vmul.f32 1.442695, %v827_v19  ;;  %v3582_v27 = vadd.f32 %v3480_v52, %v1328_v21  ;;  %v825_v39 = vsub.f32 0.0, %v817_v23 }
 0x107   : > { %v3025_v29 = vpop.eup %3024  ;;  %v846_v30 = vadd.f32 1.0, %v3023_v25  ;;  %3042 = vpow2.f32 %v1374_v22  ;;  %v1370_v45 = vmul.f32 1.442695, %v1358_v31  ;;  %v1361_v47 = vsub.f32 0.0, %v1353_v34 }
 0x108   : > { %v3027_v32 = vpop.eup %3026  ;;  %v1380_v33 = vadd.f32 1.0, %v3025_v29  ;;  %3044 = vpow2.f32 %v842_v26  ;;  %v1351_v35 = vmax.f32 %v3582_v27, -60.0  ;;  %v838_v51 = vmul.f32 1.442695, %v825_v39 }
 0x109   : > { %v3029_v36 = vpop.eup %3028  ;;  %3046 = vrcp.f32 %v846_v30  ;;  %v844_v38 = vadd.f32 1.0, %v3027_v32  ;;  %v1376_v62 = vmul.f32 1.442695, %v1361_v47 }
 0x10a   : > { %v3031_v40 = vpop.eup %3030  ;;  %3048 = vrcp.f32 %v1380_v33  ;;  %v1378_v41 = vadd.f32 1.0, %v3029_v36  ;;  %v1359_v48 = vsub.f32 0.0, %v1351_v35 }
 0x10b   : > { %v3033_v43 = vpop.eup %3032  ;;  %3050 = vrcp.f32 %v844_v38  ;;  %v847_v44 = vadd.f32 1.0, %v3031_v40 }
 0x10c   : > { %v3035_v3 = vpop.eup %3034  ;;  %3052 = vrcp.f32 %v1378_v41  ;;  %v1381_v46 = vadd.f32 1.0, %v3033_v43  ;;  %v1372_v63 = vmul.f32 1.442695, %v1359_v48  ;;  %v3618_v43 = vld [vmem:[%s4139_s7] ss:$0 sm:$0xff] }
 0x10d   : > { %3054 = vrcp.f32 %v847_v44  ;;  %v845_v50 = vadd.f32 1.0, %v3035_v3 }
 0x10e   : > { %3056 = vrcp.f32 %v1381_v46  ;;  %v2822_v53 = vpop.f32.mrf.mxu1 }
 0x10f   : > { %v3037_v55 = vpop.eup %3036  ;;  %3058 = vrcp.f32 %v845_v50  ;;  %v1058_v56 = vmul.f32 %v2822_v53, %v3470_v49 }
 0x110   : > { %v3039_v57 = vpop.eup %3038  ;;  %v850_v60 = vadd.f32 1.0, %v3037_v55  ;;  %3060 = vpow2.f32 %v1370_v45  ;;  %v1018_v1 = vpop.f32.mrf.mxu1 }
 0x111   : > { %v1379_v4 = vadd.f32 1.0, %v3039_v57  ;;  %3062 = vpow2.f32 %v838_v51  ;;  %v3592_v5 = vadd.f32 %v3480_v52, %v1058_v56  ;;  %v1056_v8 = vmul.f32 %v3470_v49, %v1018_v1 }
 0x112   : > { %3064 = vrcp.f32 %v850_v60  ;;  %v2823_v9 = vpop.f32.mrf.mxu1 }
 0x113   : > { %v3041_v10 = vpop.eup %3040  ;;  %3066 = vrcp.f32 %v1379_v4  ;;  %v1081_v11 = vmax.f32 %v3592_v5, -60.0  ;;  %v3597_v14 = vadd.f32 %v3480_v52, %v1056_v8  ;;  %v1059_v15 = vmul.f32 %v2823_v9, %v3470_v49 }
 0x114   : > { %v3043_v16 = vpop.eup %3042  ;;  %v848_v18 = vadd.f32 1.0, %v3041_v10  ;;  %3068 = vpow2.f32 %v1376_v62  ;;  %v1021_v19 = vpop.f32.mrf.mxu1 }
 0x115   : > { %v3045_v21 = vpop.eup %3044  ;;  %v1384_v22 = vadd.f32 1.0, %v3043_v16  ;;  %3070 = vpow2.f32 %v1372_v63  ;;  %v1089_v23 = vsub.f32 0.0, %v1081_v11  ;;  %v1079_v25 = vmax.f32 %v3597_v14, -60.0 }
 0x116   : > { %v3047_v26 = vpop.eup %3046  ;;  %3072 = vrcp.f32 %v848_v18  ;;  %v851_v28 = vadd.f32 1.0, %v3045_v21  ;;  %v3602_v29 = vadd.f32 %v3480_v52, %v1059_v15  ;;  %v1057_v30 = vmul.f32 %v3470_v49, %v1021_v19  ;;  %v2826_v3 = vpop.f32.mrf.mxu1 }
 0x117   : > { %v3049_v31 = vpop.eup %3048  ;;  %v3606_v32 = vmul.f32 %v3047_v26, %v3489_v58  ;;  %3074 = vrcp.f32 %v1384_v22  ;;  %v1099_v33 = vmul.f32 1.442695, %v1089_v23  ;;  %v1087_v34 = vsub.f32 0.0, %v1079_v25 }
 0x118   : > { %v3051_v35 = vpop.eup %3050  ;;  %v1396_v36 = vmul.f32 %v3049_v31, %v3493_v61  ;;  %3076 = vrcp.f32 %v851_v28  ;;  %v1082_v38 = vmax.f32 %v3602_v29, -60.0  ;;  %v3611_v39 = vadd.f32 %v3480_v52, %v1057_v30  ;;  %v1034_v18 = vpop.f32.mrf.mxu1 }
 0x119   : > { %v3053_v40 = vpop.eup %3052  ;;  %870 = vst [vmem:[#allocation2 + $0x20] sm:$0xff] %v3606_v32  ;;  %v860_v41 = vmul.f32 %v3051_v35, %v3501_v2  ;;  %3078 = vpow2.f32 %v1099_v33  ;;  %v1095_v44 = vmul.f32 1.442695, %v1087_v34  ;;  %v3625_v2 = vld [vmem:[%s4139_s7 + $0x6] ss:$0 sm:$0xff]  ;;  %v1693_v55 = vmul.f32 %v3618_v43, %v3606_v32 }
 0x11a   : > { %v3055_v58 = vpop.eup %3054  ;;  %1404 = vst [vmem:[#allocation2 + $0x140] sm:$0xff] %v1396_v36  ;;  %v1394_v61 = vmul.f32 %v3053_v40, %v3507_v7  ;;  %v1090_v45 = vsub.f32 0.0, %v1082_v38  ;;  %v1080_v7 = vmax.f32 %v3611_v39, -60.0  ;;  %v2827_v38 = vpop.f32.mrf.mxu1 }
 0x11b   : > { %v3057_v46 = vpop.eup %3056  ;;  %868 = vst [vmem:[#allocation2] sm:$0xff] %v860_v41  ;;  %v863_v47 = vmul.f32 %v3055_v58, %v3512_v12  ;;  %3080 = vpow2.f32 %v1095_v44  ;;  %v3634_v12 = vld [vmem:[%s4139_s7 + $0x3] ss:$0 sm:$0xff] }
 0x11c   : > { %v3059_v48 = vpop.eup %3058  ;;  %1402 = vst [vmem:[#allocation2 + $0x120] sm:$0xff] %v1394_v61  ;;  %v1397_v50 = vmul.f32 %v3057_v46, %v3517_v17  ;;  %v1101_v51 = vmul.f32 1.442695, %v1090_v45  ;;  %v1062_v17 = vmul.f32 %v2826_v3, %v3470_v49  ;;  %v1743_v9 = vmul.f32 %v3634_v12, %v1396_v36 }
 0x11d   : > { %v3061_v53 = vpop.eup %3060  ;;  %871 = vst [vmem:[#allocation2 + $0x30] sm:$0xff] %v863_v47  ;;  %v1714_v56 = vmul.f32 %v3625_v2, %v863_v47  ;;  %v3638_v57 = vmul.f32 %v3059_v48, %v3525_v24  ;;  %v1088_v24 = vsub.f32 0.0, %v1080_v7  ;;  %v1741_v28 = vmul.f32 %v3634_v12, %v1394_v61 }
 0x11e   : > { %v3063_v60 = vpop.eup %3062  ;;  %1405 = vst [vmem:[#allocation2 + $0x150] sm:$0xff] %v1397_v50  ;;  %v1382_v62 = vadd.f32 1.0, %v3061_v53  ;;  %3082 = vpow2.f32 %v1101_v51  ;;  %v3649_v16 = vadd.f32 %v3480_v52, %v1062_v17  ;;  %v1744_v61 = vmul.f32 %v3634_v12, %v1397_v50  ;;  %v1037_v51 = vpop.f32.mrf.mxu1 }
 0x11f   : > { %v3065_v63 = vpop.eup %3064  ;;  %v1722_v1 = vadd.f32 %v1714_v56, %v1693_v55  ;;  %869 = vst [vmem:[#allocation2 + $0x10] sm:$0xff] %v3638_v57  ;;  %v849_v4 = vadd.f32 1.0, %v3063_v60  ;;  %v1712_v15 = vmul.f32 %v3625_v2, %v3638_v57  ;;  %v1097_v33 = vmul.f32 1.442695, %v1088_v24 }
 0x120   : > { %v3067_v8 = vpop.eup %3066  ;;  %v3644_v10 = vmul.f32 %v3065_v63, %v3532_v37  ;;  %3084 = vrcp.f32 %v1382_v62  ;;  %v1691_v37 = vmul.f32 %v3618_v43, %v860_v41  ;;  %v1085_v36 = vmax.f32 %v3649_v16, -60.0 }
 0x121   : > { %v3069_v11 = vpop.eup %3068  ;;  %v3653_v21 = vmul.f32 %v3067_v8, %v3538_v42  ;;  %3086 = vrcp.f32 %v849_v4  ;;  %v3661_v31 = vadd.f32 %v1743_v9, %v1722_v1  ;;  %v1694_v41 = vmul.f32 %v3618_v43, %v863_v47 }
 0x122   : > { %v3071_v19 = vpop.eup %3070  ;;  %874 = vst [vmem:[#allocation2 + $0x60] sm:$0xff] %v3644_v10  ;;  %v1385_v23 = vadd.f32 1.0, %v3069_v11  ;;  %v1720_v42 = vadd.f32 %v1712_v15, %v1691_v37  ;;  %v1060_v50 = vmul.f32 %v3470_v49, %v1034_v18  ;;  %v1063_v62 = vmul.f32 %v2827_v38, %v3470_v49 }
 0x123   : > { %v3073_v22 = vpop.eup %3072  ;;  %v1383_v25 = vadd.f32 1.0, %v3071_v19  ;;  %1403 = vst [vmem:[#allocation2 + $0x130] sm:$0xff] %v3653_v21  ;;  %v1061_v1 = vmul.f32 %v3470_v49, %v1037_v51 }
 0x124   : > { %v3075_v26 = vpop.eup %3074  ;;  %v3659_v30 = vmul.f32 %v3073_v22, %v3546_v54  ;;  %3088 = vrcp.f32 %v1385_v23  ;;  %v3679_v48 = vadd.f32 %v1741_v28, %v1720_v42  ;;  %v3685_v60 = vadd.f32 %v3480_v52, %v1060_v50 }
 0x125   : > { %v3077_v34 = vpop.eup %3076  ;;  %v1400_v35 = vmul.f32 %v3075_v26, %v3553_v59  ;;  %v1697_v59 = vmul.f32 %v3618_v43, %v3644_v10  ;;  %3090 = vrcp.f32 %v1383_v25  ;;  %v3691_v9 = vadd.f32 %v3480_v52, %v1063_v62 }
 0x126   : > { %v3079_v40 = vpop.eup %3078  ;;  %872 = vst [vmem:[#allocation2 + $0x40] sm:$0xff] %v3659_v30  ;;  %v1715_v54 = vmul.f32 %v3625_v2, %v3659_v30  ;;  %v3670_v58 = vmul.f32 %v3077_v34, %v3559_v0  ;;  %3092 = vpow2.f32 %v1097_v33  ;;  %v1093_v0 = vsub.f32 0.0, %v1085_v36 }
 0x127   : > { %1408 = vst [vmem:[#allocation2 + $0x180] sm:$0xff] %v1400_v35  ;;  %v1747_v45 = vmul.f32 %v3634_v12, %v1400_v35  ;;  %v1113_v46 = vadd.f32 1.0, %v3079_v40  ;;  %v1083_v8 = vmax.f32 %v3685_v60, -60.0  ;;  %v1086_v19 = vmax.f32 %v3691_v9, -60.0 }
 0x128   : > { %v1723_v44 = vadd.f32 %v1715_v54, %v1694_v41  ;;  %875 = vst [vmem:[#allocation2 + $0x70] sm:$0xff] %v3670_v58  ;;  %v1718_v3 = vmul.f32 %v3625_v2, %v3670_v58  ;;  %v3081_v47 = vpop.eup %3080  ;;  %v1107_v17 = vmul.f32 1.442695, %v1093_v0  ;;  %v3700_v22 = vadd.f32 %v3480_v52, %v1061_v1 }
 0x129   : > { %3094 = vrcp.f32 %v1113_v46  ;;  %v1111_v53 = vadd.f32 1.0, %v3081_v47  ;;  %v1091_v18 = vsub.f32 0.0, %v1083_v8 }
 0x12a   : > { %v1726_v7 = vadd.f32 %v1718_v3, %v1697_v59  ;;  %v3682_v56 = vadd.f32 %v1744_v61, %v1723_v44  ;;  %v1084_v33 = vmax.f32 %v3700_v22, -60.0 }
 0x12b   : > { %v3083_v55 = vpop.eup %3082  ;;  %3096 = vrcp.f32 %v1111_v53  ;;  %v1103_v28 = vmul.f32 1.442695, %v1091_v18 }
 0x12c   : > { %v1114_v63 = vadd.f32 1.0, %v3083_v55  ;;  %3098 = vpow2.f32 %v1107_v17  ;;  %v3693_v24 = vadd.f32 %v1747_v45, %v1726_v7  ;;  %v1092_v41 = vsub.f32 0.0, %v1084_v33 }
 0x12d   : > { %v3085_v4 = vpop.eup %3084 }
 0x12e   : > { %v3696_v11 = vmul.f32 %v3085_v4, %v3564_v6  ;;  %3100 = vrcp.f32 %v1114_v63  ;;  %v2870_v15 = vpop.f32.mrf.mxu1  ;;  %v3087_v23 = vpop.eup %3086  ;;  %v1094_v6 = vsub.f32 0.0, %v1086_v19  ;;  %v1105_v3 = vmul.f32 1.442695, %v1092_v41 }
 0x12f   : > { %v1592_v37 = vmul.f32 %v2870_v15, %v3470_v49  ;;  %v3705_v26 = vmul.f32 %v3087_v23, %v3569_v13  ;;  %3102 = vpow2.f32 %v1103_v28 }
 0x130   : > { %1406 = vst [vmem:[#allocation2 + $0x160] sm:$0xff] %v3696_v11  ;;  %v1552_v25 = vpop.f32.mrf.mxu1  ;;  %v1109_v13 = vmul.f32 1.442695, %v1094_v6 }
 0x131   : > { %v3089_v34 = vpop.eup %3088  ;;  %v3709_v42 = vadd.f32 %v3480_v52, %v1592_v37  ;;  %v1590_v35 = vmul.f32 %v3470_v49, %v1552_v25  ;;  %873 = vst [vmem:[#allocation2 + $0x50] sm:$0xff] %v3705_v26 }
 0x132   : > { %v2871_v36 = vpop.f32.mrf.mxu1  ;;  %v3714_v38 = vmul.f32 %v3089_v34, %v3577_v20  ;;  %v3091_v40 = vpop.eup %3090  ;;  %3104 = vpow2.f32 %v1109_v13 }
 0x133   : > { %v1615_v54 = vmax.f32 %v3709_v42, -60.0  ;;  %v3718_v61 = vadd.f32 %v3480_v52, %v1590_v35  ;;  %v3722_v44 = vmul.f32 %v3091_v40, %v3582_v27  ;;  %v3093_v45 = vpop.eup %3092  ;;  %v1593_v51 = vmul.f32 %v2871_v36, %v3470_v49 }
 0x134   : > { %v1555_v59 = vpop.f32.mrf.mxu1  ;;  %1409 = vst [vmem:[#allocation2 + $0x190] sm:$0xff] %v3714_v38  ;;  %v1112_v50 = vadd.f32 1.0, %v3093_v45  ;;  %3106 = vpow2.f32 %v1105_v3 }
 0x135   : > { %v1623_v20 = vsub.f32 0.0, %v1615_v54  ;;  %v1613_v46 = vmax.f32 %v3718_v61, -60.0  ;;  %1407 = vst [vmem:[#allocation2 + $0x170] sm:$0xff] %v3722_v44  ;;  %v3731_v62 = vadd.f32 %v3480_v52, %v1593_v51  ;;  %v1591_v63 = vmul.f32 %v3470_v49, %v1555_v59 }
 0x136   : > { %v2874_v47 = vpop.f32.mrf.mxu1  ;;  %v3095_v0 = vpop.eup %3094  ;;  %3108 = vrcp.f32 %v1112_v50 }
 0x137   : > { %v3728_v7 = vmul.f32 %v3095_v0, %v3592_v5  ;;  %v1633_v53 = vmul.f32 1.442695, %v1623_v20  ;;  %v1621_v27 = vsub.f32 0.0, %v1613_v46  ;;  %v1616_v19 = vmax.f32 %v3731_v62, -60.0 }
 0x138   : > { %v1568_v55 = vpop.f32.mrf.mxu1  ;;  %v3097_v17 = vpop.eup %3096  ;;  %v3739_v37 = vadd.f32 %v3480_v52, %v1591_v63  ;;  %v1596_v25 = vmul.f32 %v2874_v47, %v3470_v49 }
 0x139   : > { %v3099_v1 = vpop.eup %3098  ;;  %v3735_v4 = vmul.f32 %v3097_v17, %v3597_v14  ;;  %3110 = vpow2.f32 %v1633_v53  ;;  %v1629_v18 = vmul.f32 1.442695, %v1621_v27  ;;  %v1624_v28 = vsub.f32 0.0, %v1616_v19  ;;  %v3776_v19 = vld [vmem:[%s4139_s7 + $0x8] ss:$0 sm:$0xff] }
 0x13a   : > { %v2875_v8 = vpop.f32.mrf.mxu1  ;;  %v1117_v5 = vadd.f32 1.0, %v3099_v1  ;;  %v1614_v14 = vmax.f32 %v3739_v37, -60.0  ;;  %v1594_v6 = vmul.f32 %v3470_v49, %v1568_v55  ;;  %v3748_v36 = vadd.f32 %v3480_v52, %v1596_v25 }
 0x13b   : > { %v3101_v15 = vpop.eup %3100  ;;  %v1635_v34 = vmul.f32 1.442695, %v1624_v28  ;;  %v1597_v13 = vmul.f32 %v2875_v8, %v3470_v49  ;;  %v1692_v25 = vmul.f32 %v3618_v43, %v3638_v57  ;;  %v1839_v57 = vld [vmem:[#allocation2 + $0x21] sm:$0xff] }
 0x13c   : > { %v3742_v23 = vmul.f32 %v3101_v15, %v3602_v29  ;;  %3112 = vrcp.f32 %v1117_v5  ;;  %v1571_v33 = vpop.f32.mrf.mxu1  ;;  %v1622_v35 = vsub.f32 0.0, %v1614_v14  ;;  %v3751_v40 = vadd.f32 %v3480_v52, %v1594_v6  ;;  %v3103_v29 = vpop.eup %3102  ;;  %v3788_v6 = vld [vmem:[%s4139_s7 + $0x7] ss:$0 sm:$0xff] }
 0x13d   : > { %3114 = vpow2.f32 %v1629_v18  ;;  %v1595_v41 = vmul.f32 %v3470_v49, %v1571_v33  ;;  %v1115_v54 = vadd.f32 1.0, %v3103_v29  ;;  %v1619_v45 = vmax.f32 %v3748_v36, -60.0  ;;  %v3771_v18 = vld [vmem:[%s4139_s7 + $0x2] ss:$0 sm:$0xff] }
 0x13e   : > { %3116 = vpow2.f32 %v1635_v34  ;;  %v1631_v59 = vmul.f32 1.442695, %v1622_v35  ;;  %v1617_v3 = vmax.f32 %v3751_v40, -60.0  ;;  %v3758_v20 = vadd.f32 %v3480_v52, %v1597_v13  ;;  %v1890_v29 = vld [vmem:[#allocation2 + $0x141] sm:$0xff] }
 0x13f   : > { %v3761_v46 = vadd.f32 %v3480_v52, %v1595_v41  ;;  %v3105_v47 = vpop.eup %3104  ;;  %3118 = vrcp.f32 %v1115_v54  ;;  %v1627_v0 = vsub.f32 0.0, %v1619_v45  ;;  %v1713_v35 = vmul.f32 %v3625_v2, %v3606_v32  ;;  %v1845_v13 = vld [vmem:[#allocation2 + $0x81] sm:$0xff]  ;;  %v1840_v32 = vld [vmem:[#allocation2 + $0x31] sm:$0xff] }
 0x140   : > { %v1118_v50 = vadd.f32 1.0, %v3105_v47  ;;  %3120 = vpow2.f32 %v1631_v59  ;;  %v1625_v51 = vsub.f32 0.0, %v1617_v3  ;;  %v1620_v49 = vmax.f32 %v3758_v20, -60.0  ;;  %v1837_v54 = vld [vmem:[#allocation2 + $0x1] sm:$0xff] }
 0x141   : > { %v3107_v53 = vpop.eup %3106  ;;  %v1641_v27 = vmul.f32 1.442695, %v1627_v0  ;;  %v1618_v55 = vmax.f32 %v3761_v46, -60.0  ;;  %v3792_v59 = vld [vmem:[#allocation2 + $0x80] sm:$0xff] }
 0x142   : > { %3122 = vrcp.f32 %v1118_v50  ;;  %v1116_v63 = vadd.f32 1.0, %v3107_v53  ;;  %v1637_v1 = vmul.f32 1.442695, %v1625_v51  ;;  %v1628_v8 = vsub.f32 0.0, %v1620_v49  ;;  %4157 = vst [vmem:[#allocation3_spill] sm:$0xff] %v3792_v59  ;;  %v1888_v0 = vld [vmem:[#allocation2 + $0x121] sm:$0xff] }
 0x143   : > { %v3109_v17 = vpop.eup %3108  ;;  %3124 = vpow2.f32 %v1641_v27  ;;  %v1626_v5 = vsub.f32 0.0, %v1618_v55  ;;  %v1719_v45 = vmul.f32 %v3792_v59, %v3625_v2  ;;  %v3801_v47 = vmul.f32 %v3792_v59, %v3788_v6  ;;  %v1838_v55 = vld [vmem:[#allocation2 + $0x11] sm:$0xff] }
 0x144   : > { %v3766_v52 = vmul.f32 %v3109_v17, %v3611_v39  ;;  %3126 = vrcp.f32 %v1116_v63  ;;  %v1643_v14 = vmul.f32 1.442695, %v1628_v8  ;;  %v3783_v39 = vld [vmem:[%s4139_s7 + $0x5] ss:$0 sm:$0xff]  ;;  %v1721_v50 = vadd.f32 %v1713_v35, %v1692_v25 }
 0x145   : > { %3128 = vpow2.f32 %v1637_v1  ;;  %v1639_v33 = vmul.f32 1.442695, %v1626_v5  ;;  %v1742_v51 = vmul.f32 %v3634_v12, %v3653_v21  ;;  %v3806_v53 = vmul.f32 %v3771_v18, %v1839_v57 }
 0x146   : > { %v3111_v15 = vpop.eup %3110  ;;  %v3809_v27 = vmul.f32 %v3776_v19, %v1839_v57  ;;  %v3815_v17 = vmul.f32 %v3776_v19, %v1845_v13  ;;  %v3818_v1 = vmul.f32 %v3771_v18, %v1837_v54  ;;  %v1717_v21 = vmul.f32 %v3625_v2, %v3644_v10  ;;  %v1844_v13 = vld [vmem:[#allocation2 + $0x71] sm:$0xff] }
 0x147   : > { %v1647_v28 = vadd.f32 1.0, %v3111_v15  ;;  %v1698_v8 = vmul.f32 %v3618_v43, %v3670_v58  ;;  %v3825_v15 = vmul.f32 %v3771_v18, %v1840_v32  ;;  %v3828_v5 = vmul.f32 %v3776_v19, %v1840_v32 }
 0x148   : > { %4158 = vst [vmem:[#allocation4_spill] sm:$0xff] %v3815_v17  ;;  %v3831_v25 = vmul.f32 %v3783_v39, %v1888_v0  ;;  %v3834_v35 = vmul.f32 %v3771_v18, %v1838_v55  ;;  %v3836_v10 = vadd.f32 %v1742_v51, %v1721_v50  ;;  %v1695_v58 = vmul.f32 %v3618_v43, %v3659_v30  ;;  %v3850_v0 = vld [vmem:[%s4139_s7 + $0x1] ss:$0 sm:$0xff] }
 0x149   : > { %v3113_v34 = vpop.eup %3112  ;;  %3130 = vrcp.f32 %v1647_v28  ;;  %v1889_v28 = vld [vmem:[#allocation2 + $0x131] sm:$0xff]  ;;  %v1716_v57 = vmul.f32 %v3625_v2, %v3705_v26  ;;  %v3843_v54 = vmul.f32 %v3776_v19, %v1838_v55  ;;  %v1696_v32 = vmul.f32 %v3618_v43, %v3705_v26 }
 0x14a   : > { %v3115_v41 = vpop.eup %3114  ;;  %v3797_v3 = vmul.f32 %v3113_v34, %v3649_v16  ;;  %3132 = vpow2.f32 %v1643_v14  ;;  %v3812_v16 = vmul.f32 %v3783_v39, %v1890_v29  ;;  %v1841_v14 = vld [vmem:[#allocation2 + $0x41] sm:$0xff]  ;;  %v3856_v2 = vmul.f32 %v3783_v39, %v1889_v28 }
 0x14b   : > { %v1645_v49 = vadd.f32 1.0, %v3115_v41  ;;  %3134 = vpow2.f32 %v1639_v33  ;;  %v3117_v63 = vpop.eup %3116  ;;  %v1843_v29 = vld [vmem:[#allocation2 + $0x61] sm:$0xff]  ;;  %v3859_v30 = vmul.f32 %v3771_v18, %v1841_v14  ;;  %v1727_v51 = vadd.f32 %v1719_v45, %v1698_v8 }
 0x14c   : > { %v1648_v33 = vadd.f32 1.0, %v3117_v63  ;;  %v3119_v34 = vpop.eup %3118  ;;  %4159 = vst [vmem:[#allocation5_spill] sm:$0xff] %v3856_v2  ;;  %v1891_v63 = vld [vmem:[#allocation2 + $0x151] sm:$0xff]  ;;  %v3862_v43 = vmul.f32 %v3776_v19, %v1841_v14  ;;  %v1745_v26 = vmul.f32 %v3634_v12, %v3696_v11  ;;  %v1773_v45 = vmul.f32 %v3850_v0, %v3728_v7 }
 0x14d   : > { %3136 = vrcp.f32 %v1645_v49  ;;  %v3121_v41 = vpop.eup %3120  ;;  %v3853_v50 = vmul.f32 %v3119_v34, %v3685_v60  ;;  %4160 = vst [vmem:[#allocation6_spill] sm:$0xff] %v3859_v30  ;;  %v3867_v60 = vmul.f32 %v3771_v18, %v1843_v29  ;;  %v1724_v34 = vadd.f32 %v1716_v57, %v1695_v58 }
 0x14e   : > { %3138 = vrcp.f32 %v1648_v33  ;;  %v1646_v49 = vadd.f32 1.0, %v3121_v41  ;;  %v3870_v33 = vmul.f32 %v3771_v18, %v1844_v13  ;;  %v1725_v41 = vadd.f32 %v1717_v21, %v1696_v32  ;;  %v3898_v32 = vld [vmem:[%s4139_s7 + $0x4] ss:$0 sm:$0xff] }
 0x14f   : > { %v3123_v55 = vpop.eup %3122  ;;  %v1746_v11 = vmul.f32 %v3634_v12, %v3722_v44  ;;  %v3880_v17 = vmul.f32 %v3776_v19, %v1843_v29  ;;  %v1794_v58 = vmul.f32 %v3788_v6, %v3742_v23  ;;  %v1771_v44 = vmul.f32 %v3850_v0, %v3735_v4 }
 0x150   : > { %4161 = vst [vmem:[#allocation7_spill] sm:$0xff] %v3870_v33  ;;  %v3125_v28 = vpop.eup %3124  ;;  %v3875_v8 = vmul.f32 %v3123_v55, %v3691_v9  ;;  %3140 = vrcp.f32 %v1646_v49  ;;  %v3886_v33 = vmul.f32 %v3776_v19, %v1844_v13  ;;  %v3889_v9 = vmul.f32 %v3783_v39, %v1891_v63 }
 0x151   : > { %v3127_v14 = vpop.eup %3126  ;;  %v1651_v59 = vadd.f32 1.0, %v3125_v28  ;;  %4162 = vst [vmem:[#allocation8_spill] sm:$0xff] %v3880_v17  ;;  %v1774_v29 = vmul.f32 %v3850_v0, %v3742_v23  ;;  %v1748_v13 = vmul.f32 %v3634_v12, %v3714_v38  ;;  %v1781_v55 = vadd.f32 %v1773_v45, %v3661_v31 }
 0x152   : > { %v3129_v30 = vpop.eup %3128  ;;  %v1132_v57 = vmul.f32 %v3127_v14, %v3700_v22  ;;  %4163 = vst [vmem:[#allocation9_spill] sm:$0xff] %v3886_v33  ;;  %v1753_v63 = vadd.f32 %v1745_v26, %v1724_v34  ;;  %v1754_v14 = vadd.f32 %v1746_v11, %v1725_v41  ;;  %v1772_v23 = vmul.f32 %v3850_v0, %v3766_v52  ;;  %v1842_v33 = vld [vmem:[#allocation2 + $0x51] sm:$0xff]  ;;  %v1892_v34 = vld [vmem:[#allocation2 + $0x161] sm:$0xff] }
 0x153   : > { %3142 = vrcp.f32 %v1651_v59  ;;  %v1649_v22 = vadd.f32 1.0, %v3129_v30  ;;  %v1802_v2 = vadd.f32 %v1794_v58, %v1781_v55  ;;  %v1792_v59 = vmul.f32 %v3788_v6, %v3766_v52 }
 0x154   : > { %v1793_v31 = vmul.f32 %v3788_v6, %v3728_v7  ;;  %v1782_v26 = vadd.f32 %v1774_v29, %v3682_v56  ;;  %v1756_v11 = vadd.f32 %v1748_v13, %v1727_v51  ;;  %v1780_v52 = vadd.f32 %v1772_v23, %v3836_v10 }
 0x155   : > { %3144 = vrcp.f32 %v1649_v22  ;;  %v1795_v58 = vmul.f32 %v3788_v6, %v3853_v50  ;;  %v3921_v7 = vmul.f32 %v3776_v19, %v1842_v33  ;;  %v3926_v51 = vmul.f32 %v3783_v39, %v1892_v34 }
 0x156   : > { %v3131_v21 = vpop.eup %3130  ;;  %v1777_v10 = vmul.f32 %v3850_v0, %v3797_v3  ;;  %v1778_v19 = vmul.f32 %v3850_v0, %v3875_v8  ;;  %v1798_v55 = vmul.f32 %v3788_v6, %v3875_v8 }
 0x157   : > { %v3133_v49 = vpop.eup %3132  ;;  %v1663_v28 = vmul.f32 %v3131_v21, %v3709_v42  ;;  %v1779_v42 = vadd.f32 %v1771_v44, %v3679_v48  ;;  %v3918_v21 = vmul.f32 %v3771_v18, %v1842_v33  ;;  %v1894_v48 = vld [vmem:[#allocation2 + $0x181] sm:$0xff]  ;;  %v1775_v18 = vmul.f32 %v3850_v0, %v3853_v50 }
 0x158   : > { %v3135_v4 = vpop.eup %3134  ;;  %v1652_v17 = vadd.f32 1.0, %v3133_v49  ;;  %v1776_v44 = vmul.f32 %v3850_v0, %v1132_v57  ;;  %v1803_v13 = vadd.f32 %v1795_v58, %v1782_v26  ;;  %v1796_v0 = vmul.f32 %v3788_v6, %v1132_v57 }
 0x159   : > { %v1823_v30 = vmul.f32 %v3898_v32, %v1663_v28  ;;  %v1650_v12 = vadd.f32 1.0, %v3135_v4  ;;  %v1801_v28 = vadd.f32 %v1793_v31, %v1780_v52  ;;  %v1785_v8 = vadd.f32 %v1777_v10, %v3693_v24 }
 0x15a   : > { %v3137_v38 = vpop.eup %3136  ;;  %3146 = vrcp.f32 %v1652_v17  ;;  %v1800_v17 = vadd.f32 %v1792_v59, %v1779_v42  ;;  %v1783_v59 = vadd.f32 %v1775_v18, %v1753_v63  ;;  %v1784_v42 = vadd.f32 %v1776_v44, %v1754_v14  ;;  %v1895_v44 = vld [vmem:[#allocation2 + $0x191] sm:$0xff] }
 0x15b   : > { %v1831_v45 = vadd.f32 %v1823_v30, %v1802_v2  ;;  %v1661_v41 = vmul.f32 %v3137_v38, %v3718_v61  ;;  %3148 = vrcp.f32 %v1650_v12  ;;  %v3139_v56 = vpop.eup %3138  ;;  %v1786_v12 = vadd.f32 %v1778_v19, %v1756_v11  ;;  %v3956_v38 = vld [vmem:[%s4141_s9] ss:$0 sm:$0xff] }
 0x15c   : > { %v1664_v33 = vmul.f32 %v3139_v56, %v3731_v62  ;;  %v3946_v62 = vld [vmem:[%s4140_s8] ss:$0 sm:$0xff]  ;;  %v1806_v24 = vadd.f32 %v1798_v55, %v1785_v8  ;;  %v1893_v8 = vld [vmem:[#allocation2 + $0x171] sm:$0xff] }
 0x15d   : > { %v1821_v2 = vmul.f32 %v3898_v32, %v1661_v41  ;;  %v1861_v61 = vadd.f32 %v3806_v53, %v1831_v45  ;;  %v3938_v53 = vmul.f32 %v3783_v39, %v1894_v48  ;;  %v3141_v49 = vpop.eup %3140  ;;  %v1804_v45 = vadd.f32 %v1796_v0, %v1783_v59 }
 0x15e   : > { %v1824_v50 = vmul.f32 %v3898_v32, %v1664_v33  ;;  %v1662_v4 = vmul.f32 %v3141_v49, %v3739_v37  ;;  %v1807_v52 = vadd.f32 %v3801_v47, %v1786_v12 }
 0x15f   : > { %v1829_v29 = vadd.f32 %v1821_v2, %v1800_v17  ;;  %v1882_v22 = vadd.f32 %v3828_v5, %v1861_v61 }
 0x160   : > { %v1832_v30 = vadd.f32 %v1824_v50, %v1803_v13  ;;  %v3143_v31 = vpop.eup %3142  ;;  %v1822_v57 = vmul.f32 %v3898_v32, %v1662_v4  ;;  %v4165_v13 = vld [vmem:[#allocation6_spill] sm:$0xff]  ;;  %v4166_v50 = vld [vmem:[#allocation9_spill] sm:$0xff] }
 0x161   : > { %v1859_v5 = vadd.f32 %v3818_v1, %v1829_v29  ;;  %v1911_v23 = vadd.f32 %v3812_v16, %v1882_v22  ;;  %v1797_v16 = vmul.f32 %v3788_v6, %v3797_v3  ;;  %v1667_v63 = vmul.f32 %v3143_v31, %v3748_v36  ;;  %v4164_v22 = vld [vmem:[#allocation5_spill] sm:$0xff] }
 0x162   : > { %v1862_v26 = vadd.f32 %v3825_v15, %v1832_v30  ;;  %v3145_v34 = vpop.eup %3144  ;;  %v1830_v41 = vadd.f32 %v1822_v57, %v1801_v28 }
 0x163   : > { %v1880_v1 = vadd.f32 %v3843_v54, %v1859_v5  ;;  %v1926_v37 = vmul.f32 %v3946_v62, %v1911_v23  ;;  %v1665_v54 = vmul.f32 %v3145_v34, %v3751_v40  ;;  %v1827_v58 = vmul.f32 %v3898_v32, %v1667_v63 }
 0x164   : > { %v1883_v6 = vadd.f32 %v3862_v43, %v1862_v26  ;;  %v1860_v3 = vadd.f32 %v3834_v35, %v1830_v41  ;;  %v1805_v15 = vadd.f32 %v1797_v16, %v1784_v42 }
 0x165   : > { %v1909_v11 = vadd.f32 %v3831_v25, %v1880_v1  ;;  %v3967_v14 = vadd.f32 %v3956_v38, %v1926_v37  ;;  %v1825_v17 = vmul.f32 %v3898_v32, %v1665_v54  ;;  %v1835_v40 = vadd.f32 %v1827_v58, %v1806_v24  ;;  %v4168_v37 = vld [vmem:[#allocation4_spill] sm:$0xff] }
 0x166   : > { %v1912_v47 = vadd.f32 %v3889_v9, %v1883_v6  ;;  %v1881_v43 = vadd.f32 %v3809_v27, %v1860_v3 }
 0x167   : > { %v3147_v36 = vpop.eup %3146  ;;  %v1924_v48 = vmul.f32 %v3946_v62, %v1909_v11  ;;  %v1949_v56 = vmax.f32 %v3967_v14, -60.0  ;;  %v1833_v19 = vadd.f32 %v1825_v17, %v1804_v45  ;;  %v1865_v33 = vadd.f32 %v3867_v60, %v1835_v40 }
 0x168   : > { %v3149_v25 = vpop.eup %3148  ;;  %v1668_v2 = vmul.f32 %v3147_v36, %v3758_v20  ;;  %v1927_v29 = vmul.f32 %v3946_v62, %v1912_v47  ;;  %v1910_v9 = vadd.f32 %v4164_v22, %v1881_v43  ;;  %v1908_v60 = vmul.f32 %v3783_v39, %v1895_v44 }
 0x169   : > { %v1666_v61 = vmul.f32 %v3149_v25, %v3761_v46  ;;  %v3982_v10 = vadd.f32 %v3956_v38, %v1924_v48  ;;  %v1957_v35 = vsub.f32 0.0, %v1949_v56  ;;  %v1863_v55 = vadd.f32 %v4165_v13, %v1833_v19 }
 0x16a   : > { %v1828_v18 = vmul.f32 %v3898_v32, %v1668_v2  ;;  %v1886_v28 = vadd.f32 %v4166_v50, %v1865_v33  ;;  %v3993_v0 = vadd.f32 %v3956_v38, %v1927_v29  ;;  %v1925_v4 = vmul.f32 %v3946_v62, %v1910_v9 }
 0x16b   : > { %v1826_v20 = vmul.f32 %v3898_v32, %v1666_v61  ;;  %v1947_v46 = vmax.f32 %v3982_v10, -60.0  ;;  %v1967_v49 = vmul.f32 1.442695, %v1957_v35  ;;  %v4167_v32 = vld [vmem:[#allocation7_spill] sm:$0xff]  ;;  %v1884_v30 = vadd.f32 %v3921_v7, %v1863_v55  ;;  %v4169_v7 = vld [vmem:[#allocation8_spill] sm:$0xff] }
 0x16c   : > { %v1836_v27 = vadd.f32 %v1828_v18, %v1807_v52  ;;  %v1915_v12 = vadd.f32 %v3938_v53, %v1886_v28  ;;  %v1950_v31 = vmax.f32 %v3993_v0, -60.0  ;;  %v4003_v57 = vadd.f32 %v3956_v38, %v1925_v4 }
 0x16d   : > { %v1834_v5 = vadd.f32 %v1826_v20, %v1805_v15  ;;  %v1955_v23 = vsub.f32 0.0, %v1947_v46  ;;  %3150 = vpow2.f32 %v1967_v49  ;;  %v1913_v63 = vadd.f32 %v3926_v51, %v1884_v30 }
 0x16e   : > { %v1866_v59 = vadd.f32 %v4167_v32, %v1836_v27  ;;  %v1930_v24 = vmul.f32 %v3946_v62, %v1915_v12  ;;  %v1958_v26 = vsub.f32 0.0, %v1950_v31  ;;  %v1906_v53 = vmul.f32 %v3783_v39, %v1893_v8 }
 0x16f   : > { %v1864_v42 = vadd.f32 %v3918_v21, %v1834_v5  ;;  %v1963_v1 = vmul.f32 1.442695, %v1955_v23  ;;  %v1948_v45 = vmax.f32 %v4003_v57, -60.0  ;;  %v1928_v41 = vmul.f32 %v3946_v62, %v1913_v63 }
 0x170   : > { %v1887_v16 = vadd.f32 %v4168_v37, %v1866_v59  ;;  %v4013_v11 = vadd.f32 %v3956_v38, %v1930_v24  ;;  %v1969_v54 = vmul.f32 1.442695, %v1958_v26 }
 0x171   : > { %v1885_v34 = vadd.f32 %v4169_v7, %v1864_v42  ;;  %3152 = vpow2.f32 %v1963_v1  ;;  %v1956_v58 = vsub.f32 0.0, %v1948_v45  ;;  %v1943_v6 = vadd.f32 %v3956_v38, %v1928_v41 }
 0x172   : > { %v1916_v21 = vadd.f32 %v1908_v60, %v1887_v16  ;;  %v1953_v36 = vmax.f32 %v4013_v11, -60.0  ;;  %3154 = vpow2.f32 %v1969_v54 }
 0x173   : > { %v1914_v52 = vadd.f32 %v1906_v53, %v1885_v34  ;;  %v1965_v3 = vmul.f32 1.442695, %v1956_v58  ;;  %v1951_v48 = vmax.f32 %v1943_v6, -60.0 }
 0x174   : > { %v1931_v51 = vmul.f32 %v3946_v62, %v1916_v21  ;;  %v1961_v56 = vsub.f32 0.0, %v1953_v36  ;;  %v4170_v36 = vld [vmem:[#allocation3_spill] sm:$0xff] }
 0x175   : > { %v1929_v39 = vmul.f32 %v3946_v62, %v1914_v52  ;;  %3156 = vpow2.f32 %v1965_v3  ;;  %v1959_v2 = vsub.f32 0.0, %v1951_v48  ;;  %v3008_v3 = vld [vmem:[%s4144_s12 + $0x28] sm:$0xff]   ;;  %v3010_v48 = vld [vmem:[%s4144_s12 + $0x18] sm:$0xff]  }
 0x176   : > { %v1946_v15 = vadd.f32 %v3956_v38, %v1931_v51  ;;  %v1975_v40 = vmul.f32 1.442695, %v1961_v56  ;;  %v3011_v56 = vld [vmem:[%s4144_s12 + $0x10] sm:$0xff]  }
 0x177   : > { %v1944_v25 = vadd.f32 %v3956_v38, %v1929_v39  ;;  %v1971_v43 = vmul.f32 1.442695, %v1959_v2  ;;  %v3007_v39 = vld [vmem:[%s4144_s12 + $0x30] sm:$0xff]   ;;  %v2034_v2 = vld [vmem:[%s4143_s11] sm:$0x1] }
 0x178   : > { %v1954_v17 = vmax.f32 %v1946_v15, -60.0  ;;  %3158 = vpow2.f32 %v1975_v40 }
 0x179   : > { %v1952_v47 = vmax.f32 %v1944_v25, -60.0  ;;  %3160 = vpow2.f32 %v1971_v43 }
 0x17a   : > { %v1962_v61 = vsub.f32 0.0, %v1954_v17  ;;  %v3151_v18 = vpop.eup %3150  ;;  %v3013_v17 = vld [vmem:[%s4144_s12] sm:$0xff]  }
 0x17b   : > { %v1960_v35 = vsub.f32 0.0, %v1952_v47  ;;  %v1981_v20 = vadd.f32 1.0, %v3151_v18 }
 0x17c   : > { %v1977_v62 = vmul.f32 1.442695, %v1962_v61 }
 0x17d   : > { %v1973_v19 = vmul.f32 1.442695, %v1960_v35 }
 0x17e   : > { %v3153_v33 = vpop.eup %3152  ;;  %3162 = vpow2.f32 %v1977_v62 }
 0x17f   : > { %3164 = vpow2.f32 %v1973_v19  ;;  %v1979_v44 = vadd.f32 1.0, %v3153_v33  ;;  %v3155_v29 = vpop.eup %3154 }
 0x180   : > { %v1982_v9 = vadd.f32 1.0, %v3155_v29 }
 0x181   : > { %3166 = vrcp.f32 %v1979_v44 }
 0x182   : > { %v3157_v38 = vpop.eup %3156  ;;  %3168 = vrcp.f32 %v1981_v20 }
 0x183   : > { %v1980_v22 = vadd.f32 1.0, %v3157_v38 }
 0x185   : > { %v3159_v46 = vpop.eup %3158  ;;  %3170 = vrcp.f32 %v1980_v22  ;;  %v3014_v22 = vld [vmem:[%s4146_s14 + $0x38] sm:$0xff]  }
 0x186   : > { %v3161_v49 = vpop.eup %3160  ;;  %3172 = vrcp.f32 %v1982_v9  ;;  %v1985_v13 = vadd.f32 1.0, %v3159_v46  ;;  %2916 = vmatprep.subr.bf16.mxu0 %v3014_v22  ;;  %v3015_v9 = vld [vmem:[%s4146_s14 + $0x30] sm:$0xff]   ;;  %v3016_v46 = vld [vmem:[%s4146_s14 + $0x28] sm:$0xff]  }
 0x187   : > { %v1983_v27 = vadd.f32 1.0, %v3161_v49  ;;  %v3017_v49 = vld [vmem:[%s4146_s14 + $0x20] sm:$0xff]  }
 0x189   : > { %3174 = vrcp.f32 %v1983_v27  ;;  %v3018_v27 = vld [vmem:[%s4146_s14 + $0x18] sm:$0xff]  }
 0x18a   : > { %3176 = vrcp.f32 %v1985_v13  ;;  %v3019_v13 = vld [vmem:[%s4146_s14 + $0x10] sm:$0xff]  }
 0x18b   : > { %v3163_v55 = vpop.eup %3162 }
 0x18c   : > { %v3165_v50 = vpop.eup %3164  ;;  %v1986_v5 = vadd.f32 1.0, %v3163_v55  ;;  %v3020_v55 = vld [vmem:[%s4146_s14 + $0x8] sm:$0xff]  }
 0x18d   : > { %v1984_v28 = vadd.f32 1.0, %v3165_v50  ;;  %v3021_v50 = vld [vmem:[%s4146_s14] sm:$0xff]  }
 0x18e   : > { %v3167_v60 = vpop.eup %3166 }
 0x18f   : > { %3178 = vrcp.f32 %v1984_v28  ;;  %v3169_v4 = vpop.eup %3168  ;;  %v4022_v32 = vmul.f32 %v3167_v60, %v3982_v10  ;;  %v2147_v28 = vld [vmem:[%s4145_s13] sm:$0x1] }
 0x190   : > { %3180 = vrcp.f32 %v1986_v5  ;;  %v4028_v8 = vmul.f32 %v3169_v4, %v3967_v14 }
 0x192   : > { %v3171_v23 = vpop.eup %3170 }
 0x193   : > { %v4025_v59 = vmul.f32 %v3171_v23, %v4003_v57  ;;  %v3173_v30 = vpop.eup %3172 }
 0x194   : > { %v4033_v42 = vmul.f32 %v3173_v30, %v3993_v0 }
 0x195   : > { %v2003_v12 = vadd.f32 %v4025_v59, %v4022_v32 }
 0x196   : > { %v3175_v31 = vpop.eup %3174 }
 0x197   : > { %v2004_v1 = vadd.f32 %v2003_v12, %v4028_v8  ;;  %v3177_v37 = vpop.eup %3176  ;;  %v4036_v16 = vmul.f32 %v3175_v31, %v1943_v6 }
 0x198   : > { %v4043_v26 = vmul.f32 %v3177_v37, %v4013_v11  ;;  %v3006_v11 = vld [vmem:[%s4144_s12 + $0x38] sm:$0xff]  }
 0x199   : > { %v2005_v10 = vadd.f32 %v2004_v1, %v4033_v42  ;;  %2897 = vmatpush3.bf16.msra.mxu1 %v3006_v11 }
 0x19a   : > { %2898 = vmatprep.subr.bf16.mxu1 %v4170_v36 }
 0x19b   : > { %v2006_v14 = vadd.f32 %v2005_v10, %v4036_v16 }
 0x19c   : > { %v3179_v57 = vpop.eup %3178 }
 0x19d   : > { %v4039_v63 = vmul.f32 %v3179_v57, %v1944_v25  ;;  %v3181_v24 = vpop.eup %3180  ;;  %2899 = vmatpush3.bf16.msra.mxu1 %v3007_v39  ;;  %v3012_v25 = vld [vmem:[%s4144_s12 + $0x8] sm:$0xff]   ;;  %v2242_v57 = vlaneseq }
 0x19e   : > { %v4046_v0 = vmul.f32 %v3181_v24, %v1946_v15  ;;  %2900 = vmatprep.subr.bf16.mxu1 %v4170_v36  ;;  %v3009_v15 = vld [vmem:[%s4144_s12 + $0x20] sm:$0xff]  }
 0x19f   : > { %v2007_v7 = vadd.f32 %v2006_v14, %v4039_v63  ;;  %v2243_v14 = vshrl.u32 %v2242_v57, 7 }
 0x1a1   : > { %v2008_v34 = vadd.f32 %v2007_v7, %v4043_v26  ;;  %2901 = vmatpush3.bf16.msra.mxu1 %v3008_v3  ;;  %v2244_v24 = vsub.s32 0, %v2243_v14 }
 0x1a2   : > { %2902 = vmatprep.subr.bf16.mxu1 %v4170_v36 }
 0x1a3   : > { %v2009_v53 = vadd.f32 %v2008_v34, %v4046_v0 }
 0x1a5   : > { %v2010_v45 = vrot.slane %v2009_v53, 4  ;;  %2903 = vmatpush3.bf16.msra.mxu1 %v3009_v15 }
 0x1a6   : > { %2904 = vmatprep.subr.bf16.mxu1 %v4170_v36 }
 0x1a7   : > { %v2011_v21 = vadd.f32 %v2010_v45, %v2009_v53 }
 0x1a9   : > { %v2012_v41 = vrot.slane %v2011_v21, 2  ;;  %2905 = vmatpush3.bf16.msra.mxu1 %v3010_v48 }
 0x1aa   : > { %2906 = vmatprep.subr.bf16.mxu1 %v4170_v36 }
 0x1ab   : > { %v2013_v54 = vadd.f32 %v2012_v41, %v2011_v21 }
 0x1ad   : > { %v2014_v52 = vrot.slane %v2013_v54, 1  ;;  %2907 = vmatpush3.bf16.msra.mxu1 %v3011_v56 }
 0x1ae   : > { %2908 = vmatprep.subr.bf16.mxu1 %v4170_v36 }
 0x1af   : > { %v2015_v58 = vadd.f32 %v2014_v52, %v2013_v54 }
 0x1b1   : > { %v2016_v51 = vmul.f32 0.015625, %v2015_v58  ;;  %2909 = vmatpush3.bf16.msra.mxu1 %v3012_v25 }
 0x1b2   : > { %2910 = vmatprep.subr.bf16.mxu1 %v4170_v36  ;;  %v2655_v36 = vld [vmem:[%s4148_s16] ss:$0 sm:$0xff] }
 0x1b3   : > { %v2017_v6 = vpack.c.bf16 %v2016_v51, %v2016_v51 }
 0x1b5   : > { %2893 = vmatmul.mubr.bf16.vlgmr.msra.gmra.mxu0 %v2017_v6  ;;  %2911 = vmatpush3.bf16.msra.mxu1 %v3013_v17 }
 0x1b6   : > { %2917 = vmatpush3.bf16.msra.mxu0 %v3014_v22 }
 0x1b7   : > { %2918 = vmatprep.subr.bf16.mxu0 %v3015_v9 }
 0x1ba   : > { %2919 = vmatpush3.bf16.msra.mxu0 %v3015_v9 }
 0x1bb   : > { %2920 = vmatprep.subr.bf16.mxu0 %v3016_v46 }
 0x1be   : > { %2921 = vmatpush3.bf16.msra.mxu0 %v3016_v46 }
 0x1bf   : > { %2922 = vmatprep.subr.bf16.mxu0 %v3017_v49 }
 0x1c2   : > { %2923 = vmatpush3.bf16.msra.mxu0 %v3017_v49 }
 0x1c3   : > { %2924 = vmatprep.subr.bf16.mxu0 %v3018_v27 }
 0x1c6   : > { %2925 = vmatpush3.bf16.msra.mxu0 %v3018_v27 }
 0x1c7   : > { %2926 = vmatprep.subr.bf16.mxu0 %v3019_v13 }
 0x1ca   : > { %2927 = vmatpush3.bf16.msra.mxu0 %v3019_v13 }
 0x1cb   : > { %2928 = vmatprep.subr.bf16.mxu0 %v3020_v55 }
 0x1ce   : > { %2929 = vmatpush3.bf16.msra.mxu0 %v3020_v55 }
 0x1cf   : > { %2930 = vmatprep.subr.bf16.mxu0 %v3021_v50 }
 0x1d2   : > { %2931 = vmatpush3.bf16.msra.mxu0 %v3021_v50 }
 0x275   : > { %v2117_v40 = vpop.f32.mrf.mxu0 }
 0x276   : > { %v2118_v47 = vadd.f32 %v2117_v40, %v2034_v2 }
 0x277   : > { %v2894_v61 = vpop.f32.mrf.mxu0 }
 0x278   : > { %v2123_v43 = vmax.f32 %v2118_v47, -60.0 }
 0x279   : > { %v2120_v35 = vpop.f32.mrf.mxu0 }
 0x27a   : > { %v2124_v18 = vsub.f32 0.0, %v2123_v43 }
 0x27b   : > { %v2895_v62 = vpop.f32.mrf.mxu0 }
 0x27c   : > { %v2125_v19 = vmul.f32 1.442695, %v2124_v18 }
 0x27e   : > { %3182 = vpow2.f32 %v2125_v19 }
 0x28b   : > { %v3183_v33 = vpop.eup %3182 }
 0x28c   : > { %v2127_v44 = vadd.f32 1.0, %v3183_v33 }
 0x28e   : > { %3184 = vrcp.f32 %v2127_v44 }
 0x29b   : > { %v3185_v29 = vpop.eup %3184 }
 0x29c   : > { %v2129_v20 = vmul.f32 %v3185_v29, %v2118_v47 }
 0x29e   : > { %v2130_v38 = vpack.c.bf16 %v2129_v20, %v2129_v20 }
 0x2a0   : > { %2913 = vmatmul.mubr.bf16.vlgmr.msra.gmra.mxu1 %v2130_v38 }
 0x360   : > { %v2230_v5 = vpop.f32.mrf.mxu1 }
 0x361   : > { %v2231_v60 = vadd.f32 %v2230_v5, %v2147_v28 }
 0x362   : > { %v2914_v4 = vpop.f32.mrf.mxu1 }
 0x363   : > { %v2236_v23 = vmax.f32 %v2231_v60, -60.0 }
 0x364   : > { %v2233_v30 = vpop.f32.mrf.mxu1 }
 0x365   : > { %v2237_v12 = vsub.f32 0.0, %v2236_v23 }
 0x366   : > { %v2915_v31 = vpop.f32.mrf.mxu1 }
 0x367   : > { %v2238_v1 = vmul.f32 1.442695, %v2237_v12 }
 0x369   : > { %3186 = vpow2.f32 %v2238_v1 }
 0x376   : > { %v3187_v37 = vpop.eup %3186 }
 0x377   : > { %v2240_v10 = vadd.f32 1.0, %v3187_v37 }
 0x379   : > { %3188 = vrcp.f32 %v2240_v10 }
 0x386   : > { %v3189_v7 = vpop.eup %3188 }
 0x387   : > { %v2245_v34 = vrot.slane %v3189_v7, %v2244_v24 }
 0x389   : > { %v2246_v53 = vmul.f32 %v2245_v34, %v4022_v32  ;;  %v2247_v45 = vmul.f32 %v2245_v34, %v4025_v59  ;;  %v2248_v21 = vmul.f32 %v2245_v34, %v4028_v8  ;;  %v2249_v41 = vmul.f32 %v2245_v34, %v4033_v42  ;;  %v2654_v42 = vld [vmem:[%s4147_s15] ss:$0 sm:$0xff] }
 0x38a   : > { %v2250_v54 = vmul.f32 %v2245_v34, %v4036_v16  ;;  %v2251_v52 = vmul.f32 %v2245_v34, %v4039_v63  ;;  %v2252_v11 = vmul.f32 %v2245_v34, %v4043_v26  ;;  %v2253_v32 = vmul.f32 %v2245_v34, %v4046_v0 }
 0x38b   : > { %v2254_v58 = vpack.c.bf16 %v2247_v45, %v2246_v53  ;;  %v2255_v51 = vpack.c.bf16 %v2249_v41, %v2248_v21 }
 0x38c   : > { %v2256_v6 = vpack.c.bf16 %v2251_v52, %v2250_v54  ;;  %v2257_v59 = vpack.c.bf16 %v2253_v32, %v2252_v11 }
 0x38d   : > { %2932 = vmatprep.mubr.bf16.mxu0 %v2254_v58 }
 0x38e   : > { %2933 = vmatmul.mubr.bf16.vlgmr.msra.gmra.mxu0 %v2255_v51 }
 0x38f   : > { %2936 = vmatprep.mubr.bf16.mxu0 %v2256_v6 }
 0x396   : > { %2937 = vmatmul.mubr.bf16.gmra.mxu0 %v2257_v59 }
 0x44e   : > { %v2934_v8 = vpop.f32.mrf.mxu0 }
 0x44f   : > { %v2396_v63 = vmul.f32 %v2934_v8, %v2654_v42 }
 0x450   : > { %v2356_v16 = vpop.f32.mrf.mxu0 }
 0x451   : > { %v2394_v3 = vmul.f32 %v2654_v42, %v2356_v16  ;;  %v2411_v48 = vadd.f32 %v2655_v36, %v2396_v63 }
 0x452   : > { %v2935_v39 = vpop.f32.mrf.mxu0 }
 0x453   : > { %v2397_v15 = vmul.f32 %v2935_v39, %v2654_v42  ;;  %v2409_v17 = vadd.f32 %v2655_v36, %v2394_v3 }
 0x454   : > { %v2359_v26 = vpop.f32.mrf.mxu0 }
 0x455   : > { %v2412_v56 = vadd.f32 %v2655_v36, %v2397_v15  ;;  %v2395_v0 = vmul.f32 %v2654_v42, %v2359_v26 }
 0x456   : > { %v2938_v25 = vpop.f32.mrf.mxu0 }
 0x457   : > { %v2687_v2 = vpack.c.bf16 %v2412_v56, %v2411_v48  ;;  %v2410_v40 = vadd.f32 %v2655_v36, %v2395_v0  ;;  %v2400_v43 = vmul.f32 %v2938_v25, %v2654_v42 }
 0x458   : > { %v2372_v47 = vpop.f32.mrf.mxu0 }
 0x459   : > { %2699 = vst [vmem:[%s608_s19 + $0x8] sm:$0xff] %v2687_v2   ;;  %v2682_v61 = vpack.c.bf16 %v2410_v40, %v2409_v17  ;;  %v2398_v18 = vmul.f32 %v2654_v42, %v2372_v47  ;;  %v2415_v33 = vadd.f32 %v2655_v36, %v2400_v43 }
 0x45a   : > { %v2939_v35 = vpop.f32.mrf.mxu0 }
 0x45b   : > { %2683 = vst [vmem:[%s608_s19] sm:$0xff] %v2682_v61   ;;  %v2401_v62 = vmul.f32 %v2939_v35, %v2654_v42  ;;  %v2413_v20 = vadd.f32 %v2655_v36, %v2398_v18 }
 0x45c   : > { %v2375_v19 = vpop.f32.mrf.mxu0 }
 0x45d   : > { %v2416_v44 = vadd.f32 %v2655_v36, %v2401_v62  ;;  %v2399_v29 = vmul.f32 %v2654_v42, %v2375_v19 }
 0x45f   : > { %v2697_v38 = vpack.c.bf16 %v2416_v44, %v2415_v33  ;;  %v2414_v22 = vadd.f32 %v2655_v36, %v2399_v29 }
 0x461   : > { %2701 = vst [vmem:[%s608_s19 + $0x18] sm:$0xff] %v2697_v38   ;;  %v2692_v9 = vpack.c.bf16 %v2414_v22, %v2413_v20 }
 0x463   : > { %2700 = vst [vmem:[%s608_s19 + $0x10] sm:$0xff] %v2692_v9  }
 0x464 PF: > { %s27_s24 = sadd.s32 1, %s3197_s24  }
 0x465   : > { %p24_p4 = scmp.ge.s32.totalorder %s27_s24, 4  }
 0x467   :  { %26 = sbr.rel (!%p24_p4) target bundleno = 3 (0x3), region = 134 }

// kernel: encoder_forward.9
= control target key start
LH: loop header
LB: loop body
LE: loop exit
PB: predicated region body
PF: predicated region fallthrough
CT: control target
= control target key end

     0   :  { %s375_s1 = inlined_call_operand.vmem [shape: bf16[128,128], index: 1, kind: input, shape index: {}]   ;;  %s376_s0 = inlined_call_operand.vmem [shape: bf16[32,128], index: 0, kind: input, shape index: {}]   ;;  %s377_s2 = inlined_call_operand.vmem [shape: f32[1,128], index: 2, kind: input, shape index: {}]   ;;  %s378_s3 = inlined_call_operand.vmem [shape: f32[1,128], index: 3, kind: input, shape index: {}]   ;;  %s379_s4 = inlined_call_operand.vmem [shape: bf16[32,128], index: 4, kind: output, shape index: {}]  }
   0x1   :  { %v282_v0 = vld [vmem:[%s375_s1 + $0x38] sm:$0xff]   ;;  %v283_v1 = vld [vmem:[%s375_s1 + $0x30] sm:$0xff]   ;;  %v284_v2 = vld [vmem:[%s375_s1 + $0x28] sm:$0xff]  }
   0x2   :  { %262 = vmatprep.subr.bf16.mxu0 %v282_v0  ;;  %v285_v3 = vld [vmem:[%s375_s1 + $0x20] sm:$0xff]   ;;  %v286_v5 = vld [vmem:[%s375_s1 + $0x18] sm:$0xff]   ;;  %v287_v6 = vld [vmem:[%s375_s1 + $0x10] sm:$0xff]  }
   0x3   :  { %263 = vmatpush3.bf16.msra.mxu0 %v282_v0  ;;  %v290_v4 = vld [vmem:[%s376_s0] sm:$0xff]   ;;  %v288_v7 = vld [vmem:[%s375_s1 + $0x8] sm:$0xff]  }
   0x4   :  { %264 = vmatprep.subr.bf16.mxu0 %v283_v1  ;;  %278 = vmatprep.mubr.bf16.mxu0 %v290_v4  ;;  %v289_v8 = vld [vmem:[%s375_s1] sm:$0xff]   ;;  %v291_v9 = vld [vmem:[%s376_s0 + $0x8] sm:$0xff]  }
   0x5   :  { %v231_v10 = vld [vmem:[%s377_s2] ss:$0 sm:$0xff] }
   0x6   :  { %v232_v12 = vld [vmem:[%s378_s3] ss:$0 sm:$0xff] }
   0x7   :  { %265 = vmatpush3.bf16.msra.mxu0 %v283_v1 }
   0x8   :  { %266 = vmatprep.subr.bf16.mxu0 %v284_v2 }
   0xb   :  { %267 = vmatpush3.bf16.msra.mxu0 %v284_v2 }
   0xc   :  { %268 = vmatprep.subr.bf16.mxu0 %v285_v3 }
   0xf   :  { %269 = vmatpush3.bf16.msra.mxu0 %v285_v3 }
  0x10   :  { %270 = vmatprep.subr.bf16.mxu0 %v286_v5 }
  0x13   :  { %271 = vmatpush3.bf16.msra.mxu0 %v286_v5 }
  0x14   :  { %272 = vmatprep.subr.bf16.mxu0 %v287_v6 }
  0x17   :  { %273 = vmatpush3.bf16.msra.mxu0 %v287_v6 }
  0x18   :  { %274 = vmatprep.subr.bf16.mxu0 %v288_v7 }
  0x1b   :  { %275 = vmatpush3.bf16.msra.mxu0 %v288_v7 }
  0x1c   :  { %276 = vmatprep.subr.bf16.mxu0 %v289_v8 }
  0x1f   :  { %277 = vmatpush3.bf16.msra.mxu0 %v289_v8 }
  0x22   :  { %279 = vmatmul.mubr.bf16.vlgmr.msra.gmra.mxu0 %v291_v9 }
  0xe2   :  { %v280_v11 = vpop.f32.mrf.mxu0 }
  0xe3   :  { %v156_v13 = vmul.f32 %v280_v11, %v231_v10 }
  0xe4   :  { %v132_v14 = vpop.f32.mrf.mxu0 }
  0xe5   :  { %v167_v15 = vadd.f32 %v232_v12, %v156_v13  ;;  %v154_v16 = vmul.f32 %v231_v10, %v132_v14 }
  0xe6   :  { %v281_v17 = vpop.f32.mrf.mxu0 }
  0xe7   :  { %v171_v18 = vmax.f32 %v167_v15, -60.0  ;;  %v165_v19 = vadd.f32 %v232_v12, %v154_v16  ;;  %v157_v20 = vmul.f32 %v281_v17, %v231_v10 }
  0xe8   :  { %v135_v21 = vpop.f32.mrf.mxu0 }
  0xe9   :  { %v175_v22 = vsub.f32 0.0, %v171_v18  ;;  %v169_v23 = vmax.f32 %v165_v19, -60.0  ;;  %v168_v24 = vadd.f32 %v232_v12, %v157_v20  ;;  %v155_v25 = vmul.f32 %v231_v10, %v135_v21 }
  0xeb   :  { %v181_v26 = vmul.f32 1.442695, %v175_v22  ;;  %v173_v27 = vsub.f32 0.0, %v169_v23  ;;  %v172_v28 = vmax.f32 %v168_v24, -60.0  ;;  %v166_v29 = vadd.f32 %v232_v12, %v155_v25 }
  0xed   :  { %292 = vpow2.f32 %v181_v26  ;;  %v177_v30 = vmul.f32 1.442695, %v173_v27  ;;  %v176_v31 = vsub.f32 0.0, %v172_v28  ;;  %v170_v32 = vmax.f32 %v166_v29, -60.0 }
  0xef   :  { %294 = vpow2.f32 %v177_v30  ;;  %v183_v33 = vmul.f32 1.442695, %v176_v31  ;;  %v174_v34 = vsub.f32 0.0, %v170_v32 }
  0xf1   :  { %296 = vpow2.f32 %v183_v33  ;;  %v179_v35 = vmul.f32 1.442695, %v174_v34 }
  0xf3   :  { %298 = vpow2.f32 %v179_v35 }
  0xfa   :  { %v293_v36 = vpop.eup %292 }
  0xfb   :  { %v187_v37 = vadd.f32 1.0, %v293_v36 }
  0xfc   :  { %v295_v38 = vpop.eup %294 }
  0xfd   :  { %v185_v39 = vadd.f32 1.0, %v295_v38  ;;  %300 = vrcp.f32 %v187_v37 }
  0xfe   :  { %v297_v40 = vpop.eup %296 }
  0xff   :  { %v188_v41 = vadd.f32 1.0, %v297_v40  ;;  %302 = vrcp.f32 %v185_v39 }
 0x100   :  { %v299_v42 = vpop.eup %298 }
 0x101   :  { %304 = vrcp.f32 %v188_v41  ;;  %v186_v43 = vadd.f32 1.0, %v299_v42 }
 0x103   :  { %306 = vrcp.f32 %v186_v43 }
 0x10a   :  { %v301_v44 = vpop.eup %300 }
 0x10b   :  { %v195_v47 = vmul.f32 %v301_v44, %v167_v15 }
 0x10c   :  { %v303_v45 = vpop.eup %302 }
 0x10d   :  { %v193_v50 = vmul.f32 %v303_v45, %v165_v19 }
 0x10e   :  { %v305_v46 = vpop.eup %304 }
 0x10f   :  { %v196_v48 = vmul.f32 %v305_v46, %v168_v24 }
 0x110   :  { %v307_v49 = vpop.eup %306 }
 0x111   :  { %v249_v51 = vpack.c.bf16 %v196_v48, %v195_v47  ;;  %v194_v52 = vmul.f32 %v307_v49, %v166_v29 }
 0x113   :  { %251 = vst [vmem:[%s379_s4 + $0x8] sm:$0xff] %v249_v51   ;;  %v244_v53 = vpack.c.bf16 %v194_v52, %v193_v50 }
 0x115   :  { %245 = vst [vmem:[%s379_s4] sm:$0xff] %v244_v53  }

// kernel: encoder_forward.8
= control target key start
LH: loop header
LB: loop body
LE: loop exit
PB: predicated region body
PF: predicated region fallthrough
CT: control target
= control target key end

     0   :  { %s2716_s24 = smov 0   ;;  %s3174_s0 = inlined_call_operand.vmem [shape: bf16[2,16,128], index: 0, kind: input, shape index: {}]   ;;  %s3175_s1 = inlined_call_operand.vmem [shape: bf16[2,16,128], index: 1, kind: input, shape index: {}]   ;;  %s3176_s2 = inlined_call_operand.vmem [shape: bf16[2,16,128], index: 2, kind: input, shape index: {}]   ;;  %s3177_s3 = inlined_call_operand.vmem [shape: bf16[2,16,128], index: 3, kind: input, shape index: {}]   ;;  %s3178_s4 = inlined_call_operand.vmem [shape: bf16[128,128], index: 4, kind: input, shape index: {}]   ;;  %s3179_s5 = inlined_call_operand.vmem [shape: f32[1,128], index: 5, kind: input, shape index: {}]   ;;  %s3180_s6 = inlined_call_operand.vmem [shape: f32[1,128], index: 6, kind: input, shape index: {}]   ;;  %s3181_s7 = inlined_call_operand.vmem [shape: f32[25,128], index: 7, kind: input, shape index: {}]   ;;  %s3182_s8 = inlined_call_operand.vmem [shape: f32[1,128], index: 8, kind: input, shape index: {}]   ;;  %s3183_s9 = inlined_call_operand.vmem [shape: f32[1,128], index: 9, kind: input, shape index: {}]   ;;  %s3184_s10 = inlined_call_operand.vmem [shape: bf16[128,128], index: 10, kind: input, shape index: {}]   ;;  %s3185_s11 = inlined_call_operand.vmem [shape: f32[1,128], index: 11, kind: input, shape index: {}]   ;;  %s3186_s12 = inlined_call_operand.vmem [shape: bf16[128,128], index: 12, kind: input, shape index: {}]   ;;  %s3187_s13 = inlined_call_operand.vmem [shape: f32[1,128], index: 13, kind: input, shape index: {}]   ;;  %s3188_s14 = inlined_call_operand.vmem [shape: bf16[128,128], index: 14, kind: input, shape index: {}]   ;;  %s3189_s15 = inlined_call_operand.vmem [shape: f32[1,128], index: 15, kind: input, shape index: {}]   ;;  %s3190_s16 = inlined_call_operand.vmem [shape: f32[1,128], index: 16, kind: input, shape index: {}]   ;;  %s3191_s17 = inlined_call_operand.vmem [shape: bf16[2,16,128], index: 17, kind: output, shape index: {}]  }
   0x1   :  { %3192 = sst [smem:[#allocation4_spill]] %s3174_s0 }
   0x2   :  { %3193 = sst [smem:[#allocation5_spill]] %s3175_s1 }
   0x3 LB: > { %s2159_s25 = sadd.s32 4294967295, %s2622_s24   ;;  %p2163_p0 = scmp.ge.s32.totalorder %s2622_s24, 1  ;;  %s2622_s24 = sphi %s2716_s24, %s27_s24  }
   0x4   : > { %p517_p1 = scmp.lt.s32.totalorder %s2622_s24, 3 }
   0x6   : > { %p518_p2 = pnand %p2163_p0, %p517_p1 }
   0x7   : > { %p584_p3 = scmp.lt.s32.totalorder (!%p518_p2), %s2159_s25, 1  ;;  %s3194_s21 = sld [smem:[#allocation4_spill]] (!%p518_p2) }
   0x8   : > { %521 = sbr.rel (%p518_p2) target bundleno = 1116 (0x45c), region = 88  ;;  %s3195_s26 = sld [smem:[#allocation5_spill]] (!%p518_p2) }
   0xd   : > { %v2500_v0 = vld [vmem:[%s3178_s4 + $0x38] sm:$0xff]   ;;  %v2624_v1 = vmov 0.0   ;;  %v2502_v3 = vld [vmem:[%s3178_s4 + $0x30] sm:$0xff]   ;;  %vm2625_vm0 = vmmov 0   ;;  %v2504_v5 = vld [vmem:[%s3178_s4 + $0x28] sm:$0xff]   ;;  %s3197_s25 = smov (!%p584_p3, %s2159_s25), 1 }
   0xe   : > { %2350 = vmatprep.subr.bf16.mxu0 %v2624_v1  ;;  %610 = vst [vmem:[#allocation2] sm:$0x3f] %v2624_v1  ;;  %612 = vst [vmem:[#allocation2 + $0x28] sm:$0x3f] %v2624_v1  ;;  %2370 = vmatprep.subr.bf16.mxu1 %v2624_v1  ;;  %v2501_v2 = vld [vmem:[%s3178_s4 + $0x38] sm:$0xff]   ;;  %v2503_v4 = vld [vmem:[%s3178_s4 + $0x30] sm:$0xff]  }
   0xf   : > { %614 = vst [vmem:[#allocation2 + $0x8] sm:$0x1] %v2624_v1  ;;  %615 = vst [vmem:[#allocation2 + $0x10] sm:$0x1] %v2624_v1  ;;  %2351 = vmatpush3.bf16.msra.mxu0 %v2500_v0  ;;  %2366 = vmatprep.mubr.msk.bf16.mxu0 %vm2625_vm0, %v2624_v1  ;;  %v2505_v6 = vld [vmem:[%s3178_s4 + $0x28] sm:$0xff]   ;;  %v2506_v7 = vld [vmem:[%s3178_s4 + $0x20] sm:$0xff]  }
  0x10   : > { %616 = vst [vmem:[#allocation2 + $0x18] sm:$0x1] %v2624_v1  ;;  %617 = vst [vmem:[#allocation2 + $0x20] sm:$0x1] %v2624_v1  ;;  %2371 = vmatpush3.bf16.msra.mxu1 %v2501_v2  ;;  %2352 = vmatprep.subr.bf16.mxu0 %v2624_v1  ;;  %v2507_v8 = vld [vmem:[%s3178_s4 + $0x20] sm:$0xff]   ;;  %s2794_s29 = sshll.u32 %s3197_s25, 3 }
  0x11   : > { %618 = vst [vmem:[#allocation2 + $0xd] sm:$0x1] %v2624_v1  ;;  %619 = vst [vmem:[#allocation2 + $0x15] sm:$0x1] %v2624_v1  ;;  %2372 = vmatprep.subr.bf16.mxu1 %v2624_v1  ;;  %2386 = vmatprep.mubr.msk.bf16.mxu1 %vm2625_vm0, %v2624_v1  ;;  %v2508_v9 = vld [vmem:[%s3178_s4 + $0x18] sm:$0xff]   ;;  %s588_s22 = scalar_lea.vmem %s3194_s21, %s2794_s29  ;;  %s593_s27 = scalar_lea.vmem %s3195_s26, %s2794_s29  ;;  %v2510_v11 = vld [vmem:[%s3178_s4 + $0x10] sm:$0xff]  }
  0x12   : > { %620 = vst [vmem:[#allocation2 + $0x1d] sm:$0x1] %v2624_v1  ;;  %621 = vst [vmem:[#allocation2 + $0x25] sm:$0x1] %v2624_v1  ;;  %v2509_v10 = vld [vmem:[%s3178_s4 + $0x18] sm:$0xff]   ;;  %v2511_v12 = vld [vmem:[%s3178_s4 + $0x10] sm:$0xff]   ;;  %s603_s26 = scalar_lea.vmem %s3177_s3, %s2794_s29 }
  0x13   : > { %775 = vst [vmem:[#allocation2 + $0x30] sm:$0x3f] %v2624_v1  ;;  %777 = vst [vmem:[#allocation2 + $0x58] sm:$0x3f] %v2624_v1  ;;  %2353 = vmatpush3.bf16.msra.mxu0 %v2502_v3  ;;  %v2512_v13 = vld [vmem:[%s3178_s4 + $0x8] sm:$0xff]   ;;  %v2514_v15 = vld [vmem:[%s3178_s4] sm:$0xff]  }
  0x14   : > { %779 = vst [vmem:[#allocation2 + $0x3c] sm:$0x3] %v2624_v1  ;;  %780 = vst [vmem:[#allocation2 + $0x44] sm:$0x3] %v2624_v1  ;;  %2373 = vmatpush3.bf16.msra.mxu1 %v2503_v4  ;;  %2354 = vmatprep.subr.bf16.mxu0 %v2624_v1  ;;  %v2513_v14 = vld [vmem:[%s3178_s4 + $0x8] sm:$0xff]   ;;  %v2515_v16 = vld [vmem:[%s3178_s4] sm:$0xff]  }
  0x15   : > { %781 = vst [vmem:[#allocation2 + $0x4c] sm:$0x3] %v2624_v1  ;;  %782 = vst [vmem:[#allocation2 + $0x54] sm:$0x3] %v2624_v1  ;;  %2374 = vmatprep.subr.bf16.mxu1 %v2624_v1  ;;  %v2516_v17 = vld [vmem:[%s588_s22] sm:$0xff]   ;;  %v2518_v19 = vld [vmem:[%s3178_s4 + $0x38] sm:$0xff]   ;;  %s598_s22 = scalar_lea.vmem %s3176_s2, %s2794_s29 }
  0x16   : > { %936 = vst [vmem:[#allocation2 + $0x80] sm:$0x3f] %v2624_v1  ;;  %939 = vst [vmem:[#allocation2 + $0x60] sm:$0x1] %v2624_v1  ;;  %v2517_v18 = vld [vmem:[%s593_s27] sm:$0xff]   ;;  %v2519_v20 = vld [vmem:[%s3178_s4 + $0x38] sm:$0xff]   ;;  %s608_s27 = scalar_lea.vmem %s3191_s17, %s2794_s29 }
  0x17   : > { %940 = vst [vmem:[#allocation2 + $0x68] sm:$0x1] %v2624_v1  ;;  %941 = vst [vmem:[#allocation2 + $0x70] sm:$0x1] %v2624_v1  ;;  %2355 = vmatpush3.bf16.msra.mxu0 %v2504_v5  ;;  %v2520_v21 = vld [vmem:[%s3178_s4 + $0x30] sm:$0xff]   ;;  %v2522_v23 = vld [vmem:[%s3178_s4 + $0x28] sm:$0xff]  }
  0x18   : > { %942 = vst [vmem:[#allocation2 + $0x78] sm:$0x1] %v2624_v1  ;;  %943 = vst [vmem:[#allocation2 + $0x65] sm:$0x1] %v2624_v1  ;;  %2375 = vmatpush3.bf16.msra.mxu1 %v2505_v6  ;;  %2356 = vmatprep.subr.bf16.mxu0 %v2624_v1  ;;  %v2521_v22 = vld [vmem:[%s3178_s4 + $0x30] sm:$0xff]   ;;  %v2523_v24 = vld [vmem:[%s3178_s4 + $0x28] sm:$0xff]  }
  0x19   : > { %944 = vst [vmem:[#allocation2 + $0x6d] sm:$0x1] %v2624_v1  ;;  %945 = vst [vmem:[#allocation2 + $0x75] sm:$0x1] %v2624_v1  ;;  %2376 = vmatprep.subr.bf16.mxu1 %v2624_v1  ;;  %v2524_v25 = vld [vmem:[%s3178_s4 + $0x20] sm:$0xff]   ;;  %v2526_v27 = vld [vmem:[%s3178_s4 + $0x18] sm:$0xff]  }
  0x1a   : > { %946 = vst [vmem:[#allocation2 + $0x7d] sm:$0x1] %v2624_v1  ;;  %1100 = vst [vmem:[#allocation2 + $0xb0] sm:$0x3f] %v2624_v1  ;;  %v2525_v26 = vld [vmem:[%s3178_s4 + $0x20] sm:$0xff]   ;;  %v2527_v28 = vld [vmem:[%s3178_s4 + $0x18] sm:$0xff]  }
  0x1b   : > { %1103 = vst [vmem:[#allocation2 + $0x94] sm:$0x3] %v2624_v1  ;;  %1104 = vst [vmem:[#allocation2 + $0x9c] sm:$0x3] %v2624_v1  ;;  %2357 = vmatpush3.bf16.msra.mxu0 %v2506_v7  ;;  %v2528_v29 = vld [vmem:[%s3178_s4 + $0x10] sm:$0xff]   ;;  %v2530_v31 = vld [vmem:[%s3178_s4 + $0x8] sm:$0xff]  }
  0x1c   : > { %1105 = vst [vmem:[#allocation2 + $0xa4] sm:$0x3] %v2624_v1  ;;  %1106 = vst [vmem:[#allocation2 + $0xac] sm:$0x3] %v2624_v1  ;;  %2377 = vmatpush3.bf16.msra.mxu1 %v2507_v8  ;;  %2358 = vmatprep.subr.bf16.mxu0 %v2624_v1  ;;  %v2529_v30 = vld [vmem:[%s3178_s4 + $0x10] sm:$0xff]   ;;  %v2531_v32 = vld [vmem:[%s3178_s4 + $0x8] sm:$0xff]  }
  0x1d   : > { %2378 = vmatprep.subr.bf16.mxu1 %v2624_v1  ;;  %v2532_v33 = vld [vmem:[%s3178_s4] sm:$0xff]   ;;  %v2536_v0 = vld [vmem:[%s3184_s10 + $0x38] sm:$0xff]   ;;  %v2537_v4 = vld [vmem:[%s3184_s10 + $0x30] sm:$0xff]  }
  0x1e   : > { %v2533_v34 = vld [vmem:[%s3178_s4] sm:$0xff]   ;;  %v2538_v6 = vld [vmem:[%s3184_s10 + $0x28] sm:$0xff]  }
  0x1f   : > { %2359 = vmatpush3.bf16.msra.mxu0 %v2508_v9  ;;  %v2534_v35 = vld [vmem:[%s598_s22] sm:$0xff]  }
  0x20   : > { %2379 = vmatpush3.bf16.msra.mxu1 %v2509_v10  ;;  %2360 = vmatprep.subr.bf16.mxu0 %v2624_v1  ;;  %v2535_v36 = vld [vmem:[%s603_s26] sm:$0xff]  }
  0x21   : > { %2380 = vmatprep.subr.bf16.mxu1 %v2624_v1  ;;  %v2931_v37 = vld [vmem:[%s3179_s5] ss:$0 sm:$0xff] }
  0x22   : > { %v2936_v39 = vld [vmem:[%s3180_s6] ss:$0 sm:$0xff] }
  0x23   : > { %2361 = vmatpush3.bf16.msra.mxu0 %v2510_v11  ;;  %v2539_v7 = vld [vmem:[%s3184_s10 + $0x20] sm:$0xff]   ;;  %v2540_v11 = vld [vmem:[%s3184_s10 + $0x18] sm:$0xff]  }
  0x24   : > { %2381 = vmatpush3.bf16.msra.mxu1 %v2511_v12  ;;  %2362 = vmatprep.subr.bf16.mxu0 %v2624_v1 }
  0x25   : > { %2382 = vmatprep.subr.bf16.mxu1 %v2624_v1 }
  0x27   : > { %2363 = vmatpush3.bf16.msra.mxu0 %v2512_v13 }
  0x28   : > { %2383 = vmatpush3.bf16.msra.mxu1 %v2513_v14  ;;  %2364 = vmatprep.subr.bf16.mxu0 %v2624_v1 }
  0x29   : > { %2384 = vmatprep.subr.bf16.mxu1 %v2624_v1 }
  0x2b   : > { %2365 = vmatpush3.bf16.msra.mxu0 %v2514_v15 }
  0x2c   : > { %2385 = vmatpush3.bf16.msra.mxu1 %v2515_v16  ;;  %2390 = vmatprep.subr.bf16.mxu0 %v2624_v1  ;;  %v2541_v16 = vld [vmem:[%s3184_s10 + $0x10] sm:$0xff]  }
  0x2d   : > { %2410 = vmatprep.subr.bf16.mxu1 %v2624_v1 }
  0x2e   : > { %2367 = vmatmul.mubr.bf16.vlgmr.msra.gmra.mxu0 %v2516_v17 }
  0x2f   : > { %2387 = vmatmul.mubr.bf16.vlgmr.msra.gmra.mxu1 %v2517_v18  ;;  %2391 = vmatpush3.bf16.msra.mxu0 %v2518_v19 }
  0x30   : > { %2411 = vmatpush3.bf16.msra.mxu1 %v2519_v20  ;;  %2392 = vmatprep.subr.bf16.mxu0 %v2624_v1 }
  0x31   : > { %2412 = vmatprep.subr.bf16.mxu1 %v2624_v1  ;;  %2406 = vmatprep.mubr.msk.bf16.mxu0 %vm2625_vm0, %v2624_v1 }
  0x32   : > { %2426 = vmatprep.mubr.msk.bf16.mxu1 %vm2625_vm0, %v2624_v1 }
  0x33   : > { %2393 = vmatpush3.bf16.msra.mxu0 %v2520_v21  ;;  %v2542_v21 = vld [vmem:[%s3184_s10 + $0x8] sm:$0xff]  }
  0x34   : > { %2413 = vmatpush3.bf16.msra.mxu1 %v2521_v22  ;;  %2394 = vmatprep.subr.bf16.mxu0 %v2624_v1 }
  0x35   : > { %2414 = vmatprep.subr.bf16.mxu1 %v2624_v1 }
  0x37   : > { %2395 = vmatpush3.bf16.msra.mxu0 %v2522_v23 }
  0x38   : > { %2415 = vmatpush3.bf16.msra.mxu1 %v2523_v24  ;;  %2396 = vmatprep.subr.bf16.mxu0 %v2624_v1 }
  0x39   : > { %2416 = vmatprep.subr.bf16.mxu1 %v2624_v1 }
  0x3b   : > { %2397 = vmatpush3.bf16.msra.mxu0 %v2524_v25 }
  0x3c   : > { %2417 = vmatpush3.bf16.msra.mxu1 %v2525_v26  ;;  %2398 = vmatprep.subr.bf16.mxu0 %v2624_v1 }
  0x3d   : > { %2418 = vmatprep.subr.bf16.mxu1 %v2624_v1 }
  0x3f   : > { %2399 = vmatpush3.bf16.msra.mxu0 %v2526_v27 }
  0x40   : > { %2419 = vmatpush3.bf16.msra.mxu1 %v2527_v28  ;;  %2400 = vmatprep.subr.bf16.mxu0 %v2624_v1 }
  0x41   : > { %2420 = vmatprep.subr.bf16.mxu1 %v2624_v1 }
  0x43   : > { %2401 = vmatpush3.bf16.msra.mxu0 %v2528_v29 }
  0x44   : > { %2421 = vmatpush3.bf16.msra.mxu1 %v2529_v30  ;;  %2402 = vmatprep.subr.bf16.mxu0 %v2624_v1 }
  0x45   : > { %2422 = vmatprep.subr.bf16.mxu1 %v2624_v1 }
  0x47   : > { %2403 = vmatpush3.bf16.msra.mxu0 %v2530_v31  ;;  %v2543_v31 = vld [vmem:[%s3184_s10] sm:$0xff]  }
  0x48   : > { %2423 = vmatpush3.bf16.msra.mxu1 %v2531_v32  ;;  %2404 = vmatprep.subr.bf16.mxu0 %v2624_v1 }
  0x49   : > { %2424 = vmatprep.subr.bf16.mxu1 %v2624_v1 }
  0x4b   : > { %2405 = vmatpush3.bf16.msra.mxu0 %v2532_v33 }
  0x4c   : > { %2425 = vmatpush3.bf16.msra.mxu1 %v2533_v34  ;;  %2430 = vmatprep.subr.bf16.mxu0 %v2624_v1 }
  0x4d   : > { %2450 = vmatprep.subr.bf16.mxu1 %v2624_v1 }
  0x4e   : > { %2407 = vmatmul.mubr.bf16.vlgmr.msra.gmra.mxu0 %v2534_v35 }
  0x4f   : > { %2427 = vmatmul.mubr.bf16.vlgmr.msra.gmra.mxu1 %v2535_v36  ;;  %2446 = vmatprep.mubr.msk.bf16.mxu0 %vm2625_vm0, %v2624_v1 }
  0x50   : > { %2466 = vmatprep.mubr.msk.bf16.mxu1 %vm2625_vm0, %v2624_v1  ;;  %2431 = vmatpush3.bf16.msra.mxu0 %v2536_v0 }
  0x51   : > { %2432 = vmatprep.subr.bf16.mxu0 %v2624_v1 }
  0x54   : > { %2433 = vmatpush3.bf16.msra.mxu0 %v2537_v4  ;;  %v2218_v4 = vld [vmem:[%s3181_s7] ss:$0 sm:$0xff] }
  0x55   : > { %2434 = vmatprep.subr.bf16.mxu0 %v2624_v1 }
  0x58   : > { %2435 = vmatpush3.bf16.msra.mxu0 %v2538_v6 }
  0x59   : > { %2436 = vmatprep.subr.bf16.mxu0 %v2624_v1 }
  0x5c   : > { %2437 = vmatpush3.bf16.msra.mxu0 %v2539_v7 }
  0x5d   : > { %2438 = vmatprep.subr.bf16.mxu0 %v2624_v1 }
  0x60   : > { %2439 = vmatpush3.bf16.msra.mxu0 %v2540_v11 }
  0x61   : > { %2440 = vmatprep.subr.bf16.mxu0 %v2624_v1 }
  0x64   : > { %2441 = vmatpush3.bf16.msra.mxu0 %v2541_v16 }
  0x65   : > { %2442 = vmatprep.subr.bf16.mxu0 %v2624_v1 }
  0x68   : > { %2443 = vmatpush3.bf16.msra.mxu0 %v2542_v21 }
  0x69   : > { %2444 = vmatprep.subr.bf16.mxu0 %v2624_v1 }
  0x6c   : > { %2445 = vmatpush3.bf16.msra.mxu0 %v2543_v31 }
  0x6d   : > { %2470 = vmatprep.subr.bf16.mxu0 %v2624_v1 }
  0xee   : > { %v728_v38 = vpop.f32.mrf.mxu0 }
  0xef   : > { %v742_v40 = vmul.f32 %v2931_v37, %v728_v38  ;;  %v889_v41 = vpop.f32.mrf.mxu1 }
  0xf0   : > { %v903_v42 = vmul.f32 %v2931_v37, %v889_v41  ;;  %v2368_v43 = vpop.f32.mrf.mxu0 }
  0xf1   : > { %v2941_v44 = vadd.f32 %v2936_v39, %v742_v40  ;;  %v2388_v45 = vpop.f32.mrf.mxu1 }
  0xf2   : > { %v2944_v46 = vadd.f32 %v2936_v39, %v903_v42  ;;  %v731_v47 = vpop.f32.mrf.mxu0 }
  0xf3   : > { %v753_v48 = vmax.f32 %v2941_v44, -60.0  ;;  %v743_v49 = vmul.f32 %v2931_v37, %v731_v47  ;;  %v892_v50 = vpop.f32.mrf.mxu1 }
  0xf4   : > { %v914_v51 = vmax.f32 %v2944_v46, -60.0  ;;  %v904_v52 = vmul.f32 %v2931_v37, %v892_v50  ;;  %v2369_v53 = vpop.f32.mrf.mxu0 }
  0xf5   : > { %v755_v54 = vsub.f32 0.0, %v753_v48  ;;  %v2951_v55 = vadd.f32 %v2936_v39, %v743_v49  ;;  %v2389_v56 = vpop.f32.mrf.mxu1 }
  0xf6   : > { %v916_v57 = vsub.f32 0.0, %v914_v51  ;;  %v2954_v58 = vadd.f32 %v2936_v39, %v904_v52 }
  0xf7   : > { %v757_v59 = vmul.f32 1.442695, %v755_v54  ;;  %v754_v60 = vmax.f32 %v2951_v55, -60.0 }
  0xf8   : > { %v918_v61 = vmul.f32 1.442695, %v916_v57  ;;  %v915_v62 = vmax.f32 %v2954_v58, -60.0 }
  0xf9   : > { %2560 = vpow2.f32 %v757_v59  ;;  %v756_v63 = vsub.f32 0.0, %v754_v60 }
  0xfa   : > { %2562 = vpow2.f32 %v918_v61  ;;  %v917_v2 = vsub.f32 0.0, %v915_v62 }
  0xfb   : > { %v759_v3 = vmul.f32 1.442695, %v756_v63 }
  0xfc   : > { %v920_v5 = vmul.f32 1.442695, %v917_v2 }
  0xfd   : > { %2564 = vpow2.f32 %v759_v3 }
  0xfe   : > { %2566 = vpow2.f32 %v920_v5  ;;  %v2219_v5 = vld [vmem:[%s3181_s7 + $0xa] ss:$0 sm:$0xff] }
 0x106   : > { %v2561_v8 = vpop.eup %2560 }
 0x107   : > { %v2563_v9 = vpop.eup %2562  ;;  %v761_v10 = vadd.f32 1.0, %v2561_v8 }
 0x108   : > { %v922_v12 = vadd.f32 1.0, %v2563_v9 }
 0x109   : > { %2568 = vrcp.f32 %v761_v10 }
 0x10a   : > { %v2565_v13 = vpop.eup %2564  ;;  %2570 = vrcp.f32 %v922_v12 }
 0x10b   : > { %v2567_v14 = vpop.eup %2566  ;;  %v762_v15 = vadd.f32 1.0, %v2565_v13 }
 0x10c   : > { %v923_v17 = vadd.f32 1.0, %v2567_v14 }
 0x10d   : > { %2572 = vrcp.f32 %v762_v15 }
 0x10e   : > { %2574 = vrcp.f32 %v923_v17  ;;  %v1053_v18 = vpop.f32.mrf.mxu0 }
 0x10f   : > { %v1067_v19 = vmul.f32 %v2931_v37, %v1053_v18  ;;  %v1213_v20 = vpop.f32.mrf.mxu1  ;;  %v2220_v18 = vld [vmem:[%s3181_s7 + $0x14] ss:$0 sm:$0xff] }
 0x110   : > { %v1227_v22 = vmul.f32 %v2931_v37, %v1213_v20  ;;  %v2408_v23 = vpop.f32.mrf.mxu0 }
 0x111   : > { %v1076_v24 = vadd.f32 %v2936_v39, %v1067_v19  ;;  %v2428_v25 = vpop.f32.mrf.mxu1 }
 0x112   : > { %v1236_v26 = vadd.f32 %v2936_v39, %v1227_v22  ;;  %v1056_v27 = vpop.f32.mrf.mxu0 }
 0x113   : > { %v1078_v28 = vmax.f32 %v1076_v24, -60.0  ;;  %v1068_v29 = vmul.f32 %v2931_v37, %v1056_v27  ;;  %v1216_v30 = vpop.f32.mrf.mxu1  ;;  %v1264_v27 = vld [vmem:[#allocation2 + $0x28] sm:$0xf] }
 0x114   : > { %v1238_v32 = vmax.f32 %v1236_v26, -60.0  ;;  %v1228_v33 = vmul.f32 %v2931_v37, %v1216_v30  ;;  %v2409_v34 = vpop.f32.mrf.mxu0 }
 0x115   : > { %v1080_v35 = vsub.f32 0.0, %v1078_v28  ;;  %v1077_v36 = vadd.f32 %v2936_v39, %v1068_v29  ;;  %v2429_v38 = vpop.f32.mrf.mxu1  ;;  %v2222_v29 = vld [vmem:[%s3181_s7 + $0xf] ss:$0 sm:$0xff]  ;;  %v1335_v34 = vld [vmem:[#allocation2 + $0x30] sm:$0xf] }
 0x116   : > { %v2569_v40 = vpop.eup %2568  ;;  %v1240_v41 = vsub.f32 0.0, %v1238_v32  ;;  %v1237_v42 = vadd.f32 %v2936_v39, %v1228_v33 }
 0x117   : > { %v2571_v43 = vpop.eup %2570  ;;  %v765_v45 = vmul.f32 %v2569_v40, %v2941_v44  ;;  %v1079_v47 = vmax.f32 %v1077_v36, -60.0  ;;  %v1082_v37 = vmul.f32 1.442695, %v1080_v35  ;;  %v1299_v40 = vmul.f32 %v2220_v18, %v1264_v27 }
 0x118   : > { %v926_v48 = vmul.f32 %v2571_v43, %v2944_v46  ;;  %v1239_v49 = vmax.f32 %v1237_v42, -60.0  ;;  %v1242_v52 = vmul.f32 1.442695, %v1240_v41  ;;  %v1308_v41 = vld [vmem:[#allocation2 + $0x80] sm:$0xf] }
 0x119   : > { %767 = vst [vmem:[#allocation2 + $0x9] ss:$8 sps:$4 sm:$0xff] %v765_v45   ;;  %v1081_v50 = vsub.f32 0.0, %v1079_v47  ;;  %2576 = vpow2.f32 %v1082_v37  ;;  %v2223_v43 = vld [vmem:[%s3181_s7 + $0x1] ss:$0 sm:$0xff] }
 0x11a   : > { %v2573_v51 = vpop.eup %2572  ;;  %928 = vst [vmem:[#allocation2 + $0x38] ss:$8 sps:$4 sm:$0xff] %v926_v48   ;;  %v1241_v53 = vsub.f32 0.0, %v1239_v49  ;;  %2578 = vpow2.f32 %v1242_v52  ;;  %v2224_v45 = vld [vmem:[%s3181_s7 + $0xb] ss:$0 sm:$0xff]  ;;  %v1346_v52 = vmul.f32 %v2223_v43, %v1335_v34 }
 0x11b   : > { %v2575_v54 = vpop.eup %2574  ;;  %v766_v39 = vmul.f32 %v2573_v51, %v2951_v55  ;;  %v1084_v56 = vmul.f32 1.442695, %v1081_v50  ;;  %v1259_v55 = vld [vmem:[#allocation2] sm:$0xf]  ;;  %v1340_v49 = vld [vmem:[#allocation2 + $0x58] sm:$0xf] }
 0x11c   : > { %v927_v44 = vmul.f32 %v2575_v54, %v2954_v58  ;;  %v1244_v57 = vmul.f32 1.442695, %v1241_v53  ;;  %v1270_v11 = vmul.f32 %v2218_v4, %v1259_v55 }
 0x11d   : > { %771 = vst [vmem:[#allocation2 + $0x19] ss:$8 sps:$4 sm:$0xff] %v766_v39   ;;  %2580 = vpow2.f32 %v1084_v56 }
 0x11e   : > { %932 = vst [vmem:[#allocation2 + $0x48] ss:$8 sps:$4 sm:$0xff] %v927_v44   ;;  %2582 = vpow2.f32 %v1244_v57  ;;  %v1330_v44 = vmul.f32 %v2222_v29, %v1308_v41  ;;  %v2229_v41 = vld [vmem:[%s3181_s7 + $0xc] ss:$0 sm:$0xff] }
 0x120   : > { %v1260_v3 = vld [vmem:[#allocation2 + $0x8] sm:$0xf]  ;;  %v1261_v17 = vld [vmem:[#allocation2 + $0x10] sm:$0xf] }
 0x121   : > { %v1283_v12 = vmul.f32 %v2219_v5, %v1260_v3  ;;  %v1271_v23 = vmul.f32 %v2218_v4, %v1260_v3  ;;  %v1284_v25 = vmul.f32 %v2219_v5, %v1261_v17  ;;  %v1296_v28 = vmul.f32 %v2220_v18, %v1261_v17  ;;  %v1336_v37 = vld [vmem:[#allocation2 + $0x38] sm:$0xf]  ;;  %v1337_v57 = vld [vmem:[#allocation2 + $0x40] sm:$0xf] }
 0x123   : > { %v1287_v20 = vadd.f32 %v1283_v12, %v1270_v11  ;;  %v2226_v12 = vld [vmem:[%s3181_s7 + $0x6] ss:$0 sm:$0xff] }
 0x124   : > { %v1262_v13 = vld [vmem:[#allocation2 + $0x18] sm:$0xf]  ;;  %v1263_v15 = vld [vmem:[#allocation2 + $0x20] sm:$0xf] }
 0x125   : > { %v1285_v19 = vmul.f32 %v2219_v5, %v1262_v13  ;;  %v1273_v21 = vmul.f32 %v2218_v4, %v1262_v13  ;;  %v1286_v22 = vmul.f32 %v2219_v5, %v1263_v15  ;;  %v1297_v31 = vmul.f32 %v2220_v18, %v1262_v13  ;;  %v1339_v3 = vld [vmem:[#allocation2 + $0x50] sm:$0xf] }
 0x126   : > { %v2577_v46 = vpop.eup %2576  ;;  %v1300_v35 = vadd.f32 %v1296_v28, %v1287_v20  ;;  %v1298_v47 = vmul.f32 %v2220_v18, %v1263_v15 }
 0x127   : > { %v2579_v59 = vpop.eup %2578  ;;  %v1086_v62 = vadd.f32 1.0, %v2577_v46  ;;  %v2225_v46 = vld [vmem:[%s3181_s7 + $0x15] ss:$0 sm:$0xff] }
 0x128   : > { %v1246_v63 = vadd.f32 1.0, %v2579_v59 }
 0x129   : > { %2584 = vrcp.f32 %v1086_v62 }
 0x12a   : > { %v2581_v60 = vpop.eup %2580  ;;  %2586 = vrcp.f32 %v1246_v63  ;;  %v1359_v63 = vmul.f32 %v2224_v45, %v1336_v37 }
 0x12b   : > { %v2583_v61 = vpop.eup %2582  ;;  %v1087_v0 = vadd.f32 1.0, %v2581_v60 }
 0x12c   : > { %v1247_v2 = vadd.f32 1.0, %v2583_v61 }
 0x12d   : > { %2588 = vrcp.f32 %v1087_v0  ;;  %v1338_v0 = vld [vmem:[#allocation2 + $0x48] sm:$0xf] }
 0x12e   : > { %2590 = vrcp.f32 %v1247_v2  ;;  %v1361_v20 = vmul.f32 %v2224_v45, %v1338_v0 }
 0x136   : > { %v2585_v58 = vpop.eup %2584 }
 0x137   : > { %v2587_v6 = vpop.eup %2586  ;;  %v1090_v7 = vmul.f32 %v2585_v58, %v1076_v24  ;;  %v1272_v24 = vmul.f32 %v2218_v4, %v1261_v17  ;;  %v1375_v58 = vmul.f32 %v2225_v46, %v1340_v49 }
 0x138   : > { %v1250_v9 = vmul.f32 %v2587_v6, %v1236_v26  ;;  %v2221_v26 = vld [vmem:[%s3181_s7 + $0x5] ss:$0 sm:$0xff] }
 0x139   : > { %1092 = vst [vmem:[#allocation2 + $0x61] ss:$8 sps:$4 sm:$0xff] %v1090_v7   ;;  %v1289_v30 = vadd.f32 %v1285_v19, %v1272_v24  ;;  %v1360_v19 = vmul.f32 %v2224_v45, %v1337_v57 }
 0x13a   : > { %v2589_v8 = vpop.eup %2588  ;;  %1252 = vst [vmem:[#allocation2 + $0x90] ss:$8 sps:$4 sm:$0xff] %v1250_v9   ;;  %v1348_v9 = vmul.f32 %v2223_v43, %v1337_v57 }
 0x13b   : > { %v2591_v10 = vpop.eup %2590  ;;  %v1091_v14 = vmul.f32 %v2589_v8, %v1077_v36  ;;  %v1290_v36 = vadd.f32 %v1286_v22, %v1273_v21  ;;  %v1302_v56 = vadd.f32 %v1298_v47, %v1289_v30  ;;  %v1347_v8 = vmul.f32 %v2223_v43, %v1336_v37 }
 0x13c   : > { %v1251_v16 = vmul.f32 %v2591_v10, %v1237_v42  ;;  %v1288_v42 = vadd.f32 %v1284_v25, %v1271_v23  ;;  %v1372_v10 = vmul.f32 %v2225_v46, %v1337_v57  ;;  %v1362_v21 = vmul.f32 %v2224_v45, %v1339_v3  ;;  %v2227_v23 = vld [vmem:[%s3181_s7 + $0x10] ss:$0 sm:$0xff]  ;;  %v2228_v25 = vld [vmem:[%s3181_s7 + $0x2] ss:$0 sm:$0xff] }
 0x13d   : > { %1096 = vst [vmem:[#allocation2 + $0x71] ss:$8 sps:$4 sm:$0xff] %v1091_v14   ;;  %v1303_v60 = vadd.f32 %v1299_v40, %v1290_v36  ;;  %v1349_v14 = vmul.f32 %v2223_v43, %v1338_v0  ;;  %v1416_v40 = vld [vmem:[#allocation2 + $0x29] sm:$0xf] }
 0x13e   : > { %1256 = vst [vmem:[#allocation2 + $0xa0] ss:$8 sps:$4 sm:$0xff] %v1251_v16   ;;  %v1301_v39 = vadd.f32 %v1297_v31, %v1288_v42  ;;  %v1411_v16 = vld [vmem:[#allocation2 + $0x1] sm:$0xf]  ;;  %v1384_v31 = vld [vmem:[#allocation2 + $0xb0] sm:$0xf] }
 0x13f   : > { %v1422_v34 = vmul.f32 %v2228_v25, %v1411_v16  ;;  %v2232_v16 = vld [vmem:[%s3181_s7 + $0x11] ss:$0 sm:$0xff] }
 0x140   : > { %v1304_v32 = vld [vmem:[#allocation2 + $0x60] sm:$0xf]  ;;  %v1305_v33 = vld [vmem:[#allocation2 + $0x68] sm:$0xf] }
 0x141   : > { %v1314_v38 = vmul.f32 %v2221_v26, %v1304_v32  ;;  %v1315_v48 = vmul.f32 %v2221_v26, %v1305_v33  ;;  %v1327_v51 = vmul.f32 %v2222_v29, %v1305_v33  ;;  %v1380_v11 = vld [vmem:[#allocation2 + $0x90] sm:$0xf]  ;;  %v1381_v22 = vld [vmem:[#allocation2 + $0x98] sm:$0xf]  ;;  %v1373_v32 = vmul.f32 %v2225_v46, %v1338_v0 }
 0x142   : > { %v1390_v27 = vmul.f32 %v2226_v12, %v1380_v11  ;;  %v1374_v33 = vmul.f32 %v2225_v46, %v1339_v3  ;;  %v1403_v43 = vmul.f32 %v2227_v23, %v1381_v22  ;;  %v1414_v46 = vld [vmem:[#allocation2 + $0x19] sm:$0xf] }
 0x143   : > { %v1318_v50 = vadd.f32 %v1314_v38, %v1300_v35  ;;  %v1319_v2 = vadd.f32 %v1315_v48, %v1301_v39  ;;  %v1412_v38 = vld [vmem:[#allocation2 + $0x9] sm:$0xf]  ;;  %v1391_v48 = vmul.f32 %v2226_v12, %v1381_v22 }
 0x144   : > { %v1306_v53 = vld [vmem:[#allocation2 + $0x70] sm:$0xf]  ;;  %v1307_v54 = vld [vmem:[#allocation2 + $0x78] sm:$0xf] }
 0x145   : > { %v1331_v59 = vadd.f32 %v1327_v51, %v1318_v50  ;;  %v1316_v61 = vmul.f32 %v2221_v26, %v1306_v53  ;;  %v1317_v62 = vmul.f32 %v2221_v26, %v1307_v54  ;;  %v1328_v55 = vmul.f32 %v2222_v29, %v1306_v53  ;;  %v1382_v30 = vld [vmem:[#allocation2 + $0xa0] sm:$0xf]  ;;  %v1383_v36 = vld [vmem:[#allocation2 + $0xa8] sm:$0xf]  ;;  %v1413_v51 = vld [vmem:[#allocation2 + $0x11] sm:$0xf] }
 0x146   : > { %v1329_v7 = vmul.f32 %v2222_v29, %v1307_v54  ;;  %v1392_v37 = vmul.f32 %v2226_v12, %v1382_v30  ;;  %v1406_v50 = vmul.f32 %v2227_v23, %v1384_v31  ;;  %v1424_v3 = vmul.f32 %v2228_v25, %v1413_v51  ;;  %v1458_v22 = vld [vmem:[#allocation2 + $0x71] sm:$0xf]  ;;  %v2234_v31 = vld [vmem:[%s3181_s7 + $0xd] ss:$0 sm:$0xff] }
 0x147   : > { %v1350_v4 = vadd.f32 %v1346_v52, %v1331_v59  ;;  %v1320_v5 = vadd.f32 %v1316_v61, %v1302_v56  ;;  %v1321_v6 = vadd.f32 %v1317_v62, %v1303_v60  ;;  %v1332_v13 = vadd.f32 %v1328_v55, %v1319_v2  ;;  %v2230_v52 = vld [vmem:[%s3181_s7 + $0x16] ss:$0 sm:$0xff]  ;;  %v1415_v61 = vld [vmem:[#allocation2 + $0x21] sm:$0xf] }
 0x148   : > { %v1393_v56 = vmul.f32 %v2226_v12, %v1383_v36  ;;  %v1451_v57 = vmul.f32 %v2230_v52, %v1416_v40  ;;  %v1404_v60 = vmul.f32 %v2227_v23, %v1382_v30  ;;  %v1405_v2 = vmul.f32 %v2227_v23, %v1383_v36  ;;  %v1488_v30 = vld [vmem:[#allocation2 + $0x39] sm:$0xf] }
 0x149   : > { %v1363_v15 = vadd.f32 %v1359_v63, %v1350_v4  ;;  %v1333_v17 = vadd.f32 %v1329_v7, %v1320_v5  ;;  %v1334_v18 = vadd.f32 %v1330_v44, %v1321_v6  ;;  %v1351_v24 = vadd.f32 %v1347_v8, %v1332_v13  ;;  %v1456_v5 = vld [vmem:[#allocation2 + $0x61] sm:$0xf]  ;;  %v2231_v6 = vld [vmem:[%s3181_s7 + $0x7] ss:$0 sm:$0xff]  ;;  %v1487_v7 = vld [vmem:[#allocation2 + $0x31] sm:$0xf] }
 0x14a   : > { %v1435_v44 = vmul.f32 %v2229_v41, %v1412_v38  ;;  %v1423_v55 = vmul.f32 %v2228_v25, %v1412_v38  ;;  %v1448_v4 = vmul.f32 %v2230_v52, %v1413_v51  ;;  %v1425_v8 = vmul.f32 %v2228_v25, %v1414_v46  ;;  %v1492_v36 = vld [vmem:[#allocation2 + $0x59] sm:$0xf] }
 0x14b   : > { %v1376_v26 = vadd.f32 %v1372_v10, %v1363_v15  ;;  %v1352_v28 = vadd.f32 %v1348_v9, %v1333_v17  ;;  %v1353_v29 = vadd.f32 %v1349_v14, %v1334_v18  ;;  %v1364_v35 = vadd.f32 %v1360_v19, %v1351_v24  ;;  %v1457_v15 = vld [vmem:[#allocation2 + $0x69] sm:$0xf]  ;;  %v2233_v18 = vld [vmem:[%s3181_s7 + $0x3] ss:$0 sm:$0xff] }
 0x14c   : > { %v1436_v12 = vmul.f32 %v2229_v41, %v1413_v51  ;;  %v1437_v13 = vmul.f32 %v2229_v41, %v1414_v46  ;;  %v1438_v14 = vmul.f32 %v2229_v41, %v1415_v61  ;;  %v1460_v19 = vld [vmem:[#allocation2 + $0x81] sm:$0xf]  ;;  %v1498_v25 = vmul.f32 %v2233_v18, %v1487_v7  ;;  %v1490_v51 = vld [vmem:[#allocation2 + $0x49] sm:$0xf] }
 0x14d   : > { %v1394_v42 = vadd.f32 %v1390_v27, %v1376_v26  ;;  %v1365_v45 = vadd.f32 %v1361_v20, %v1352_v28  ;;  %v1366_v47 = vadd.f32 %v1362_v21, %v1353_v29  ;;  %v1377_v49 = vadd.f32 %v1373_v32, %v1364_v35  ;;  %v1459_v28 = vld [vmem:[#allocation2 + $0x79] sm:$0xf] }
 0x14e   : > { %v1466_v20 = vmul.f32 %v2231_v6, %v1456_v5  ;;  %v1449_v26 = vmul.f32 %v2230_v52, %v1414_v46  ;;  %v1450_v27 = vmul.f32 %v2230_v52, %v1415_v61  ;;  %v1479_v32 = vmul.f32 %v2232_v16, %v1457_v15 }
 0x14f   : > { %v1407_v53 = vadd.f32 %v1403_v43, %v1394_v42  ;;  %v1378_v54 = vadd.f32 %v1374_v33, %v1365_v45  ;;  %v1379_v39 = vadd.f32 %v1375_v58, %v1366_v47  ;;  %v1395_v59 = vadd.f32 %v1391_v48, %v1377_v49  ;;  %v1489_v43 = vld [vmem:[#allocation2 + $0x41] sm:$0xf]  ;;  %v2235_v45 = vld [vmem:[%s3181_s7 + $0x17] ss:$0 sm:$0xff] }
 0x150   : > { %v1467_v38 = vmul.f32 %v2231_v6, %v1457_v15  ;;  %v1482_v40 = vmul.f32 %v2232_v16, %v1460_v19  ;;  %v1468_v41 = vmul.f32 %v2231_v6, %v1458_v22  ;;  %v1469_v48 = vmul.f32 %v2231_v6, %v1459_v28 }
 0x151   : > { %v1426_v62 = vadd.f32 %v1422_v34, %v1407_v53  ;;  %v1396_v63 = vadd.f32 %v1392_v37, %v1378_v54  ;;  %v1397_v0 = vadd.f32 %v1393_v56, %v1379_v39  ;;  %v1408_v58 = vadd.f32 %v1404_v60, %v1395_v59  ;;  %v1491_v39 = vld [vmem:[#allocation2 + $0x51] sm:$0xf] }
 0x152   : > { %v1480_v52 = vmul.f32 %v2232_v16, %v1458_v22  ;;  %v1527_v54 = vmul.f32 %v2235_v45, %v1492_v36  ;;  %v1499_v60 = vmul.f32 %v2233_v18, %v1488_v30  ;;  %v1500_v61 = vmul.f32 %v2233_v18, %v1489_v43  ;;  %v1535_v22 = vld [vmem:[#allocation2 + $0xa9] sm:$0xf] }
 0x153   : > { %v1439_v9 = vadd.f32 %v1435_v44, %v1426_v62  ;;  %v1409_v10 = vadd.f32 %v1405_v2, %v1396_v63  ;;  %v1410_v11 = vadd.f32 %v1406_v50, %v1397_v0  ;;  %v1427_v17 = vadd.f32 %v1423_v55, %v1408_v58  ;;  %v1532_v63 = vld [vmem:[#allocation2 + $0x91] sm:$0xf]  ;;  %v2236_v0 = vld [vmem:[%s3181_s7 + $0x8] ss:$0 sm:$0xff] }
 0x154   : > { %v1511_v50 = vmul.f32 %v2234_v31, %v1488_v30  ;;  %v1481_v44 = vmul.f32 %v2232_v16, %v1459_v28  ;;  %v1524_v62 = vmul.f32 %v2235_v45, %v1489_v43  ;;  %v1512_v6 = vmul.f32 %v2234_v31, %v1489_v43  ;;  %v1534_v16 = vld [vmem:[#allocation2 + $0xa1] sm:$0xf] }
 0x155   : > { %v1452_v21 = vadd.f32 %v1448_v4, %v1439_v9  ;;  %v1428_v23 = vadd.f32 %v1424_v3, %v1409_v10  ;;  %v1429_v24 = vadd.f32 %v1425_v8, %v1410_v11  ;;  %v1440_v29 = vadd.f32 %v1436_v12, %v1427_v17  ;;  %v1563_v3 = vld [vmem:[#allocation2 + $0x2] sm:$0xf]  ;;  %v1533_v8 = vld [vmem:[#allocation2 + $0x99] sm:$0xf]  ;;  %v2237_v9 = vld [vmem:[%s3181_s7 + $0x12] ss:$0 sm:$0xff] }
 0x156   : > { %v1513_v58 = vmul.f32 %v2234_v31, %v1490_v51  ;;  %v1514_v7 = vmul.f32 %v2234_v31, %v1491_v39  ;;  %v2238_v11 = vld [vmem:[%s3181_s7 + $0x4] ss:$0 sm:$0xff]  ;;  %v1536_v17 = vld [vmem:[#allocation2 + $0xb1] sm:$0xf]  ;;  %v1526_v19 = vmul.f32 %v2235_v45, %v1491_v39  ;;  %v1543_v30 = vmul.f32 %v2236_v0, %v1533_v8 }
 0x157   : > { %v1470_v33 = vadd.f32 %v1466_v20, %v1452_v21  ;;  %v1441_v34 = vadd.f32 %v1437_v13, %v1428_v23  ;;  %v1442_v35 = vadd.f32 %v1438_v14, %v1429_v24  ;;  %v1453_v42 = vadd.f32 %v1449_v26, %v1440_v29  ;;  %v1564_v23 = vld [vmem:[#allocation2 + $0xa] sm:$0xf] }
 0x158   : > { %v1542_v13 = vmul.f32 %v2236_v0, %v1532_v63  ;;  %v1574_v20 = vmul.f32 %v2238_v11, %v1563_v3  ;;  %v1568_v24 = vld [vmem:[#allocation2 + $0x2a] sm:$0xf] }
 0x159   : > { %v1483_v47 = vadd.f32 %v1479_v32, %v1470_v33  ;;  %v1454_v49 = vadd.f32 %v1450_v27, %v1441_v34  ;;  %v1455_v37 = vadd.f32 %v1451_v57, %v1442_v35  ;;  %v1471_v53 = vadd.f32 %v1467_v38, %v1453_v42  ;;  %v1565_v34 = vld [vmem:[#allocation2 + $0x12] sm:$0xf]  ;;  %v2240_v35 = vld [vmem:[%s3181_s7 + $0x18] ss:$0 sm:$0xff] }
 0x15a   : > { %v1501_v57 = vmul.f32 %v2233_v18, %v1490_v51  ;;  %v1525_v18 = vmul.f32 %v2235_v45, %v1490_v51  ;;  %v1555_v27 = vmul.f32 %v2237_v9, %v1533_v8  ;;  %v1544_v32 = vmul.f32 %v2236_v0, %v1534_v16  ;;  %v1566_v45 = vld [vmem:[#allocation2 + $0x1a] sm:$0xf] }
 0x15b   : > { %v1502_v56 = vadd.f32 %v1498_v25, %v1483_v47  ;;  %v1472_v46 = vadd.f32 %v1468_v41, %v1454_v49  ;;  %v1473_v59 = vadd.f32 %v1469_v48, %v1455_v37  ;;  %v1484_v2 = vadd.f32 %v1480_v52, %v1471_v53  ;;  %v2239_v25 = vld [vmem:[%s3181_s7 + $0xe] ss:$0 sm:$0xff]  ;;  %v1567_v49 = vld [vmem:[#allocation2 + $0x22] sm:$0xf] }
 0x15c   : > { %v1558_v33 = vmul.f32 %v2237_v9, %v1536_v17  ;;  %v1545_v41 = vmul.f32 %v2236_v0, %v1535_v22  ;;  %v1587_v42 = vmul.f32 %v2239_v25, %v1564_v23  ;;  %v1603_v43 = vmul.f32 %v2240_v35, %v1568_v24 }
 0x15d   : > { %v1515_v55 = vadd.f32 %v1511_v50, %v1502_v56  ;;  %v1485_v4 = vadd.f32 %v1481_v44, %v1472_v46  ;;  %v1486_v5 = vadd.f32 %v1482_v40, %v1473_v59  ;;  %v1503_v10 = vadd.f32 %v1499_v60, %v1484_v2  ;;  %v1608_v44 = vld [vmem:[#allocation2 + $0x62] sm:$0xf]  ;;  %v2241_v46 = vld [vmem:[%s3181_s7 + $0x9] ss:$0 sm:$0xff] }
 0x15e   : > { %v1556_v48 = vmul.f32 %v2237_v9, %v1534_v16  ;;  %v1557_v52 = vmul.f32 %v2237_v9, %v1535_v22  ;;  %v1575_v53 = vmul.f32 %v2238_v11, %v1564_v23  ;;  %v1576_v39 = vmul.f32 %v2238_v11, %v1565_v34 }
 0x15f   : > { %v1528_v12 = vadd.f32 %v1524_v62, %v1515_v55  ;;  %v1504_v14 = vadd.f32 %v1500_v61, %v1485_v4  ;;  %v1505_v15 = vadd.f32 %v1501_v57, %v1486_v5  ;;  %v1516_v21 = vadd.f32 %v1512_v6, %v1503_v10  ;;  %v1609_v57 = vld [vmem:[#allocation2 + $0x6a] sm:$0xf]  ;;  %v2242_v55 = vld [vmem:[%s3181_s7 + $0x13] ss:$0 sm:$0xff]  ;;  %v1612_v4 = vld [vmem:[#allocation2 + $0x82] sm:$0xf] }
 0x160   : > { %v1600_v56 = vmul.f32 %v2240_v35, %v1565_v34  ;;  %v1577_v59 = vmul.f32 %v2238_v11, %v1566_v45  ;;  %v1588_v63 = vmul.f32 %v2239_v25, %v1565_v34  ;;  %v1589_v0 = vmul.f32 %v2239_v25, %v1566_v45  ;;  %v1611_v11 = vld [vmem:[#allocation2 + $0x7a] sm:$0xf] }
 0x161   : > { %v1546_v26 = vadd.f32 %v1542_v13, %v1528_v12  ;;  %v1517_v28 = vadd.f32 %v1513_v58, %v1504_v14  ;;  %v1518_v29 = vadd.f32 %v1514_v7, %v1505_v15  ;;  %v1529_v31 = vadd.f32 %v1525_v18, %v1516_v21  ;;  %v1610_v58 = vld [vmem:[#allocation2 + $0x72] sm:$0xf]  ;;  %v2243_v21 = vld [vmem:[%s3182_s8] ss:$0 sm:$0xff] }
 0x162   : > { %v1590_v2 = vmul.f32 %v2239_v25, %v1567_v49  ;;  %v1618_v5 = vmul.f32 %v2241_v46, %v1608_v44  ;;  %v1601_v9 = vmul.f32 %v2240_v35, %v1566_v45  ;;  %v1602_v10 = vmul.f32 %v2240_v35, %v1567_v49 }
 0x163   : > { %v1559_v36 = vadd.f32 %v1555_v27, %v1546_v26  ;;  %v1530_v38 = vadd.f32 %v1526_v19, %v1517_v28  ;;  %v1531_v40 = vadd.f32 %v1527_v54, %v1518_v29  ;;  %v1547_v47 = vadd.f32 %v1543_v30, %v1529_v31  ;;  %v2244_v28 = vld [vmem:[%s3183_s9] ss:$0 sm:$0xff] }
 0x164   : > { %v1631_v13 = vmul.f32 %v2242_v55, %v1609_v57  ;;  %v1619_v17 = vmul.f32 %v2241_v46, %v1609_v57  ;;  %v1634_v18 = vmul.f32 %v2242_v55, %v1612_v4  ;;  %v1620_v19 = vmul.f32 %v2241_v46, %v1610_v58 }
 0x165   : > { %v1578_v37 = vadd.f32 %v1574_v20, %v1559_v36  ;;  %v1548_v50 = vadd.f32 %v1544_v32, %v1530_v38  ;;  %v1549_v51 = vadd.f32 %v1545_v41, %v1531_v40  ;;  %v1560_v54 = vadd.f32 %v1556_v48, %v1547_v47 }
 0x166   : > { %v1621_v23 = vmul.f32 %v2241_v46, %v1611_v11  ;;  %v1632_v26 = vmul.f32 %v2242_v55, %v1610_v58  ;;  %v1633_v29 = vmul.f32 %v2242_v55, %v1611_v11 }
 0x167   : > { %v1591_v60 = vadd.f32 %v1587_v42, %v1578_v37  ;;  %v1561_v61 = vadd.f32 %v1557_v52, %v1548_v50  ;;  %v1562_v62 = vadd.f32 %v1558_v33, %v1549_v51  ;;  %v1579_v3 = vadd.f32 %v1575_v53, %v1560_v54 }
 0x169   : > { %v1604_v6 = vadd.f32 %v1600_v56, %v1591_v60  ;;  %v1580_v7 = vadd.f32 %v1576_v39, %v1561_v61  ;;  %v1581_v8 = vadd.f32 %v1577_v59, %v1562_v62  ;;  %v1592_v12 = vadd.f32 %v1588_v63, %v1579_v3 }
 0x16b   : > { %v1622_v14 = vadd.f32 %v1618_v5, %v1604_v6  ;;  %v1593_v15 = vadd.f32 %v1589_v0, %v1580_v7  ;;  %v1594_v16 = vadd.f32 %v1590_v2, %v1581_v8  ;;  %v1605_v20 = vadd.f32 %v1601_v9, %v1592_v12 }
 0x16d   : > { %v1635_v22 = vadd.f32 %v1631_v13, %v1622_v14  ;;  %v1606_v24 = vadd.f32 %v1602_v10, %v1593_v15  ;;  %v1607_v25 = vadd.f32 %v1603_v43, %v1594_v16  ;;  %v1623_v27 = vadd.f32 %v1619_v17, %v1605_v20  ;;  %v2545_v20 = vld [vmem:[%s3186_s12 + $0x30] sm:$0xff]  }
 0x16f   : > { %v1624_v30 = vadd.f32 %v1620_v19, %v1606_v24  ;;  %v1625_v31 = vadd.f32 %v1621_v23, %v1607_v25  ;;  %v1646_v32 = vmul.f32 %v2243_v21, %v1635_v22  ;;  %v1636_v33 = vadd.f32 %v1632_v26, %v1623_v27  ;;  %v2544_v19 = vld [vmem:[%s3186_s12 + $0x38] sm:$0xff]   ;;  %v2547_v22 = vld [vmem:[%s3186_s12 + $0x20] sm:$0xff]   ;;  %v2549_v24 = vld [vmem:[%s3186_s12 + $0x10] sm:$0xff]  }
 0x170   : > { %2451 = vmatpush3.bf16.msra.mxu1 %v2544_v19  ;;  %v2548_v23 = vld [vmem:[%s3186_s12 + $0x18] sm:$0xff]   ;;  %v2550_v25 = vld [vmem:[%s3186_s12 + $0x8] sm:$0xff]   ;;  %v2551_v26 = vld [vmem:[%s3186_s12] sm:$0xff]  }
 0x171   : > { %v1637_v34 = vadd.f32 %v1633_v29, %v1624_v30  ;;  %v1638_v35 = vadd.f32 %v1634_v18, %v1625_v31  ;;  %v1657_v36 = vadd.f32 %v2244_v28, %v1646_v32  ;;  %v1647_v38 = vmul.f32 %v2243_v21, %v1636_v33  ;;  %2452 = vmatprep.subr.bf16.mxu1 %v2624_v1  ;;  %v1720_v27 = vld [vmem:[%s3185_s11] sm:$0x1] }
 0x173   : > { %v1648_v40 = vmul.f32 %v2243_v21, %v1637_v34  ;;  %v1649_v41 = vmul.f32 %v2243_v21, %v1638_v35  ;;  %v1661_v42 = vmax.f32 %v1657_v36, -60.0  ;;  %v1658_v45 = vadd.f32 %v2244_v28, %v1647_v38  ;;  %v2546_v21 = vld [vmem:[%s3186_s12 + $0x28] sm:$0xff]  }
 0x174   : > { %2453 = vmatpush3.bf16.msra.mxu1 %v2545_v20 }
 0x175   : > { %v1659_v43 = vadd.f32 %v2244_v28, %v1648_v40  ;;  %v1660_v47 = vadd.f32 %v2244_v28, %v1649_v41  ;;  %v1665_v48 = vsub.f32 0.0, %v1661_v42  ;;  %v1662_v49 = vmax.f32 %v1658_v45, -60.0  ;;  %2454 = vmatprep.subr.bf16.mxu1 %v2624_v1 }
 0x177   : > { %v1663_v37 = vmax.f32 %v1659_v43, -60.0  ;;  %v1664_v50 = vmax.f32 %v1660_v47, -60.0  ;;  %v1669_v51 = vmul.f32 1.442695, %v1665_v48  ;;  %v1666_v52 = vsub.f32 0.0, %v1662_v49  ;;  %v2555_v48 = vld [vmem:[%s3188_s14 + $0x20] sm:$0xff]  }
 0x178   : > { %2455 = vmatpush3.bf16.msra.mxu1 %v2546_v21  ;;  %v2556_v49 = vld [vmem:[%s3188_s14 + $0x18] sm:$0xff]  }
 0x179   : > { %v1667_v53 = vsub.f32 0.0, %v1663_v37  ;;  %v1668_v39 = vsub.f32 0.0, %v1664_v50  ;;  %2592 = vpow2.f32 %v1669_v51  ;;  %v1671_v56 = vmul.f32 1.442695, %v1666_v52  ;;  %2456 = vmatprep.subr.bf16.mxu1 %v2624_v1  ;;  %v2557_v37 = vld [vmem:[%s3188_s14 + $0x10] sm:$0xff]   ;;  %v2558_v50 = vld [vmem:[%s3188_s14 + $0x8] sm:$0xff]  }
 0x17a   : > { %v2559_v51 = vld [vmem:[%s3188_s14] sm:$0xff]  }
 0x17b   : > { %v1673_v44 = vmul.f32 1.442695, %v1667_v53  ;;  %v1675_v46 = vmul.f32 1.442695, %v1668_v39  ;;  %2594 = vpow2.f32 %v1671_v56  ;;  %v1833_v52 = vld [vmem:[%s3187_s13] sm:$0x1] }
 0x17c   : > { %2457 = vmatpush3.bf16.msra.mxu1 %v2547_v22 }
 0x17d   : > { %2596 = vpow2.f32 %v1673_v44  ;;  %2458 = vmatprep.subr.bf16.mxu1 %v2624_v1 }
 0x17e   : > { %2598 = vpow2.f32 %v1675_v46 }
 0x180   : > { %2459 = vmatpush3.bf16.msra.mxu1 %v2548_v23 }
 0x181   : > { %2460 = vmatprep.subr.bf16.mxu1 %v2624_v1 }
 0x184   : > { %2461 = vmatpush3.bf16.msra.mxu1 %v2549_v24 }
 0x185   : > { %2462 = vmatprep.subr.bf16.mxu1 %v2624_v1 }
 0x186   : > { %v2593_v54 = vpop.eup %2592 }
 0x187   : > { %v1677_v59 = vadd.f32 1.0, %v2593_v54 }
 0x188   : > { %v2595_v60 = vpop.eup %2594  ;;  %2463 = vmatpush3.bf16.msra.mxu1 %v2550_v25 }
 0x189   : > { %2600 = vrcp.f32 %v1677_v59  ;;  %v1678_v62 = vadd.f32 1.0, %v2595_v60  ;;  %2464 = vmatprep.subr.bf16.mxu1 %v2624_v1 }
 0x18a   : > { %v2597_v61 = vpop.eup %2596 }
 0x18b   : > { %v2599_v63 = vpop.eup %2598  ;;  %v1679_v0 = vadd.f32 1.0, %v2597_v61  ;;  %2602 = vrcp.f32 %v1678_v62 }
 0x18c   : > { %v1680_v2 = vadd.f32 1.0, %v2599_v63  ;;  %2465 = vmatpush3.bf16.msra.mxu1 %v2551_v26  ;;  %v1928_v63 = vlaneseq }
 0x18d   : > { %2604 = vrcp.f32 %v1679_v0 }
 0x18e   : > { %2606 = vrcp.f32 %v1680_v2  ;;  %v1929_v0 = vshrl.u32 %v1928_v63, 7 }
 0x196   : > { %v2601_v57 = vpop.eup %2600 }
 0x197   : > { %v1685_v55 = vmul.f32 %v2601_v57, %v1657_v36 }
 0x198   : > { %v2603_v3 = vpop.eup %2602 }
 0x199   : > { %1689 = vst [vmem:[#allocation3] sm:$0xf] %v1685_v55  ;;  %v1686_v5 = vmul.f32 %v2603_v3, %v1658_v45  ;;  %v2552_v45 = vld [vmem:[%s3188_s14 + $0x38] sm:$0xff]  }
 0x19a   : > { %v2605_v4 = vpop.eup %2604 }
 0x19b   : > { %v2607_v6 = vpop.eup %2606  ;;  %v1687_v58 = vmul.f32 %v2605_v4, %v1659_v43  ;;  %1690 = vst [vmem:[#allocation3 + $0x4] sm:$0xf] %v1686_v5  ;;  %v2553_v43 = vld [vmem:[%s3188_s14 + $0x30] sm:$0xff]  }
 0x19c   : > { %v1688_v7 = vmul.f32 %v2607_v6, %v1660_v47  ;;  %v2554_v47 = vld [vmem:[%s3188_s14 + $0x28] sm:$0xff]   ;;  %v2269_v6 = vld [vmem:[%s3189_s15] ss:$0 sm:$0xff] }
 0x19d   : > { %1691 = vst [vmem:[#allocation3 + $0x8] sm:$0xf] %v1687_v58 }
 0x19e   : > { %1692 = vst [vmem:[#allocation3 + $0xc] sm:$0xf] %v1688_v7 }
 0x1a2   : > { %v3083_v8 = vld [vmem:[#allocation3] sm:$0xff] }
 0x1a5   : > { %v3085_v9 = vld [vmem:[#allocation3 + $0x8] sm:$0xff] }
 0x1a6   : > { %v1695_v10 = vadd.f32 %v3085_v9, %v3083_v8 }
 0x1a8   : > { %v1696_v11 = vrot.slane %v1695_v10, 4 }
 0x1aa   : > { %v1697_v12 = vadd.f32 %v1696_v11, %v1695_v10  ;;  %v2270_v10 = vld [vmem:[%s3190_s16] ss:$0 sm:$0xff] }
 0x1ac   : > { %v1698_v13 = vrot.slane %v1697_v12, 2 }
 0x1ae   : > { %v1699_v14 = vadd.f32 %v1698_v13, %v1697_v12 }
 0x1b0   : > { %v1700_v15 = vrot.slane %v1699_v14, 1 }
 0x1b2   : > { %v1701_v16 = vadd.f32 %v1700_v15, %v1699_v14 }
 0x1b4   : > { %v1702_v17 = vmul.f32 0.0625, %v1701_v16 }
 0x1b6   : > { %v1703_v18 = vpack.c.bf16 %v1702_v17, %v1702_v17 }
 0x1b8   : > { %2447 = vmatmul.mubr.bf16.vlgmr.msra.gmra.mxu0 %v1703_v18 }
 0x1b9   : > { %2486 = vmatprep.mubr.msk.bf16.mxu0 %vm2625_vm0, %v2624_v1  ;;  %2471 = vmatpush3.bf16.msra.mxu0 %v2552_v45 }
 0x1ba   : > { %2472 = vmatprep.subr.bf16.mxu0 %v2624_v1 }
 0x1bd   : > { %2473 = vmatpush3.bf16.msra.mxu0 %v2553_v43 }
 0x1be   : > { %2474 = vmatprep.subr.bf16.mxu0 %v2624_v1 }
 0x1c1   : > { %2475 = vmatpush3.bf16.msra.mxu0 %v2554_v47 }
 0x1c2   : > { %2476 = vmatprep.subr.bf16.mxu0 %v2624_v1 }
 0x1c5   : > { %2477 = vmatpush3.bf16.msra.mxu0 %v2555_v48 }
 0x1c6   : > { %2478 = vmatprep.subr.bf16.mxu0 %v2624_v1 }
 0x1c9   : > { %2479 = vmatpush3.bf16.msra.mxu0 %v2556_v49 }
 0x1ca   : > { %2480 = vmatprep.subr.bf16.mxu0 %v2624_v1 }
 0x1cd   : > { %2481 = vmatpush3.bf16.msra.mxu0 %v2557_v37 }
 0x1ce   : > { %2482 = vmatprep.subr.bf16.mxu0 %v2624_v1 }
 0x1d1   : > { %2483 = vmatpush3.bf16.msra.mxu0 %v2558_v50 }
 0x1d2   : > { %2484 = vmatprep.subr.bf16.mxu0 %v2624_v1  ;;  %v1930_v1 = vsub.s32 0, %v1929_v0 }
 0x1d5   : > { %2485 = vmatpush3.bf16.msra.mxu0 %v2559_v51 }
 0x278   : > { %v1803_v28 = vpop.f32.mrf.mxu0 }
 0x279   : > { %v1804_v29 = vadd.f32 %v1803_v28, %v1720_v27 }
 0x27a   : > { %v2448_v30 = vpop.f32.mrf.mxu0 }
 0x27b   : > { %v1809_v31 = vmax.f32 %v1804_v29, -60.0 }
 0x27c   : > { %v1806_v32 = vpop.f32.mrf.mxu0 }
 0x27d   : > { %v1810_v33 = vsub.f32 0.0, %v1809_v31 }
 0x27e   : > { %v2449_v34 = vpop.f32.mrf.mxu0 }
 0x27f   : > { %v1811_v35 = vmul.f32 1.442695, %v1810_v33 }
 0x281   : > { %2608 = vpow2.f32 %v1811_v35 }
 0x28e   : > { %v2609_v36 = vpop.eup %2608 }
 0x28f   : > { %v1813_v38 = vadd.f32 1.0, %v2609_v36 }
 0x291   : > { %2610 = vrcp.f32 %v1813_v38 }
 0x29e   : > { %v2611_v40 = vpop.eup %2610 }
 0x29f   : > { %v1815_v41 = vmul.f32 %v2611_v40, %v1804_v29 }
 0x2a1   : > { %v1816_v42 = vpack.c.bf16 %v1815_v41, %v1815_v41 }
 0x2a3   : > { %2467 = vmatmul.mubr.bf16.vlgmr.msra.gmra.mxu1 %v1816_v42 }
 0x363   : > { %v1916_v53 = vpop.f32.mrf.mxu1 }
 0x364   : > { %v1917_v39 = vadd.f32 %v1916_v53, %v1833_v52 }
 0x365   : > { %v2468_v56 = vpop.f32.mrf.mxu1 }
 0x366   : > { %v1922_v44 = vmax.f32 %v1917_v39, -60.0 }
 0x367   : > { %v1919_v46 = vpop.f32.mrf.mxu1 }
 0x368   : > { %v1923_v54 = vsub.f32 0.0, %v1922_v44 }
 0x369   : > { %v2469_v59 = vpop.f32.mrf.mxu1 }
 0x36a   : > { %v1924_v60 = vmul.f32 1.442695, %v1923_v54 }
 0x36c   : > { %2612 = vpow2.f32 %v1924_v60 }
 0x379   : > { %v2613_v61 = vpop.eup %2612 }
 0x37a   : > { %v1926_v62 = vadd.f32 1.0, %v2613_v61 }
 0x37c   : > { %2614 = vrcp.f32 %v1926_v62 }
 0x389   : > { %v2615_v2 = vpop.eup %2614 }
 0x38a   : > { %v1931_v57 = vrot.slane %v2615_v2, %v1930_v1 }
 0x38c   : > { %v1932_v55 = vmul.f32 %v1931_v57, %v3083_v8  ;;  %v1933_v3 = vmul.f32 %v1931_v57, %v3085_v9 }
 0x38e   : > { %v1934_v4 = vpack.c.bf16 %v1933_v3, %v1932_v55 }
 0x390   : > { %2487 = vmatmul.mubr.bf16.vlgmr.msra.gmra.mxu0 %v1934_v4 }
 0x450   : > { %v2033_v5 = vpop.f32.mrf.mxu0 }
 0x451   : > { %v2047_v7 = vmul.f32 %v2269_v6, %v2033_v5 }
 0x452   : > { %v2488_v58 = vpop.f32.mrf.mxu0 }
 0x453   : > { %v2056_v14 = vadd.f32 %v2270_v10, %v2047_v7 }
 0x454   : > { %v2036_v11 = vpop.f32.mrf.mxu0 }
 0x455   : > { %v2048_v12 = vmul.f32 %v2269_v6, %v2036_v11 }
 0x456   : > { %v2489_v13 = vpop.f32.mrf.mxu0 }
 0x457   : > { %v2057_v8 = vadd.f32 %v2270_v10, %v2048_v12 }
 0x459   : > { %v2285_v9 = vpack.c.bf16 %v2057_v8, %v2056_v14 }
 0x45b   : > { %2286 = vst [vmem:[%s608_s27] sm:$0xff] %v2285_v9  }
 0x45c PF: > { %s27_s24 = sadd.s32 1, %s2622_s24  }
 0x45d   : > { %p24_p4 = scmp.ge.s32.totalorder %s27_s24, 4  }
 0x45f   :  { %26 = sbr.rel (!%p24_p4) target bundleno = 3 (0x3), region = 148 }

</bundles_post_ra>
